<compile_context>
chip_gen: v7x
topology: tpu7x:2x2x1
jax: 0.10.0
libtpu: 0.0.40
codegen_flags: <defaults>
</compile_context>

<pallas_src>
import numpy as np

import jax
import jax.numpy as jnp
from jax import lax
from jax.experimental import pallas as pl
from jax.experimental.pallas import tpu as pltpu


# ----------------------------------------------------------------------------
# Fused kernel: whole ObsEncoder forward for one batch block of `bblk` images.
# ----------------------------------------------------------------------------
def _make_fused_kernel(H, W, bblk):
    H1, W1 = H, W
    H2, W2 = H // 2, W // 2
    H3, W3 = H // 4, W // 4
    H4, W4 = H // 8, W // 8

    def kernel(x_ref,                      # (bblk, H, W, 3)   uint8
               w1_ref, b1_ref,             # (27, 32)   bf16 , (1, 32)  f32
               w2_ref, b2_ref,             # (288, 64)  bf16 , (1, 64)  f32
               w3_ref, b3_ref,             # (576, 128) bf16 , (1, 128) f32
               w4_ref, b4_ref,             # (3,3,128,256) bf16, (1, 256) f32
               fw1_ref, fb1_ref,           # (256, 256) bf16 , (1, 256) f32
               fw2_ref, fb2_ref,           # (256, E)   bf16 , (1, E)   f32
               o_ref,                      # (bblk, 1, E) f32
               p1, p2, p3, p4,             # bf16 padded-activation scratch
               t2, t3):                    # bf16 im2col patch scratch

        def set_padded(pad_ref, val, h, w, c):
            # Zero ONLY the 1-px border (interior is overwritten right below).
            # Must run every grid step: scratch persists across steps / cores.
            z_row = jnp.zeros((bblk, 1, w + 2, c), pad_ref.dtype)
            z_col = jnp.zeros((bblk, h + 2, 1, c), pad_ref.dtype)
            pad_ref[:, 0:1, :, :] = z_row
            pad_ref[:, h + 1:h + 2, :, :] = z_row
            pad_ref[:, :, 0:1, :] = z_col
            pad_ref[:, :, w + 1:w + 2, :] = z_col
            pad_ref[:, 1:1 + h, 1:1 + w, :] = (
                val.reshape(bblk, h, w, c).astype(pad_ref.dtype))

        def conv_bias_act(acc, b_ref):
            # Conv2d bias -> clamp(-10,10) -> ReLU  ==  clip(0, 10)   (in f32)
            return jnp.clip(acc + b_ref[...], 0.0, 10.0)

        def im2col_conv(pad_ref, patch_ref, w_ref, b_ref, h, w, cin):
            # 3x3 "SAME" conv as ONE MXU matmul with K = 9*cin.  The 9 shifted
            # slices are staged in a preallocated bf16 VMEM patch (no lane-axis
            # concatenate, no doubled live pressure).
            m = bblk * h * w
            for t in range(9):
                dy, dx = t // 3, t % 3
                patch_ref[:, t * cin:(t + 1) * cin] = (
                    pad_ref[:, dy:dy + h, dx:dx + w, :].reshape(m, cin))
            acc = jnp.dot(patch_ref[...], w_ref[...],
                          preferred_element_type=jnp.float32)
            return conv_bias_act(acc, b_ref)

        def maxpool2(acc, h_tot, w, c):
            # acc: (h_tot*w, c) rows in (b, y, x) raster order; h_tot = bblk*h.
            y = acc.reshape(h_tot // 2, 2, w, c)
            y = jnp.maximum(y[:, 0], y[:, 1])                   # (h_tot//2, w, c)
            y = y.reshape(h_tot // 2, w // 2, 2, c)
            return jnp.maximum(y[:, :, 0, :], y[:, :, 1, :])    # (h_tot//2, w//2, c)

        # ---- stage 1: conv1 as one K=27 im2col matmul ------------------------
        # uint8 is widened via i32 (cheap at this size) and rounded to bf16 by
        # the p1 store; the 1/255 normalisation is folded into w1 (0..255 are
        # exactly representable in bf16, so no precision is lost here).
        x = x_ref[...].astype(jnp.int32).astype(jnp.float32)    # (bblk, H, W, 3)
        set_padded(p1, x, H1, W1, 3)
        m1 = bblk * H1 * W1
        cols = [p1[:, dy:dy + H1, dx:dx + W1, :].reshape(m1, 3)
                for dy in range(3) for dx in range(3)]
        patch1 = jnp.concatenate(cols, axis=1)                  # (m1, 27) bf16
        a1 = conv_bias_act(
            jnp.dot(patch1, w1_ref[...], preferred_element_type=jnp.float32),
            b1_ref)                                             # (m1, 32) f32

        # ---- stage 2 ---------------------------------------------------------
        set_padded(p2, maxpool2(a1, bblk * H1, W1, 32), H2, W2, 32)
        a2 = im2col_conv(p2, t2, w2_ref, b2_ref, H2, W2, 32)    # (bblk*H2*W2, 64)

        # ---- stage 3 ---------------------------------------------------------
        set_padded(p3, maxpool2(a2, bblk * H2, W2, 64), H3, W3, 64)
        a3 = im2col_conv(p3, t3, w3_ref, b3_ref, H3, W3, 64)    # (bblk*H3*W3, 128)

        # ---- stage 4: Cin=128 -> keep the 9-tap K=128 accumulate (no im2col) -
        set_padded(p4, maxpool2(a3, bblk * H3, W3, 128), H4, W4, 128)
        m4 = bblk * H4 * W4
        acc4 = jnp.zeros((m4, 256), jnp.float32)
        for dy in range(3):
            for dx in range(3):
                tap = p4[:, dy:dy + H4, dx:dx + W4, :].reshape(m4, 128)
                acc4 = acc4 + jnp.dot(tap, w4_ref[dy, dx],
                                      preferred_element_type=jnp.float32)
        a4 = conv_bias_act(acc4, b4_ref)                        # (m4, 256) f32

        # ---- global average pool + FC head -----------------------------------
        feat = jnp.mean(a4.reshape(bblk, H4 * W4, 256), axis=1)      # (bblk, 256)
        h1 = jnp.dot(feat.astype(jnp.bfloat16), fw1_ref[...],
                     preferred_element_type=jnp.float32)
        h1 = jnp.maximum(h1 + fb1_ref[...], 0.0)
        emb = jnp.dot(h1.astype(jnp.bfloat16), fw2_ref[...],
                      preferred_element_type=jnp.float32)
        emb = jnp.clip(emb + fb2_ref[...], -10.0, 10.0)              # (bblk, E)
        o_ref[...] = jnp.expand_dims(emb, 1)

    return kernel


# ----------------------------------------------------------------------------
# Wrapper: one pallas_call for the whole forward pass.
# ----------------------------------------------------------------------------
@jax.jit
def obs_encoder_forward(params, obs):
    """obs: (B, T, V, H, W, 3) uint8  ->  emb: (B, 1, emb_dim) float32."""
    # Like the reference forward: take last timestep / last view (channels-last
    # byte input per the docstring; the NCHW branch is not needed here).
    x = obs[:, -1, -1]                                   # (B, H, W, 3) uint8
    B, H, W, _ = x.shape
    E = params["fc2_w"].shape[-1]
    assert H % 8 == 0 and W % 8 == 0, "need H, W divisible by 8 (3 maxpools)"

    # At most 2 grid steps (one per v7x TensorCore); fold the rest of the batch
    # into the matmul M dimension.  On a 1-TC chip (v5e/v6e) the second step is
    # ~0.35us of extra overhead, negligible.
    bblk = B // 2 if (B > 1 and B % 2 == 0) else B
    n_steps = B // bblk

    bf = jnp.bfloat16
    # 1/255 image normalisation folded into conv1 weights (exact: linear op).
    w1 = (params["conv1_w"].astype(jnp.float32) / 255.0).reshape(27, 32).astype(bf)
    w2 = params["conv2_w"].reshape(9 * 32, 64).astype(bf)   # (dy,dx,cin)-major
    w3 = params["conv3_w"].reshape(9 * 64, 128).astype(bf)
    w4 = params["conv4_w"].astype(bf)                       # (3,3,128,256) HWIO
    fw1 = params["fc1_w"].astype(bf)
    fw2 = params["fc2_w"].astype(bf)

    def row(v):
        return v.reshape(1, -1).astype(jnp.float32)          # biases stay f32

    args = (x,
            w1, row(params["conv1_b"]),
            w2, row(params["conv2_b"]),
            w3, row(params["conv3_b"]),
            w4, row(params["conv4_b"]),
            fw1, row(params["fc1_b"]),
            fw2, row(params["fc2_b"]))

    def const_spec(a):
        n = a.ndim
        return pl.BlockSpec(a.shape, lambda b, _n=n: (0,) * _n)

    in_specs = [pl.BlockSpec((bblk, H, W, 3), lambda b: (b, 0, 0, 0))]
    # TODO(synk): mark these constant-index weight specs single-buffered
    # (pipeline_mode=pl.Buffered(1)) once VMEM headroom matters (224-scale/v7x).
    in_specs += [const_spec(a) for a in args[1:]]

    return pl.pallas_call(
        _make_fused_kernel(H, W, bblk),
        out_shape=jax.ShapeDtypeStruct((B, 1, E), jnp.float32),
        grid=(n_steps,),
        in_specs=in_specs,
        out_specs=pl.BlockSpec((bblk, 1, E), lambda b: (b, 0, 0)),
        scratch_shapes=[
            pltpu.VMEM((bblk, H + 2, W + 2, 3), bf),              # p1
            pltpu.VMEM((bblk, H // 2 + 2, W // 2 + 2, 32), bf),   # p2
            pltpu.VMEM((bblk, H // 4 + 2, W // 4 + 2, 64), bf),   # p3
            pltpu.VMEM((bblk, H // 8 + 2, W // 8 + 2, 128), bf),  # p4
            pltpu.VMEM((bblk * (H // 2) * (W // 2), 9 * 32), bf), # t2 patch
            pltpu.VMEM((bblk * (H // 4) * (W // 4), 9 * 64), bf), # t3 patch
        ],
        compiler_params=pltpu.CompilerParams(
            dimension_semantics=("parallel",)),   # batch blocks across v7x TCs
    )(*args)


# ----------------------------------------------------------------------------
# Parameter init (module's synthetic init: randn * 0.001, zero bias)
# ----------------------------------------------------------------------------
def init_params(key, emb_dim, scale=1e-3, bias_scale=0.0):
    ks = jax.random.split(key, 10)

    def cw(k, cin, cout):
        return jax.random.normal(k, (3, 3, cin, cout), jnp.float32) * scale

    def bias(k, c):
        return jax.random.normal(k, (c,), jnp.float32) * bias_scale

    return {
        "conv1_w": cw(ks[0], 3, 32),    "conv1_b": bias(ks[6], 32),
        "conv2_w": cw(ks[1], 32, 64),   "conv2_b": bias(ks[7], 64),
        "conv3_w": cw(ks[2], 64, 128),  "conv3_b": bias(ks[8], 128),
        "conv4_w": cw(ks[3], 128, 256), "conv4_b": bias(ks[9], 256),
        "fc1_w": jax.random.normal(ks[4], (256, 256), jnp.float32) * scale,
        "fc1_b": jnp.zeros((256,), jnp.float32),
        "fc2_w": jax.random.normal(ks[5], (256, emb_dim), jnp.float32) * scale,
        "fc2_b": jnp.zeros((emb_dim,), jnp.float32),
    }


# ----------------------------------------------------------------------------
# Pure-JAX references for verification.
#   mxu_bf16=False : faithful f32 PyTorch-module semantics.
#   mxu_bf16=True  : mirrors the kernel's bf16-operand / f32-accumulate MXU
#                    discipline (differences vs. the kernel are accumulation
#                    order only) -> allows a tight mechanical check.
# ----------------------------------------------------------------------------
def reference_forward(params, obs, *, mxu_bf16=False):
    bf = jnp.bfloat16
    hp = lax.Precision.HIGHEST
    x_u8 = obs[:, -1, -1]

    if mxu_bf16:
        x = x_u8.astype(jnp.float32).astype(bf)        # integer-valued bf16
        w1 = (params["conv1_w"].astype(jnp.float32) / 255.0).astype(bf)
    else:
        x = x_u8.astype(jnp.float32) / 255.0
        w1 = params["conv1_w"]

    def conv(x, w, b):
        if mxu_bf16:
            lhs, rhs, prec = x.astype(bf), w.astype(bf), None
        else:
            lhs, rhs, prec = x, w, hp
        y = lax.conv_general_dilated(
            lhs, rhs, (1, 1), "SAME",
            dimension_numbers=("NHWC", "HWIO", "NHWC"),
            preferred_element_type=jnp.float32, precision=prec)
        y = jnp.clip(y + b, -10.0, 10.0)      # clamp right after Conv2d
        return jnp.maximum(y, 0.0)            # then ReLU

    def maxpool(x):
        return jnp.maximum(jnp.maximum(x[:, 0::2, 0::2], x[:, 0::2, 1::2]),
                           jnp.maximum(x[:, 1::2, 0::2], x[:, 1::2, 1::2]))

    def dense(v, w, b):
        if mxu_bf16:
            y = jnp.dot(v.astype(bf), w.astype(bf),
                        preferred_element_type=jnp.float32)
        else:
            y = jnp.dot(v, w, precision=hp)
        return y + b

    x = maxpool(conv(x, w1, params["conv1_b"]))
    x = maxpool(conv(x, params["conv2_w"], params["conv2_b"]))
    x = maxpool(conv(x, params["conv3_w"], params["conv3_b"]))
    x = conv(x, params["conv4_w"], params["conv4_b"]).mean(axis=(1, 2))
    h = jnp.maximum(dense(x, params["fc1_w"], params["fc1_b"]), 0.0)
    o = jnp.clip(dense(h, params["fc2_w"], params["fc2_b"]), -10.0, 10.0)
    return o[:, None, :]


if __name__ == "__main__":
    key = jax.random.PRNGKey(0)
    pkey, okey = jax.random.split(key)

    emb_dim = 128
    T, V, H, W = 2, 2, 16, 16

    # ---- (a) module-faithful init (randn*0.001, zero biases), B=2 -----------
    #      -> 2 grid steps of 1 image each (one per v7x TensorCore).
    B = 2
    obs = jax.random.randint(okey, (B, T, V, H, W, 3), 0, 256,
                             dtype=jnp.int32).astype(jnp.uint8)
    params = init_params(pkey, emb_dim, scale=1e-3, bias_scale=0.0)
    out = jax.block_until_ready(obs_encoder_forward(params, obs))
    assert out.shape == (B, 1, emb_dim), out.shape
    # Tight check vs. the bf16-operand-discipline reference (differences are
    # f32 accumulation order only).
    ref_bf = reference_forward(params, obs, mxu_bf16=True)
    np.testing.assert_allclose(np.asarray(out), np.asarray(ref_bf),
                               rtol=3e-2, atol=1e-8)
    # Loose check vs. the faithful f32 module semantics (bounds bf16 drift).
    ref_f32 = reference_forward(params, obs, mxu_bf16=False)
    np.testing.assert_allclose(np.asarray(out), np.asarray(ref_f32),
                               rtol=8e-2, atol=1e-6)

    # ---- (b) stress init (larger weights + nonzero conv biases), B=4 --------
    #      Exercises the batch-folding path (Bblk=2 images stacked into the
    #      matmul M dim) and both clamp rails (activations are O(1-10)).
    B2 = 4
    obs2 = jax.random.randint(jax.random.PRNGKey(2), (B2, T, V, H, W, 3),
                              0, 256, dtype=jnp.int32).astype(jnp.uint8)
    params2 = init_params(jax.random.PRNGKey(1), emb_dim, scale=0.2,
                          bias_scale=0.1)
    out2 = jax.block_until_ready(obs_encoder_forward(params2, obs2))
    assert out2.shape == (B2, 1, emb_dim), out2.shape
    # At this adversarial weight scale the bf16-vs-f32 gap itself is large by
    # construction (per-layer gain ~3x amplifies operand rounding), so the
    # meaningful mechanical check is against the bf16-discipline reference.
    ref2_bf = reference_forward(params2, obs2, mxu_bf16=True)
    np.testing.assert_allclose(np.asarray(out2), np.asarray(ref2_bf),
                               rtol=3e-2, atol=3e-2)

    print("KERNEL_OK")
</pallas_src>

<mosaic_0001>
module attributes {stable_mosaic.version = 11 : i64} {
  func.func @kernel(%arg0: i32, %arg1: memref<1x16x16x3xi8, #tpu.memory_space<vmem>>, %arg2: memref<27x32xbf16, #tpu.memory_space<vmem>>, %arg3: memref<1x32xf32, #tpu.memory_space<vmem>>, %arg4: memref<288x64xbf16, #tpu.memory_space<vmem>>, %arg5: memref<1x64xf32, #tpu.memory_space<vmem>>, %arg6: memref<576x128xbf16, #tpu.memory_space<vmem>>, %arg7: memref<1x128xf32, #tpu.memory_space<vmem>>, %arg8: memref<3x3x128x256xbf16, #tpu.memory_space<vmem>>, %arg9: memref<1x256xf32, #tpu.memory_space<vmem>>, %arg10: memref<256x256xbf16, #tpu.memory_space<vmem>>, %arg11: memref<1x256xf32, #tpu.memory_space<vmem>>, %arg12: memref<256x128xbf16, #tpu.memory_space<vmem>>, %arg13: memref<1x128xf32, #tpu.memory_space<vmem>>, %arg14: memref<1x1x128xf32, #tpu.memory_space<vmem>>, %arg15: memref<1x18x18x3xbf16, #tpu.memory_space<vmem>>, %arg16: memref<1x10x10x32xbf16, #tpu.memory_space<vmem>>, %arg17: memref<1x6x6x64xbf16, #tpu.memory_space<vmem>>, %arg18: memref<1x4x4x128xbf16, #tpu.memory_space<vmem>>, %arg19: memref<64x288xbf16, #tpu.memory_space<vmem>>, %arg20: memref<16x576xbf16, #tpu.memory_space<vmem>>) attributes {dimension_semantics = [#tpu.dimension_semantics<parallel>], iteration_bounds = array<i64: 2>, scalar_prefetch = 0 : i64, scratch_operands = 6 : i64, tpu.core_type = #tpu.core_type<tc>, window_params = [{transform_indices = @transform_0, window_bounds = array<i64: 1, 16, 16, 3>}, {pipeline_mode = #tpu.pipeline_mode<synchronous>, transform_indices = @transform_1, window_bounds = array<i64: 27, 32>}, {pipeline_mode = #tpu.pipeline_mode<synchronous>, transform_indices = @transform_2, window_bounds = array<i64: 1, 32>}, {pipeline_mode = #tpu.pipeline_mode<synchronous>, transform_indices = @transform_3, window_bounds = array<i64: 288, 64>}, {pipeline_mode = #tpu.pipeline_mode<synchronous>, transform_indices = @transform_4, window_bounds = array<i64: 1, 64>}, {pipeline_mode = #tpu.pipeline_mode<synchronous>, transform_indices = @transform_5, window_bounds = array<i64: 576, 128>}, {pipeline_mode = #tpu.pipeline_mode<synchronous>, transform_indices = @transform_6, window_bounds = array<i64: 1, 128>}, {pipeline_mode = #tpu.pipeline_mode<synchronous>, transform_indices = @transform_7, window_bounds = array<i64: 3, 3, 128, 256>}, {pipeline_mode = #tpu.pipeline_mode<synchronous>, transform_indices = @transform_8, window_bounds = array<i64: 1, 256>}, {pipeline_mode = #tpu.pipeline_mode<synchronous>, transform_indices = @transform_9, window_bounds = array<i64: 256, 256>}, {pipeline_mode = #tpu.pipeline_mode<synchronous>, transform_indices = @transform_10, window_bounds = array<i64: 1, 256>}, {pipeline_mode = #tpu.pipeline_mode<synchronous>, transform_indices = @transform_11, window_bounds = array<i64: 256, 128>}, {pipeline_mode = #tpu.pipeline_mode<synchronous>, transform_indices = @transform_12, window_bounds = array<i64: 1, 128>}, {transform_indices = @transform_13, window_bounds = array<i64: 1, 1, 128>}]} {
    %c0 = arith.constant 0 : index
    %c0_0 = arith.constant 0 : index
    %c0_1 = arith.constant 0 : index
    %c0_2 = arith.constant 0 : index
    %0 = vector.load %arg1[%c0, %c0_0, %c0_1, %c0_2] : memref<1x16x16x3xi8, #tpu.memory_space<vmem>>, vector<1x16x16x3xi8>
    %1 = arith.extui %0 : vector<1x16x16x3xi8> to vector<1x16x16x3xi32>
    %2 = arith.sitofp %1 : vector<1x16x16x3xi32> to vector<1x16x16x3xf32>
    %cst = arith.constant 0.000000e+00 : bf16
    %3 = vector.broadcast %cst : bf16 to vector<1x1x18x3xbf16>
    %cst_3 = arith.constant 0.000000e+00 : bf16
    %4 = vector.broadcast %cst_3 : bf16 to vector<1x18x1x3xbf16>
    %c0_4 = arith.constant 0 : index
    %c0_5 = arith.constant 0 : index
    %c0_6 = arith.constant 0 : index
    %c0_7 = arith.constant 0 : index
    %5 = vector.load %arg15[%c0_4, %c0_5, %c0_6, %c0_7] : memref<1x18x18x3xbf16, #tpu.memory_space<vmem>>, vector<1x1x18x3xbf16>
    tpu.vector_store %arg15[%c0_4, %c0_5, %c0_6, %c0_7], %3 {strides = array<i32>} : memref<1x18x18x3xbf16, #tpu.memory_space<vmem>>, vector<1x1x18x3xbf16>,
    %c0_8 = arith.constant 0 : index
    %c17 = arith.constant 17 : index
    %c0_9 = arith.constant 0 : index
    %c0_10 = arith.constant 0 : index
    %6 = vector.load %arg15[%c0_8, %c17, %c0_9, %c0_10] : memref<1x18x18x3xbf16, #tpu.memory_space<vmem>>, vector<1x1x18x3xbf16>
    tpu.vector_store %arg15[%c0_8, %c17, %c0_9, %c0_10], %3 {strides = array<i32>} : memref<1x18x18x3xbf16, #tpu.memory_space<vmem>>, vector<1x1x18x3xbf16>,
    %c0_11 = arith.constant 0 : index
    %c0_12 = arith.constant 0 : index
    %c0_13 = arith.constant 0 : index
    %c0_14 = arith.constant 0 : index
    %7 = vector.load %arg15[%c0_11, %c0_12, %c0_13, %c0_14] : memref<1x18x18x3xbf16, #tpu.memory_space<vmem>>, vector<1x18x1x3xbf16>
    tpu.vector_store %arg15[%c0_11, %c0_12, %c0_13, %c0_14], %4 {strides = array<i32>} : memref<1x18x18x3xbf16, #tpu.memory_space<vmem>>, vector<1x18x1x3xbf16>,
    %c0_15 = arith.constant 0 : index
    %c0_16 = arith.constant 0 : index
    %c17_17 = arith.constant 17 : index
    %c0_18 = arith.constant 0 : index
    %8 = vector.load %arg15[%c0_15, %c0_16, %c17_17, %c0_18] : memref<1x18x18x3xbf16, #tpu.memory_space<vmem>>, vector<1x18x1x3xbf16>
    tpu.vector_store %arg15[%c0_15, %c0_16, %c17_17, %c0_18], %4 {strides = array<i32>} : memref<1x18x18x3xbf16, #tpu.memory_space<vmem>>, vector<1x18x1x3xbf16>,
    %9 = arith.truncf %2 : vector<1x16x16x3xf32> to vector<1x16x16x3xbf16>
    %c0_19 = arith.constant 0 : index
    %c1 = arith.constant 1 : index
    %c1_20 = arith.constant 1 : index
    %c0_21 = arith.constant 0 : index
    %10 = vector.load %arg15[%c0_19, %c1, %c1_20, %c0_21] : memref<1x18x18x3xbf16, #tpu.memory_space<vmem>>, vector<1x16x16x3xbf16>
    tpu.vector_store %arg15[%c0_19, %c1, %c1_20, %c0_21], %9 {strides = array<i32>} : memref<1x18x18x3xbf16, #tpu.memory_space<vmem>>, vector<1x16x16x3xbf16>,
    %c0_22 = arith.constant 0 : index
    %c0_23 = arith.constant 0 : index
    %c0_24 = arith.constant 0 : index
    %c0_25 = arith.constant 0 : index
    %11 = vector.load %arg15[%c0_22, %c0_23, %c0_24, %c0_25] : memref<1x18x18x3xbf16, #tpu.memory_space<vmem>>, vector<1x16x16x3xbf16>
    %12 = vector.shape_cast %11 : vector<1x16x16x3xbf16> to vector<256x3xbf16>
    %c0_26 = arith.constant 0 : index
    %c0_27 = arith.constant 0 : index
    %c1_28 = arith.constant 1 : index
    %c0_29 = arith.constant 0 : index
    %13 = vector.load %arg15[%c0_26, %c0_27, %c1_28, %c0_29] : memref<1x18x18x3xbf16, #tpu.memory_space<vmem>>, vector<1x16x16x3xbf16>
    %14 = vector.shape_cast %13 : vector<1x16x16x3xbf16> to vector<256x3xbf16>
    %c0_30 = arith.constant 0 : index
    %c0_31 = arith.constant 0 : index
    %c2 = arith.constant 2 : index
    %c0_32 = arith.constant 0 : index
    %15 = vector.load %arg15[%c0_30, %c0_31, %c2, %c0_32] : memref<1x18x18x3xbf16, #tpu.memory_space<vmem>>, vector<1x16x16x3xbf16>
    %16 = vector.shape_cast %15 : vector<1x16x16x3xbf16> to vector<256x3xbf16>
    %c0_33 = arith.constant 0 : index
    %c1_34 = arith.constant 1 : index
    %c0_35 = arith.constant 0 : index
    %c0_36 = arith.constant 0 : index
    %17 = vector.load %arg15[%c0_33, %c1_34, %c0_35, %c0_36] : memref<1x18x18x3xbf16, #tpu.memory_space<vmem>>, vector<1x16x16x3xbf16>
    %18 = vector.shape_cast %17 : vector<1x16x16x3xbf16> to vector<256x3xbf16>
    %c0_37 = arith.constant 0 : index
    %c1_38 = arith.constant 1 : index
    %c1_39 = arith.constant 1 : index
    %c0_40 = arith.constant 0 : index
    %19 = vector.load %arg15[%c0_37, %c1_38, %c1_39, %c0_40] : memref<1x18x18x3xbf16, #tpu.memory_space<vmem>>, vector<1x16x16x3xbf16>
    %20 = vector.shape_cast %19 : vector<1x16x16x3xbf16> to vector<256x3xbf16>
    %c0_41 = arith.constant 0 : index
    %c1_42 = arith.constant 1 : index
    %c2_43 = arith.constant 2 : index
    %c0_44 = arith.constant 0 : index
    %21 = vector.load %arg15[%c0_41, %c1_42, %c2_43, %c0_44] : memref<1x18x18x3xbf16, #tpu.memory_space<vmem>>, vector<1x16x16x3xbf16>
    %22 = vector.shape_cast %21 : vector<1x16x16x3xbf16> to vector<256x3xbf16>
    %c0_45 = arith.constant 0 : index
    %c2_46 = arith.constant 2 : index
    %c0_47 = arith.constant 0 : index
    %c0_48 = arith.constant 0 : index
    %23 = vector.load %arg15[%c0_45, %c2_46, %c0_47, %c0_48] : memref<1x18x18x3xbf16, #tpu.memory_space<vmem>>, vector<1x16x16x3xbf16>
    %24 = vector.shape_cast %23 : vector<1x16x16x3xbf16> to vector<256x3xbf16>
    %c0_49 = arith.constant 0 : index
    %c2_50 = arith.constant 2 : index
    %c1_51 = arith.constant 1 : index
    %c0_52 = arith.constant 0 : index
    %25 = vector.load %arg15[%c0_49, %c2_50, %c1_51, %c0_52] : memref<1x18x18x3xbf16, #tpu.memory_space<vmem>>, vector<1x16x16x3xbf16>
    %26 = vector.shape_cast %25 : vector<1x16x16x3xbf16> to vector<256x3xbf16>
    %c0_53 = arith.constant 0 : index
    %c2_54 = arith.constant 2 : index
    %c2_55 = arith.constant 2 : index
    %c0_56 = arith.constant 0 : index
    %27 = vector.load %arg15[%c0_53, %c2_54, %c2_55, %c0_56] : memref<1x18x18x3xbf16, #tpu.memory_space<vmem>>, vector<1x16x16x3xbf16>
    %28 = vector.shape_cast %27 : vector<1x16x16x3xbf16> to vector<256x3xbf16>
    %29 = tpu.concatenate %12, %14, %16, %18, %20, %22, %24, %26, %28 in 1 : vector<256x3xbf16>, vector<256x3xbf16>, vector<256x3xbf16>, vector<256x3xbf16>, vector<256x3xbf16>, vector<256x3xbf16>, vector<256x3xbf16>, vector<256x3xbf16>, vector<256x3xbf16> -> vector<256x27xbf16>
    %c0_57 = arith.constant 0 : index
    %c0_58 = arith.constant 0 : index
    %30 = vector.load %arg2[%c0_57, %c0_58] : memref<27x32xbf16, #tpu.memory_space<vmem>>, vector<27x32xbf16>
    %cst_59 = arith.constant dense<0.000000e+00> : vector<256x32xf32>
    %31 = tpu.matmul %29, %30, %cst_59 {dimension_numbers = #tpu.dot_dimension_numbers<[1], [0], [0], [1], [0, 0, 1, 1], [], []>} : vector<256x27xbf16>, vector<27x32xbf16>, vector<256x32xf32> -> vector<256x32xf32>
    %c0_60 = arith.constant 0 : index
    %c0_61 = arith.constant 0 : index
    %32 = vector.load %arg3[%c0_60, %c0_61] : memref<1x32xf32, #tpu.memory_space<vmem>>, vector<1x32xf32>
    %33 = vector.broadcast %32 : vector<1x32xf32> to vector<256x32xf32>
    %34 = arith.addf %31, %33 : vector<256x32xf32>
    %cst_62 = arith.constant 0.000000e+00 : f32
    %cst_63 = arith.constant 1.000000e+01 : f32
    %35 = vector.broadcast %cst_62 : f32 to vector<256x32xf32>
    %36 = arith.maximumf %35, %34 : vector<256x32xf32>
    %37 = vector.broadcast %cst_63 : f32 to vector<256x32xf32>
    %38 = arith.minimumf %37, %36 : vector<256x32xf32>
    %39 = vector.shape_cast %38 : vector<256x32xf32> to vector<8x2x16x32xf32>
    %40 = vector.extract_strided_slice %39 {offsets = [0, 0, 0, 0], sizes = [8, 1, 16, 32], strides = [1, 1, 1, 1]} : vector<8x2x16x32xf32> to vector<8x1x16x32xf32>
    %41 = vector.shape_cast %40 : vector<8x1x16x32xf32> to vector<8x16x32xf32>
    %42 = vector.extract_strided_slice %39 {offsets = [0, 1, 0, 0], sizes = [8, 1, 16, 32], strides = [1, 1, 1, 1]} : vector<8x2x16x32xf32> to vector<8x1x16x32xf32>
    %43 = vector.shape_cast %42 : vector<8x1x16x32xf32> to vector<8x16x32xf32>
    %44 = arith.maximumf %41, %43 : vector<8x16x32xf32>
    %45 = vector.shape_cast %44 : vector<8x16x32xf32> to vector<8x8x2x32xf32>
    %46 = vector.extract_strided_slice %45 {offsets = [0, 0, 0, 0], sizes = [8, 8, 1, 32], strides = [1, 1, 1, 1]} : vector<8x8x2x32xf32> to vector<8x8x1x32xf32>
    %47 = vector.shape_cast %46 : vector<8x8x1x32xf32> to vector<8x8x32xf32>
    %48 = vector.extract_strided_slice %45 {offsets = [0, 0, 1, 0], sizes = [8, 8, 1, 32], strides = [1, 1, 1, 1]} : vector<8x8x2x32xf32> to vector<8x8x1x32xf32>
    %49 = vector.shape_cast %48 : vector<8x8x1x32xf32> to vector<8x8x32xf32>
    %50 = arith.maximumf %47, %49 : vector<8x8x32xf32>
    %cst_64 = arith.constant 0.000000e+00 : bf16
    %51 = vector.broadcast %cst_64 : bf16 to vector<1x1x10x32xbf16>
    %cst_65 = arith.constant 0.000000e+00 : bf16
    %52 = vector.broadcast %cst_65 : bf16 to vector<1x10x1x32xbf16>
    %c0_66 = arith.constant 0 : index
    %c0_67 = arith.constant 0 : index
    %c0_68 = arith.constant 0 : index
    %c0_69 = arith.constant 0 : index
    %53 = vector.load %arg16[%c0_66, %c0_67, %c0_68, %c0_69] : memref<1x10x10x32xbf16, #tpu.memory_space<vmem>>, vector<1x1x10x32xbf16>
    tpu.vector_store %arg16[%c0_66, %c0_67, %c0_68, %c0_69], %51 {strides = array<i32>} : memref<1x10x10x32xbf16, #tpu.memory_space<vmem>>, vector<1x1x10x32xbf16>,
    %c0_70 = arith.constant 0 : index
    %c9 = arith.constant 9 : index
    %c0_71 = arith.constant 0 : index
    %c0_72 = arith.constant 0 : index
    %54 = vector.load %arg16[%c0_70, %c9, %c0_71, %c0_72] : memref<1x10x10x32xbf16, #tpu.memory_space<vmem>>, vector<1x1x10x32xbf16>
    tpu.vector_store %arg16[%c0_70, %c9, %c0_71, %c0_72], %51 {strides = array<i32>} : memref<1x10x10x32xbf16, #tpu.memory_space<vmem>>, vector<1x1x10x32xbf16>,
    %c0_73 = arith.constant 0 : index
    %c0_74 = arith.constant 0 : index
    %c0_75 = arith.constant 0 : index
    %c0_76 = arith.constant 0 : index
    %55 = vector.load %arg16[%c0_73, %c0_74, %c0_75, %c0_76] : memref<1x10x10x32xbf16, #tpu.memory_space<vmem>>, vector<1x10x1x32xbf16>
    tpu.vector_store %arg16[%c0_73, %c0_74, %c0_75, %c0_76], %52 {strides = array<i32>} : memref<1x10x10x32xbf16, #tpu.memory_space<vmem>>, vector<1x10x1x32xbf16>,
    %c0_77 = arith.constant 0 : index
    %c0_78 = arith.constant 0 : index
    %c9_79 = arith.constant 9 : index
    %c0_80 = arith.constant 0 : index
    %56 = vector.load %arg16[%c0_77, %c0_78, %c9_79, %c0_80] : memref<1x10x10x32xbf16, #tpu.memory_space<vmem>>, vector<1x10x1x32xbf16>
    tpu.vector_store %arg16[%c0_77, %c0_78, %c9_79, %c0_80], %52 {strides = array<i32>} : memref<1x10x10x32xbf16, #tpu.memory_space<vmem>>, vector<1x10x1x32xbf16>,
    %57 = vector.shape_cast %50 : vector<8x8x32xf32> to vector<1x8x8x32xf32>
    %58 = arith.truncf %57 : vector<1x8x8x32xf32> to vector<1x8x8x32xbf16>
    %c0_81 = arith.constant 0 : index
    %c1_82 = arith.constant 1 : index
    %c1_83 = arith.constant 1 : index
    %c0_84 = arith.constant 0 : index
    %59 = vector.load %arg16[%c0_81, %c1_82, %c1_83, %c0_84] : memref<1x10x10x32xbf16, #tpu.memory_space<vmem>>, vector<1x8x8x32xbf16>
    tpu.vector_store %arg16[%c0_81, %c1_82, %c1_83, %c0_84], %58 {strides = array<i32>} : memref<1x10x10x32xbf16, #tpu.memory_space<vmem>>, vector<1x8x8x32xbf16>,
    %c0_85 = arith.constant 0 : index
    %c0_86 = arith.constant 0 : index
    %c0_87 = arith.constant 0 : index
    %c0_88 = arith.constant 0 : index
    %60 = vector.load %arg16[%c0_85, %c0_86, %c0_87, %c0_88] : memref<1x10x10x32xbf16, #tpu.memory_space<vmem>>, vector<1x8x8x32xbf16>
    %61 = vector.shape_cast %60 : vector<1x8x8x32xbf16> to vector<64x32xbf16>
    %c0_89 = arith.constant 0 : index
    %c0_90 = arith.constant 0 : index
    %62 = vector.load %arg19[%c0_89, %c0_90] : memref<64x288xbf16, #tpu.memory_space<vmem>>, vector<64x32xbf16>
    tpu.vector_store %arg19[%c0_89, %c0_90], %61 {strides = array<i32>} : memref<64x288xbf16, #tpu.memory_space<vmem>>, vector<64x32xbf16>,
    %c0_91 = arith.constant 0 : index
    %c0_92 = arith.constant 0 : index
    %c1_93 = arith.constant 1 : index
    %c0_94 = arith.constant 0 : index
    %63 = vector.load %arg16[%c0_91, %c0_92, %c1_93, %c0_94] : memref<1x10x10x32xbf16, #tpu.memory_space<vmem>>, vector<1x8x8x32xbf16>
    %64 = vector.shape_cast %63 : vector<1x8x8x32xbf16> to vector<64x32xbf16>
    %c0_95 = arith.constant 0 : index
    %c32 = arith.constant 32 : index
    %65 = vector.load %arg19[%c0_95, %c32] : memref<64x288xbf16, #tpu.memory_space<vmem>>, vector<64x32xbf16>
    tpu.vector_store %arg19[%c0_95, %c32], %64 {strides = array<i32>} : memref<64x288xbf16, #tpu.memory_space<vmem>>, vector<64x32xbf16>,
    %c0_96 = arith.constant 0 : index
    %c0_97 = arith.constant 0 : index
    %c2_98 = arith.constant 2 : index
    %c0_99 = arith.constant 0 : index
    %66 = vector.load %arg16[%c0_96, %c0_97, %c2_98, %c0_99] : memref<1x10x10x32xbf16, #tpu.memory_space<vmem>>, vector<1x8x8x32xbf16>
    %67 = vector.shape_cast %66 : vector<1x8x8x32xbf16> to vector<64x32xbf16>
    %c0_100 = arith.constant 0 : index
    %c64 = arith.constant 64 : index
    %68 = vector.load %arg19[%c0_100, %c64] : memref<64x288xbf16, #tpu.memory_space<vmem>>, vector<64x32xbf16>
    tpu.vector_store %arg19[%c0_100, %c64], %67 {strides = array<i32>} : memref<64x288xbf16, #tpu.memory_space<vmem>>, vector<64x32xbf16>,
    %c0_101 = arith.constant 0 : index
    %c1_102 = arith.constant 1 : index
    %c0_103 = arith.constant 0 : index
    %c0_104 = arith.constant 0 : index
    %69 = vector.load %arg16[%c0_101, %c1_102, %c0_103, %c0_104] : memref<1x10x10x32xbf16, #tpu.memory_space<vmem>>, vector<1x8x8x32xbf16>
    %70 = vector.shape_cast %69 : vector<1x8x8x32xbf16> to vector<64x32xbf16>
    %c0_105 = arith.constant 0 : index
    %c96 = arith.constant 96 : index
    %71 = vector.load %arg19[%c0_105, %c96] : memref<64x288xbf16, #tpu.memory_space<vmem>>, vector<64x32xbf16>
    tpu.vector_store %arg19[%c0_105, %c96], %70 {strides = array<i32>} : memref<64x288xbf16, #tpu.memory_space<vmem>>, vector<64x32xbf16>,
    %c0_106 = arith.constant 0 : index
    %c1_107 = arith.constant 1 : index
    %c1_108 = arith.constant 1 : index
    %c0_109 = arith.constant 0 : index
    %72 = vector.load %arg16[%c0_106, %c1_107, %c1_108, %c0_109] : memref<1x10x10x32xbf16, #tpu.memory_space<vmem>>, vector<1x8x8x32xbf16>
    %73 = vector.shape_cast %72 : vector<1x8x8x32xbf16> to vector<64x32xbf16>
    %c0_110 = arith.constant 0 : index
    %c128 = arith.constant 128 : index
    %74 = vector.load %arg19[%c0_110, %c128] : memref<64x288xbf16, #tpu.memory_space<vmem>>, vector<64x32xbf16>
    tpu.vector_store %arg19[%c0_110, %c128], %73 {strides = array<i32>} : memref<64x288xbf16, #tpu.memory_space<vmem>>, vector<64x32xbf16>,
    %c0_111 = arith.constant 0 : index
    %c1_112 = arith.constant 1 : index
    %c2_113 = arith.constant 2 : index
    %c0_114 = arith.constant 0 : index
    %75 = vector.load %arg16[%c0_111, %c1_112, %c2_113, %c0_114] : memref<1x10x10x32xbf16, #tpu.memory_space<vmem>>, vector<1x8x8x32xbf16>
    %76 = vector.shape_cast %75 : vector<1x8x8x32xbf16> to vector<64x32xbf16>
    %c0_115 = arith.constant 0 : index
    %c160 = arith.constant 160 : index
    %77 = vector.load %arg19[%c0_115, %c160] : memref<64x288xbf16, #tpu.memory_space<vmem>>, vector<64x32xbf16>
    tpu.vector_store %arg19[%c0_115, %c160], %76 {strides = array<i32>} : memref<64x288xbf16, #tpu.memory_space<vmem>>, vector<64x32xbf16>,
    %c0_116 = arith.constant 0 : index
    %c2_117 = arith.constant 2 : index
    %c0_118 = arith.constant 0 : index
    %c0_119 = arith.constant 0 : index
    %78 = vector.load %arg16[%c0_116, %c2_117, %c0_118, %c0_119] : memref<1x10x10x32xbf16, #tpu.memory_space<vmem>>, vector<1x8x8x32xbf16>
    %79 = vector.shape_cast %78 : vector<1x8x8x32xbf16> to vector<64x32xbf16>
    %c0_120 = arith.constant 0 : index
    %c192 = arith.constant 192 : index
    %80 = vector.load %arg19[%c0_120, %c192] : memref<64x288xbf16, #tpu.memory_space<vmem>>, vector<64x32xbf16>
    tpu.vector_store %arg19[%c0_120, %c192], %79 {strides = array<i32>} : memref<64x288xbf16, #tpu.memory_space<vmem>>, vector<64x32xbf16>,
    %c0_121 = arith.constant 0 : index
    %c2_122 = arith.constant 2 : index
    %c1_123 = arith.constant 1 : index
    %c0_124 = arith.constant 0 : index
    %81 = vector.load %arg16[%c0_121, %c2_122, %c1_123, %c0_124] : memref<1x10x10x32xbf16, #tpu.memory_space<vmem>>, vector<1x8x8x32xbf16>
    %82 = vector.shape_cast %81 : vector<1x8x8x32xbf16> to vector<64x32xbf16>
    %c0_125 = arith.constant 0 : index
    %c224 = arith.constant 224 : index
    %83 = vector.load %arg19[%c0_125, %c224] : memref<64x288xbf16, #tpu.memory_space<vmem>>, vector<64x32xbf16>
    tpu.vector_store %arg19[%c0_125, %c224], %82 {strides = array<i32>} : memref<64x288xbf16, #tpu.memory_space<vmem>>, vector<64x32xbf16>,
    %c0_126 = arith.constant 0 : index
    %c2_127 = arith.constant 2 : index
    %c2_128 = arith.constant 2 : index
    %c0_129 = arith.constant 0 : index
    %84 = vector.load %arg16[%c0_126, %c2_127, %c2_128, %c0_129] : memref<1x10x10x32xbf16, #tpu.memory_space<vmem>>, vector<1x8x8x32xbf16>
    %85 = vector.shape_cast %84 : vector<1x8x8x32xbf16> to vector<64x32xbf16>
    %c0_130 = arith.constant 0 : index
    %c256 = arith.constant 256 : index
    %86 = vector.load %arg19[%c0_130, %c256] : memref<64x288xbf16, #tpu.memory_space<vmem>>, vector<64x32xbf16>
    tpu.vector_store %arg19[%c0_130, %c256], %85 {strides = array<i32>} : memref<64x288xbf16, #tpu.memory_space<vmem>>, vector<64x32xbf16>,
    %c0_131 = arith.constant 0 : index
    %c0_132 = arith.constant 0 : index
    %87 = vector.load %arg19[%c0_131, %c0_132] : memref<64x288xbf16, #tpu.memory_space<vmem>>, vector<64x288xbf16>
    %c0_133 = arith.constant 0 : index
    %c0_134 = arith.constant 0 : index
    %88 = vector.load %arg4[%c0_133, %c0_134] : memref<288x64xbf16, #tpu.memory_space<vmem>>, vector<288x64xbf16>
    %cst_135 = arith.constant dense<0.000000e+00> : vector<64x64xf32>
    %89 = tpu.matmul %87, %88, %cst_135 {dimension_numbers = #tpu.dot_dimension_numbers<[1], [0], [0], [1], [0, 0, 1, 1], [], []>} : vector<64x288xbf16>, vector<288x64xbf16>, vector<64x64xf32> -> vector<64x64xf32>
    %c0_136 = arith.constant 0 : index
    %c0_137 = arith.constant 0 : index
    %90 = vector.load %arg5[%c0_136, %c0_137] : memref<1x64xf32, #tpu.memory_space<vmem>>, vector<1x64xf32>
    %91 = vector.broadcast %90 : vector<1x64xf32> to vector<64x64xf32>
    %92 = arith.addf %89, %91 : vector<64x64xf32>
    %cst_138 = arith.constant 0.000000e+00 : f32
    %cst_139 = arith.constant 1.000000e+01 : f32
    %93 = vector.broadcast %cst_138 : f32 to vector<64x64xf32>
    %94 = arith.maximumf %93, %92 : vector<64x64xf32>
    %95 = vector.broadcast %cst_139 : f32 to vector<64x64xf32>
    %96 = arith.minimumf %95, %94 : vector<64x64xf32>
    %97 = vector.shape_cast %96 : vector<64x64xf32> to vector<4x2x8x64xf32>
    %98 = vector.extract_strided_slice %97 {offsets = [0, 0, 0, 0], sizes = [4, 1, 8, 64], strides = [1, 1, 1, 1]} : vector<4x2x8x64xf32> to vector<4x1x8x64xf32>
    %99 = vector.shape_cast %98 : vector<4x1x8x64xf32> to vector<4x8x64xf32>
    %100 = vector.extract_strided_slice %97 {offsets = [0, 1, 0, 0], sizes = [4, 1, 8, 64], strides = [1, 1, 1, 1]} : vector<4x2x8x64xf32> to vector<4x1x8x64xf32>
    %101 = vector.shape_cast %100 : vector<4x1x8x64xf32> to vector<4x8x64xf32>
    %102 = arith.maximumf %99, %101 : vector<4x8x64xf32>
    %103 = vector.shape_cast %102 : vector<4x8x64xf32> to vector<4x4x2x64xf32>
    %104 = vector.extract_strided_slice %103 {offsets = [0, 0, 0, 0], sizes = [4, 4, 1, 64], strides = [1, 1, 1, 1]} : vector<4x4x2x64xf32> to vector<4x4x1x64xf32>
    %105 = vector.shape_cast %104 : vector<4x4x1x64xf32> to vector<4x4x64xf32>
    %106 = vector.extract_strided_slice %103 {offsets = [0, 0, 1, 0], sizes = [4, 4, 1, 64], strides = [1, 1, 1, 1]} : vector<4x4x2x64xf32> to vector<4x4x1x64xf32>
    %107 = vector.shape_cast %106 : vector<4x4x1x64xf32> to vector<4x4x64xf32>
    %108 = arith.maximumf %105, %107 : vector<4x4x64xf32>
    %cst_140 = arith.constant 0.000000e+00 : bf16
    %109 = vector.broadcast %cst_140 : bf16 to vector<1x1x6x64xbf16>
    %cst_141 = arith.constant 0.000000e+00 : bf16
    %110 = vector.broadcast %cst_141 : bf16 to vector<1x6x1x64xbf16>
    %c0_142 = arith.constant 0 : index
    %c0_143 = arith.constant 0 : index
    %c0_144 = arith.constant 0 : index
    %c0_145 = arith.constant 0 : index
    %111 = vector.load %arg17[%c0_142, %c0_143, %c0_144, %c0_145] : memref<1x6x6x64xbf16, #tpu.memory_space<vmem>>, vector<1x1x6x64xbf16>
    tpu.vector_store %arg17[%c0_142, %c0_143, %c0_144, %c0_145], %109 {strides = array<i32>} : memref<1x6x6x64xbf16, #tpu.memory_space<vmem>>, vector<1x1x6x64xbf16>,
    %c0_146 = arith.constant 0 : index
    %c5 = arith.constant 5 : index
    %c0_147 = arith.constant 0 : index
    %c0_148 = arith.constant 0 : index
    %112 = vector.load %arg17[%c0_146, %c5, %c0_147, %c0_148] : memref<1x6x6x64xbf16, #tpu.memory_space<vmem>>, vector<1x1x6x64xbf16>
    tpu.vector_store %arg17[%c0_146, %c5, %c0_147, %c0_148], %109 {strides = array<i32>} : memref<1x6x6x64xbf16, #tpu.memory_space<vmem>>, vector<1x1x6x64xbf16>,
    %c0_149 = arith.constant 0 : index
    %c0_150 = arith.constant 0 : index
    %c0_151 = arith.constant 0 : index
    %c0_152 = arith.constant 0 : index
    %113 = vector.load %arg17[%c0_149, %c0_150, %c0_151, %c0_152] : memref<1x6x6x64xbf16, #tpu.memory_space<vmem>>, vector<1x6x1x64xbf16>
    tpu.vector_store %arg17[%c0_149, %c0_150, %c0_151, %c0_152], %110 {strides = array<i32>} : memref<1x6x6x64xbf16, #tpu.memory_space<vmem>>, vector<1x6x1x64xbf16>,
    %c0_153 = arith.constant 0 : index
    %c0_154 = arith.constant 0 : index
    %c5_155 = arith.constant 5 : index
    %c0_156 = arith.constant 0 : index
    %114 = vector.load %arg17[%c0_153, %c0_154, %c5_155, %c0_156] : memref<1x6x6x64xbf16, #tpu.memory_space<vmem>>, vector<1x6x1x64xbf16>
    tpu.vector_store %arg17[%c0_153, %c0_154, %c5_155, %c0_156], %110 {strides = array<i32>} : memref<1x6x6x64xbf16, #tpu.memory_space<vmem>>, vector<1x6x1x64xbf16>,
    %115 = vector.shape_cast %108 : vector<4x4x64xf32> to vector<1x4x4x64xf32>
    %116 = arith.truncf %115 : vector<1x4x4x64xf32> to vector<1x4x4x64xbf16>
    %c0_157 = arith.constant 0 : index
    %c1_158 = arith.constant 1 : index
    %c1_159 = arith.constant 1 : index
    %c0_160 = arith.constant 0 : index
    %117 = vector.load %arg17[%c0_157, %c1_158, %c1_159, %c0_160] : memref<1x6x6x64xbf16, #tpu.memory_space<vmem>>, vector<1x4x4x64xbf16>
    tpu.vector_store %arg17[%c0_157, %c1_158, %c1_159, %c0_160], %116 {strides = array<i32>} : memref<1x6x6x64xbf16, #tpu.memory_space<vmem>>, vector<1x4x4x64xbf16>,
    %c0_161 = arith.constant 0 : index
    %c0_162 = arith.constant 0 : index
    %c0_163 = arith.constant 0 : index
    %c0_164 = arith.constant 0 : index
    %118 = vector.load %arg17[%c0_161, %c0_162, %c0_163, %c0_164] : memref<1x6x6x64xbf16, #tpu.memory_space<vmem>>, vector<1x4x4x64xbf16>
    %119 = vector.shape_cast %118 : vector<1x4x4x64xbf16> to vector<16x64xbf16>
    %c0_165 = arith.constant 0 : index
    %c0_166 = arith.constant 0 : index
    %120 = vector.load %arg20[%c0_165, %c0_166] : memref<16x576xbf16, #tpu.memory_space<vmem>>, vector<16x64xbf16>
    tpu.vector_store %arg20[%c0_165, %c0_166], %119 {strides = array<i32>} : memref<16x576xbf16, #tpu.memory_space<vmem>>, vector<16x64xbf16>,
    %c0_167 = arith.constant 0 : index
    %c0_168 = arith.constant 0 : index
    %c1_169 = arith.constant 1 : index
    %c0_170 = arith.constant 0 : index
    %121 = vector.load %arg17[%c0_167, %c0_168, %c1_169, %c0_170] : memref<1x6x6x64xbf16, #tpu.memory_space<vmem>>, vector<1x4x4x64xbf16>
    %122 = vector.shape_cast %121 : vector<1x4x4x64xbf16> to vector<16x64xbf16>
    %c0_171 = arith.constant 0 : index
    %c64_172 = arith.constant 64 : index
    %123 = vector.load %arg20[%c0_171, %c64_172] : memref<16x576xbf16, #tpu.memory_space<vmem>>, vector<16x64xbf16>
    tpu.vector_store %arg20[%c0_171, %c64_172], %122 {strides = array<i32>} : memref<16x576xbf16, #tpu.memory_space<vmem>>, vector<16x64xbf16>,
    %c0_173 = arith.constant 0 : index
    %c0_174 = arith.constant 0 : index
    %c2_175 = arith.constant 2 : index
    %c0_176 = arith.constant 0 : index
    %124 = vector.load %arg17[%c0_173, %c0_174, %c2_175, %c0_176] : memref<1x6x6x64xbf16, #tpu.memory_space<vmem>>, vector<1x4x4x64xbf16>
    %125 = vector.shape_cast %124 : vector<1x4x4x64xbf16> to vector<16x64xbf16>
    %c0_177 = arith.constant 0 : index
    %c128_178 = arith.constant 128 : index
    %126 = vector.load %arg20[%c0_177, %c128_178] : memref<16x576xbf16, #tpu.memory_space<vmem>>, vector<16x64xbf16>
    tpu.vector_store %arg20[%c0_177, %c128_178], %125 {strides = array<i32>} : memref<16x576xbf16, #tpu.memory_space<vmem>>, vector<16x64xbf16>,
    %c0_179 = arith.constant 0 : index
    %c1_180 = arith.constant 1 : index
    %c0_181 = arith.constant 0 : index
    %c0_182 = arith.constant 0 : index
    %127 = vector.load %arg17[%c0_179, %c1_180, %c0_181, %c0_182] : memref<1x6x6x64xbf16, #tpu.memory_space<vmem>>, vector<1x4x4x64xbf16>
    %128 = vector.shape_cast %127 : vector<1x4x4x64xbf16> to vector<16x64xbf16>
    %c0_183 = arith.constant 0 : index
    %c192_184 = arith.constant 192 : index
    %129 = vector.load %arg20[%c0_183, %c192_184] : memref<16x576xbf16, #tpu.memory_space<vmem>>, vector<16x64xbf16>
    tpu.vector_store %arg20[%c0_183, %c192_184], %128 {strides = array<i32>} : memref<16x576xbf16, #tpu.memory_space<vmem>>, vector<16x64xbf16>,
    %c0_185 = arith.constant 0 : index
    %c1_186 = arith.constant 1 : index
    %c1_187 = arith.constant 1 : index
    %c0_188 = arith.constant 0 : index
    %130 = vector.load %arg17[%c0_185, %c1_186, %c1_187, %c0_188] : memref<1x6x6x64xbf16, #tpu.memory_space<vmem>>, vector<1x4x4x64xbf16>
    %131 = vector.shape_cast %130 : vector<1x4x4x64xbf16> to vector<16x64xbf16>
    %c0_189 = arith.constant 0 : index
    %c256_190 = arith.constant 256 : index
    %132 = vector.load %arg20[%c0_189, %c256_190] : memref<16x576xbf16, #tpu.memory_space<vmem>>, vector<16x64xbf16>
    tpu.vector_store %arg20[%c0_189, %c256_190], %131 {strides = array<i32>} : memref<16x576xbf16, #tpu.memory_space<vmem>>, vector<16x64xbf16>,
    %c0_191 = arith.constant 0 : index
    %c1_192 = arith.constant 1 : index
    %c2_193 = arith.constant 2 : index
    %c0_194 = arith.constant 0 : index
    %133 = vector.load %arg17[%c0_191, %c1_192, %c2_193, %c0_194] : memref<1x6x6x64xbf16, #tpu.memory_space<vmem>>, vector<1x4x4x64xbf16>
    %134 = vector.shape_cast %133 : vector<1x4x4x64xbf16> to vector<16x64xbf16>
    %c0_195 = arith.constant 0 : index
    %c320 = arith.constant 320 : index
    %135 = vector.load %arg20[%c0_195, %c320] : memref<16x576xbf16, #tpu.memory_space<vmem>>, vector<16x64xbf16>
    tpu.vector_store %arg20[%c0_195, %c320], %134 {strides = array<i32>} : memref<16x576xbf16, #tpu.memory_space<vmem>>, vector<16x64xbf16>,
    %c0_196 = arith.constant 0 : index
    %c2_197 = arith.constant 2 : index
    %c0_198 = arith.constant 0 : index
    %c0_199 = arith.constant 0 : index
    %136 = vector.load %arg17[%c0_196, %c2_197, %c0_198, %c0_199] : memref<1x6x6x64xbf16, #tpu.memory_space<vmem>>, vector<1x4x4x64xbf16>
    %137 = vector.shape_cast %136 : vector<1x4x4x64xbf16> to vector<16x64xbf16>
    %c0_200 = arith.constant 0 : index
    %c384 = arith.constant 384 : index
    %138 = vector.load %arg20[%c0_200, %c384] : memref<16x576xbf16, #tpu.memory_space<vmem>>, vector<16x64xbf16>
    tpu.vector_store %arg20[%c0_200, %c384], %137 {strides = array<i32>} : memref<16x576xbf16, #tpu.memory_space<vmem>>, vector<16x64xbf16>,
    %c0_201 = arith.constant 0 : index
    %c2_202 = arith.constant 2 : index
    %c1_203 = arith.constant 1 : index
    %c0_204 = arith.constant 0 : index
    %139 = vector.load %arg17[%c0_201, %c2_202, %c1_203, %c0_204] : memref<1x6x6x64xbf16, #tpu.memory_space<vmem>>, vector<1x4x4x64xbf16>
    %140 = vector.shape_cast %139 : vector<1x4x4x64xbf16> to vector<16x64xbf16>
    %c0_205 = arith.constant 0 : index
    %c448 = arith.constant 448 : index
    %141 = vector.load %arg20[%c0_205, %c448] : memref<16x576xbf16, #tpu.memory_space<vmem>>, vector<16x64xbf16>
    tpu.vector_store %arg20[%c0_205, %c448], %140 {strides = array<i32>} : memref<16x576xbf16, #tpu.memory_space<vmem>>, vector<16x64xbf16>,
    %c0_206 = arith.constant 0 : index
    %c2_207 = arith.constant 2 : index
    %c2_208 = arith.constant 2 : index
    %c0_209 = arith.constant 0 : index
    %142 = vector.load %arg17[%c0_206, %c2_207, %c2_208, %c0_209] : memref<1x6x6x64xbf16, #tpu.memory_space<vmem>>, vector<1x4x4x64xbf16>
    %143 = vector.shape_cast %142 : vector<1x4x4x64xbf16> to vector<16x64xbf16>
    %c0_210 = arith.constant 0 : index
    %c512 = arith.constant 512 : index
    %144 = vector.load %arg20[%c0_210, %c512] : memref<16x576xbf16, #tpu.memory_space<vmem>>, vector<16x64xbf16>
    tpu.vector_store %arg20[%c0_210, %c512], %143 {strides = array<i32>} : memref<16x576xbf16, #tpu.memory_space<vmem>>, vector<16x64xbf16>,
    %c0_211 = arith.constant 0 : index
    %c0_212 = arith.constant 0 : index
    %145 = vector.load %arg20[%c0_211, %c0_212] : memref<16x576xbf16, #tpu.memory_space<vmem>>, vector<16x576xbf16>
    %c0_213 = arith.constant 0 : index
    %c0_214 = arith.constant 0 : index
    %146 = vector.load %arg6[%c0_213, %c0_214] : memref<576x128xbf16, #tpu.memory_space<vmem>>, vector<576x128xbf16>
    %cst_215 = arith.constant dense<0.000000e+00> : vector<16x128xf32>
    %147 = tpu.matmul %145, %146, %cst_215 {dimension_numbers = #tpu.dot_dimension_numbers<[1], [0], [0], [1], [0, 0, 1, 1], [], []>} : vector<16x576xbf16>, vector<576x128xbf16>, vector<16x128xf32> -> vector<16x128xf32>
    %c0_216 = arith.constant 0 : index
    %c0_217 = arith.constant 0 : index
    %148 = vector.load %arg7[%c0_216, %c0_217] : memref<1x128xf32, #tpu.memory_space<vmem>>, vector<1x128xf32>
    %149 = vector.broadcast %148 : vector<1x128xf32> to vector<16x128xf32>
    %150 = arith.addf %147, %149 : vector<16x128xf32>
    %cst_218 = arith.constant 0.000000e+00 : f32
    %cst_219 = arith.constant 1.000000e+01 : f32
    %151 = vector.broadcast %cst_218 : f32 to vector<16x128xf32>
    %152 = arith.maximumf %151, %150 : vector<16x128xf32>
    %153 = vector.broadcast %cst_219 : f32 to vector<16x128xf32>
    %154 = arith.minimumf %153, %152 : vector<16x128xf32>
    %155 = vector.shape_cast %154 : vector<16x128xf32> to vector<2x2x4x128xf32>
    %156 = vector.extract_strided_slice %155 {offsets = [0, 0, 0, 0], sizes = [2, 1, 4, 128], strides = [1, 1, 1, 1]} : vector<2x2x4x128xf32> to vector<2x1x4x128xf32>
    %157 = vector.shape_cast %156 : vector<2x1x4x128xf32> to vector<2x4x128xf32>
    %158 = vector.extract_strided_slice %155 {offsets = [0, 1, 0, 0], sizes = [2, 1, 4, 128], strides = [1, 1, 1, 1]} : vector<2x2x4x128xf32> to vector<2x1x4x128xf32>
    %159 = vector.shape_cast %158 : vector<2x1x4x128xf32> to vector<2x4x128xf32>
    %160 = arith.maximumf %157, %159 : vector<2x4x128xf32>
    %161 = vector.shape_cast %160 : vector<2x4x128xf32> to vector<2x2x2x128xf32>
    %162 = vector.extract_strided_slice %161 {offsets = [0, 0, 0, 0], sizes = [2, 2, 1, 128], strides = [1, 1, 1, 1]} : vector<2x2x2x128xf32> to vector<2x2x1x128xf32>
    %163 = vector.shape_cast %162 : vector<2x2x1x128xf32> to vector<2x2x128xf32>
    %164 = vector.extract_strided_slice %161 {offsets = [0, 0, 1, 0], sizes = [2, 2, 1, 128], strides = [1, 1, 1, 1]} : vector<2x2x2x128xf32> to vector<2x2x1x128xf32>
    %165 = vector.shape_cast %164 : vector<2x2x1x128xf32> to vector<2x2x128xf32>
    %166 = arith.maximumf %163, %165 : vector<2x2x128xf32>
    %cst_220 = arith.constant 0.000000e+00 : bf16
    %167 = vector.broadcast %cst_220 : bf16 to vector<1x1x4x128xbf16>
    %cst_221 = arith.constant 0.000000e+00 : bf16
    %168 = vector.broadcast %cst_221 : bf16 to vector<1x4x1x128xbf16>
    %c0_222 = arith.constant 0 : index
    %c0_223 = arith.constant 0 : index
    %c0_224 = arith.constant 0 : index
    %c0_225 = arith.constant 0 : index
    %169 = vector.load %arg18[%c0_222, %c0_223, %c0_224, %c0_225] : memref<1x4x4x128xbf16, #tpu.memory_space<vmem>>, vector<1x1x4x128xbf16>
    tpu.vector_store %arg18[%c0_222, %c0_223, %c0_224, %c0_225], %167 {strides = array<i32>} : memref<1x4x4x128xbf16, #tpu.memory_space<vmem>>, vector<1x1x4x128xbf16>,
    %c0_226 = arith.constant 0 : index
    %c3 = arith.constant 3 : index
    %c0_227 = arith.constant 0 : index
    %c0_228 = arith.constant 0 : index
    %170 = vector.load %arg18[%c0_226, %c3, %c0_227, %c0_228] : memref<1x4x4x128xbf16, #tpu.memory_space<vmem>>, vector<1x1x4x128xbf16>
    tpu.vector_store %arg18[%c0_226, %c3, %c0_227, %c0_228], %167 {strides = array<i32>} : memref<1x4x4x128xbf16, #tpu.memory_space<vmem>>, vector<1x1x4x128xbf16>,
    %c0_229 = arith.constant 0 : index
    %c0_230 = arith.constant 0 : index
    %c0_231 = arith.constant 0 : index
    %c0_232 = arith.constant 0 : index
    %171 = vector.load %arg18[%c0_229, %c0_230, %c0_231, %c0_232] : memref<1x4x4x128xbf16, #tpu.memory_space<vmem>>, vector<1x4x1x128xbf16>
    tpu.vector_store %arg18[%c0_229, %c0_230, %c0_231, %c0_232], %168 {strides = array<i32>} : memref<1x4x4x128xbf16, #tpu.memory_space<vmem>>, vector<1x4x1x128xbf16>,
    %c0_233 = arith.constant 0 : index
    %c0_234 = arith.constant 0 : index
    %c3_235 = arith.constant 3 : index
    %c0_236 = arith.constant 0 : index
    %172 = vector.load %arg18[%c0_233, %c0_234, %c3_235, %c0_236] : memref<1x4x4x128xbf16, #tpu.memory_space<vmem>>, vector<1x4x1x128xbf16>
    tpu.vector_store %arg18[%c0_233, %c0_234, %c3_235, %c0_236], %168 {strides = array<i32>} : memref<1x4x4x128xbf16, #tpu.memory_space<vmem>>, vector<1x4x1x128xbf16>,
    %173 = vector.shape_cast %166 : vector<2x2x128xf32> to vector<1x2x2x128xf32>
    %174 = arith.truncf %173 : vector<1x2x2x128xf32> to vector<1x2x2x128xbf16>
    %c0_237 = arith.constant 0 : index
    %c1_238 = arith.constant 1 : index
    %c1_239 = arith.constant 1 : index
    %c0_240 = arith.constant 0 : index
    %175 = vector.load %arg18[%c0_237, %c1_238, %c1_239, %c0_240] : memref<1x4x4x128xbf16, #tpu.memory_space<vmem>>, vector<1x2x2x128xbf16>
    tpu.vector_store %arg18[%c0_237, %c1_238, %c1_239, %c0_240], %174 {strides = array<i32>} : memref<1x4x4x128xbf16, #tpu.memory_space<vmem>>, vector<1x2x2x128xbf16>,
    %cst_241 = arith.constant 0.000000e+00 : f32
    %176 = vector.broadcast %cst_241 : f32 to vector<4x256xf32>
    %c0_242 = arith.constant 0 : index
    %c0_243 = arith.constant 0 : index
    %c0_244 = arith.constant 0 : index
    %c0_245 = arith.constant 0 : index
    %177 = vector.load %arg18[%c0_242, %c0_243, %c0_244, %c0_245] : memref<1x4x4x128xbf16, #tpu.memory_space<vmem>>, vector<1x2x2x128xbf16>
    %178 = vector.shape_cast %177 : vector<1x2x2x128xbf16> to vector<4x128xbf16>
    %c0_246 = arith.constant 0 : index
    %c0_247 = arith.constant 0 : index
    %c0_248 = arith.constant 0 : index
    %c0_249 = arith.constant 0 : index
    %179 = vector.load %arg8[%c0_246, %c0_247, %c0_248, %c0_249] : memref<3x3x128x256xbf16, #tpu.memory_space<vmem>>, vector<1x1x128x256xbf16>
    %180 = vector.shape_cast %179 : vector<1x1x128x256xbf16> to vector<128x256xbf16>
    %cst_250 = arith.constant dense<0.000000e+00> : vector<4x256xf32>
    %181 = tpu.matmul %178, %180, %cst_250 {dimension_numbers = #tpu.dot_dimension_numbers<[1], [0], [0], [1], [0, 0, 1, 1], [], []>} : vector<4x128xbf16>, vector<128x256xbf16>, vector<4x256xf32> -> vector<4x256xf32>
    %182 = arith.addf %176, %181 : vector<4x256xf32>
    %c0_251 = arith.constant 0 : index
    %c0_252 = arith.constant 0 : index
    %c1_253 = arith.constant 1 : index
    %c0_254 = arith.constant 0 : index
    %183 = vector.load %arg18[%c0_251, %c0_252, %c1_253, %c0_254] : memref<1x4x4x128xbf16, #tpu.memory_space<vmem>>, vector<1x2x2x128xbf16>
    %184 = vector.shape_cast %183 : vector<1x2x2x128xbf16> to vector<4x128xbf16>
    %c0_255 = arith.constant 0 : index
    %c1_256 = arith.constant 1 : index
    %c0_257 = arith.constant 0 : index
    %c0_258 = arith.constant 0 : index
    %185 = vector.load %arg8[%c0_255, %c1_256, %c0_257, %c0_258] : memref<3x3x128x256xbf16, #tpu.memory_space<vmem>>, vector<1x1x128x256xbf16>
    %186 = vector.shape_cast %185 : vector<1x1x128x256xbf16> to vector<128x256xbf16>
    %cst_259 = arith.constant dense<0.000000e+00> : vector<4x256xf32>
    %187 = tpu.matmul %184, %186, %cst_259 {dimension_numbers = #tpu.dot_dimension_numbers<[1], [0], [0], [1], [0, 0, 1, 1], [], []>} : vector<4x128xbf16>, vector<128x256xbf16>, vector<4x256xf32> -> vector<4x256xf32>
    %188 = arith.addf %182, %187 : vector<4x256xf32>
    %c0_260 = arith.constant 0 : index
    %c0_261 = arith.constant 0 : index
    %c2_262 = arith.constant 2 : index
    %c0_263 = arith.constant 0 : index
    %189 = vector.load %arg18[%c0_260, %c0_261, %c2_262, %c0_263] : memref<1x4x4x128xbf16, #tpu.memory_space<vmem>>, vector<1x2x2x128xbf16>
    %190 = vector.shape_cast %189 : vector<1x2x2x128xbf16> to vector<4x128xbf16>
    %c0_264 = arith.constant 0 : index
    %c2_265 = arith.constant 2 : index
    %c0_266 = arith.constant 0 : index
    %c0_267 = arith.constant 0 : index
    %191 = vector.load %arg8[%c0_264, %c2_265, %c0_266, %c0_267] : memref<3x3x128x256xbf16, #tpu.memory_space<vmem>>, vector<1x1x128x256xbf16>
    %192 = vector.shape_cast %191 : vector<1x1x128x256xbf16> to vector<128x256xbf16>
    %cst_268 = arith.constant dense<0.000000e+00> : vector<4x256xf32>
    %193 = tpu.matmul %190, %192, %cst_268 {dimension_numbers = #tpu.dot_dimension_numbers<[1], [0], [0], [1], [0, 0, 1, 1], [], []>} : vector<4x128xbf16>, vector<128x256xbf16>, vector<4x256xf32> -> vector<4x256xf32>
    %194 = arith.addf %188, %193 : vector<4x256xf32>
    %c0_269 = arith.constant 0 : index
    %c1_270 = arith.constant 1 : index
    %c0_271 = arith.constant 0 : index
    %c0_272 = arith.constant 0 : index
    %195 = vector.load %arg18[%c0_269, %c1_270, %c0_271, %c0_272] : memref<1x4x4x128xbf16, #tpu.memory_space<vmem>>, vector<1x2x2x128xbf16>
    %196 = vector.shape_cast %195 : vector<1x2x2x128xbf16> to vector<4x128xbf16>
    %c1_273 = arith.constant 1 : index
    %c0_274 = arith.constant 0 : index
    %c0_275 = arith.constant 0 : index
    %c0_276 = arith.constant 0 : index
    %197 = vector.load %arg8[%c1_273, %c0_274, %c0_275, %c0_276] : memref<3x3x128x256xbf16, #tpu.memory_space<vmem>>, vector<1x1x128x256xbf16>
    %198 = vector.shape_cast %197 : vector<1x1x128x256xbf16> to vector<128x256xbf16>
    %cst_277 = arith.constant dense<0.000000e+00> : vector<4x256xf32>
    %199 = tpu.matmul %196, %198, %cst_277 {dimension_numbers = #tpu.dot_dimension_numbers<[1], [0], [0], [1], [0, 0, 1, 1], [], []>} : vector<4x128xbf16>, vector<128x256xbf16>, vector<4x256xf32> -> vector<4x256xf32>
    %200 = arith.addf %194, %199 : vector<4x256xf32>
    %c0_278 = arith.constant 0 : index
    %c1_279 = arith.constant 1 : index
    %c1_280 = arith.constant 1 : index
    %c0_281 = arith.constant 0 : index
    %201 = vector.load %arg18[%c0_278, %c1_279, %c1_280, %c0_281] : memref<1x4x4x128xbf16, #tpu.memory_space<vmem>>, vector<1x2x2x128xbf16>
    %202 = vector.shape_cast %201 : vector<1x2x2x128xbf16> to vector<4x128xbf16>
    %c1_282 = arith.constant 1 : index
    %c1_283 = arith.constant 1 : index
    %c0_284 = arith.constant 0 : index
    %c0_285 = arith.constant 0 : index
    %203 = vector.load %arg8[%c1_282, %c1_283, %c0_284, %c0_285] : memref<3x3x128x256xbf16, #tpu.memory_space<vmem>>, vector<1x1x128x256xbf16>
    %204 = vector.shape_cast %203 : vector<1x1x128x256xbf16> to vector<128x256xbf16>
    %cst_286 = arith.constant dense<0.000000e+00> : vector<4x256xf32>
    %205 = tpu.matmul %202, %204, %cst_286 {dimension_numbers = #tpu.dot_dimension_numbers<[1], [0], [0], [1], [0, 0, 1, 1], [], []>} : vector<4x128xbf16>, vector<128x256xbf16>, vector<4x256xf32> -> vector<4x256xf32>
    %206 = arith.addf %200, %205 : vector<4x256xf32>
    %c0_287 = arith.constant 0 : index
    %c1_288 = arith.constant 1 : index
    %c2_289 = arith.constant 2 : index
    %c0_290 = arith.constant 0 : index
    %207 = vector.load %arg18[%c0_287, %c1_288, %c2_289, %c0_290] : memref<1x4x4x128xbf16, #tpu.memory_space<vmem>>, vector<1x2x2x128xbf16>
    %208 = vector.shape_cast %207 : vector<1x2x2x128xbf16> to vector<4x128xbf16>
    %c1_291 = arith.constant 1 : index
    %c2_292 = arith.constant 2 : index
    %c0_293 = arith.constant 0 : index
    %c0_294 = arith.constant 0 : index
    %209 = vector.load %arg8[%c1_291, %c2_292, %c0_293, %c0_294] : memref<3x3x128x256xbf16, #tpu.memory_space<vmem>>, vector<1x1x128x256xbf16>
    %210 = vector.shape_cast %209 : vector<1x1x128x256xbf16> to vector<128x256xbf16>
    %cst_295 = arith.constant dense<0.000000e+00> : vector<4x256xf32>
    %211 = tpu.matmul %208, %210, %cst_295 {dimension_numbers = #tpu.dot_dimension_numbers<[1], [0], [0], [1], [0, 0, 1, 1], [], []>} : vector<4x128xbf16>, vector<128x256xbf16>, vector<4x256xf32> -> vector<4x256xf32>
    %212 = arith.addf %206, %211 : vector<4x256xf32>
    %c0_296 = arith.constant 0 : index
    %c2_297 = arith.constant 2 : index
    %c0_298 = arith.constant 0 : index
    %c0_299 = arith.constant 0 : index
    %213 = vector.load %arg18[%c0_296, %c2_297, %c0_298, %c0_299] : memref<1x4x4x128xbf16, #tpu.memory_space<vmem>>, vector<1x2x2x128xbf16>
    %214 = vector.shape_cast %213 : vector<1x2x2x128xbf16> to vector<4x128xbf16>
    %c2_300 = arith.constant 2 : index
    %c0_301 = arith.constant 0 : index
    %c0_302 = arith.constant 0 : index
    %c0_303 = arith.constant 0 : index
    %215 = vector.load %arg8[%c2_300, %c0_301, %c0_302, %c0_303] : memref<3x3x128x256xbf16, #tpu.memory_space<vmem>>, vector<1x1x128x256xbf16>
    %216 = vector.shape_cast %215 : vector<1x1x128x256xbf16> to vector<128x256xbf16>
    %cst_304 = arith.constant dense<0.000000e+00> : vector<4x256xf32>
    %217 = tpu.matmul %214, %216, %cst_304 {dimension_numbers = #tpu.dot_dimension_numbers<[1], [0], [0], [1], [0, 0, 1, 1], [], []>} : vector<4x128xbf16>, vector<128x256xbf16>, vector<4x256xf32> -> vector<4x256xf32>
    %218 = arith.addf %212, %217 : vector<4x256xf32>
    %c0_305 = arith.constant 0 : index
    %c2_306 = arith.constant 2 : index
    %c1_307 = arith.constant 1 : index
    %c0_308 = arith.constant 0 : index
    %219 = vector.load %arg18[%c0_305, %c2_306, %c1_307, %c0_308] : memref<1x4x4x128xbf16, #tpu.memory_space<vmem>>, vector<1x2x2x128xbf16>
    %220 = vector.shape_cast %219 : vector<1x2x2x128xbf16> to vector<4x128xbf16>
    %c2_309 = arith.constant 2 : index
    %c1_310 = arith.constant 1 : index
    %c0_311 = arith.constant 0 : index
    %c0_312 = arith.constant 0 : index
    %221 = vector.load %arg8[%c2_309, %c1_310, %c0_311, %c0_312] : memref<3x3x128x256xbf16, #tpu.memory_space<vmem>>, vector<1x1x128x256xbf16>
    %222 = vector.shape_cast %221 : vector<1x1x128x256xbf16> to vector<128x256xbf16>
    %cst_313 = arith.constant dense<0.000000e+00> : vector<4x256xf32>
    %223 = tpu.matmul %220, %222, %cst_313 {dimension_numbers = #tpu.dot_dimension_numbers<[1], [0], [0], [1], [0, 0, 1, 1], [], []>} : vector<4x128xbf16>, vector<128x256xbf16>, vector<4x256xf32> -> vector<4x256xf32>
    %224 = arith.addf %218, %223 : vector<4x256xf32>
    %c0_314 = arith.constant 0 : index
    %c2_315 = arith.constant 2 : index
    %c2_316 = arith.constant 2 : index
    %c0_317 = arith.constant 0 : index
    %225 = vector.load %arg18[%c0_314, %c2_315, %c2_316, %c0_317] : memref<1x4x4x128xbf16, #tpu.memory_space<vmem>>, vector<1x2x2x128xbf16>
    %226 = vector.shape_cast %225 : vector<1x2x2x128xbf16> to vector<4x128xbf16>
    %c2_318 = arith.constant 2 : index
    %c2_319 = arith.constant 2 : index
    %c0_320 = arith.constant 0 : index
    %c0_321 = arith.constant 0 : index
    %227 = vector.load %arg8[%c2_318, %c2_319, %c0_320, %c0_321] : memref<3x3x128x256xbf16, #tpu.memory_space<vmem>>, vector<1x1x128x256xbf16>
    %228 = vector.shape_cast %227 : vector<1x1x128x256xbf16> to vector<128x256xbf16>
    %cst_322 = arith.constant dense<0.000000e+00> : vector<4x256xf32>
    %229 = tpu.matmul %226, %228, %cst_322 {dimension_numbers = #tpu.dot_dimension_numbers<[1], [0], [0], [1], [0, 0, 1, 1], [], []>} : vector<4x128xbf16>, vector<128x256xbf16>, vector<4x256xf32> -> vector<4x256xf32>
    %230 = arith.addf %224, %229 : vector<4x256xf32>
    %c0_323 = arith.constant 0 : index
    %c0_324 = arith.constant 0 : index
    %231 = vector.load %arg9[%c0_323, %c0_324] : memref<1x256xf32, #tpu.memory_space<vmem>>, vector<1x256xf32>
    %232 = vector.broadcast %231 : vector<1x256xf32> to vector<4x256xf32>
    %233 = arith.addf %230, %232 : vector<4x256xf32>
    %cst_325 = arith.constant 0.000000e+00 : f32
    %cst_326 = arith.constant 1.000000e+01 : f32
    %234 = vector.broadcast %cst_325 : f32 to vector<4x256xf32>
    %235 = arith.maximumf %234, %233 : vector<4x256xf32>
    %236 = vector.broadcast %cst_326 : f32 to vector<4x256xf32>
    %237 = arith.minimumf %236, %235 : vector<4x256xf32>
    %238 = vector.shape_cast %237 : vector<4x256xf32> to vector<1x4x256xf32>
    %cst_327 = arith.constant dense<0.000000e+00> : vector<1x256xf32>
    %239 = vector.multi_reduction <add>, %238, %cst_327 [1] : vector<1x4x256xf32> to vector<1x256xf32>
    %cst_328 = arith.constant 4.000000e+00 : f32
    %240 = vector.broadcast %cst_328 : f32 to vector<1x256xf32>
    %241 = arith.divf %239, %240 : vector<1x256xf32>
    %242 = arith.truncf %241 : vector<1x256xf32> to vector<1x256xbf16>
    %c0_329 = arith.constant 0 : index
    %c0_330 = arith.constant 0 : index
    %243 = vector.load %arg10[%c0_329, %c0_330] : memref<256x256xbf16, #tpu.memory_space<vmem>>, vector<256x256xbf16>
    %cst_331 = arith.constant dense<0.000000e+00> : vector<1x256xf32>
    %244 = tpu.matmul %242, %243, %cst_331 {dimension_numbers = #tpu.dot_dimension_numbers<[1], [0], [0], [1], [0, 0, 1, 1], [], []>} : vector<1x256xbf16>, vector<256x256xbf16>, vector<1x256xf32> -> vector<1x256xf32>
    %c0_332 = arith.constant 0 : index
    %c0_333 = arith.constant 0 : index
    %245 = vector.load %arg11[%c0_332, %c0_333] : memref<1x256xf32, #tpu.memory_space<vmem>>, vector<1x256xf32>
    %246 = arith.addf %244, %245 : vector<1x256xf32>
    %cst_334 = arith.constant 0.000000e+00 : f32
    %247 = vector.broadcast %cst_334 : f32 to vector<1x256xf32>
    %248 = arith.maximumf %246, %247 : vector<1x256xf32>
    %249 = arith.truncf %248 : vector<1x256xf32> to vector<1x256xbf16>
    %c0_335 = arith.constant 0 : index
    %c0_336 = arith.constant 0 : index
    %250 = vector.load %arg12[%c0_335, %c0_336] : memref<256x128xbf16, #tpu.memory_space<vmem>>, vector<256x128xbf16>
    %cst_337 = arith.constant dense<0.000000e+00> : vector<1x128xf32>
    %251 = tpu.matmul %249, %250, %cst_337 {dimension_numbers = #tpu.dot_dimension_numbers<[1], [0], [0], [1], [0, 0, 1, 1], [], []>} : vector<1x256xbf16>, vector<256x128xbf16>, vector<1x128xf32> -> vector<1x128xf32>
    %c0_338 = arith.constant 0 : index
    %c0_339 = arith.constant 0 : index
    %252 = vector.load %arg13[%c0_338, %c0_339] : memref<1x128xf32, #tpu.memory_space<vmem>>, vector<1x128xf32>
    %253 = arith.addf %251, %252 : vector<1x128xf32>
    %cst_340 = arith.constant -1.000000e+01 : f32
    %cst_341 = arith.constant 1.000000e+01 : f32
    %254 = vector.broadcast %cst_340 : f32 to vector<1x128xf32>
    %255 = arith.maximumf %254, %253 : vector<1x128xf32>
    %256 = vector.broadcast %cst_341 : f32 to vector<1x128xf32>
    %257 = arith.minimumf %256, %255 : vector<1x128xf32>
    %258 = vector.shape_cast %257 : vector<1x128xf32> to vector<1x1x128xf32>
    %c0_342 = arith.constant 0 : index
    %c0_343 = arith.constant 0 : index
    %c0_344 = arith.constant 0 : index
    %259 = vector.load %arg14[%c0_342, %c0_343, %c0_344] : memref<1x1x128xf32, #tpu.memory_space<vmem>>, vector<1x1x128xf32>
    tpu.vector_store %arg14[%c0_342, %c0_343, %c0_344], %258 {strides = array<i32>} : memref<1x1x128xf32, #tpu.memory_space<vmem>>, vector<1x1x128xf32>,
    return
  }
  func.func @transform_0(%arg0: i32) -> (i32, i32, i32, i32) {
    %c0_i32 = arith.constant 0 : i32
    %c0_i32_0 = arith.constant 0 : i32
    %c0_i32_1 = arith.constant 0 : i32
    %c0_i32_2 = arith.constant 0 : i32
    return %arg0, %c0_i32, %c0_i32_0, %c0_i32_1 : i32, i32, i32, i32
  }
  func.func @transform_1(%arg0: i32) -> (i32, i32) {
    %c0_i32 = arith.constant 0 : i32
    %c0_i32_0 = arith.constant 0 : i32
    %c0_i32_1 = arith.constant 0 : i32
    return %c0_i32, %c0_i32_0 : i32, i32
  }
  func.func @transform_2(%arg0: i32) -> (i32, i32) {
    %c0_i32 = arith.constant 0 : i32
    %c0_i32_0 = arith.constant 0 : i32
    %c0_i32_1 = arith.constant 0 : i32
    return %c0_i32, %c0_i32_0 : i32, i32
  }
  func.func @transform_3(%arg0: i32) -> (i32, i32) {
    %c0_i32 = arith.constant 0 : i32
    %c0_i32_0 = arith.constant 0 : i32
    %c0_i32_1 = arith.constant 0 : i32
    return %c0_i32, %c0_i32_0 : i32, i32
  }
  func.func @transform_4(%arg0: i32) -> (i32, i32) {
    %c0_i32 = arith.constant 0 : i32
    %c0_i32_0 = arith.constant 0 : i32
    %c0_i32_1 = arith.constant 0 : i32
    return %c0_i32, %c0_i32_0 : i32, i32
  }
  func.func @transform_5(%arg0: i32) -> (i32, i32) {
    %c0_i32 = arith.constant 0 : i32
    %c0_i32_0 = arith.constant 0 : i32
    %c0_i32_1 = arith.constant 0 : i32
    return %c0_i32, %c0_i32_0 : i32, i32
  }
  func.func @transform_6(%arg0: i32) -> (i32, i32) {
    %c0_i32 = arith.constant 0 : i32
    %c0_i32_0 = arith.constant 0 : i32
    %c0_i32_1 = arith.constant 0 : i32
    return %c0_i32, %c0_i32_0 : i32, i32
  }
  func.func @transform_7(%arg0: i32) -> (i32, i32, i32, i32) {
    %c0_i32 = arith.constant 0 : i32
    %c0_i32_0 = arith.constant 0 : i32
    %c0_i32_1 = arith.constant 0 : i32
    %c0_i32_2 = arith.constant 0 : i32
    %c0_i32_3 = arith.constant 0 : i32
    return %c0_i32, %c0_i32_0, %c0_i32_1, %c0_i32_2 : i32, i32, i32, i32
  }
  func.func @transform_8(%arg0: i32) -> (i32, i32) {
    %c0_i32 = arith.constant 0 : i32
    %c0_i32_0 = arith.constant 0 : i32
    %c0_i32_1 = arith.constant 0 : i32
    return %c0_i32, %c0_i32_0 : i32, i32
  }
  func.func @transform_9(%arg0: i32) -> (i32, i32) {
    %c0_i32 = arith.constant 0 : i32
    %c0_i32_0 = arith.constant 0 : i32
    %c0_i32_1 = arith.constant 0 : i32
    return %c0_i32, %c0_i32_0 : i32, i32
  }
  func.func @transform_10(%arg0: i32) -> (i32, i32) {
    %c0_i32 = arith.constant 0 : i32
    %c0_i32_0 = arith.constant 0 : i32
    %c0_i32_1 = arith.constant 0 : i32
    return %c0_i32, %c0_i32_0 : i32, i32
  }
  func.func @transform_11(%arg0: i32) -> (i32, i32) {
    %c0_i32 = arith.constant 0 : i32
    %c0_i32_0 = arith.constant 0 : i32
    %c0_i32_1 = arith.constant 0 : i32
    return %c0_i32, %c0_i32_0 : i32, i32
  }
  func.func @transform_12(%arg0: i32) -> (i32, i32) {
    %c0_i32 = arith.constant 0 : i32
    %c0_i32_0 = arith.constant 0 : i32
    %c0_i32_1 = arith.constant 0 : i32
    return %c0_i32, %c0_i32_0 : i32, i32
  }
  func.func @transform_13(%arg0: i32) -> (i32, i32, i32) {
    %c0_i32 = arith.constant 0 : i32
    %c0_i32_0 = arith.constant 0 : i32
    %c0_i32_1 = arith.constant 0 : i32
    return %arg0, %c0_i32, %c0_i32_0 : i32, i32, i32
  }
}

</mosaic_0001>

<bundles_post_ra>
// kernel: obs_encoder_forward.1
= control target key start
LH: loop header
LB: loop body
LE: loop exit
PB: predicated region body
PF: predicated region fallthrough
CT: control target
= control target key end

     0   :  { %s15632_s0 = inlined_call_operand.vmem [shape: u8[2,16,16,3], index: 0, kind: input, shape index: {}]   ;;  %s15633_s1 = inlined_call_operand.vmem [shape: bf16[27,32], index: 1, kind: input, shape index: {}]   ;;  %s15634_s2 = inlined_call_operand.vmem [shape: f32[1,32], index: 2, kind: input, shape index: {}]   ;;  %s15635_s3 = inlined_call_operand.vmem [shape: bf16[288,64], index: 3, kind: input, shape index: {}]   ;;  %s15636_s4 = inlined_call_operand.vmem [shape: f32[1,64], index: 4, kind: input, shape index: {}]   ;;  %s15637_s5 = inlined_call_operand.vmem [shape: bf16[576,128], index: 5, kind: input, shape index: {}]   ;;  %s15638_s6 = inlined_call_operand.vmem [shape: f32[1,128], index: 6, kind: input, shape index: {}]   ;;  %s15639_s7 = inlined_call_operand.vmem [shape: bf16[3,3,128,256], index: 7, kind: input, shape index: {}]   ;;  %s15640_s8 = inlined_call_operand.vmem [shape: f32[1,256], index: 8, kind: input, shape index: {}]   ;;  %s15641_s9 = inlined_call_operand.vmem [shape: bf16[256,256], index: 9, kind: input, shape index: {}]   ;;  %s15642_s10 = inlined_call_operand.vmem [shape: f32[1,256], index: 10, kind: input, shape index: {}]   ;;  %s15643_s11 = inlined_call_operand.vmem [shape: bf16[256,128], index: 11, kind: input, shape index: {}]   ;;  %s15644_s12 = inlined_call_operand.vmem [shape: f32[1,128], index: 12, kind: input, shape index: {}]   ;;  %s15645_s13 = inlined_call_operand.hbm [shape: f32[2,1,128], index: 13, kind: output, shape index: {}]  }
   0x1   :  { %15681 = sst [smem:[#allocation11_spill]] %s15632_s0 }
   0x2   :  { %15682 = sst [smem:[#allocation12_spill]] %s15633_s1 }
   0x3   :  { %15683 = sst [smem:[#allocation13_spill]] %s15634_s2 }
   0x4   :  { %18 = vsyncpa [#allocation9], 0 }
   0x5   :  { %20 = vsyncpa [#allocation9 + $0x1], 0  ;;  %s12130_s25 = smov 0   ;;  %s12132_s26 = smov 0  }
   0x6   :  { %s12134_s27 = smov 0   ;;  %s12136_s28 = smov 0  }
   0x7 LB: > { %s12151_s29 = sadd.s32 4294967295, %s12040_s28   ;;  %s10325_s30 = sadd.s32 4294967294, %s12040_s28   ;;  %s12040_s28 = sphi %s12136_s28, %s15793_s28   ;;  %s12036_s27 = sphi %s12134_s27, %s15792_s27   ;;  %s12032_s26 = sphi %s12132_s26, %s15791_s26   ;;  %s12028_s25 = sphi %s12130_s25, %s15790_s25  }
   0x8   : > { %s12155_s14 = sadd.s32 1, %s12040_s28   ;;  %s311_s15 = sadd.s32 1, %s12036_s27 }
   0x9   : > { %s308_s16 = ssub.s32 %s12040_s28, %s12155_s14  ;;  %p321_p0 = scmp.ne.s32.totalorder %s12036_s27, %s12032_s26 }
   0xa   : > { %p309_p1 = scmp.eq.s32.totalorder %s308_s16, 0  ;;  %p322_p2 = scmp.eq.s32.totalorder %s12151_s29, 1 }
   0xb   : > { %p327_p3 = scmp.ne.s32.totalorder %s12032_s26, %s12028_s25  ;;  %p328_p4 = scmp.eq.s32.totalorder %s10325_s30, 1 }
   0xc   : > { %s12166_s17 = scalar_select %p309_p1, %s12036_s27, %s311_s15  }
   0xd   : > { %p12168_p5 = por %p322_p2, %p321_p0  ;;  %p12172_p6 = por %p328_p4, %p327_p3 }
   0xe   : > { %p10328_p7 = scmp.ge.s32.totalorder %s12040_s28, 1  ;;  %p390_p8 = scmp.lt.s32.totalorder %s12040_s28, 3 }
  0x10   : > { %p391_p9 = pnand %p10328_p7, %p390_p8 }
  0x11   : > { %vm471_vm0 = vcmask (!%p391_p9), 19456   ;;  %vm474_vm1 = vcmask (!%p391_p9), 16384   ;;  %vm15666_vm2 = vsmask.f32 (!%p391_p9), 256  ;;  %v15658_v0 = vmov (!%p391_p9), 0   ;;  %p433_p10 = scmp.lt.s32.totalorder (!%p391_p9), %s12151_s29, 1 }
  0x12   : > { %394 = sbr.rel (%p391_p9) target bundleno = 2458 (0x99a), region = 72  ;;  %472 = vst.msk [vmem:[#allocation2] sm:$0xf] (!%p391_p9), %vm471_vm0, %v15658_v0  ;;  %473 = vst.msk [vmem:[#allocation2 + $0x4] sm:$0xf] (!%p391_p9), %vm471_vm0, %v15658_v0  ;;  %vm1561_vm6 = vcmask (!%p391_p9), 1042432  }
  0x13   : > { %475 = vst.msk [vmem:[#allocation2 + $0x8] sm:$0x1] (!%p391_p9), %vm474_vm1, %v15658_v0  ;;  %vm12186_vm3 = vmand (!%p391_p9), %vm474_vm1, %vm15666_vm2  ;;  %vm15665_vm4 = vsmask.f32 (!%p391_p9), 7938  ;;  %v486_v2 = vld [vmem:[#allocation2 + $0xc] sm:$0x1] (!%p391_p9) }
  0x14   : > { %477 = vst.msk [vmem:[#allocation2 + $0xcc] sm:$0xf] (!%p391_p9), %vm471_vm0, %v15658_v0  ;;  %478 = vst.msk [vmem:[#allocation2 + $0xd0] sm:$0xf] (!%p391_p9), %vm471_vm0, %v15658_v0  ;;  %v489_v3 = vld [vmem:[#allocation2 + $0x18] sm:$0x1] (!%p391_p9) }
  0x15   : > { %479 = vst.msk [vmem:[#allocation2 + $0xd4] sm:$0x1] (!%p391_p9), %vm474_vm1, %v15658_v0  ;;  %8066 = vst [vmem:[#allocation5] sm:$0x3] (!%p391_p9), %v15658_v0  ;;  %v487_v4 = vsel (!%p391_p9), %vm12186_vm3, 0, %v486_v2  ;;  %v490_v5 = vsel (!%p391_p9), %vm12186_vm3, 0, %v489_v3 }
  0x16   : > { %8068 = vst [vmem:[#allocation5 + $0x6] sm:$0x3] (!%p391_p9), %v15658_v0  ;;  %v492_v6 = vld [vmem:[#allocation2 + $0x24] sm:$0x1] (!%p391_p9)  ;;  %488 = vst [vmem:[#allocation2 + $0xc] sm:$0x1] (!%p391_p9), %v487_v4 }
  0x17   : > { %491 = vst [vmem:[#allocation2 + $0x18] sm:$0x1] (!%p391_p9), %v490_v5  ;;  %v493_v7 = vsel (!%p391_p9), %vm12186_vm3, 0, %v492_v6  ;;  %vm12208_vm5 = vmand (!%p391_p9), %vm474_vm1, %vm15665_vm4  ;;  %v542_v9 = vld [vmem:[#allocation2 + $0x14] sm:$0x1] (!%p391_p9)  ;;  %vm1562_vm7 = vcmask (!%p391_p9), 1046532  }
  0x18   : > { %494 = vst [vmem:[#allocation2 + $0x24] sm:$0x1] (!%p391_p9), %v493_v7  ;;  %v545_v10 = vld [vmem:[#allocation2 + $0x20] sm:$0x1] (!%p391_p9)  ;;  %s15690_s0 = sld [smem:[#allocation11_spill]] (!%p391_p9)  ;;  %v543_v11 = vsel (!%p391_p9), %vm12208_vm5, 0, %v542_v9  ;;  %vm12230_vm9 = vmor (!%p391_p9), %vm1561_vm6, %vm1562_vm7 }
  0x19   : > { %s434_s20 = scalar_select %p433_p10, %s12151_s29, 1  ;;  %vm15662_vm8 = vsmask.f32 4368  ;;  %v546_v12 = vsel %vm12208_vm5, 0, %v545_v10  ;;  %544 = vst [vmem:[#allocation2 + $0x14] sm:$0x1] %v543_v11  ;;  %vm12241_vm10 = vmand %vm471_vm0, %vm15665_vm4 }
  0x1a   : > { %547 = vst [vmem:[#allocation2 + $0x20] sm:$0x1] %v546_v12  ;;  %v539_v16 = vld [vmem:[#allocation2 + $0x8] sm:$0x1]  ;;  %v12224_v17 = vld [vmem:[#allocation2 + $0x4] sm:$0xf]  ;;  %vm12250_vm11 = vmor %vm15666_vm2, %vm15662_vm8 }
  0x1b   : > { %s11216_s21 = sshll.u32 %s434_s20, 6  ;;  %v1497_v18 = vld [vmem:[#allocation2] sm:$0xe]  ;;  %v540_v22 = vsel %vm12208_vm5, 0, %v539_v16  ;;  %v1566_v25 = vrot.slane %v12224_v17, 5  ;;  %v1123_v35 = vshll.u32 %v12224_v17, 16 }
  0x1c   : > { %v10331_v24 = vrot.slane %v1497_v18, 9  ;;  %v483_v26 = vld [vmem:[#allocation2] sm:$0x1]  ;;  %541 = vst [vmem:[#allocation2 + $0x8] sm:$0x1] %v540_v22  ;;  %s15656_s30 = smov 6  }
  0x1d   : > { %v484_v27 = vsel %vm12186_vm3, 0, %v483_v26  ;;  %v950_v33 = vld [vmem:[#allocation2 + $0xc] sm:$0xf]  ;;  %v1568_v48 = vrot.slane %v1566_v25, 4  ;;  %vm1110_vm12 = vsmask.f32 3328 }
  0x1e   : > { %s12215_s24 = scalar_lea.vmem %s15690_s0, %s11216_s21  ;;  %485 = vst [vmem:[#allocation2] sm:$0x1] %v484_v27  ;;  %v1567_v37 = vsel %vm12230_vm9, %v10331_v24, %v1566_v25  ;;  %v957_v59 = vld [vmem:[#allocation2 + $0x18] sm:$0xf]  ;;  %vm1111_vm13 = vsmask.f32 7440 }
  0x1f   : > { %v439_v13 = vld [vmem:[%s12215_s24] sm:$0x3]  ;;  %v440_v14 = vld [vmem:[%s12215_s24 + $0x2] sm:$0x3]  ;;  %v441_v15 = vld [vmem:[%s12215_s24 + $0x4] sm:$0x3] }
  0x20   : > { %v593_v19 = vunpack.c.l.u8.bf16 %v439_v13  ;;  %v594_v20 = vunpack.c.l.u8.bf16 %v440_v14  ;;  %v595_v21 = vunpack.c.l.u8.bf16 %v441_v15  ;;  %v442_v31 = vld [vmem:[%s12215_s24 + $0x6] sm:$0x3]  ;;  %v443_v41 = vld [vmem:[%s12215_s24 + $0x8] sm:$0x3]  ;;  %v444_v46 = vld [vmem:[%s12215_s24 + $0xa] sm:$0x3] }
  0x21   : > { %v596_v34 = vunpack.c.l.u8.bf16 %v442_v31  ;;  %v597_v47 = vunpack.c.l.u8.bf16 %v443_v41  ;;  %v598_v54 = vunpack.c.l.u8.bf16 %v444_v46  ;;  %v964_v13 = vld [vmem:[#allocation2 + $0x24] sm:$0xf]  ;;  %v1127_v25 = vshrl.u32 %v12224_v17, 16  ;;  %v12269_v26 = vld [vmem:[%s12215_s24 + $0xc] sm:$0x3]  ;;  %s15648_s15 = smov 9   ;;  %vm12325_vm14 = vmor %vm1110_vm12, %vm1111_vm13 }
  0x22   : > { %v628_v28 = vshrl.u32 %v593_v19, 16  ;;  %v631_v29 = vshll.u32 %v593_v19, 16  ;;  %v636_v30 = vshrl.u32 %v594_v20, 16  ;;  %v639_v32 = vshll.u32 %v594_v20, 16  ;;  %v954_v20 = vld [vmem:[#allocation2 + $0x14] sm:$0x1] }
  0x23   : > { %v645_v40 = vshrl.u32 %v595_v21, 16  ;;  %v648_v43 = vshll.u32 %v595_v21, 16  ;;  %v653_v44 = vshrl.u32 %v596_v34, 16  ;;  %v656_v45 = vshll.u32 %v596_v34, 16  ;;  %v1094_v61 = vld [vmem:[#allocation2 + $0x8] sm:$0x1] }
  0x24   : > { %v630_v38 = vrot.slane %v628_v28, 7  ;;  %v638_v39 = vrot.slane %v636_v30, 7  ;;  %v662_v55 = vshrl.u32 %v597_v47, 16  ;;  %v665_v60 = vshll.u32 %v597_v47, 16  ;;  %v961_v21 = vld [vmem:[#allocation2 + $0x20] sm:$0x1] }
  0x25   : > { %v647_v52 = vrot.slane %v645_v40, 7  ;;  %v655_v53 = vrot.slane %v653_v44, 7  ;;  %v1133_v4 = vshll.u32 %v1094_v61, 16  ;;  %v1569_v5 = vrot.slane %v1094_v61, 5  ;;  %v1062_v9 = vld [vmem:[#allocation2] sm:$0xf] }
  0x26   : > { %v633_v49 = vor.u32 %v631_v29, %v630_v38  ;;  %v634_v50 = vrot.slane %v630_v38, 4  ;;  %v641_v51 = vor.u32 %v639_v32, %v638_v39  ;;  %v643_v57 = vrot.slane %v638_v39, 4  ;;  %v12276_v31 = vld [vmem:[%s12215_s24 + $0xe] sm:$0x3]  ;;  %v12289_v38 = vld [vmem:[%s12215_s24 + $0x12] sm:$0x3] }
  0x27   : > { %v650_v62 = vor.u32 %v648_v43, %v647_v52  ;;  %v651_v63 = vrot.slane %v647_v52, 4  ;;  %v658_v2 = vor.u32 %v656_v45, %v655_v53  ;;  %v660_v3 = vrot.slane %v655_v53, 4  ;;  %s15646_s16 = smov 18   ;;  %s15660_s20 = smov 3  }
  0x28   : > { %v642_v56 = vsel %vm12250_vm11, %v634_v50, %v641_v51  ;;  %v951_v58 = vsel %vm12241_vm10, %v633_v49, %v950_v33  ;;  %v664_v6 = vrot.slane %v662_v55, 7  ;;  %v670_v7 = vshrl.u32 %v598_v54, 16  ;;  %s15650_s21 = smov 15   ;;  %s15663_s22 = smov 24  }
  0x29   : > { %952 = vst [vmem:[#allocation2 + $0xc] sm:$0xf] %v951_v58  ;;  %953 = vst.msk [vmem:[#allocation2 + $0x10] sm:$0xf] %vm471_vm0, %v642_v56  ;;  %v659_v10 = vsel %vm12250_vm11, %v651_v63, %v658_v2  ;;  %v958_v11 = vsel %vm12241_vm10, %v650_v62, %v957_v59  ;;  %v673_v12 = vshll.u32 %v598_v54, 16  ;;  %v1114_v14 = vshrl.u32 %v1062_v9, 16 }
  0x2a   : > { %v1570_v15 = vsel %vm12230_vm9, %v1568_v48, %v1569_v5  ;;  %959 = vst [vmem:[#allocation2 + $0x18] sm:$0xf] %v958_v11  ;;  %960 = vst.msk [vmem:[#allocation2 + $0x1c] sm:$0xf] %vm471_vm0, %v659_v10  ;;  %v667_v16 = vor.u32 %v665_v60, %v664_v6  ;;  %v668_v18 = vrot.slane %v664_v6, 4  ;;  %v672_v19 = vrot.slane %v670_v7, 7 }
  0x2b   : > { %v10411_v22 = vcombine.low %v1567_v37, %v1570_v15  ;;  %v1117_v24 = vshll.u32 %v1062_v9, 16  ;;  %v1116_v29 = vrot.slane %v1114_v14, 4  ;;  %v12273_v30 = vrot.slane %v1123_v35, 5  ;;  %v12286_v37 = vld [vmem:[%s12215_s24 + $0x10] sm:$0x3]  ;;  %s15654_s23 = smov 12  }
  0x2c   : > { %v675_v27 = vor.u32 %v673_v12, %v672_v19  ;;  %v965_v28 = vsel %vm12241_vm10, %v667_v16, %v964_v13  ;;  %v12279_v33 = vrot.slane %v1127_v25, 4  ;;  %v955_v17 = vsel %vm12186_vm3, %v643_v57, %v954_v20  ;;  %s15700_s1 = sld [smem:[#allocation12_spill]]  ;;  %s15707_s0 = smov 24  }
  0x2d   : > { %3085 = vrot.lane.b32.xlu1 %v10411_v22, %s15656_s30  ;;  %966 = vst [vmem:[#allocation2 + $0x24] sm:$0xf] %v965_v28  ;;  %v1119_v32 = vrot.slane %v1117_v24, 5  ;;  %v962_v34 = vsel %vm12186_vm3, %v660_v3, %v961_v21  ;;  %v12295_v41 = vrot.slane %v672_v19, 4  ;;  %v12297_v43 = vrot.slane %v1133_v4, 5  ;;  %s15718_s2 = sld [smem:[#allocation13_spill]] }
  0x2e   : > { %v676_v40 = vsel %vm12250_vm11, %v668_v18, %v675_v27  ;;  %956 = vst [vmem:[#allocation2 + $0x14] sm:$0x1] %v955_v17  ;;  %963 = vst [vmem:[#allocation2 + $0x20] sm:$0x1] %v962_v34  ;;  %v599_v44 = vunpack.c.l.u8.bf16 %v12269_v26  ;;  %v600_v49 = vunpack.c.l.u8.bf16 %v12276_v31  ;;  %v1130_v58 = vor.u32 %v12279_v33, %v12273_v30 }
  0x2f   : > { %967 = vst.msk [vmem:[#allocation2 + $0x28] sm:$0xf] %vm471_vm0, %v676_v40  ;;  %v1120_v52 = vor.u32 %v1119_v32, %v1116_v29  ;;  %v601_v59 = vunpack.c.l.u8.bf16 %v12286_v37  ;;  %v602_v3 = vunpack.c.l.u8.bf16 %v12289_v38  ;;  %v12569_v38 = vld [vmem:[%s12215_s24 + $0x1e] sm:$0x3]  ;;  %vm15670_vm15 = vcmask 23552  }
  0x30   : > { %v1676_v35 = vld [vmem:[#allocation2 + $0xc] sm:$0xf]  ;;  %v12291_v39 = vld [vmem:[#allocation2 + $0x10] sm:$0xf]  ;;  %v1131_v32 = vrot.slane %v1130_v58, 4  ;;  %vm15669_vm1 = vcmask 48128  }
  0x31   : > { %v1738_v45 = vshrl.u32 %v12291_v39, 16  ;;  %v10427_v46 = vcombine.low %v1676_v35, %v12291_v39  ;;  %v1725_v47 = vshrl.u32 %v1676_v35, 16  ;;  %v1498_v48 = vld [vmem:[#allocation2 + $0xc] sm:$0xe]  ;;  %v1734_v50 = vshll.u32 %v12291_v39, 16 }
  0x32   : > { %v1728_v51 = vshll.u32 %v1676_v35, 16  ;;  %v10332_v53 = vrot.slane %v1498_v48, 9  ;;  %v1678_v56 = vld [vmem:[#allocation2 + $0x18] sm:$0xf]  ;;  %v12310_v57 = vld [vmem:[#allocation2 + $0x1c] sm:$0xf] }
  0x33   : > { %v12305_v54 = vrot.slane %v1738_v45, 4  ;;  %3181 = vrot.lane.b32.xlu0 %v10427_v46, %s15648_s15  ;;  %v12308_v55 = vrot.slane %v1725_v47, 4  ;;  %v10428_v61 = vcombine.low %v1678_v56, %v12310_v57  ;;  %v1749_v62 = vshrl.u32 %v1678_v56, 16  ;;  %v2285_v63 = vld [vmem:[#allocation2 + $0x18] sm:$0xf] }
  0x34   : > { %v12315_v60 = vrot.slane %v1728_v51, 5  ;;  %v12318_v2 = vld [vmem:[#allocation2 + $0x10] sm:$0xf]  ;;  %v1752_v4 = vshll.u32 %v1678_v56, 16  ;;  %v12321_v5 = vld [vmem:[#allocation2 + $0x1c] sm:$0xf]  ;;  %v1136_v46 = vsel %vm12325_vm14, %v1131_v32, %v12297_v43 }
  0x35   : > { %v2334_v6 = vshrl.u32 %v2285_v63, 16  ;;  %v2337_v7 = vshll.u32 %v2285_v63, 16  ;;  %v1121_v10 = vrot.slane %v1120_v52, 4  ;;  %v1762_v12 = vshrl.u32 %v12310_v57, 16  ;;  %3183 = vrot.lane.b32.xlu1 %v10428_v61, %s15648_s15  ;;  %v2287_v15 = vld [vmem:[#allocation2 + $0x24] sm:$0xf] }
  0x36   : > { %v1731_v11 = vor.u32 %v12315_v60, %v12308_v55  ;;  %v1751_v13 = vrot.slane %v1749_v62, 4  ;;  %v10475_v14 = vcombine.low %v2285_v63, %v12321_v5  ;;  %v2108_v16 = vld [vmem:[#allocation2 + $0xc] sm:$0xe]  ;;  %v1754_v18 = vrot.slane %v1752_v4, 5  ;;  %v12337_v22 = vld [vmem:[#allocation2 + $0x14] sm:$0x1] }
  0x37   : > { %v12334_v19 = vrot.slane %v2334_v6, 4  ;;  %v2347_v20 = vshrl.u32 %v12321_v5, 16  ;;  %v2358_v21 = vshrl.u32 %v2287_v15, 16  ;;  %v2109_v24 = vld [vmem:[#allocation2 + $0x18] sm:$0xe]  ;;  %v12339_v25 = vrot.slane %v2337_v7, 5 }
  0x38   : > { %3437 = vrot.lane.b32.xlu0 %v10475_v14, %s15646_s16  ;;  %v12342_v27 = vld [vmem:[#allocation2 + $0x28] sm:$0xf]  ;;  %v2361_v28 = vshll.u32 %v2287_v15, 16  ;;  %v1126_v29 = vsel %vm12325_vm14, %v1121_v10, %v12273_v30  ;;  %v1573_v35 = vrot.slane %v12318_v2, 5  ;;  %v12352_v40 = vld [vmem:[#allocation2 + $0x14] sm:$0x1]  ;;  %v1755_v32 = vor.u32 %v1754_v18, %v1751_v13 }
  0x39   : > { %v12347_v33 = vrot.slane %v2358_v21, 4  ;;  %v2371_v17 = vshrl.u32 %v12342_v27, 16  ;;  %v10476_v34 = vcombine.low %v2287_v15, %v12342_v27  ;;  %v1576_v47 = vrot.slane %v12337_v22, 5  ;;  %v1709_v48 = vld [vmem:[#allocation2 + $0x20] sm:$0x1] }
  0x3a   : > { %v12354_v45 = vrot.slane %v2361_v28, 5  ;;  %v10347_v30 = vrot.slane %v2108_v16, 9  ;;  %v10395_v51 = vcombine.low %v1126_v29, %v1136_v46  ;;  %v1574_v52 = vsel %vm12230_vm9, %v10332_v53, %v1573_v35  ;;  %v2717_v61 = vld [vmem:[#allocation2 + $0x18] sm:$0xe]  ;;  %v12366_v6 = vld [vmem:[#allocation2 + $0x20] sm:$0x1] }
  0x3b   : > { %3439 = vrot.lane.b32.xlu1 %v10476_v34, %s15646_s16  ;;  %v1575_v56 = vrot.slane %v1573_v35, 4  ;;  %v2174_v58 = vrot.slane %v12291_v39, 5  ;;  %v2177_v62 = vrot.slane %v12352_v40, 5  ;;  %v10348_v63 = vrot.slane %v2109_v24, 9  ;;  %v548_v35 = vld [vmem:[#allocation2 + $0x2c] sm:$0x1] }
  0x3c   : > { %v2181_v4 = vrot.slane %v12310_v57, 5  ;;  %v2184_v43 = vrot.slane %v1709_v48, 5  ;;  %3005 = vrot.lane.b32.xlu0 %v10395_v51, %s15660_s20  ;;  %v10363_v14 = vrot.slane %v2717_v61, 9  ;;  %v2783_v24 = vrot.slane %v12321_v5, 5  ;;  %v2718_v46 = vld [vmem:[#allocation2 + $0x24] sm:$0xe] }
  0x3d   : > { %v1577_v7 = vsel %vm12230_vm9, %v1575_v56, %v1576_v47  ;;  %v2175_v53 = vsel %vm12230_vm9, %v10347_v30, %v2174_v58  ;;  %v2176_v10 = vrot.slane %v2174_v58, 4  ;;  %v2786_v29 = vrot.slane %v12366_v6, 5  ;;  %s15652_s16 = smov 21  }
  0x3e   : > { %v10412_v15 = vcombine.low %v1574_v52, %v1577_v7  ;;  %v2182_v16 = vsel %vm12230_vm9, %v10348_v63, %v2181_v4  ;;  %v2183_v21 = vrot.slane %v2181_v4, 4  ;;  %v1758_v34 = vshll.u32 %v12310_v57, 16 }
  0x3f   : > { %v2178_v28 = vsel %vm12230_vm9, %v2176_v10, %v2177_v62  ;;  %v2784_v51 = vsel %vm12230_vm9, %v10363_v14, %v2783_v24  ;;  %v2785_v52 = vrot.slane %v2783_v24, 4  ;;  %v1756_v58 = vrot.slane %v1755_v32, 4 }
  0x40   : > { %3087 = vrot.lane.b32.xlu1 %v10412_v15, %s15656_s30  ;;  %v10459_v47 = vcombine.low %v2175_v53, %v2178_v28  ;;  %v2185_v30 = vsel %vm12230_vm9, %v2183_v21, %v2184_v43  ;;  %v1760_v61 = vrot.slane %v1758_v34, 5  ;;  %v1764_v13 = vrot.slane %v1762_v12, 4  ;;  %v1064_v43 = vld [vmem:[#allocation2 + $0xc] sm:$0xf]  ;;  %v12418_v34 = vld [vmem:[#allocation2 + $0x1c] sm:$0xf] }
  0x41   : > { %v10460_v56 = vcombine.low %v2182_v16, %v2185_v30  ;;  %v2787_v18 = vsel %vm12230_vm9, %v2785_v52, %v2786_v29  ;;  %v1768_v62 = vshll.u32 %v1709_v48, 16  ;;  %v549_v63 = vsel %vm12208_vm5, 0, %v548_v35 }
  0x42   : > { %3341 = vrot.lane.b32.xlu0 %v10459_v47, %s15650_s21  ;;  %v10364_v4 = vrot.slane %v2718_v46, 9  ;;  %v12395_v7 = vrot.slane %v1731_v11, 4  ;;  %v10507_v53 = vcombine.low %v2784_v51, %v2787_v18  ;;  %v1765_v57 = vor.u32 %v1764_v13, %v1760_v61  ;;  %550 = vst [vmem:[#allocation2 + $0x2c] sm:$0x1] %v549_v63 }
  0x43   : > { %v2790_v12 = vrot.slane %v12342_v27, 5  ;;  %v1770_v10 = vrot.slane %v1768_v62, 5  ;;  %v2364_v48 = vor.u32 %v12354_v45, %v12347_v33  ;;  %v2367_v14 = vshll.u32 %v12342_v27, 16 }
  0x44   : > { %3343 = vrot.lane.b32.xlu1 %v10460_v56, %s15650_s21  ;;  %v2373_v15 = vrot.slane %v2371_v17, 4  ;;  %v1761_v16 = vsel %vm12325_vm14, %v1756_v58, %v1760_v61  ;;  %v1766_v55 = vrot.slane %v1765_v57, 4  ;;  %v1138_v11 = vshrl.u32 %v1064_v43, 16  ;;  %v1066_v17 = vld [vmem:[#allocation2 + $0x18] sm:$0xf] }
  0x45   : > { %v12406_v60 = vsel %vm12230_vm9, %v10364_v4, %v2790_v12  ;;  %v12409_v21 = vrot.slane %v2790_v12, 4  ;;  %v12411_v24 = vrot.slane %v2367_v14, 5  ;;  %v1141_v33 = vshll.u32 %v1064_v43, 16  ;;  %v12423_v58 = vld [vmem:[#allocation2 + $0x20] sm:$0x1] }
  0x46   : > { %3597 = vrot.lane.b32.xlu0 %v10507_v53, %s15663_s22  ;;  %v1147_v27 = vshll.u32 %v12318_v2, 16  ;;  %v1771_v45 = vsel %vm12325_vm14, %v1766_v55, %v1770_v10  ;;  %v1140_v28 = vrot.slane %v1138_v11, 4  ;;  %v1151_v29 = vshrl.u32 %v12318_v2, 16  ;;  %v1068_v57 = vld [vmem:[#allocation2 + $0x24] sm:$0xf] }
  0x47   : > { %v1157_v32 = vshll.u32 %v12337_v22, 16  ;;  %v10444_v35 = vcombine.low %v1761_v16, %v1771_v45  ;;  %v12420_v46 = vrot.slane %v2364_v48, 4  ;;  %v2374_v47 = vor.u32 %v2373_v15, %v12411_v24 }
  0x48   : > { %v1143_v30 = vrot.slane %v1141_v33, 5  ;;  %v1149_v51 = vrot.slane %v1147_v27, 5  ;;  %v1153_v52 = vrot.slane %v1151_v29, 4  ;;  %v1162_v61 = vshrl.u32 %v1066_v17, 16  ;;  %v12437_v33 = vld [vmem:[#allocation2 + $0x28] sm:$0xf] }
  0x49   : > { %v1159_v56 = vrot.slane %v1157_v32, 5  ;;  %3263 = vrot.lane.b32.xlu1 %v10444_v35, %s15654_s23  ;;  %v968_v2 = vld [vmem:[#allocation2 + $0x2c] sm:$0x1]  ;;  %v12426_v13 = vrot.slane %v2374_v47, 4  ;;  %v1165_v18 = vshll.u32 %v1066_v17, 16  ;;  %v1171_v62 = vshll.u32 %v12418_v34, 16 }
  0x4a   : > { %v1144_v22 = vor.u32 %v1143_v30, %v1140_v28  ;;  %v969_v63 = vsel %vm12186_vm3, %v12295_v41, %v968_v2  ;;  %v1154_v4 = vor.u32 %v1153_v52, %v1149_v51  ;;  %v1164_v43 = vrot.slane %v1162_v61, 4 }
  0x4b   : > { %v1175_v53 = vshrl.u32 %v12418_v34, 16  ;;  %970 = vst [vmem:[#allocation2 + $0x2c] sm:$0x1] %v969_v63  ;;  %v1167_v10 = vrot.slane %v1165_v18, 5  ;;  %v1173_v48 = vrot.slane %v1171_v62, 5  ;;  %v1181_v14 = vshll.u32 %v12423_v58, 16 }
  0x4c   : > { %v1145_v12 = vrot.slane %v1144_v22, 4  ;;  %v1155_v15 = vrot.slane %v1154_v4, 4  ;;  %v1736_v55 = vrot.slane %v1734_v50, 5  ;;  %v1744_v11 = vshll.u32 %v12352_v40, 16 }
  0x4d   : > { %v1177_v16 = vrot.slane %v1175_v53, 4  ;;  %v2370_v41 = vsel %vm12325_vm14, %v12420_v46, %v12411_v24  ;;  %v1168_v27 = vor.u32 %v1167_v10, %v1164_v43  ;;  %v1183_v17 = vrot.slane %v1181_v14, 5 }
  0x4e   : > { %v1186_v45 = vshrl.u32 %v1068_v57, 16  ;;  %v1150_v28 = vsel %vm12325_vm14, %v1145_v12, %v1149_v51  ;;  %v1160_v29 = vsel %vm12325_vm14, %v1155_v15, %v1159_v56  ;;  %v1741_v50 = vor.u32 %v12305_v54, %v1736_v55  ;;  %v1500_v12 = vld [vmem:[#allocation2 + $0x24] sm:$0xe] }
  0x4f   : > { %v1178_v39 = vor.u32 %v1177_v16, %v1173_v48  ;;  %v1169_v40 = vrot.slane %v1168_v27, 4  ;;  %v1737_v32 = vsel %vm12325_vm14, %v12395_v7, %v1736_v55  ;;  %v1746_v35 = vrot.slane %v1744_v11, 5 }
  0x50   : > { %v1188_v47 = vrot.slane %v1186_v45, 4  ;;  %v1742_v46 = vrot.slane %v1741_v50, 4  ;;  %v1189_v30 = vshll.u32 %v1068_v57, 16  ;;  %v1195_v52 = vshll.u32 %v12437_v33, 16 }
  0x51   : > { %v1179_v24 = vrot.slane %v1178_v39, 4  ;;  %v10396_v61 = vcombine.low %v1150_v28, %v1160_v29  ;;  %v1174_v51 = vsel %vm12325_vm14, %v1169_v40, %v1173_v48  ;;  %v1199_v56 = vshrl.u32 %v12437_v33, 16 }
  0x52   : > { %v2343_v54 = vshll.u32 %v12321_v5, 16  ;;  %v2318_v2 = vld [vmem:[#allocation2 + $0x2c] sm:$0x1]  ;;  %v1747_v7 = vsel %vm12325_vm14, %v1742_v46, %v1746_v35  ;;  %v1191_v62 = vrot.slane %v1189_v30, 5  ;;  %v1197_v63 = vrot.slane %v1195_v52, 5 }
  0x53   : > { %v1184_v22 = vsel %vm12325_vm14, %v1179_v24, %v1183_v17  ;;  %v1097_v18 = vld [vmem:[#allocation2 + $0x2c] sm:$0x1]  ;;  %v2793_v4 = vrot.slane %v2318_v2, 5  ;;  %v2377_v43 = vshll.u32 %v2318_v2, 16  ;;  %v2340_v57 = vor.u32 %v12339_v25, %v12334_v19  ;;  %v1499_v17 = vld [vmem:[#allocation2 + $0x18] sm:$0xe] }
  0x54   : > { %v10397_v53 = vcombine.low %v1174_v51, %v1184_v22  ;;  %v10443_v10 = vcombine.low %v1737_v32, %v1747_v7  ;;  %v1192_v48 = vor.u32 %v1191_v62, %v1188_v47  ;;  %v1201_v14 = vrot.slane %v1199_v56, 4  ;;  %v12476_v30 = vld [vmem:[#allocation2 + $0x24] sm:$0xf]  ;;  %v12487_v2 = vld [vmem:[#allocation2 + $0x28] sm:$0xf] }
  0x55   : > { %v1205_v15 = vshll.u32 %v1097_v18, 16  ;;  %v2794_v16 = vsel %vm12230_vm9, %v12409_v21, %v2793_v4  ;;  %v2379_v55 = vrot.slane %v2377_v43, 5  ;;  %v2345_v11 = vrot.slane %v2343_v54, 5  ;;  %v551_v22 = vld [vmem:[#allocation2 + $0x38] sm:$0x1] }
  0x56   : > { %v2349_v27 = vrot.slane %v2347_v20, 4  ;;  %v10508_v45 = vcombine.low %v12406_v60, %v2794_v16  ;;  %v1193_v28 = vrot.slane %v1192_v48, 4  ;;  %v1202_v29 = vor.u32 %v1201_v14, %v1197_v63  ;;  %v495_v60 = vld [vmem:[#allocation2 + $0x30] sm:$0x1]  ;;  %v1710_v43 = vld [vmem:[#allocation2 + $0x2c] sm:$0x1] }
  0x57   : > { %v1207_v19 = vrot.slane %v1205_v15, 5  ;;  %v2380_v25 = vsel %vm12325_vm14, %v12426_v13, %v2379_v55  ;;  %v2341_v39 = vrot.slane %v2340_v57, 4  ;;  %v2353_v40 = vshll.u32 %v12366_v6, 16  ;;  %v2110_v15 = vld [vmem:[#allocation2 + $0x24] sm:$0xe] }
  0x58   : > { %v2350_v50 = vor.u32 %v2349_v27, %v2345_v11  ;;  %3599 = vrot.lane.b32.xlu0 %v10508_v45, %s15663_s22  ;;  %v10492_v21 = vcombine.low %v2370_v41, %v2380_v25  ;;  %v1198_v5 = vsel %vm12325_vm14, %v1193_v28, %v1197_v63  ;;  %v1203_v20 = vrot.slane %v1202_v29, 4 }
  0x59   : > { %v10334_v32 = vrot.slane %v1500_v12, 9  ;;  %v2355_v47 = vrot.slane %v2353_v40, 5  ;;  %v1587_v24 = vrot.slane %v12437_v33, 5  ;;  %v1590_v46 = vrot.slane %v1097_v18, 5 }
  0x5a   : > { %v2351_v35 = vrot.slane %v2350_v50, 4  ;;  %3519 = vrot.lane.b32.xlu1 %v10492_v21, %s15652_s16  ;;  %v1208_v6 = vsel %vm12325_vm14, %v1203_v20, %v1207_v19  ;;  %v10333_v13 = vrot.slane %v1499_v17, 9  ;;  %v1580_v41 = vrot.slane %v12418_v34, 5  ;;  %v554_v50 = vld [vmem:[#allocation2 + $0x44] sm:$0x1] }
  0x5b   : > { %v1583_v52 = vrot.slane %v12423_v58, 5  ;;  %v10398_v51 = vcombine.low %v1198_v5, %v1208_v6  ;;  %v2346_v56 = vsel %vm12325_vm14, %v2341_v39, %v2345_v11  ;;  %v1589_v54 = vrot.slane %v1587_v24, 4  ;;  %v498_v11 = vld [vmem:[#allocation2 + $0x3c] sm:$0x1] }
  0x5c   : > { %v2356_v33 = vsel %vm12325_vm14, %v2351_v35, %v2355_v47  ;;  %3007 = vrot.lane.b32.xlu0 %v10396_v61, %s15660_s20  ;;  %v1588_v7 = vsel %vm12230_vm9, %v10334_v32, %v1587_v24  ;;  %v12494_v34 = vsel %vm12230_vm9, %v10333_v13, %v1580_v41  ;;  %v1582_v58 = vrot.slane %v1580_v41, 4 }
  0x5d   : > { %v496_v18 = vsel %vm12186_vm3, 0, %v495_v60  ;;  %v1591_v62 = vsel %vm12230_vm9, %v1589_v54, %v1590_v46  ;;  %v679_v63 = vshrl.u32 %v599_v44, 16  ;;  %v682_v61 = vshll.u32 %v599_v44, 16  ;;  %v501_v46 = vld [vmem:[#allocation2 + $0x48] sm:$0x1] }
  0x5e   : > { %497 = vst [vmem:[#allocation2 + $0x30] sm:$0x1] %v496_v18  ;;  %v687_v4 = vshrl.u32 %v600_v49, 16  ;;  %3009 = vrot.lane.b32.xlu1 %v10397_v53, %s15660_s20  ;;  %v10491_v57 = vcombine.low %v2346_v56, %v2356_v33  ;;  %v1584_v12 = vsel %vm12230_vm9, %v1582_v58, %v1583_v52  ;;  %v690_v48 = vshll.u32 %v600_v49, 16 }
  0x5f   : > { %v1773_v14 = vshrl.u32 %v12476_v30, 16  ;;  %v10414_v16 = vcombine.low %v1588_v7, %v1591_v62  ;;  %v681_v55 = vrot.slane %v679_v63, 7  ;;  %v1776_v44 = vshll.u32 %v12476_v30, 16  ;;  %v12544_v7 = vld [vmem:[%s12215_s24 + $0x16] sm:$0x3] }
  0x60   : > { %v689_v26 = vrot.slane %v687_v4, 7  ;;  %3261 = vrot.lane.b32.xlu0 %v10443_v10, %s15654_s23  ;;  %v10413_v53 = vcombine.low %v12494_v34, %v1584_v12  ;;  %v1786_v17 = vshrl.u32 %v12487_v2, 16  ;;  %v552_v31 = vsel %vm12208_vm5, 0, %v551_v22  ;;  %v12547_v34 = vld [vmem:[%s12215_s24 + $0x18] sm:$0x3] }
  0x61   : > { %v1775_v27 = vrot.slane %v1773_v14, 4  ;;  %v684_v49 = vor.u32 %v682_v61, %v681_v55  ;;  %v685_v45 = vrot.slane %v681_v55, 4  ;;  %553 = vst [vmem:[#allocation2 + $0x38] sm:$0x1] %v552_v31  ;;  %v1778_v19 = vrot.slane %v1776_v44, 5 }
  0x62   : > { %v692_v28 = vor.u32 %v690_v48, %v689_v26  ;;  %v694_v29 = vrot.slane %v689_v26, 4  ;;  %3011 = vrot.lane.b32.xlu1 %v10398_v51, %s15660_s20  ;;  %v1782_v25 = vshll.u32 %v12487_v2, 16  ;;  %v1788_v39 = vrot.slane %v1786_v17, 4  ;;  %v12536_v51 = vld [vmem:[%s12215_s24 + $0x14] sm:$0x3] }
  0x63   : > { %v1792_v10 = vshll.u32 %v1710_v43, 16  ;;  %v10349_v21 = vrot.slane %v2110_v15, 9  ;;  %v2188_v5 = vrot.slane %v12487_v2, 5  ;;  %v2191_v20 = vrot.slane %v1710_v43, 5  ;;  %v12566_v12 = vld [vmem:[%s12215_s24 + $0x1c] sm:$0x3] }
  0x64   : > { %v693_v40 = vsel %vm12250_vm11, %v685_v45, %v692_v28  ;;  %3517 = vrot.lane.b32.xlu0 %v10491_v57, %s15652_s16  ;;  %v1779_v60 = vor.u32 %v1778_v19, %v1775_v27  ;;  %v1784_v35 = vrot.slane %v1782_v25, 5  ;;  %v499_v24 = vsel %vm12186_vm3, 0, %v498_v11  ;;  %v12563_v57 = vld [vmem:[%s12215_s24 + $0x1a] sm:$0x3] }
  0x65   : > { %v971_v32 = vld [vmem:[#allocation2 + $0x30] sm:$0xf]  ;;  %974 = vst.msk [vmem:[#allocation2 + $0x34] sm:$0xf] %vm471_vm0, %v693_v40  ;;  %v1794_v47 = vrot.slane %v1792_v10, 5  ;;  %v12531_v13 = vsel %vm12230_vm9, %v10349_v21, %v2188_v5  ;;  %v2190_v41 = vrot.slane %v2188_v5, 4  ;;  %v603_v55 = vunpack.c.l.u8.bf16 %v12536_v51 }
  0x66   : > { %v972_v6 = vsel %vm12241_vm10, %v684_v49, %v971_v32  ;;  %500 = vst [vmem:[#allocation2 + $0x3c] sm:$0x1] %v499_v24  ;;  %v696_v52 = vshrl.u32 %v601_v59, 16  ;;  %3091 = vrot.lane.b32.xlu1 %v10414_v16, %s15656_s30  ;;  %v1780_v56 = vrot.slane %v1779_v60, 4  ;;  %v1789_v33 = vor.u32 %v1788_v39, %v1784_v35 }
  0x67   : > { %973 = vst [vmem:[#allocation2 + $0x30] sm:$0xf] %v972_v6  ;;  %v699_v54 = vshll.u32 %v601_v59, 16  ;;  %v704_v22 = vshrl.u32 %v602_v3, 16  ;;  %v12551_v58 = vsel %vm12230_vm9, %v2190_v41, %v2191_v20  ;;  %v707_v62 = vshll.u32 %v602_v3, 16 }
  0x68   : > { %v698_v18 = vrot.slane %v696_v52, 7  ;;  %v555_v37 = vsel %vm12208_vm5, 0, %v554_v50  ;;  %3089 = vrot.lane.b32.xlu0 %v10413_v53, %s15656_s30  ;;  %v10429_v59 = vcombine.low %v12476_v30, %v12487_v2  ;;  %v975_v63 = vld [vmem:[#allocation2 + $0x38] sm:$0x1]  ;;  %v1785_v61 = vsel %vm12325_vm14, %v1780_v56, %v1784_v35 }
  0x69   : > { %v1790_v4 = vrot.slane %v1789_v33, 4  ;;  %v706_v43 = vrot.slane %v704_v22, 7  ;;  %556 = vst [vmem:[#allocation2 + $0x44] sm:$0x1] %v555_v37  ;;  %v976_v3 = vsel %vm12186_vm3, %v694_v29, %v975_v63  ;;  %v502_v30 = vsel %vm12186_vm3, 0, %v501_v46 }
  0x6a   : > { %v701_v48 = vor.u32 %v699_v54, %v698_v18  ;;  %v702_v14 = vrot.slane %v698_v18, 4  ;;  %977 = vst [vmem:[#allocation2 + $0x38] sm:$0x1] %v976_v3  ;;  %v10461_v15 = vcombine.low %v12531_v13, %v12551_v58  ;;  %503 = vst [vmem:[#allocation2 + $0x48] sm:$0x1] %v502_v30  ;;  %v604_v27 = vunpack.c.l.u8.bf16 %v12544_v7 }
  0x6b   : > { %v1795_v2 = vsel %vm12325_vm14, %v1790_v4, %v1794_v47  ;;  %v709_v16 = vor.u32 %v707_v62, %v706_v43  ;;  %v711_v11 = vrot.slane %v706_v43, 4  ;;  %v605_v17 = vunpack.c.l.u8.bf16 %v12547_v34 }
  0x6c   : > { %v1683_v26 = vld [vmem:[#allocation2 + $0x34] sm:$0xf]  ;;  %v10445_v44 = vcombine.low %v1785_v61, %v1795_v2  ;;  %3185 = vrot.lane.b32.xlu0 %v10429_v59, %s15648_s15  ;;  %v606_v50 = vunpack.c.l.u8.bf16 %v12563_v57  ;;  %v607_v40 = vunpack.c.l.u8.bf16 %v12566_v12  ;;  %v608_v21 = vunpack.c.l.u8.bf16 %v12569_v38 }
  0x6d   : > { %v12580_v53 = vld [vmem:[#allocation2 + $0x34] sm:$0xf]  ;;  %v1810_v31 = vshrl.u32 %v1683_v26, 16  ;;  %v1806_v49 = vshll.u32 %v1683_v26, 16  ;;  %v2195_v45 = vrot.slane %v1683_v26, 5  ;;  %v710_v28 = vsel %vm12250_vm11, %v702_v14, %v709_v16 }
  0x6e   : > { %v978_v29 = vld [vmem:[#allocation2 + $0x3c] sm:$0xf]  ;;  %v1682_v19 = vld [vmem:[#allocation2 + $0x30] sm:$0xf]  ;;  %981 = vst.msk [vmem:[#allocation2 + $0x40] sm:$0xf] %vm471_vm0, %v710_v28 }
  0x6f   : > { %v2111_v25 = vld [vmem:[#allocation2 + $0x30] sm:$0xe]  ;;  %v979_v39 = vsel %vm12241_vm10, %v701_v48, %v978_v29  ;;  %v1797_v5 = vshrl.u32 %v1682_v19, 16  ;;  %v1800_v20 = vshll.u32 %v1682_v19, 16  ;;  %v10430_v32 = vcombine.low %v1682_v19, %v1683_v26 }
  0x70   : > { %v2289_v10 = vld [vmem:[#allocation2 + $0x30] sm:$0xf]  ;;  %v1808_v60 = vrot.slane %v1806_v49, 5  ;;  %980 = vst [vmem:[#allocation2 + $0x3c] sm:$0xf] %v979_v39  ;;  %v1812_v35 = vrot.slane %v1810_v31, 4  ;;  %3265 = vrot.lane.b32.xlu0 %v10445_v44, %s15654_s23 }
  0x71   : > { %v10350_v47 = vrot.slane %v2111_v25, 9  ;;  %v2197_v24 = vrot.slane %v2195_v45, 4  ;;  %v2382_v46 = vshrl.u32 %v2289_v10, 16  ;;  %v1799_v6 = vrot.slane %v1797_v5, 4  ;;  %3187 = vrot.lane.b32.xlu1 %v10430_v32, %s15648_s15  ;;  %v982_v56 = vld [vmem:[#allocation2 + $0x44] sm:$0x1] }
  0x72   : > { %v1802_v13 = vrot.slane %v1800_v20, 5  ;;  %v2385_v41 = vshll.u32 %v2289_v10, 16  ;;  %v2395_v52 = vshrl.u32 %v12580_v53, 16  ;;  %v1711_v33 = vld [vmem:[#allocation2 + $0x38] sm:$0x1]  ;;  %v1813_v54 = vor.u32 %v1812_v35, %v1808_v60  ;;  %s15699_s15 = smov 18  }
  0x73   : > { %v2196_v22 = vsel %vm12230_vm9, %v10350_v47, %v2195_v45  ;;  %v2384_v58 = vrot.slane %v2382_v46, 4  ;;  %v10477_v18 = vcombine.low %v2289_v10, %v12580_v53  ;;  %v1816_v37 = vshll.u32 %v1711_v33, 16  ;;  %v1070_v25 = vld [vmem:[#allocation2 + $0x30] sm:$0xf]  ;;  %v12616_v32 = vld [vmem:[#allocation2 + $0x34] sm:$0xf] }
  0x74   : > { %v1803_v62 = vor.u32 %v1802_v13, %v1799_v6  ;;  %v2198_v59 = vrot.slane %v1711_v33, 5  ;;  %v2387_v63 = vrot.slane %v2385_v41, 5  ;;  %v1814_v61 = vrot.slane %v1813_v54, 4  ;;  %3345 = vrot.lane.b32.xlu0 %v10461_v15, %s15650_s21  ;;  %v12613_v15 = vld [vmem:[#allocation2 + $0x38] sm:$0x1] }
  0x75   : > { %v983_v4 = vsel %vm12186_vm3, %v711_v11, %v982_v56  ;;  %v2391_v43 = vshll.u32 %v12580_v53, 16  ;;  %v2397_v3 = vrot.slane %v2395_v52, 4  ;;  %v1818_v14 = vrot.slane %v1816_v37, 5  ;;  %v12605_v2 = vld [vmem:[#allocation2 + $0x40] sm:$0xf] }
  0x76   : > { %v1804_v48 = vrot.slane %v1803_v62, 4  ;;  %v2199_v30 = vsel %vm12230_vm9, %v2197_v24, %v2198_v59  ;;  %984 = vst [vmem:[#allocation2 + $0x44] sm:$0x1] %v983_v4  ;;  %v2388_v16 = vor.u32 %v2387_v63, %v2384_v58  ;;  %v2419_v31 = vshrl.u32 %v12605_v2, 16  ;;  %v12623_v54 = vld [vmem:[#allocation2 + $0x38] sm:$0x1] }
  0x77   : > { %v10462_v26 = vcombine.low %v2196_v22, %v2199_v30  ;;  %v2291_v44 = vld [vmem:[#allocation2 + $0x3c] sm:$0xf]  ;;  %v2415_v11 = vshll.u32 %v12605_v2, 16  ;;  %v2393_v49 = vrot.slane %v2391_v43, 5  ;;  %v1819_v28 = vsel %vm12325_vm14, %v1814_v61, %v1818_v14  ;;  %v2719_v58 = vld [vmem:[#allocation2 + $0x30] sm:$0xe] }
  0x78   : > { %v1809_v45 = vsel %vm12325_vm14, %v1804_v48, %v1808_v60  ;;  %v2406_v29 = vshrl.u32 %v2291_v44, 16  ;;  %v2409_v19 = vshll.u32 %v2291_v44, 16  ;;  %v10478_v10 = vcombine.low %v2291_v44, %v12605_v2  ;;  %3441 = vrot.lane.b32.xlu0 %v10477_v18, %s15699_s15  ;;  %v1072_v44 = vld [vmem:[#allocation2 + $0x3c] sm:$0xf] }
  0x79   : > { %v10446_v39 = vcombine.low %v1809_v45, %v1819_v28  ;;  %v2417_v5 = vrot.slane %v2415_v11, 5  ;;  %v2421_v20 = vrot.slane %v2419_v31, 4  ;;  %v2389_v60 = vrot.slane %v2388_v16, 4  ;;  %v1073_v31 = vld [vmem:[#allocation2 + $0x40] sm:$0xf] }
  0x7a   : > { %v2408_v35 = vrot.slane %v2406_v29, 4  ;;  %v2411_v47 = vrot.slane %v2409_v19, 5  ;;  %v2398_v24 = vor.u32 %v2397_v3, %v2393_v49  ;;  %v2401_v6 = vshll.u32 %v12613_v15, 16  ;;  %v2720_v19 = vld [vmem:[#allocation2 + $0x3c] sm:$0xe] }
  0x7b   : > { %3267 = vrot.lane.b32.xlu1 %v10446_v39, %s15654_s23  ;;  %v2422_v46 = vor.u32 %v2421_v20, %v2417_v5  ;;  %v1210_v13 = vshrl.u32 %v1070_v25, 16  ;;  %v1213_v41 = vshll.u32 %v1070_v25, 16  ;;  %v2394_v56 = vsel %vm12325_vm14, %v2389_v60, %v2393_v49 }
  0x7c   : > { %v2412_v52 = vor.u32 %v2411_v47, %v2408_v35  ;;  %v2399_v33 = vrot.slane %v2398_v24, 4  ;;  %v1219_v22 = vshll.u32 %v12616_v32, 16  ;;  %v2403_v37 = vrot.slane %v2401_v6, 5 }
  0x7d   : > { %v12626_v18 = vld [vmem:[#allocation2 + $0x44] sm:$0x1]  ;;  %v2423_v62 = vrot.slane %v2422_v46, 4  ;;  %v1212_v59 = vrot.slane %v1210_v13, 4  ;;  %v1215_v63 = vrot.slane %v1213_v41, 5  ;;  %v1223_v3 = vshrl.u32 %v12616_v32, 16 }
  0x7e   : > { %v2413_v61 = vrot.slane %v2412_v52, 4  ;;  %v2425_v4 = vshll.u32 %v12626_v18, 16  ;;  %v1221_v43 = vrot.slane %v1219_v22, 5  ;;  %v2404_v48 = vsel %vm12325_vm14, %v2399_v33, %v2403_v37  ;;  %v1099_v29 = vld [vmem:[#allocation2 + $0x44] sm:$0x1] }
  0x7f   : > { %3347 = vrot.lane.b32.xlu1 %v10462_v26, %s15650_s21  ;;  %v1216_v14 = vor.u32 %v1215_v63, %v1212_v59  ;;  %v1229_v30 = vshll.u32 %v12623_v54, 16  ;;  %v10365_v16 = vrot.slane %v2719_v58, 9  ;;  %v10493_v45 = vcombine.low %v2394_v56, %v2404_v48  ;;  %v1502_v13 = vld [vmem:[#allocation2 + $0x3c] sm:$0xe]  ;;  %s15702_s21 = smov 15  }
  0x80   : > { %v2418_v11 = vsel %vm12325_vm14, %v2413_v61, %v2417_v5  ;;  %v2427_v49 = vrot.slane %v2425_v4, 5  ;;  %v1225_v28 = vrot.slane %v1223_v3, 4  ;;  %v2797_v26 = vrot.slane %v12580_v53, 5 }
  0x81   : > { %v1217_v25 = vrot.slane %v1216_v14, 4  ;;  %v1231_v39 = vrot.slane %v1229_v30, 5  ;;  %v2800_v20 = vrot.slane %v12613_v15, 5  ;;  %3521 = vrot.lane.b32.xlu0 %v10493_v45, %s15652_s16  ;;  %v1234_v60 = vshrl.u32 %v1072_v44, 16 }
  0x82   : > { %v2428_v35 = vsel %vm12325_vm14, %v2423_v62, %v2427_v49  ;;  %v1226_v47 = vor.u32 %v1225_v28, %v1221_v43  ;;  %v1237_v24 = vshll.u32 %v1072_v44, 16  ;;  %v2798_v6 = vsel %vm12230_vm9, %v10365_v16, %v2797_v26 }
  0x83   : > { %3443 = vrot.lane.b32.xlu1 %v10478_v10, %s15699_s15  ;;  %v10494_v5 = vcombine.low %v2418_v11, %v2428_v35  ;;  %v1222_v46 = vsel %vm12325_vm14, %v1217_v25, %v1221_v43  ;;  %v2799_v53 = vrot.slane %v2797_v26, 4  ;;  %v1236_v41 = vrot.slane %v1234_v60, 4  ;;  %v1501_v10 = vld [vmem:[#allocation2 + $0x30] sm:$0xe]  ;;  %v12663_v26 = vld [vmem:[#allocation2 + $0x3c] sm:$0xf] }
  0x84   : > { %v1227_v15 = vrot.slane %v1226_v47, 4  ;;  %v1239_v52 = vrot.slane %v1237_v24, 5  ;;  %v1243_v56 = vshll.u32 %v1073_v31, 16  ;;  %v1247_v22 = vshrl.u32 %v1073_v31, 16 }
  0x85   : > { %v2801_v33 = vsel %vm12230_vm9, %v2799_v53, %v2800_v20  ;;  %v1253_v58 = vshll.u32 %v1099_v29, 16  ;;  %v10366_v62 = vrot.slane %v2720_v19, 9  ;;  %v2804_v48 = vrot.slane %v12605_v2, 5  ;;  %v11574_v19 = vld [vmem:[%s15700_s1] sm:$0xff]  }
  0x86   : > { %v1232_v37 = vsel %vm12325_vm14, %v1227_v15, %v1231_v39  ;;  %v10509_v59 = vcombine.low %v2798_v6, %v2801_v33  ;;  %v1240_v63 = vor.u32 %v1239_v52, %v1236_v41  ;;  %v1245_v61 = vrot.slane %v1243_v56, 5  ;;  %11440 = vmatprep.subr.bf16.mxu0 %v11574_v19  ;;  %v557_v6 = vld [vmem:[#allocation2 + $0x50] sm:$0x1]  ;;  %v985_v15 = vld [vmem:[#allocation2 + $0x48] sm:$0xf] }
  0x87   : > { %3523 = vrot.lane.b32.xlu1 %v10494_v5, %s15652_s16  ;;  %v10399_v4 = vcombine.low %v1222_v46, %v1232_v37  ;;  %v1249_v43 = vrot.slane %v1247_v22, 4  ;;  %v1255_v3 = vrot.slane %v1253_v58, 5  ;;  %v2807_v30 = vrot.slane %v12626_v18, 5  ;;  %11441 = vmatpush3.bf16.msra.mxu0 %v11574_v19  ;;  %v2112_v33 = vld [vmem:[#allocation2 + $0x3c] sm:$0xe]  ;;  %s15701_s16 = smov 9  }
  0x88   : > { %3601 = vrot.lane.b32.xlu0 %v10509_v59, %s15663_s22  ;;  %v1241_v14 = vrot.slane %v1240_v63, 4  ;;  %v10336_v16 = vrot.slane %v1502_v13, 9  ;;  %v1601_v44 = vrot.slane %v1073_v31, 5  ;;  %v2805_v49 = vsel %vm12230_vm9, %v10366_v62, %v2804_v48  ;;  %v12665_v31 = vld [vmem:[#allocation2 + $0x40] sm:$0xf] }
  0x89   : > { %v1250_v11 = vor.u32 %v1249_v43, %v1245_v61  ;;  %v2806_v45 = vrot.slane %v2804_v48, 4  ;;  %v1604_v28 = vrot.slane %v1099_v29, 5  ;;  %v10335_v18 = vrot.slane %v1501_v10, 9  ;;  %v507_v19 = vld [vmem:[#allocation2 + $0x60] sm:$0x1] }
  0x8a   : > { %v1246_v2 = vsel %vm12325_vm14, %v1241_v14, %v1245_v61  ;;  %v1602_v25 = vsel %vm12230_vm9, %v10336_v16, %v1601_v44  ;;  %v1603_v39 = vrot.slane %v1601_v44, 4  ;;  %v1594_v35 = vrot.slane %v12616_v32, 5 }
  0x8b   : > { %3013 = vrot.lane.b32.xlu1 %v10399_v4, %s15660_s20  ;;  %v1251_v20 = vrot.slane %v1250_v11, 4  ;;  %v2808_v29 = vsel %vm12230_vm9, %v2806_v45, %v2807_v30  ;;  %v1597_v47 = vrot.slane %v12623_v54, 5  ;;  %v713_v5 = vshrl.u32 %v603_v55, 16  ;;  %v504_v4 = vld [vmem:[#allocation2 + $0x54] sm:$0x1] }
  0x8c   : > { %v10510_v60 = vcombine.low %v2805_v49, %v2808_v29  ;;  %v1605_v24 = vsel %vm12230_vm9, %v1603_v39, %v1604_v28  ;;  %v716_v46 = vshll.u32 %v603_v55, 16  ;;  %v1595_v32 = vsel %vm12230_vm9, %v10335_v18, %v1594_v35  ;;  %v1712_v55 = vld [vmem:[#allocation2 + $0x44] sm:$0x1]  ;;  %v560_v28 = vld [vmem:[#allocation2 + $0x5c] sm:$0x1] }
  0x8d   : > { %v1256_v53 = vsel %vm12325_vm14, %v1251_v20, %v1255_v3  ;;  %v10416_v13 = vcombine.low %v1602_v25, %v1605_v24  ;;  %v1596_v54 = vrot.slane %v1594_v35, 4  ;;  %v715_v52 = vrot.slane %v713_v5, 7 }
  0x8e   : > { %v10400_v41 = vcombine.low %v1246_v2, %v1256_v53  ;;  %3603 = vrot.lane.b32.xlu0 %v10510_v60, %s15663_s22  ;;  %v721_v56 = vshrl.u32 %v604_v27, 16  ;;  %v724_v51 = vshll.u32 %v604_v27, 16  ;;  %v1821_v58 = vshrl.u32 %v12663_v26, 16  ;;  %v12714_v60 = vld [vmem:[%s12215_s24 + $0x22] sm:$0x3] }
  0x8f   : > { %v1598_v22 = vsel %vm12230_vm9, %v1596_v54, %v1597_v47  ;;  %v1824_v62 = vshll.u32 %v12663_v26, 16  ;;  %v1834_v10 = vshrl.u32 %v12665_v31, 16  ;;  %v718_v59 = vor.u32 %v716_v46, %v715_v52 }
  0x90   : > { %3015 = vrot.lane.b32.xlu1 %v10400_v41, %s15660_s20  ;;  %v10415_v37 = vcombine.low %v1595_v32, %v1598_v22  ;;  %v719_v63 = vrot.slane %v715_v52, 4  ;;  %v723_v61 = vrot.slane %v721_v56, 7  ;;  %v1823_v7 = vrot.slane %v1821_v58, 4 }
  0x91   : > { %v1826_v27 = vrot.slane %v1824_v62, 5  ;;  %v10431_v43 = vcombine.low %v12663_v26, %v12665_v31  ;;  %v558_v3 = vsel %vm12208_vm5, 0, %v557_v6  ;;  %v986_v30 = vsel %vm12241_vm10, %v718_v59, %v985_v15  ;;  %v12706_v26 = vld [vmem:[%s12215_s24 + $0x20] sm:$0x3] }
  0x92   : > { %3093 = vrot.lane.b32.xlu0 %v10415_v37, %s15656_s30  ;;  %v726_v48 = vor.u32 %v724_v51, %v723_v61  ;;  %v728_v14 = vrot.slane %v723_v61, 4  ;;  %559 = vst [vmem:[#allocation2 + $0x50] sm:$0x1] %v558_v3  ;;  %v1830_v16 = vshll.u32 %v12665_v31, 16  ;;  %987 = vst [vmem:[#allocation2 + $0x48] sm:$0xf] %v986_v30  ;;  %v609_v51 = vunpack.c.l.u8.bf16 %v12706_v26 }
  0x93   : > { %v1827_v44 = vor.u32 %v1826_v27, %v1823_v7  ;;  %v1836_v11 = vrot.slane %v1834_v10, 4  ;;  %v1840_v49 = vshll.u32 %v1712_v55, 16  ;;  %v10351_v45 = vrot.slane %v2112_v33, 9  ;;  %v12749_v30 = vld [vmem:[#allocation2] sm:$0xf] }
  0x94   : > { %3095 = vrot.lane.b32.xlu1 %v10416_v13, %s15656_s30  ;;  %v727_v2 = vsel %vm12250_vm11, %v719_v63, %v726_v48  ;;  %v1832_v25 = vrot.slane %v1830_v16, 5  ;;  %v2202_v39 = vrot.slane %v12665_v31, 5  ;;  %v2205_v18 = vrot.slane %v1712_v55, 5 }
  0x95   : > { %988 = vst.msk [vmem:[#allocation2 + $0x4c] sm:$0xf] %vm471_vm0, %v727_v2  ;;  %v1828_v20 = vrot.slane %v1827_v44, 4  ;;  %v1842_v29 = vrot.slane %v1840_v49, 5  ;;  %v505_v35 = vsel %vm12186_vm3, 0, %v504_v4  ;;  %v730_v47 = vshrl.u32 %v605_v17, 16 }
  0x96   : > { %3189 = vrot.lane.b32.xlu0 %v10431_v43, %s15701_s16  ;;  %v1837_v24 = vor.u32 %v1836_v11, %v1832_v25  ;;  %v12719_v31 = vsel %vm12230_vm9, %v10351_v45, %v2202_v39  ;;  %v2204_v5 = vrot.slane %v2202_v39, 4  ;;  %506 = vst [vmem:[#allocation2 + $0x54] sm:$0x1] %v505_v35  ;;  %v733_v46 = vshll.u32 %v605_v17, 16  ;;  %v12743_v4 = vld [vmem:[%s12215_s24 + $0x24] sm:$0x3] }
  0x97   : > { %v1833_v6 = vsel %vm12325_vm14, %v1828_v20, %v1832_v25  ;;  %v732_v53 = vrot.slane %v730_v47, 7  ;;  %v738_v13 = vshrl.u32 %v606_v50, 16  ;;  %v741_v32 = vshll.u32 %v606_v50, 16 }
  0x98   : > { %v1838_v54 = vrot.slane %v1837_v24, 4  ;;  %v2206_v15 = vsel %vm12230_vm9, %v2204_v5, %v2205_v18  ;;  %v561_v41 = vsel %vm12208_vm5, 0, %v560_v28  ;;  %v508_v34 = vsel %vm12186_vm3, 0, %v507_v19 }
  0x99   : > { %v989_v17 = vld [vmem:[#allocation2 + $0x50] sm:$0x1]  ;;  %v736_v52 = vrot.slane %v732_v53, 4  ;;  %v740_v56 = vrot.slane %v738_v13, 7  ;;  %562 = vst [vmem:[#allocation2 + $0x5c] sm:$0x1] %v561_v41  ;;  %v610_v57 = vunpack.c.l.u8.bf16 %v12714_v60  ;;  %v10463_v58 = vcombine.low %v12719_v31, %v2206_v15 }
  0x9a   : > { %509 = vst [vmem:[#allocation2 + $0x60] sm:$0x1] %v508_v34  ;;  %v1686_v50 = vld [vmem:[#allocation2 + $0x48] sm:$0xf]  ;;  %v990_v55 = vsel %vm12186_vm3, %v728_v14, %v989_v17  ;;  %v1843_v33 = vsel %vm12325_vm14, %v1838_v54, %v1842_v29  ;;  %v735_v62 = vor.u32 %v733_v46, %v732_v53  ;;  %v12747_v14 = vld [vmem:[#allocation2 + $0x4] sm:$0xf]  ;;  %v611_v46 = vunpack.c.l.u8.bf16 %v12743_v4 }
  0x9b   : > { %v2113_v22 = vld [vmem:[#allocation2 + $0x48] sm:$0xe]  ;;  %v1845_v37 = vshrl.u32 %v1686_v50, 16  ;;  %v1848_v59 = vshll.u32 %v1686_v50, 16  ;;  %991 = vst [vmem:[#allocation2 + $0x50] sm:$0x1] %v990_v55  ;;  %v10447_v63 = vcombine.low %v1833_v6, %v1843_v33  ;;  %v743_v27 = vor.u32 %v741_v32, %v740_v56 }
  0x9c   : > { %v2293_v10 = vld [vmem:[#allocation2 + $0x48] sm:$0xf]  ;;  %v10352_v61 = vrot.slane %v2113_v22, 9  ;;  %v1687_v7 = vld [vmem:[#allocation2 + $0x4c] sm:$0xf]  ;;  %v745_v43 = vrot.slane %v740_v56, 4  ;;  %v10379_v16 = vcombine.low %v12749_v30, %v12747_v14 }
  0x9d   : > { %v12745_v3 = vld [vmem:[#allocation2 + $0x4c] sm:$0xf]  ;;  %v2430_v48 = vshrl.u32 %v2293_v10, 16  ;;  %v1847_v44 = vrot.slane %v1845_v37, 4  ;;  %v1850_v11 = vrot.slane %v1848_v59, 5  ;;  %v1858_v49 = vshrl.u32 %v1687_v7, 16  ;;  %3269 = vrot.lane.b32.xlu0 %v10447_v63, %s15654_s23 }
  0x9e   : > { %v10432_v45 = vcombine.low %v1686_v50, %v1687_v7  ;;  %v992_v28 = vld [vmem:[#allocation2 + $0x54] sm:$0xf]  ;;  %v1854_v19 = vshll.u32 %v1687_v7, 16  ;;  %v2209_v2 = vrot.slane %v1687_v7, 5  ;;  %v744_v25 = vsel %vm12250_vm11, %v736_v52, %v743_v27  ;;  %v1074_v54 = vld [vmem:[#allocation2 + $0x48] sm:$0xf] }
  0x9f   : > { %v993_v39 = vsel %vm12241_vm10, %v735_v62, %v992_v28  ;;  %v1851_v18 = vor.u32 %v1850_v11, %v1847_v44  ;;  %v1860_v20 = vrot.slane %v1858_v49, 4  ;;  %995 = vst.msk [vmem:[#allocation2 + $0x58] sm:$0xf] %vm471_vm0, %v744_v25  ;;  %v2432_v29 = vrot.slane %v2430_v48, 4  ;;  %v12786_v25 = vld [vmem:[#allocation2 + $0x4c] sm:$0xf] }
  0xa0   : > { %3191 = vrot.lane.b32.xlu1 %v10432_v45, %s15701_s16  ;;  %994 = vst [vmem:[#allocation2 + $0x54] sm:$0xf] %v993_v39  ;;  %v2433_v35 = vshll.u32 %v2293_v10, 16  ;;  %v1856_v47 = vrot.slane %v1854_v19, 5  ;;  %v2211_v24 = vrot.slane %v2209_v2, 4  ;;  %v2443_v31 = vshrl.u32 %v12745_v3, 16 }
  0xa1   : > { %v996_v5 = vld [vmem:[#allocation2 + $0x5c] sm:$0x1]  ;;  %v1852_v6 = vrot.slane %v1851_v18, 4  ;;  %3349 = vrot.lane.b32.xlu0 %v10463_v58, %s15702_s21  ;;  %v10479_v13 = vcombine.low %v2293_v10, %v12745_v3  ;;  %v2210_v34 = vsel %vm12230_vm9, %v10352_v61, %v2209_v2  ;;  %v2439_v52 = vshll.u32 %v12745_v3, 16 }
  0xa2   : > { %v2435_v53 = vrot.slane %v2433_v35, 5  ;;  %v997_v32 = vsel %vm12186_vm3, %v745_v43, %v996_v5  ;;  %v1713_v15 = vld [vmem:[#allocation2 + $0x50] sm:$0x1]  ;;  %v1861_v41 = vor.u32 %v1860_v20, %v1856_v47  ;;  %v2445_v56 = vrot.slane %v2443_v31, 4 }
  0xa3   : > { %998 = vst [vmem:[#allocation2 + $0x5c] sm:$0x1] %v997_v32  ;;  %v12768_v17 = vld [vmem:[#allocation2 + $0x50] sm:$0x1]  ;;  %v1857_v50 = vsel %vm12325_vm14, %v1852_v6, %v1856_v47  ;;  %v1864_v55 = vshll.u32 %v1713_v15, 16  ;;  %v2212_v33 = vrot.slane %v1713_v15, 5 }
  0xa4   : > { %v2436_v22 = vor.u32 %v2435_v53, %v2432_v29  ;;  %v1862_v58 = vrot.slane %v1861_v41, 4  ;;  %v2441_v62 = vrot.slane %v2439_v52, 5  ;;  %v2449_v10 = vshll.u32 %v12768_v17, 16  ;;  %v12793_v35 = vld [vmem:[#allocation2 + $0x50] sm:$0x1] }
  0xa5   : > { %v1258_v37 = vshrl.u32 %v1074_v54, 16  ;;  %v1866_v59 = vrot.slane %v1864_v55, 5  ;;  %v2213_v63 = vsel %vm12230_vm9, %v2211_v24, %v2212_v33  ;;  %3445 = vrot.lane.b32.xlu0 %v10479_v13, %s15699_s15  ;;  %v1261_v7 = vshll.u32 %v1074_v54, 16 }
  0xa6   : > { %v2437_v61 = vrot.slane %v2436_v22, 4  ;;  %v10464_v27 = vcombine.low %v2210_v34, %v2213_v63  ;;  %v12779_v48 = vld [vmem:[#allocation2 + $0x58] sm:$0xf]  ;;  %v2446_v44 = vor.u32 %v2445_v56, %v2441_v62  ;;  %v2451_v11 = vrot.slane %v2449_v10, 5  ;;  %v2721_v56 = vld [vmem:[#allocation2 + $0x48] sm:$0xe]  ;;  %v12804_v63 = vpop.permute.xlu1 %3085 }
  0xa7   : > { %v12777_v43 = vld [vmem:[#allocation2 + $0x54] sm:$0xf]  ;;  %v1260_v49 = vrot.slane %v1258_v37, 4  ;;  %v1867_v45 = vsel %vm12325_vm14, %v1862_v58, %v1866_v59  ;;  %v2467_v2 = vshrl.u32 %v12779_v48, 16  ;;  %v2463_v20 = vshll.u32 %v12779_v48, 16 }
  0xa8   : > { %v2454_v28 = vshrl.u32 %v12777_v43, 16  ;;  %v2457_v19 = vshll.u32 %v12777_v43, 16  ;;  %v10448_v39 = vcombine.low %v1857_v50, %v1867_v45  ;;  %v10480_v18 = vcombine.low %v12777_v43, %v12779_v48  ;;  %v1076_v58 = vld [vmem:[#allocation2 + $0x54] sm:$0xf]  ;;  %v12809_v45 = vpop.permute.xlu0 %3181 }
  0xa9   : > { %v2442_v29 = vsel %vm12325_vm14, %v2437_v61, %v2441_v62  ;;  %v2469_v5 = vrot.slane %v2467_v2, 4  ;;  %v2447_v6 = vrot.slane %v2446_v44, 4  ;;  %v2465_v53 = vrot.slane %v2463_v20, 5  ;;  %v2722_v20 = vld [vmem:[#allocation2 + $0x54] sm:$0xe] }
  0xaa   : > { %v2456_v47 = vrot.slane %v2454_v28, 4  ;;  %v2459_v24 = vrot.slane %v2457_v19, 5  ;;  %v12795_v31 = vld [vmem:[#allocation2 + $0x5c] sm:$0x1]  ;;  %3271 = vrot.lane.b32.xlu1 %v10448_v39, %s15654_s23  ;;  %v1263_v32 = vrot.slane %v1261_v7, 5  ;;  %v1267_v54 = vshll.u32 %v12786_v25, 16 }
  0xab   : > { %v2473_v13 = vshll.u32 %v12795_v31, 16  ;;  %v2452_v41 = vsel %vm12325_vm14, %v2447_v6, %v2451_v11  ;;  %v1271_v34 = vshrl.u32 %v12786_v25, 16  ;;  %v1277_v52 = vshll.u32 %v12793_v35, 16  ;;  %s15703_s23 = smov 21   ;;  %v1077_v11 = vld [vmem:[#allocation2 + $0x58] sm:$0xf] }
  0xac   : > { %v2460_v15 = vor.u32 %v2459_v24, %v2456_v47  ;;  %v2470_v50 = vor.u32 %v2469_v5, %v2465_v53  ;;  %v10495_v33 = vcombine.low %v2442_v29, %v2452_v41  ;;  %v1264_v22 = vor.u32 %v1263_v32, %v1260_v49  ;;  %v1101_v2 = vld [vmem:[#allocation2 + $0x5c] sm:$0x1]  ;;  %v1504_v24 = vld [vmem:[#allocation2 + $0x54] sm:$0xe]  ;;  %v1503_v32 = vld [vmem:[#allocation2 + $0x48] sm:$0xe] }
  0xad   : > { %v2475_v55 = vrot.slane %v2473_v13, 5  ;;  %v1269_v10 = vrot.slane %v1267_v54, 5  ;;  %v1273_v37 = vrot.slane %v1271_v34, 4  ;;  %v1279_v59 = vrot.slane %v1277_v52, 5 }
  0xae   : > { %v2461_v62 = vrot.slane %v2460_v15, 4  ;;  %3351 = vrot.lane.b32.xlu1 %v10464_v27, %s15702_s21  ;;  %v2471_v61 = vrot.slane %v2470_v50, 4  ;;  %3525 = vrot.lane.b32.xlu0 %v10495_v33, %s15703_s23  ;;  %v1265_v7 = vrot.slane %v1264_v22, 4  ;;  %v10367_v43 = vrot.slane %v2721_v56, 9 }
  0xaf   : > { %v2811_v44 = vrot.slane %v12745_v3, 5  ;;  %v1274_v28 = vor.u32 %v1273_v37, %v1269_v10  ;;  %v2814_v19 = vrot.slane %v12768_v17, 5  ;;  %v1282_v39 = vshrl.u32 %v1076_v58, 16 }
  0xb0   : > { %v2466_v49 = vsel %vm12325_vm14, %v2461_v62, %v2465_v53  ;;  %v2476_v27 = vsel %vm12325_vm14, %v2471_v61, %v2475_v55  ;;  %v1270_v29 = vsel %vm12325_vm14, %v1265_v7, %v1269_v10  ;;  %v1285_v13 = vshll.u32 %v1076_v58, 16  ;;  %v12825_v55 = vpop.permute.xlu1 %3183 }
  0xb1   : > { %v2812_v3 = vsel %vm12230_vm9, %v10367_v43, %v2811_v44  ;;  %v2813_v47 = vrot.slane %v2811_v44, 4  ;;  %v10496_v5 = vcombine.low %v2466_v49, %v2476_v27  ;;  %v1275_v6 = vrot.slane %v1274_v28, 4  ;;  %v12834_v28 = vld [vmem:[%s12215_s24 + $0x26] sm:$0x3] }
  0xb2   : > { %v1284_v53 = vrot.slane %v1282_v39, 4  ;;  %3447 = vrot.lane.b32.xlu1 %v10480_v18, %s15699_s15  ;;  %v1291_v54 = vshll.u32 %v1077_v11, 16  ;;  %v1295_v15 = vshrl.u32 %v1077_v11, 16  ;;  %v1301_v41 = vshll.u32 %v1101_v2, 16  ;;  %v12827_v18 = vpop.permute.xlu0 %3437 }
  0xb3   : > { %v2815_v17 = vsel %vm12230_vm9, %v2813_v47, %v2814_v19  ;;  %v1280_v34 = vsel %vm12325_vm14, %v1275_v6, %v1279_v59  ;;  %v1287_v56 = vrot.slane %v1285_v13, 5  ;;  %v10368_v50 = vrot.slane %v2722_v20, 9  ;;  %v12842_v47 = vld [vmem:[#allocation2 + $0x54] sm:$0xf]  ;;  %v563_v6 = vld [vmem:[#allocation2 + $0x68] sm:$0x1] }
  0xb4   : > { %v10511_v52 = vcombine.low %v2812_v3, %v2815_v17  ;;  %v10401_v33 = vcombine.low %v1270_v29, %v1280_v34  ;;  %v1293_v22 = vrot.slane %v1291_v54, 5  ;;  %v1297_v58 = vrot.slane %v1295_v15, 4 }
  0xb5   : > { %v1303_v62 = vrot.slane %v1301_v41, 5  ;;  %v1288_v10 = vor.u32 %v1287_v56, %v1284_v53  ;;  %v2818_v37 = vrot.slane %v12779_v48, 5  ;;  %v2821_v61 = vrot.slane %v12795_v31, 5  ;;  %v12852_v53 = vpop.permute.xlu1 %3439  ;;  %v1714_v56 = vld [vmem:[#allocation2 + $0x5c] sm:$0x1] }
  0xb6   : > { %3605 = vrot.lane.b32.xlu0 %v10511_v52, %s15663_s22  ;;  %v10338_v59 = vrot.slane %v1504_v24, 9  ;;  %3527 = vrot.lane.b32.xlu1 %v10496_v5, %s15703_s23  ;;  %v1298_v7 = vor.u32 %v1297_v58, %v1293_v22  ;;  %v1615_v43 = vrot.slane %v1077_v11, 5  ;;  %v1618_v44 = vrot.slane %v1101_v2, 5  ;;  %v12844_v11 = vld [vmem:[#allocation2 + $0x58] sm:$0xf]  ;;  %v12861_v54 = vpop.permute.xlu0 %3005 }
  0xb7   : > { %v10337_v49 = vrot.slane %v1503_v32, 9  ;;  %v1289_v19 = vrot.slane %v1288_v10, 4  ;;  %v2819_v39 = vsel %vm12230_vm9, %v10368_v50, %v2818_v37  ;;  %v2820_v20 = vrot.slane %v2818_v37, 4  ;;  %v999_v52 = vld [vmem:[#allocation2 + $0x60] sm:$0xf] }
  0xb8   : > { %v1608_v27 = vrot.slane %v12786_v25, 5  ;;  %v1299_v29 = vrot.slane %v1298_v7, 4  ;;  %v1616_v48 = vsel %vm12230_vm9, %v10338_v59, %v1615_v43  ;;  %v1617_v31 = vrot.slane %v1615_v43, 4  ;;  %v2114_v10 = vld [vmem:[#allocation2 + $0x54] sm:$0xe] }
  0xb9   : > { %v1611_v3 = vrot.slane %v12793_v35, 5  ;;  %v1294_v2 = vsel %vm12325_vm14, %v1289_v19, %v1293_v22  ;;  %v2822_v24 = vsel %vm12230_vm9, %v2820_v20, %v2821_v61  ;;  %v747_v17 = vshrl.u32 %v607_v40, 16  ;;  %v510_v59 = vld [vmem:[#allocation2 + $0x6c] sm:$0x1]  ;;  %v12880_v20 = vpop.permute.xlu1 %3087 }
  0xba   : > { %v1609_v25 = vsel %vm12230_vm9, %v10337_v49, %v1608_v27  ;;  %v1610_v5 = vrot.slane %v1608_v27, 4  ;;  %3017 = vrot.lane.b32.xlu1 %v10401_v33, %s15660_s20  ;;  %v1304_v35 = vsel %vm12325_vm14, %v1299_v29, %v1303_v62  ;;  %v10512_v13 = vcombine.low %v2819_v39, %v2822_v24 }
  0xbb   : > { %v1619_v32 = vsel %vm12230_vm9, %v1617_v31, %v1618_v44  ;;  %v10402_v15 = vcombine.low %v1294_v2, %v1304_v35  ;;  %v750_v34 = vshll.u32 %v607_v40, 16  ;;  %v612_v50 = vunpack.c.l.u8.bf16 %v12834_v28 }
  0xbc   : > { %v1612_v41 = vsel %vm12230_vm9, %v1610_v5, %v1611_v3  ;;  %3607 = vrot.lane.b32.xlu0 %v10512_v13, %s15663_s22  ;;  %v749_v22 = vrot.slane %v747_v17, 7  ;;  %v755_v58 = vshrl.u32 %v608_v21, 16  ;;  %v758_v62 = vshll.u32 %v608_v21, 16  ;;  %v12887_v3 = vpop.permute.xlu0 %3341 }
  0xbd   : > { %v10417_v33 = vcombine.low %v1609_v25, %v1612_v41  ;;  %v10418_v37 = vcombine.low %v1616_v48, %v1619_v32  ;;  %v1869_v61 = vshrl.u32 %v12842_v47, 16  ;;  %v1872_v12 = vshll.u32 %v12842_v47, 16 }
  0xbe   : > { %v1882_v40 = vshrl.u32 %v12844_v11, 16  ;;  %3019 = vrot.lane.b32.xlu1 %v10402_v15, %s15660_s20  ;;  %v752_v7 = vor.u32 %v750_v34, %v749_v22  ;;  %v753_v43 = vrot.slane %v749_v22, 4  ;;  %v757_v44 = vrot.slane %v755_v58, 7 }
  0xbf   : > { %v564_v49 = vsel %vm12208_vm5, 0, %v563_v6  ;;  %v1871_v19 = vrot.slane %v1869_v61, 4  ;;  %v1874_v38 = vrot.slane %v1872_v12, 5  ;;  %v1878_v21 = vshll.u32 %v12844_v11, 16 }
  0xc0   : > { %565 = vst [vmem:[#allocation2 + $0x68] sm:$0x1] %v564_v49  ;;  %v1884_v39 = vrot.slane %v1882_v40, 4  ;;  %3097 = vrot.lane.b32.xlu0 %v10417_v33, %s15656_s30  ;;  %v760_v27 = vor.u32 %v758_v62, %v757_v44  ;;  %v1000_v29 = vsel %vm12241_vm10, %v752_v7, %v999_v52  ;;  %v10433_v48 = vcombine.low %v12842_v47, %v12844_v11  ;;  %v566_v47 = vld [vmem:[#allocation2 + $0x74] sm:$0x1]  ;;  %v12915_v60 = vpop.permute.xlu0 %3597 }
  0xc1   : > { %v1888_v31 = vshll.u32 %v1714_v56, 16  ;;  %1001 = vst [vmem:[#allocation2 + $0x60] sm:$0xf] %v1000_v29  ;;  %v1875_v2 = vor.u32 %v1874_v38, %v1871_v19  ;;  %v1880_v24 = vrot.slane %v1878_v21, 5  ;;  %v10353_v25 = vrot.slane %v2114_v10, 9 }
  0xc2   : > { %v2216_v5 = vrot.slane %v12844_v11, 5  ;;  %3099 = vrot.lane.b32.xlu1 %v10418_v37, %s15656_s30  ;;  %v761_v6 = vsel %vm12250_vm11, %v753_v43, %v760_v27  ;;  %v762_v35 = vrot.slane %v757_v44, 4  ;;  %v2219_v13 = vrot.slane %v1714_v56, 5  ;;  %v12911_v37 = vpop.permute.xlu1 %3343  ;;  %s15704_s30 = smov 12  }
  0xc3   : > { %v511_v32 = vsel %vm12186_vm3, 0, %v510_v59  ;;  %1002 = vst.msk [vmem:[#allocation2 + $0x64] sm:$0xf] %vm471_vm0, %v761_v6  ;;  %v1876_v17 = vrot.slane %v1875_v2, 4  ;;  %v1885_v15 = vor.u32 %v1884_v39, %v1880_v24  ;;  %v1890_v41 = vrot.slane %v1888_v31, 5 }
  0xc4   : > { %v2218_v34 = vrot.slane %v2216_v5, 4  ;;  %512 = vst [vmem:[#allocation2 + $0x6c] sm:$0x1] %v511_v32  ;;  %3193 = vrot.lane.b32.xlu0 %v10433_v48, %s15701_s16  ;;  %v764_v11 = vshrl.u32 %v609_v51, 16  ;;  %v767_v52 = vshll.u32 %v609_v51, 16  ;;  %v772_v56 = vshrl.u32 %v610_v57, 16 }
  0xc5   : > { %v775_v33 = vshll.u32 %v610_v57, 16  ;;  %v1881_v22 = vsel %vm12325_vm14, %v1876_v17, %v1880_v24  ;;  %v1886_v58 = vrot.slane %v1885_v15, 4  ;;  %v2217_v62 = vsel %vm12230_vm9, %v10353_v25, %v2216_v5  ;;  %v12935_v24 = vld [vmem:[#allocation2 + $0x10] sm:$0xf]  ;;  %v12937_v25 = vld [vmem:[#allocation2 + $0xc] sm:$0xf] }
  0xc6   : > { %v567_v10 = vsel %vm12208_vm5, 0, %v566_v47  ;;  %v2220_v51 = vsel %vm12230_vm9, %v2218_v34, %v2219_v13  ;;  %v766_v61 = vrot.slane %v764_v11, 7  ;;  %v774_v12 = vrot.slane %v772_v56, 7  ;;  %v12942_v47 = vpop.permute.xlu1 %3263 }
  0xc7   : > { %v1003_v26 = vld [vmem:[#allocation2 + $0x68] sm:$0x1]  ;;  %568 = vst [vmem:[#allocation2 + $0x74] sm:$0x1] %v567_v10  ;;  %v1891_v40 = vsel %vm12325_vm14, %v1886_v58, %v1890_v41  ;;  %v3632_v59 = vsel %vm15670_vm15, %v10379_v16, %v12861_v54  ;;  %v10465_v2 = vcombine.low %v2217_v62, %v2220_v51  ;;  %vm15668_vm6 = vcmask 72704  }
  0xc8   : > { %v1004_v57 = vsel %vm12186_vm3, %v762_v35, %v1003_v26  ;;  %v1690_v7 = vld [vmem:[#allocation2 + $0x60] sm:$0xf]  ;;  %v10449_v43 = vcombine.low %v1881_v22, %v1891_v40  ;;  %v769_v49 = vor.u32 %v767_v52, %v766_v61  ;;  %v770_v19 = vrot.slane %v766_v61, 4 }
  0xc9   : > { %1005 = vst [vmem:[#allocation2 + $0x68] sm:$0x1] %v1004_v57  ;;  %v2115_v44 = vld [vmem:[#allocation2 + $0x60] sm:$0xe]  ;;  %v777_v38 = vor.u32 %v775_v33, %v774_v12  ;;  %v1893_v21 = vshrl.u32 %v1690_v7, 16  ;;  %v1896_v39 = vshll.u32 %v1690_v7, 16  ;;  %v12933_v54 = vsel %vm15669_vm1, %v3632_v59, %v12804_v63 }
  0xca   : > { %v10354_v27 = vrot.slane %v2115_v44, 9  ;;  %v779_v29 = vrot.slane %v774_v12, 4  ;;  %v2297_v48 = vld [vmem:[#allocation2 + $0x60] sm:$0xf]  ;;  %v1691_v31 = vld [vmem:[#allocation2 + $0x64] sm:$0xf]  ;;  %3273 = vrot.lane.b32.xlu0 %v10449_v43, %s15704_s30  ;;  %v12946_v34 = vpop.permute.xlu0 %3599 }
  0xcb   : > { %v778_v14 = vsel %vm12250_vm11, %v770_v19, %v777_v38  ;;  %v1006_v30 = vld [vmem:[#allocation2 + $0x6c] sm:$0xf]  ;;  %v12929_v16 = vld [vmem:[#allocation2 + $0x64] sm:$0xf]  ;;  %v1895_v6 = vrot.slane %v1893_v21, 4  ;;  %v1898_v35 = vrot.slane %v1896_v39, 5  ;;  %v10434_v32 = vcombine.low %v1690_v7, %v1691_v31 }
  0xcc   : > { %v1906_v13 = vshrl.u32 %v1691_v31, 16  ;;  %1009 = vst.msk [vmem:[#allocation2 + $0x70] sm:$0xf] %vm471_vm0, %v778_v14  ;;  %v1902_v17 = vshll.u32 %v1691_v31, 16  ;;  %v2223_v15 = vrot.slane %v1691_v31, 5  ;;  %v1007_v63 = vsel %vm12241_vm10, %v769_v49, %v1006_v30  ;;  %v12966_v31 = vpop.permute.xlu1 %3519 }
  0xcd   : > { %v2478_v41 = vshrl.u32 %v2297_v48, 16  ;;  %3195 = vrot.lane.b32.xlu1 %v10434_v32, %s15701_s16  ;;  %v1899_v11 = vor.u32 %v1898_v35, %v1895_v6  ;;  %1008 = vst [vmem:[#allocation2 + $0x6c] sm:$0xf] %v1007_v63  ;;  %v2481_v56 = vshll.u32 %v2297_v48, 16  ;;  %v2491_v33 = vshrl.u32 %v12929_v16, 16 }
  0xce   : > { %v1908_v52 = vrot.slane %v1906_v13, 4  ;;  %v1010_v22 = vld [vmem:[#allocation2 + $0x74] sm:$0x1]  ;;  %v1904_v58 = vrot.slane %v1902_v17, 5  ;;  %v12952_v62 = vsel %vm12230_vm9, %v10354_v27, %v2223_v15  ;;  %v2225_v10 = vrot.slane %v2223_v15, 4  ;;  %3353 = vrot.lane.b32.xlu0 %v10465_v2, %s15702_s21  ;;  %v12961_v19 = vpop.permute.xlu0 %3007 }
  0xcf   : > { %v2480_v26 = vrot.slane %v2478_v41, 4  ;;  %v1900_v61 = vrot.slane %v1899_v11, 4  ;;  %v2483_v12 = vrot.slane %v2481_v56, 5  ;;  %v10481_v57 = vcombine.low %v2297_v48, %v12929_v16  ;;  %v1078_v48 = vld [vmem:[#allocation2 + $0x60] sm:$0xf] }
  0xd0   : > { %v1715_v51 = vld [vmem:[#allocation2 + $0x68] sm:$0x1]  ;;  %v1011_v40 = vsel %vm12186_vm3, %v779_v29, %v1010_v22  ;;  %v1909_v7 = vor.u32 %v1908_v52, %v1904_v58  ;;  %v2487_v49 = vshll.u32 %v12929_v16, 16  ;;  %v2493_v39 = vrot.slane %v2491_v33, 4 }
  0xd1   : > { %v12958_v59 = vld [vmem:[#allocation2 + $0x68] sm:$0x1]  ;;  %v1912_v43 = vshll.u32 %v1715_v51, 16  ;;  %v2226_v44 = vrot.slane %v1715_v51, 5  ;;  %1012 = vst [vmem:[#allocation2 + $0x74] sm:$0x1] %v1011_v40  ;;  %v1905_v38 = vsel %vm12325_vm14, %v1900_v61, %v1904_v58  ;;  %v2484_v21 = vor.u32 %v2483_v12, %v2480_v26 }
  0xd2   : > { %v2497_v27 = vshll.u32 %v12958_v59, 16  ;;  %v1910_v29 = vrot.slane %v1909_v7, 4  ;;  %3449 = vrot.lane.b32.xlu0 %v10481_v57, %s15699_s15  ;;  %v2489_v6 = vrot.slane %v2487_v49, 5  ;;  %v1306_v52 = vshrl.u32 %v1078_v48, 16  ;;  %v12978_v56 = vpop.permute.xlu0 %3261  ;;  %v12985_v57 = vld [vmem:[#allocation2 + $0x68] sm:$0x1] }
  0xd3   : > { %v1914_v2 = vrot.slane %v1912_v43, 5  ;;  %v2227_v14 = vsel %vm12230_vm9, %v2225_v10, %v2226_v44  ;;  %v12970_v30 = vld [vmem:[#allocation2 + $0x70] sm:$0xf]  ;;  %v2485_v17 = vrot.slane %v2484_v21, 4  ;;  %v1309_v49 = vshll.u32 %v1078_v48, 16 }
  0xd4   : > { %v10466_v35 = vcombine.low %v12952_v62, %v2227_v14  ;;  %v2515_v13 = vshrl.u32 %v12970_v30, 16  ;;  %v2511_v32 = vshll.u32 %v12970_v30, 16  ;;  %v2299_v63 = vld [vmem:[#allocation2 + $0x6c] sm:$0xf]  ;;  %v2494_v41 = vor.u32 %v2493_v39, %v2489_v6  ;;  %v12981_v62 = vld [vmem:[#allocation2 + $0x64] sm:$0xf] }
  0xd5   : > { %v1915_v15 = vsel %vm12325_vm14, %v1910_v29, %v1914_v2  ;;  %v2499_v11 = vrot.slane %v2497_v27, 5  ;;  %v2502_v22 = vshrl.u32 %v2299_v63, 16  ;;  %v2505_v58 = vshll.u32 %v2299_v63, 16  ;;  %v2723_v2 = vld [vmem:[#allocation2 + $0x60] sm:$0xe] }
  0xd6   : > { %v10450_v33 = vcombine.low %v1905_v38, %v1915_v15  ;;  %v10482_v10 = vcombine.low %v2299_v63, %v12970_v30  ;;  %v2513_v26 = vrot.slane %v2511_v32, 5  ;;  %v2517_v51 = vrot.slane %v2515_v13, 4  ;;  %v12990_v38 = vpop.permute.xlu1 %3009  ;;  %v12996_v14 = vpop.permute.xlu0 %3517 }
  0xd7   : > { %v2490_v61 = vsel %vm12325_vm14, %v2485_v17, %v2489_v6  ;;  %v2495_v12 = vrot.slane %v2494_v41, 4  ;;  %v2504_v40 = vrot.slane %v2502_v22, 4  ;;  %v2507_v7 = vrot.slane %v2505_v58, 5 }
  0xd8   : > { %3275 = vrot.lane.b32.xlu1 %v10450_v33, %s15704_s30  ;;  %v12988_v43 = vld [vmem:[#allocation2 + $0x74] sm:$0x1]  ;;  %v1308_v44 = vrot.slane %v1306_v52, 4  ;;  %v2518_v21 = vor.u32 %v2517_v51, %v2513_v26  ;;  %v1315_v29 = vshll.u32 %v12981_v62, 16  ;;  %v1311_v32 = vrot.slane %v1309_v49, 5 }
  0xd9   : > { %v2521_v39 = vshll.u32 %v12988_v43, 16  ;;  %v2500_v27 = vsel %vm12325_vm14, %v2495_v12, %v2499_v11  ;;  %v2508_v6 = vor.u32 %v2507_v7, %v2504_v40  ;;  %v1319_v17 = vshrl.u32 %v12981_v62, 16  ;;  %v1080_v52 = vld [vmem:[#allocation2 + $0x6c] sm:$0xf]  ;;  %v1081_v33 = vld [vmem:[#allocation2 + $0x70] sm:$0xf] }
  0xda   : > { %v10497_v13 = vcombine.low %v2490_v61, %v2500_v27  ;;  %v2519_v15 = vrot.slane %v2518_v21, 4  ;;  %v1317_v63 = vrot.slane %v1315_v29, 5  ;;  %v1325_v41 = vshll.u32 %v12985_v57, 16  ;;  %v13006_v49 = vpop.permute.xlu0 %3089  ;;  %v1103_v27 = vld [vmem:[#allocation2 + $0x74] sm:$0x1] }
  0xdb   : > { %v2523_v48 = vrot.slane %v2521_v39, 5  ;;  %v2509_v11 = vrot.slane %v2508_v6, 4  ;;  %v1312_v22 = vor.u32 %v1311_v32, %v1308_v44  ;;  %v1321_v58 = vrot.slane %v1319_v17, 4  ;;  %v13010_v44 = vpop.permute.xlu1 %3011  ;;  %v1506_v17 = vld [vmem:[#allocation2 + $0x6c] sm:$0xe] }
  0xdc   : > { %3355 = vrot.lane.b32.xlu1 %v10466_v35, %s15702_s21  ;;  %3529 = vrot.lane.b32.xlu0 %v10497_v13, %s15703_s23  ;;  %v10369_v51 = vrot.slane %v2723_v2, 9  ;;  %v1327_v12 = vrot.slane %v1325_v41, 5  ;;  %v2825_v40 = vrot.slane %v12929_v16, 5  ;;  %v2828_v7 = vrot.slane %v12958_v59, 5  ;;  %v2724_v16 = vld [vmem:[#allocation2 + $0x6c] sm:$0xe] }
  0xdd   : > { %v2524_v61 = vsel %vm12325_vm14, %v2519_v15, %v2523_v48  ;;  %v2514_v21 = vsel %vm12325_vm14, %v2509_v11, %v2513_v26  ;;  %v1313_v35 = vrot.slane %v1312_v22, 4  ;;  %v1322_v39 = vor.u32 %v1321_v58, %v1317_v63 }
  0xde   : > { %v1330_v29 = vshrl.u32 %v1080_v52, 16  ;;  %v10498_v2 = vcombine.low %v2514_v21, %v2524_v61  ;;  %v2826_v6 = vsel %vm12230_vm9, %v10369_v51, %v2825_v40  ;;  %v2827_v13 = vrot.slane %v2825_v40, 4  ;;  %v13019_v61 = vpop.permute.xlu0 %3185  ;;  %v1505_v21 = vld [vmem:[#allocation2 + $0x60] sm:$0xe] }
  0xdf   : > { %v1333_v32 = vshll.u32 %v1080_v52, 16  ;;  %v1318_v59 = vsel %vm12325_vm14, %v1313_v35, %v1317_v63  ;;  %v1323_v26 = vrot.slane %v1322_v39, 4  ;;  %v1339_v48 = vshll.u32 %v1081_v33, 16 }
  0xe0   : > { %3451 = vrot.lane.b32.xlu1 %v10482_v10, %s15699_s15  ;;  %v1332_v15 = vrot.slane %v1330_v29, 4  ;;  %v2829_v41 = vsel %vm12230_vm9, %v2827_v13, %v2828_v7  ;;  %v1343_v22 = vshrl.u32 %v1081_v33, 16  ;;  %v1349_v58 = vshll.u32 %v1103_v27, 16  ;;  %v513_v29 = vld [vmem:[#allocation2 + $0x78] sm:$0x1] }
  0xe1   : > { %v1335_v11 = vrot.slane %v1333_v32, 5  ;;  %v1328_v52 = vsel %vm12325_vm14, %v1323_v26, %v1327_v12  ;;  %v10513_v51 = vcombine.low %v2826_v6, %v2829_v41  ;;  %v1341_v40 = vrot.slane %v1339_v48, 5  ;;  %v13027_v12 = vpop.permute.xlu1 %3091 }
  0xe2   : > { %v10370_v10 = vrot.slane %v2724_v16, 9  ;;  %v10403_v0 = vcombine.low %v1318_v59, %v1328_v52  ;;  %v1345_v35 = vrot.slane %v1343_v22, 4  ;;  %v1351_v39 = vrot.slane %v1349_v58, 5  ;;  %v13041_v22 = vld [vmem:[#allocation2 + $0x70] sm:$0xf] }
  0xe3   : > { %v1336_v63 = vor.u32 %v1335_v11, %v1332_v15  ;;  %3609 = vrot.lane.b32.xlu0 %v10513_v51, %s15663_s22  ;;  %v2832_v7 = vrot.slane %v12970_v30, 5  ;;  %v2835_v13 = vrot.slane %v12988_v43, 5  ;;  %v10340_v32 = vrot.slane %v1506_v17, 9  ;;  %v13033_v11 = vld [vmem:[#allocation2 + $0x6c] sm:$0xf]  ;;  %v13035_v30 = vpop.permute.xlu0 %3265 }
  0xe4   : > { %3531 = vrot.lane.b32.xlu1 %v10498_v2, %s15703_s23  ;;  %v1629_v5 = vrot.slane %v1081_v33, 5  ;;  %v1346_v16 = vor.u32 %v1345_v35, %v1341_v40  ;;  %v1632_v26 = vrot.slane %v1103_v27, 5  ;;  %v10339_v59 = vrot.slane %v1505_v21, 9 }
  0xe5   : > { %v1337_v6 = vrot.slane %v1336_v63, 4  ;;  %v2833_v15 = vsel %vm12230_vm9, %v10370_v10, %v2832_v7  ;;  %v2834_v48 = vrot.slane %v2832_v7, 4  ;;  %v1622_v17 = vrot.slane %v12981_v62, 5  ;;  %v569_v10 = vld [vmem:[#allocation2 + $0x80] sm:$0x1] }
  0xe6   : > { %v1630_v2 = vsel %vm12230_vm9, %v10340_v32, %v1629_v5  ;;  %v1631_v41 = vrot.slane %v1629_v5, 4  ;;  %v1347_v33 = vrot.slane %v1346_v16, 4  ;;  %v1625_v27 = vrot.slane %v12985_v57, 5 }
  0xe7   : > { %v1342_v43 = vsel %vm12325_vm14, %v1337_v6, %v1341_v40  ;;  %v2836_v58 = vsel %vm12230_vm9, %v2834_v48, %v2835_v13  ;;  %v514_v52 = vsel %vm12186_vm3, 0, %v513_v29  ;;  %v781_v51 = vshrl.u32 %v611_v46, 16  ;;  %v13058_v29 = vpop.permute.xlu1 %3187 }
  0xe8   : > { %3021 = vrot.lane.b32.xlu1 %v10403_v0, %s15660_s20  ;;  %v1633_v5 = vsel %vm12230_vm9, %v1631_v41, %v1632_v26  ;;  %v1352_v62 = vsel %vm12325_vm14, %v1347_v33, %v1351_v39  ;;  %v10514_v57 = vcombine.low %v2833_v15, %v2836_v58  ;;  %v1623_v0 = vsel %vm12230_vm9, %v10339_v59, %v1622_v17  ;;  %v13071_v59 = vld [vmem:[#allocation2 + $0x74] sm:$0x1]  ;;  %v13073_v15 = vpop.permute.xlu0 %3345  ;;  %v11946_v33 = vld [vmem:[#allocation2 + $0x18] sm:$0xf]  ;;  %v11948_v58 = vld [vmem:[#allocation2 + $0x24] sm:$0xf] }
  0xe9   : > { %v10420_v40 = vcombine.low %v1630_v2, %v1633_v5  ;;  %515 = vst [vmem:[#allocation2 + $0x78] sm:$0x1] %v514_v52  ;;  %v10404_v21 = vcombine.low %v1342_v43, %v1352_v62  ;;  %v1624_v63 = vrot.slane %v1622_v17, 4  ;;  %v783_v35 = vrot.slane %v781_v51, 7  ;;  %v11947_v17 = vld [vmem:[#allocation2 + $0x1c] sm:$0xf] }
  0xea   : > { %v784_v7 = vshll.u32 %v611_v46, 16  ;;  %3611 = vrot.lane.b32.xlu0 %v10514_v57, %s15663_s22  ;;  %v789_v39 = vshrl.u32 %v612_v50, 16  ;;  %v792_v13 = vshll.u32 %v612_v50, 16  ;;  %v1917_v32 = vshrl.u32 %v13033_v11, 16  ;;  %v11949_v5 = vld [vmem:[#allocation2 + $0x28] sm:$0xf] }
  0xeb   : > { %v1920_v6 = vshll.u32 %v13033_v11, 16  ;;  %v1626_v4 = vsel %vm12230_vm9, %v1624_v63, %v1625_v27  ;;  %v787_v16 = vrot.slane %v783_v35, 4  ;;  %v1930_v26 = vshrl.u32 %v13041_v22, 16  ;;  %v2116_v57 = vld [vmem:[#allocation2 + $0x6c] sm:$0xe]  ;;  %s15708_s22 = smov 3  }
  0xec   : > { %3023 = vrot.lane.b32.xlu1 %v10404_v21, %s15660_s20  ;;  %v786_v46 = vor.u32 %v784_v7, %v783_v35  ;;  %v10419_v48 = vcombine.low %v1623_v0, %v1626_v4  ;;  %v791_v28 = vrot.slane %v789_v39, 7  ;;  %v1919_v50 = vrot.slane %v1917_v32, 4  ;;  %s15705_s20 = smov 6   ;;  %v459_v7 = vld [vmem:[%s12215_s24 + $0x28] sm:$0x3] }
  0xed   : > { %v1922_v2 = vrot.slane %v1920_v6, 5  ;;  %v10435_v41 = vcombine.low %v13033_v11, %v13041_v22  ;;  %v570_v43 = vsel %vm12208_vm5, 0, %v569_v10  ;;  %v10381_v27 = vcombine.low %v11946_v33, %v11947_v17  ;;  %v516_v39 = vld [vmem:[#allocation2 + $0x84] sm:$0x1] }
  0xee   : > { %v10382_v52 = vcombine.low %v11948_v58, %v11949_v5  ;;  %3101 = vrot.lane.b32.xlu0 %v10419_v48, %s15705_s20  ;;  %v794_v51 = vor.u32 %v792_v13, %v791_v28  ;;  %571 = vst [vmem:[#allocation2 + $0x80] sm:$0x1] %v570_v43  ;;  %vm3744_vm7 = vcmask 97280   ;;  %v15706_v11 = vcombine.low %v12937_v25, %v12935_v24  ;;  %v13090_v13 = vpop.permute.xlu1 %3267 }
  0xef   : > { %v1923_v21 = vor.u32 %v1922_v2, %v1919_v50  ;;  %v1926_v63 = vshll.u32 %v13041_v22, 16  ;;  %v1932_v35 = vrot.slane %v1930_v26, 4  ;;  %v796_v32 = vrot.slane %v791_v28, 4 }
  0xf0   : > { %v3635_v62 = vsel %vm15670_vm15, %v15706_v11, %v12961_v19  ;;  %3103 = vrot.lane.b32.xlu1 %v10420_v40, %s15705_s20  ;;  %v1013_v0 = vld [vmem:[#allocation2 + $0x78] sm:$0xf]  ;;  %v795_v24 = vsel %vm12250_vm11, %v787_v16, %v794_v51  ;;  %v1936_v40 = vshll.u32 %v13071_v59, 16  ;;  %v3713_v26 = vsel %vm15668_vm6, %v12933_v54, %v12809_v45  ;;  %v13104_v16 = vpop.permute.xlu0 %3441 }
  0xf1   : > { %v3682_v10 = vsel %vm15669_vm1, %v3635_v62, %v12880_v20  ;;  %v1014_v25 = vsel %vm12241_vm10, %v786_v46, %v1013_v0  ;;  %v460_v20 = vld [vmem:[%s12215_s24 + $0x2a] sm:$0x3]  ;;  %1016 = vst.msk [vmem:[#allocation2 + $0x7c] sm:$0xf] %vm471_vm0, %v795_v24  ;;  %v1924_v6 = vrot.slane %v1923_v21, 4  ;;  %v1928_v4 = vrot.slane %v1926_v63, 5 }
  0xf2   : > { %v3715_v19 = vsel %vm15668_vm6, %v3682_v10, %v12825_v55  ;;  %1015 = vst [vmem:[#allocation2 + $0x78] sm:$0xf] %v1014_v25  ;;  %3197 = vrot.lane.b32.xlu0 %v10435_v41, %s15701_s16  ;;  %v13111_v46 = vsel %vm15670_vm15, %v10381_v27, %v12990_v38  ;;  %vm15673_vm12 = vcmask 121856   ;;  %v3746_v48 = vsel %vm3744_vm7, %v3713_v26, %v12978_v56  ;;  %v13127_v27 = vpop.permute.xlu1 %3347 }
  0xf3   : > { %v3748_v55 = vsel %vm3744_vm7, %v3715_v19, %v12942_v47  ;;  %v1933_v28 = vor.u32 %v1932_v35, %v1928_v4  ;;  %v1938_v50 = vrot.slane %v1936_v40, 5  ;;  %v3641_v45 = vsel %vm15670_vm15, %v10382_v52, %v13010_v44 }
  0xf4   : > { %v10355_v54 = vrot.slane %v2116_v57, 9  ;;  %v2230_v2 = vrot.slane %v13041_v22, 5  ;;  %v2233_v41 = vrot.slane %v13071_v59, 5  ;;  %v517_v47 = vsel %vm12186_vm3, 0, %v516_v39  ;;  %v13135_v51 = vpop.permute.xlu0 %3521 }
  0xf5   : > { %v613_v43 = vunpack.c.l.u8.bf16 %v459_v7  ;;  %v1017_v38 = vld [vmem:[#allocation2 + $0x80] sm:$0x1]  ;;  %v1929_v33 = vsel %vm12325_vm14, %v1924_v6, %v1928_v4  ;;  %v1934_v17 = vrot.slane %v1933_v28, 4  ;;  %v13125_v56 = vsel %vm15673_vm12, %v3746_v48, %v12887_v3  ;;  %518 = vst [vmem:[#allocation2 + $0x84] sm:$0x1] %v517_v47 }
  0xf6   : > { %v614_v44 = vunpack.c.l.u8.bf16 %v460_v20  ;;  %v1018_v22 = vsel %vm12186_vm3, %v796_v32, %v1017_v38  ;;  %v2232_v59 = vrot.slane %v2230_v2, 4  ;;  %vm3964_vm13 = vcmask 1044480   ;;  %v13147_v48 = vpop.permute.xlu1 %3443 }
  0xf7   : > { %vm3965_vm8 = vcmask 1045504   ;;  %1019 = vst [vmem:[#allocation2 + $0x80] sm:$0x1] %v1018_v22  ;;  %v1939_v58 = vsel %vm12325_vm14, %v1934_v17, %v1938_v50  ;;  %v2231_v5 = vsel %vm12230_vm9, %v10355_v54, %v2230_v2  ;;  %v798_v52 = vshrl.u32 %v613_v43, 16 }
  0xf8   : > { %v801_v3 = vshll.u32 %v613_v43, 16  ;;  %v1695_v62 = vld [vmem:[#allocation2 + $0x7c] sm:$0xf]  ;;  %v10451_v57 = vcombine.low %v1929_v33, %v1939_v58  ;;  %v2234_v0 = vsel %vm12230_vm9, %v2232_v59, %v2233_v41  ;;  %v13139_v10 = vshrl.u32 %v614_v44, 16 }
  0xf9   : > { %v1694_v11 = vld [vmem:[#allocation2 + $0x78] sm:$0xf]  ;;  %v809_v21 = vshll.u32 %v614_v44, 16  ;;  %v1954_v7 = vshrl.u32 %v1695_v62, 16  ;;  %v1950_v25 = vshll.u32 %v1695_v62, 16  ;;  %v2237_v19 = vrot.slane %v1695_v62, 5 }
  0xfa   : > { %v1941_v63 = vshrl.u32 %v1694_v11, 16  ;;  %v1944_v35 = vshll.u32 %v1694_v11, 16  ;;  %v10436_v39 = vcombine.low %v1694_v11, %v1695_v62  ;;  %v2117_v24 = vld [vmem:[#allocation2 + $0x78] sm:$0xe]  ;;  %3277 = vrot.lane.b32.xlu0 %v10451_v57, %s15704_s30  ;;  %v10467_v40 = vcombine.low %v2231_v5, %v2234_v0  ;;  %v13155_v38 = vpop.permute.xlu0 %3601  ;;  %v13164_v0 = vld [vmem:[#allocation2 + $0x7c] sm:$0xf] }
  0xfb   : > { %v13144_v20 = vsel %vm15669_vm1, %v3641_v45, %v13027_v12  ;;  %v1956_v4 = vrot.slane %v1954_v7, 4  ;;  %v800_v26 = vrot.slane %v798_v52, 7  ;;  %v1952_v28 = vrot.slane %v1950_v25, 5  ;;  %v11576_v45 = vld [vmem:[%s15700_s1 + $0x8] sm:$0x3f]  }
  0xfc   : > { %v1943_v32 = vrot.slane %v1941_v63, 4  ;;  %v1946_v6 = vrot.slane %v1944_v35, 5  ;;  %3199 = vrot.lane.b32.xlu1 %v10436_v39, %s15701_s16  ;;  %v10356_v50 = vrot.slane %v2117_v24, 9  ;;  %v808_v54 = vrot.slane %v13139_v10, 7  ;;  %v1020_v2 = vld [vmem:[#allocation2 + $0x84] sm:$0xf]  ;;  %v13171_v39 = vpop.permute.xlu1 %3523 }
  0xfd   : > { %v3781_v41 = vsel %vm15673_vm12, %v3748_v55, %v12911_v37  ;;  %v803_v43 = vor.u32 %v801_v3, %v800_v26  ;;  %v804_v12 = vrot.slane %v800_v26, 4  ;;  %v1957_v17 = vor.u32 %v1956_v4, %v1952_v28  ;;  %v2301_v3 = vld [vmem:[#allocation2 + $0x78] sm:$0xf]  ;;  %v572_v7 = vld [vmem:[#allocation2 + $0x8c] sm:$0x1] }
  0xfe   : > { %v1947_v47 = vor.u32 %v1946_v6, %v1943_v32  ;;  %v1717_v33 = vld [vmem:[#allocation2 + $0x80] sm:$0x1]  ;;  %v2239_v44 = vrot.slane %v2237_v19, 4  ;;  %3357 = vrot.lane.b32.xlu0 %v10467_v40, %s15702_s21  ;;  %v811_v22 = vor.u32 %v809_v21, %v808_v54  ;;  %v12051_v59 = vmov 65535  }
  0xff   : > { %v3966_v58 = vsel %vm3964_vm13, 4294967295, %v12051_v59  ;;  %v1960_v37 = vshll.u32 %v1717_v33, 16  ;;  %v2240_v55 = vrot.slane %v1717_v33, 5  ;;  %v1021_v52 = vsel %vm12241_vm10, %v803_v43, %v1020_v2 }
 0x100   : > { %v1948_v5 = vrot.slane %v1947_v47, 4  ;;  %v1958_v11 = vrot.slane %v1957_v17, 4  ;;  %v812_v62 = vsel %vm12250_vm11, %v804_v12, %v811_v22  ;;  %1022 = vst [vmem:[#allocation2 + $0x84] sm:$0xf] %v1021_v52  ;;  %v3967_v57 = vsel %vm3965_vm8, %v3966_v58, 0  ;;  %v13183_v26 = vpop.permute.xlu0 %3603  ;;  %v13202_v58 = vpop.permute.xlu1 %3013 }
 0x101   : > { %vm15671_vm4 = vcmask 146432   ;;  %v1962_v21 = vrot.slane %v1960_v37, 5  ;;  %v2238_v63 = vsel %vm12230_vm9, %v10356_v50, %v2237_v19  ;;  %1023 = vst.msk [vmem:[#allocation2 + $0x88] sm:$0xf] %vm471_vm0, %v812_v62  ;;  %v3969_v35 = vand.u32 %v11576_v45, %v3967_v57  ;;  %v13190_v47 = vld [vmem:[#allocation2 + $0x80] sm:$0x1] }
 0x102   : > { %v1953_v10 = vsel %vm12325_vm14, %v1948_v5, %v1952_v28  ;;  %v2241_v24 = vsel %vm12230_vm9, %v2239_v44, %v2240_v55  ;;  %v3812_v25 = vsel %vm15671_vm4, %v13125_v56, %v12827_v18  ;;  %vm15672_vm8 = vcmask 171008   ;;  %v1082_v17 = vld [vmem:[#allocation2 + $0x78] sm:$0xf] }
 0x103   : > { %v2526_v40 = vshrl.u32 %v2301_v3, 16  ;;  %v1963_v32 = vsel %vm12325_vm14, %v1958_v11, %v1962_v21  ;;  %11442 = vmatprep.subr.bf16.mxu0 %v3969_v35  ;;  %v3845_v19 = vsel %vm15672_vm8, %v3812_v25, %v12996_v14  ;;  %v2529_v6 = vshll.u32 %v2301_v3, 16  ;;  %v13211_v11 = vld [vmem:[#allocation2 + $0x7c] sm:$0xf]  ;;  %v13220_v25 = vld [vmem:[#allocation2 + $0x80] sm:$0x1] }
 0x104   : > { %v2539_v4 = vshrl.u32 %v13164_v0, 16  ;;  %v10452_v28 = vcombine.low %v1953_v10, %v1963_v32  ;;  %11443 = vmatpush3.bf16.msra.mxu0 %v3969_v35  ;;  %v10483_v2 = vcombine.low %v2301_v3, %v13164_v0  ;;  %v573_v18 = vsel %vm12208_vm5, 0, %v572_v7  ;;  %v13213_v62 = vpop.permute.xlu0 %3093 }
 0x105   : > { %v2528_v50 = vrot.slane %v2526_v40, 4  ;;  %v2531_v56 = vrot.slane %v2529_v6, 5  ;;  %574 = vst [vmem:[#allocation2 + $0x8c] sm:$0x1] %v573_v18  ;;  %vm3876_vm13 = vcmask 195584   ;;  %vm15667_vm2 = vcmask 220160  }
 0x106   : > { %v3814_v14 = vsel %vm15671_vm4, %v3781_v41, %v12852_v53  ;;  %3279 = vrot.lane.b32.xlu1 %v10452_v28, %s15704_s30  ;;  %v10468_v43 = vcombine.low %v2238_v63, %v2241_v24  ;;  %3453 = vrot.lane.b32.xlu0 %v10483_v2, %s15699_s15  ;;  %v3878_v12 = vsel %vm3876_vm13, %v3845_v19, %v12915_v60  ;;  %v2535_v33 = vshll.u32 %v13164_v0, 16 }
 0x107   : > { %v3847_v45 = vsel %vm15672_vm8, %v3814_v14, %v12966_v31  ;;  %v813_v44 = vrot.slane %v808_v54, 4  ;;  %v2303_v22 = vld [vmem:[#allocation2 + $0x84] sm:$0xf]  ;;  %11444 = vmatprep.mubr.msk.bf16.mxu0 %vm15667_vm2, %v3878_v12  ;;  %v2532_v41 = vor.u32 %v2531_v56, %v2528_v50  ;;  %v2541_v59 = vrot.slane %v2539_v4, 4  ;;  %v2725_v14 = vld [vmem:[#allocation2 + $0x78] sm:$0xe]  ;;  %v13227_v12 = vpop.permute.xlu1 %3015 }
 0x108   : > { %v3880_v53 = vsel %vm3876_vm13, %v3847_v45, %v12946_v34  ;;  %v13204_v5 = vld [vmem:[#allocation2 + $0x88] sm:$0xf]  ;;  %v2550_v60 = vshrl.u32 %v2303_v22, 16  ;;  %v2553_v37 = vshll.u32 %v2303_v22, 16  ;;  %v2537_v31 = vrot.slane %v2535_v33, 5 }
 0x109   : > { %11445 = vmatmul.mubr.msk.bf16.vlgmr.msra.gmra.mrb[0].mxu0 %vm15667_vm2, %v3880_v53  ;;  %v2545_v55 = vshll.u32 %v13190_v47, 16  ;;  %v2563_v54 = vshrl.u32 %v13204_v5, 16  ;;  %v10484_v52 = vcombine.low %v2303_v22, %v13204_v5  ;;  %v2559_v3 = vshll.u32 %v13204_v5, 16 }
 0x10a   : > { %v2533_v34 = vrot.slane %v2532_v41, 4  ;;  %3359 = vrot.lane.b32.xlu1 %v10468_v43, %s15702_s21  ;;  %v2552_v57 = vrot.slane %v2550_v60, 4  ;;  %v2555_v10 = vrot.slane %v2553_v37, 5  ;;  %v2542_v21 = vor.u32 %v2541_v59, %v2537_v31  ;;  %v1084_v43 = vld [vmem:[#allocation2 + $0x84] sm:$0xf]  ;;  %v13240_v37 = vpop.permute.xlu0 %3189 }
 0x10b   : > { %v2547_v63 = vrot.slane %v2545_v55, 5  ;;  %v13216_v35 = vrot.slane %v2559_v3, 5  ;;  %v2565_v7 = vrot.slane %v2563_v54, 4  ;;  %v1354_v40 = vshrl.u32 %v1082_v17, 16 }
 0x10c   : > { %v2538_v24 = vsel %vm12325_vm14, %v2533_v34, %v2537_v31  ;;  %v1024_v32 = vld [vmem:[#allocation2 + $0x8c] sm:$0x1]  ;;  %v2556_v19 = vor.u32 %v2555_v10, %v2552_v57  ;;  %v2543_v6 = vrot.slane %v2542_v21, 4  ;;  %v1357_v4 = vshll.u32 %v1082_v17, 16 }
 0x10d   : > { %v1363_v28 = vshll.u32 %v13211_v11, 16  ;;  %v1025_v50 = vsel %vm12186_vm3, %v813_v44, %v1024_v32  ;;  %v2566_v2 = vor.u32 %v2565_v7, %v13216_v35  ;;  %v1356_v18 = vrot.slane %v1354_v40, 4  ;;  %v13234_v44 = vld [vmem:[#allocation2 + $0x88] sm:$0xf]  ;;  %v2726_v7 = vld [vmem:[#allocation2 + $0x84] sm:$0xe] }
 0x10e   : > { %v1367_v56 = vshrl.u32 %v13211_v11, 16  ;;  %3455 = vrot.lane.b32.xlu1 %v10484_v52, %s15699_s15  ;;  %1026 = vst [vmem:[#allocation2 + $0x8c] sm:$0x1] %v1025_v50  ;;  %v13230_v45 = vrot.slane %v2556_v19, 4  ;;  %v2548_v33 = vsel %vm12325_vm14, %v2543_v6, %v2547_v63  ;;  %v1359_v17 = vrot.slane %v1357_v4, 5 }
 0x10f   : > { %v1365_v22 = vrot.slane %v1363_v28, 5  ;;  %v3684_v53 = vsel %vm15669_vm1, %v13111_v46, %v13006_v49  ;;  %v10499_v41 = vcombine.low %v2538_v24, %v2548_v33  ;;  %v1373_v60 = vshll.u32 %v13220_v25, 16  ;;  %v1508_v33 = vld [vmem:[#allocation2 + $0x84] sm:$0xe] }
 0x110   : > { %v1369_v59 = vrot.slane %v1367_v56, 4  ;;  %v2562_v31 = vsel %vm12325_vm14, %v13230_v45, %v13216_v35  ;;  %v2567_v55 = vrot.slane %v2566_v2, 4  ;;  %v3719_v54 = vsel %vm15668_vm6, %v13144_v20, %v13058_v29  ;;  %v13255_v20 = vpop.permute.xlu1 %3095  ;;  %v13266_v56 = vpop.permute.xlu0 %3269 }
 0x111   : > { %v1360_v52 = vor.u32 %v1359_v17, %v1356_v18  ;;  %3533 = vrot.lane.b32.xlu0 %v10499_v41, %s15703_s23  ;;  %v1375_v46 = vrot.slane %v1373_v60, 5  ;;  %v10371_v3 = vrot.slane %v2725_v14, 9  ;;  %v2839_v34 = vrot.slane %v13164_v0, 5 }
 0x112   : > { %v1370_v49 = vor.u32 %v1369_v59, %v1365_v22  ;;  %v2842_v10 = vrot.slane %v13190_v47, 5  ;;  %v1378_v21 = vshrl.u32 %v1084_v43, 16  ;;  %v1381_v63 = vshll.u32 %v1084_v43, 16 }
 0x113   : > { %v1361_v57 = vrot.slane %v1360_v52, 4  ;;  %v2840_v24 = vsel %vm12230_vm9, %v10371_v3, %v2839_v34  ;;  %v2841_v40 = vrot.slane %v2839_v34, 4  ;;  %v1387_v29 = vshll.u32 %v13234_v44, 16  ;;  %v1507_v52 = vld [vmem:[#allocation2 + $0x78] sm:$0xe] }
 0x114   : > { %v1371_v35 = vrot.slane %v1370_v49, 4  ;;  %v3717_v32 = vsel %vm15668_vm6, %v3684_v53, %v13019_v61  ;;  %v1380_v19 = vrot.slane %v1378_v21, 4  ;;  %v1383_v0 = vrot.slane %v1381_v63, 5 }
 0x115   : > { %v1391_v6 = vshrl.u32 %v13234_v44, 16  ;;  %v2326_v47 = vld [vmem:[#allocation2 + $0x8c] sm:$0x1]  ;;  %v1366_v4 = vsel %vm12325_vm14, %v1361_v57, %v1365_v22  ;;  %v3752_v28 = vsel %vm3744_vm7, %v3719_v54, %v13090_v13  ;;  %v2843_v50 = vsel %vm12230_vm9, %v2841_v40, %v2842_v10  ;;  %v519_v57 = vld [vmem:[#allocation2 + $0x90] sm:$0x1]  ;;  %v13275_v10 = vpop.permute.xlu1 %3191 }
 0x116   : > { %v1105_v2 = vld [vmem:[#allocation2 + $0x8c] sm:$0x1]  ;;  %v1389_v18 = vrot.slane %v1387_v29, 5  ;;  %v2569_v14 = vshll.u32 %v2326_v47, 16  ;;  %v1376_v61 = vsel %vm12325_vm14, %v1371_v35, %v1375_v46  ;;  %v10515_v43 = vcombine.low %v2840_v24, %v2843_v50 }
 0x117   : > { %v1384_v45 = vor.u32 %v1383_v0, %v1380_v19  ;;  %v1393_v17 = vrot.slane %v1391_v6, 4  ;;  %v1397_v53 = vshll.u32 %v1105_v2, 16  ;;  %v3750_v22 = vsel %vm3744_vm7, %v3717_v32, %v13035_v30  ;;  %v462_v32 = vld [vmem:[%s12215_s24 + $0x2e] sm:$0x3] }
 0x118   : > { %v10372_v13 = vrot.slane %v2726_v7, 9  ;;  %v2571_v41 = vrot.slane %v2569_v14, 5  ;;  %3613 = vrot.lane.b32.xlu0 %v10515_v43, %s15707_s0  ;;  %v2846_v60 = vrot.slane %v13204_v5, 5  ;;  %v2849_v54 = vrot.slane %v2326_v47, 5  ;;  %v461_v5 = vld [vmem:[%s12215_s24 + $0x2c] sm:$0x3] }
 0x119   : > { %v1385_v59 = vrot.slane %v1384_v45, 4  ;;  %v1394_v49 = vor.u32 %v1393_v17, %v1389_v18  ;;  %v1399_v46 = vrot.slane %v1397_v53, 5  ;;  %v10342_v3 = vrot.slane %v1508_v33, 9 }
 0x11a   : > { %v1643_v34 = vrot.slane %v13234_v44, 5  ;;  %v2572_v30 = vsel %vm12325_vm14, %v2567_v55, %v2571_v41  ;;  %v10405_v21 = vcombine.low %v1366_v4, %v1376_v61  ;;  %v2847_v63 = vsel %vm12230_vm9, %v10372_v13, %v2846_v60  ;;  %v13285_v44 = vpop.permute.xlu0 %3349  ;;  %v13310_v61 = vld [vmem:[#allocation2 + $0x88] sm:$0xf] }
 0x11b   : > { %v2848_v7 = vrot.slane %v2846_v60, 4  ;;  %v10500_v35 = vcombine.low %v2562_v31, %v2572_v30  ;;  %v1395_v24 = vrot.slane %v1394_v49, 4  ;;  %v3785_v40 = vsel %vm15673_vm12, %v3752_v28, %v13127_v27  ;;  %v13295_v31 = vld [vmem:[#allocation2 + $0x84] sm:$0xf]  ;;  %v575_v60 = vld [vmem:[#allocation2 + $0x98] sm:$0x1] }
 0x11c   : > { %v1645_v29 = vrot.slane %v1643_v34, 4  ;;  %v1390_v19 = vsel %vm12325_vm14, %v1385_v59, %v1389_v18  ;;  %v13293_v0 = vsel %vm12230_vm9, %v10342_v3, %v1643_v34  ;;  %v1646_v6 = vrot.slane %v1105_v2, 5  ;;  %v13317_v17 = vpop.permute.xlu1 %3271  ;;  %v13328_v34 = vld [vmem:[#allocation2 + $0x8c] sm:$0x1] }
 0x11d   : > { %v2850_v55 = vsel %vm12230_vm9, %v2848_v7, %v2849_v54  ;;  %3535 = vrot.lane.b32.xlu1 %v10500_v35, %s15703_s23  ;;  %v1400_v27 = vsel %vm12325_vm14, %v1395_v24, %v1399_v46  ;;  %v10341_v4 = vrot.slane %v1507_v52, 9  ;;  %v1636_v28 = vrot.slane %v13211_v11, 5  ;;  %v2118_v7 = vld [vmem:[#allocation2 + $0x84] sm:$0xe] }
 0x11e   : > { %v10516_v47 = vcombine.low %v2847_v63, %v2850_v55  ;;  %v13303_v50 = vsel %vm12230_vm9, %v1645_v29, %v1646_v6  ;;  %v3783_v18 = vsel %vm15673_vm12, %v3750_v22, %v13073_v15  ;;  %v1639_v2 = vrot.slane %v13220_v25, 5  ;;  %v13326_v54 = vpop.permute.xlu0 %3445  ;;  %v463_v55 = vld [vmem:[%s12215_s24 + $0x30] sm:$0x3] }
 0x11f   : > { %v520_v14 = vsel %vm12186_vm3, 0, %v519_v57  ;;  %v3818_v43 = vsel %vm15671_vm4, %v3785_v40, %v13147_v48  ;;  %v1637_v11 = vsel %vm12230_vm9, %v10341_v4, %v1636_v28  ;;  %v1638_v45 = vrot.slane %v1636_v28, 4  ;;  %v464_v28 = vld [vmem:[%s12215_s24 + $0x32] sm:$0x3] }
 0x120   : > { %3615 = vrot.lane.b32.xlu0 %v10516_v47, %s15707_s0  ;;  %521 = vst [vmem:[#allocation2 + $0x90] sm:$0x1] %v520_v14  ;;  %v615_v33 = vunpack.c.l.u8.bf16 %v461_v5  ;;  %v10406_v15 = vcombine.low %v1390_v19, %v1400_v27  ;;  %v10422_v25 = vcombine.low %v13293_v0, %v13303_v50  ;;  %v616_v53 = vunpack.c.l.u8.bf16 %v462_v32  ;;  %v522_v0 = vld [vmem:[#allocation2 + $0x9c] sm:$0x1]  ;;  %v13343_v6 = vpop.permute.xlu1 %3351 }
 0x121   : > { %v1965_v22 = vshrl.u32 %v13295_v31, 16  ;;  %3025 = vrot.lane.b32.xlu1 %v10405_v21, %s15708_s22  ;;  %v1640_v48 = vsel %vm12230_vm9, %v1638_v45, %v1639_v2  ;;  %v1968_v59 = vshll.u32 %v13295_v31, 16  ;;  %v3816_v30 = vsel %vm15671_vm4, %v3783_v18, %v13104_v16  ;;  %v11950_v45 = vld [vmem:[#allocation2 + $0x3c] sm:$0xf] }
 0x122   : > { %v815_v13 = vshrl.u32 %v615_v33, 16  ;;  %v818_v41 = vshll.u32 %v615_v33, 16  ;;  %v10421_v52 = vcombine.low %v1637_v11, %v1640_v48  ;;  %v823_v49 = vshrl.u32 %v616_v53, 16  ;;  %v11951_v33 = vld [vmem:[#allocation2 + $0x40] sm:$0xf] }
 0x123   : > { %v826_v46 = vshll.u32 %v616_v53, 16  ;;  %v1967_v3 = vrot.slane %v1965_v22, 4  ;;  %v1970_v21 = vrot.slane %v1968_v59, 5  ;;  %v1978_v63 = vshrl.u32 %v13310_v61, 16  ;;  %v11952_v22 = vld [vmem:[#allocation2 + $0x30] sm:$0xf] }
 0x124   : > { %v817_v57 = vrot.slane %v815_v13, 7  ;;  %3105 = vrot.lane.b32.xlu0 %v10421_v52, %s15705_s20  ;;  %v825_v5 = vrot.slane %v823_v49, 7  ;;  %v3851_v35 = vsel %vm15672_vm8, %v3818_v43, %v13171_v39  ;;  %v10437_v24 = vcombine.low %v13295_v31, %v13310_v61  ;;  %v13351_v43 = vpop.permute.xlu0 %3525  ;;  %v11953_v48 = vld [vmem:[#allocation2 + $0x34] sm:$0xf] }
 0x125   : > { %v576_v40 = vsel %vm12208_vm5, 0, %v575_v60  ;;  %3027 = vrot.lane.b32.xlu1 %v10406_v15, %s15708_s22  ;;  %v1971_v32 = vor.u32 %v1970_v21, %v1967_v3  ;;  %v1974_v19 = vshll.u32 %v13310_v61, 16  ;;  %v3849_v31 = vsel %vm15672_vm8, %v3816_v30, %v13135_v51  ;;  %v13369_v21 = vpop.permute.xlu1 %3447 }
 0x126   : > { %v820_v16 = vor.u32 %v818_v41, %v817_v57  ;;  %v821_v29 = vrot.slane %v817_v57, 4  ;;  %577 = vst [vmem:[#allocation2 + $0x98] sm:$0x1] %v576_v40  ;;  %v828_v39 = vor.u32 %v826_v46, %v825_v5  ;;  %v830_v27 = vrot.slane %v825_v5, 4 }
 0x127   : > { %v1027_v47 = vld [vmem:[#allocation2 + $0x90] sm:$0xf]  ;;  %v1980_v4 = vrot.slane %v1978_v63, 4  ;;  %v1972_v18 = vrot.slane %v1971_v32, 4  ;;  %v1976_v2 = vrot.slane %v1974_v19, 5  ;;  %v1984_v14 = vshll.u32 %v13328_v34, 16 }
 0x128   : > { %v1028_v50 = vsel %vm12241_vm10, %v820_v16, %v1027_v47  ;;  %v829_v11 = vsel %vm12250_vm11, %v821_v29, %v828_v39  ;;  %3201 = vrot.lane.b32.xlu0 %v10437_v24, %s15701_s16  ;;  %v3882_v51 = vsel %vm3876_vm13, %v3849_v31, %v13155_v38  ;;  %v10384_v15 = vcombine.low %v11950_v45, %v11951_v33  ;;  %v578_v24 = vld [vmem:[#allocation2 + $0xa4] sm:$0x1]  ;;  %v13382_v32 = vpop.permute.xlu0 %3605 }
 0x129   : > { %1029 = vst [vmem:[#allocation2 + $0x90] sm:$0xf] %v1028_v50  ;;  %v10357_v53 = vrot.slane %v2118_v7, 9  ;;  %3107 = vrot.lane.b32.xlu1 %v10422_v25, %s15705_s20  ;;  %1030 = vst.msk [vmem:[#allocation2 + $0x94] sm:$0xf] %vm471_vm0, %v829_v11  ;;  %v10383_v13 = vcombine.low %v11952_v22, %v11953_v48  ;;  %v1981_v41 = vor.u32 %v1980_v4, %v1976_v2  ;;  %v1986_v59 = vrot.slane %v1984_v14, 5  ;;  %v13395_v33 = vpop.permute.xlu1 %3527 }
 0x12a   : > { %v2244_v60 = vrot.slane %v13310_v61, 5  ;;  %11448 = vmatprep.mubr.msk.bf16.mxu0 %vm15667_vm2, %v3882_v51  ;;  %v1977_v38 = vsel %vm12325_vm14, %v1972_v18, %v1976_v2  ;;  %v2247_v52 = vrot.slane %v13328_v34, 5  ;;  %v523_v49 = vsel %vm12186_vm3, 0, %v522_v0 }
 0x12b   : > { %v617_v25 = vunpack.c.l.u8.bf16 %v463_v55  ;;  %v1982_v46 = vrot.slane %v1981_v41, 4  ;;  %v3647_v3 = vsel %vm15670_vm15, %v10384_v15, %v13227_v12  ;;  %524 = vst [vmem:[#allocation2 + $0x9c] sm:$0x1] %v523_v49  ;;  %v618_v30 = vunpack.c.l.u8.bf16 %v464_v28 }
 0x12c   : > { %v2246_v57 = vrot.slane %v2244_v60, 4  ;;  %v2245_v63 = vsel %vm12230_vm9, %v10357_v53, %v2244_v60  ;;  %v3884_v34 = vsel %vm3876_vm13, %v3851_v35, %v13183_v26  ;;  %v13386_v35 = vsel %vm15670_vm15, %v10383_v13, %v13202_v58 }
 0x12d   : > { %v1031_v61 = vld [vmem:[#allocation2 + $0x98] sm:$0x1]  ;;  %v832_v7 = vshrl.u32 %v617_v25, 16  ;;  %v835_v5 = vshll.u32 %v617_v25, 16  ;;  %v1987_v12 = vsel %vm12325_vm14, %v1982_v46, %v1986_v59  ;;  %v840_v29 = vshrl.u32 %v618_v30, 16  ;;  %11449 = vmatmul.mubr.msk.bf16.gmra.mrb[4].mxu0 %vm15667_vm2, %v3884_v34 }
 0x12e   : > { %v1032_v40 = vsel %vm12186_vm3, %v830_v27, %v1031_v61  ;;  %v2248_v16 = vsel %vm12230_vm9, %v2246_v57, %v2247_v52  ;;  %v10453_v19 = vcombine.low %v1977_v38, %v1987_v12  ;;  %v843_v0 = vshll.u32 %v618_v30, 16  ;;  %v13400_v52 = vpop.permute.xlu0 %3607 }
 0x12f   : > { %1033 = vst [vmem:[#allocation2 + $0x98] sm:$0x1] %v1032_v40  ;;  %v834_v55 = vrot.slane %v832_v7, 7  ;;  %v842_v39 = vrot.slane %v840_v29, 7  ;;  %v13390_v27 = vsel %vm15669_vm1, %v3647_v3, %v13255_v20  ;;  %v579_v47 = vsel %vm12208_vm5, 0, %v578_v24 }
 0x130   : > { %v1698_v26 = vld [vmem:[#allocation2 + $0x90] sm:$0xf]  ;;  %v1699_v31 = vld [vmem:[#allocation2 + $0x94] sm:$0xf]  ;;  %3281 = vrot.lane.b32.xlu0 %v10453_v19, %s15704_s30  ;;  %v10469_v18 = vcombine.low %v2245_v63, %v2248_v16  ;;  %580 = vst [vmem:[#allocation2 + $0xa4] sm:$0x1] %v579_v47 }
 0x131   : > { %v1989_v4 = vshrl.u32 %v1698_v26, 16  ;;  %v1992_v28 = vshll.u32 %v1698_v26, 16  ;;  %v2119_v50 = vld [vmem:[#allocation2 + $0x90] sm:$0xe]  ;;  %v837_v2 = vor.u32 %v835_v5, %v834_v55  ;;  %v2002_v14 = vshrl.u32 %v1699_v31, 16 }
 0x132   : > { %v10438_v58 = vcombine.low %v1698_v26, %v1699_v31  ;;  %v1998_v11 = vshll.u32 %v1699_v31, 16  ;;  %v2251_v51 = vrot.slane %v1699_v31, 5  ;;  %v2305_v45 = vld [vmem:[#allocation2 + $0x90] sm:$0xf]  ;;  %v838_v53 = vrot.slane %v834_v55, 4 }
 0x133   : > { %v1991_v20 = vrot.slane %v1989_v4, 4  ;;  %v1994_v15 = vrot.slane %v1992_v28, 5  ;;  %v845_v22 = vor.u32 %v843_v0, %v842_v39  ;;  %v1034_v48 = vld [vmem:[#allocation2 + $0x9c] sm:$0xf]  ;;  %v2004_v41 = vrot.slane %v2002_v14, 4 }
 0x134   : > { %3203 = vrot.lane.b32.xlu1 %v10438_v58, %s15701_s16  ;;  %v2000_v13 = vrot.slane %v1998_v11, 5  ;;  %v10358_v59 = vrot.slane %v2119_v50, 9  ;;  %v2253_v60 = vrot.slane %v2251_v51, 4  ;;  %v13398_v38 = vld [vmem:[#allocation2 + $0x94] sm:$0xf]  ;;  %3361 = vrot.lane.b32.xlu0 %v10469_v18, %s15702_s21  ;;  %v847_v46 = vrot.slane %v842_v39, 4  ;;  %v13413_v39 = vpop.permute.xlu1 %3017  ;;  %v13426_v11 = vpop.permute.xlu0 %3097 }
 0x135   : > { %v1995_v49 = vor.u32 %v1994_v15, %v1991_v20  ;;  %v846_v25 = vsel %vm12250_vm11, %v838_v53, %v845_v22  ;;  %v1035_v3 = vsel %vm12241_vm10, %v837_v2, %v1034_v48  ;;  %v2574_v61 = vshrl.u32 %v2305_v45, 16  ;;  %v1086_v5 = vld [vmem:[#allocation2 + $0x90] sm:$0xf]  ;;  %v13422_v50 = vld [vmem:[#allocation2 + $0x94] sm:$0xf] }
 0x136   : > { %v1719_v57 = vld [vmem:[#allocation2 + $0x98] sm:$0x1]  ;;  %v2005_v30 = vor.u32 %v2004_v41, %v2000_v13  ;;  %1036 = vst [vmem:[#allocation2 + $0x9c] sm:$0xf] %v1035_v3  ;;  %1037 = vst.msk [vmem:[#allocation2 + $0xa0] sm:$0xf] %vm471_vm0, %v846_v25  ;;  %v10485_v12 = vcombine.low %v2305_v45, %v13398_v38  ;;  %v2252_v4 = vsel %vm12230_vm9, %v10358_v59, %v2251_v51 }
 0x137   : > { %v2577_v63 = vshll.u32 %v2305_v45, 16  ;;  %v2587_v7 = vshrl.u32 %v13398_v38, 16  ;;  %v1996_v34 = vrot.slane %v1995_v49, 4  ;;  %v2008_v24 = vshll.u32 %v1719_v57, 16  ;;  %v13410_v16 = vld [vmem:[#allocation2 + $0x98] sm:$0x1] }
 0x138   : > { %v2254_v40 = vrot.slane %v1719_v57, 5  ;;  %v2006_v29 = vrot.slane %v2005_v30, 4  ;;  %v2576_v19 = vrot.slane %v2574_v61, 4  ;;  %v1038_v0 = vld [vmem:[#allocation2 + $0xa4] sm:$0x1]  ;;  %v2583_v26 = vshll.u32 %v13398_v38, 16  ;;  %3457 = vrot.lane.b32.xlu0 %v10485_v12, %s15699_s15 }
 0x139   : > { %v2579_v55 = vrot.slane %v2577_v63, 5  ;;  %v2001_v47 = vsel %vm12325_vm14, %v1996_v34, %v2000_v13  ;;  %v2010_v31 = vrot.slane %v2008_v24, 5  ;;  %v1039_v28 = vsel %vm12186_vm3, %v847_v46, %v1038_v0  ;;  %v13442_v63 = vpop.permute.xlu1 %3019 }
 0x13a   : > { %v2255_v18 = vsel %vm12230_vm9, %v2253_v60, %v2254_v40  ;;  %1040 = vst [vmem:[#allocation2 + $0xa4] sm:$0x1] %v1039_v28  ;;  %v2585_v14 = vrot.slane %v2583_v26, 5  ;;  %v2589_v58 = vrot.slane %v2587_v7, 4  ;;  %v2593_v51 = vshll.u32 %v13410_v16, 16 }
 0x13b   : > { %v2580_v2 = vor.u32 %v2579_v55, %v2576_v19  ;;  %v2011_v45 = vsel %vm12325_vm14, %v2006_v29, %v2010_v31  ;;  %v1402_v20 = vshrl.u32 %v1086_v5, 16  ;;  %v1405_v15 = vshll.u32 %v1086_v5, 16  ;;  %v13449_v19 = vpop.permute.xlu0 %3193 }
 0x13c   : > { %v10454_v53 = vcombine.low %v2001_v47, %v2011_v45  ;;  %v2590_v48 = vor.u32 %v2589_v58, %v2585_v14  ;;  %v1411_v13 = vshll.u32 %v13422_v50, 16  ;;  %v10470_v41 = vcombine.low %v2252_v4, %v2255_v18  ;;  %v2727_v4 = vld [vmem:[#allocation2 + $0x90] sm:$0xe] }
 0x13d   : > { %v2581_v22 = vrot.slane %v2580_v2, 4  ;;  %v2307_v59 = vld [vmem:[#allocation2 + $0x9c] sm:$0xf]  ;;  %v13432_v60 = vld [vmem:[#allocation2 + $0xa0] sm:$0xf]  ;;  %v13437_v49 = vsel %vm15669_vm1, %v13386_v35, %v13213_v62  ;;  %v2595_v25 = vrot.slane %v2593_v51, 5  ;;  %v3723_v45 = vsel %vm15668_vm6, %v13390_v27, %v13275_v10 }
 0x13e   : > { %v1404_v46 = vrot.slane %v1402_v20, 4  ;;  %3283 = vrot.lane.b32.xlu1 %v10454_v53, %s15704_s30  ;;  %v2598_v3 = vshrl.u32 %v2307_v59, 16  ;;  %v2601_v57 = vshll.u32 %v2307_v59, 16  ;;  %v2611_v30 = vshrl.u32 %v13432_v60, 16  ;;  %v13447_v62 = vld [vmem:[#allocation2 + $0x98] sm:$0x1] }
 0x13f   : > { %v10486_v61 = vcombine.low %v2307_v59, %v13432_v60  ;;  %v2607_v7 = vshll.u32 %v13432_v60, 16  ;;  %v2586_v5 = vsel %vm12325_vm14, %v2581_v22, %v2585_v14  ;;  %v2591_v34 = vrot.slane %v2590_v48, 4 }
 0x140   : > { %v1407_v35 = vrot.slane %v1405_v15, 5  ;;  %v2600_v24 = vrot.slane %v2598_v3, 4  ;;  %v2603_v40 = vrot.slane %v2601_v57, 5  ;;  %v2613_v12 = vrot.slane %v2611_v30, 4  ;;  %v1088_v15 = vld [vmem:[#allocation2 + $0x9c] sm:$0xf] }
 0x141   : > { %v1413_v29 = vrot.slane %v1411_v13, 5  ;;  %v13451_v55 = vld [vmem:[#allocation2 + $0xa4] sm:$0x1]  ;;  %v2609_v0 = vrot.slane %v2607_v7, 5  ;;  %v2596_v26 = vsel %vm12325_vm14, %v2591_v34, %v2595_v25  ;;  %v1415_v31 = vshrl.u32 %v13422_v50, 16  ;;  %v13472_v34 = vpop.permute.xlu0 %3273 }
 0x142   : > { %v1408_v47 = vor.u32 %v1407_v35, %v1404_v46  ;;  %3363 = vrot.lane.b32.xlu1 %v10470_v41, %s15702_s21  ;;  %v2604_v28 = vor.u32 %v2603_v40, %v2600_v24  ;;  %v2617_v18 = vshll.u32 %v13451_v55, 16  ;;  %v10501_v2 = vcombine.low %v2586_v5, %v2596_v26  ;;  %v13463_v41 = vpop.permute.xlu1 %3099  ;;  %v1089_v57 = vld [vmem:[#allocation2 + $0xa0] sm:$0xf]  ;;  %v1107_v30 = vld [vmem:[#allocation2 + $0xa4] sm:$0x1] }
 0x143   : > { %v1421_v14 = vshll.u32 %v13447_v62, 16  ;;  %v2614_v58 = vor.u32 %v2613_v12, %v2609_v0  ;;  %v1417_v20 = vrot.slane %v1415_v31, 4  ;;  %v10373_v13 = vrot.slane %v2727_v4, 9  ;;  %v2728_v4 = vld [vmem:[#allocation2 + $0x9c] sm:$0xe] }
 0x144   : > { %v1409_v51 = vrot.slane %v1408_v47, 4  ;;  %v2605_v53 = vrot.slane %v2604_v28, 4  ;;  %v2619_v22 = vrot.slane %v2617_v18, 5  ;;  %3537 = vrot.lane.b32.xlu0 %v10501_v2, %s15703_s23  ;;  %v2853_v3 = vrot.slane %v13398_v38, 5 }
 0x145   : > { %v1423_v48 = vrot.slane %v1421_v14, 5  ;;  %v2615_v59 = vrot.slane %v2614_v58, 4  ;;  %v1418_v46 = vor.u32 %v1417_v20, %v1413_v29  ;;  %v2856_v27 = vrot.slane %v13410_v16, 5  ;;  %v1510_v58 = vld [vmem:[#allocation2 + $0x9c] sm:$0xe] }
 0x146   : > { %v1414_v25 = vsel %vm12325_vm14, %v1409_v51, %v1413_v29  ;;  %3459 = vrot.lane.b32.xlu1 %v10486_v61, %s15699_s15  ;;  %v2610_v10 = vsel %vm12325_vm14, %v2605_v53, %v2609_v0  ;;  %v1426_v7 = vshrl.u32 %v1088_v15, 16  ;;  %v1429_v5 = vshll.u32 %v1088_v15, 16  ;;  %v13483_v51 = vpop.permute.xlu1 %3195 }
 0x147   : > { %v2620_v35 = vsel %vm12325_vm14, %v2615_v59, %v2619_v22  ;;  %v1419_v24 = vrot.slane %v1418_v46, 4  ;;  %v2854_v38 = vsel %vm12230_vm9, %v10373_v13, %v2853_v3  ;;  %v2855_v40 = vrot.slane %v2853_v3, 4  ;;  %v525_v46 = vld [vmem:[#allocation2 + $0xa8] sm:$0x1]  ;;  %v13492_v3 = vpop.permute.xlu0 %3353 }
 0x148   : > { %v10502_v12 = vcombine.low %v2610_v10, %v2620_v35  ;;  %v1428_v61 = vrot.slane %v1426_v7, 4  ;;  %v1431_v29 = vrot.slane %v1429_v5, 5  ;;  %v1435_v26 = vshll.u32 %v1089_v57, 16  ;;  %v465_v5 = vld [vmem:[%s12215_s24 + $0x34] sm:$0x3] }
 0x149   : > { %v1424_v16 = vsel %vm12325_vm14, %v1419_v24, %v1423_v48  ;;  %v2857_v0 = vsel %vm12230_vm9, %v2855_v40, %v2856_v27  ;;  %v1439_v47 = vshrl.u32 %v1089_v57, 16  ;;  %v1445_v31 = vshll.u32 %v1107_v30, 16 }
 0x14a   : > { %3539 = vrot.lane.b32.xlu1 %v10502_v12, %s15703_s23  ;;  %v10407_v28 = vcombine.low %v1414_v25, %v1424_v16  ;;  %v10517_v18 = vcombine.low %v2854_v38, %v2857_v0  ;;  %v1432_v2 = vor.u32 %v1431_v29, %v1428_v61  ;;  %v1437_v14 = vrot.slane %v1435_v26, 5  ;;  %v13512_v61 = vpop.permute.xlu1 %3275 }
 0x14b   : > { %v3721_v20 = vsel %vm15668_vm6, %v13437_v49, %v13240_v37  ;;  %v3756_v15 = vsel %vm3744_vm7, %v3723_v45, %v13317_v17  ;;  %v1441_v53 = vrot.slane %v1439_v47, 4  ;;  %v1447_v22 = vrot.slane %v1445_v31, 5  ;;  %v1509_v17 = vld [vmem:[#allocation2 + $0x90] sm:$0xe]  ;;  %v1700_v47 = vld [vmem:[#allocation2 + $0x9c] sm:$0xf] }
 0x14c   : > { %3617 = vrot.lane.b32.xlu0 %v10517_v18, %s15707_s0  ;;  %v1433_v48 = vrot.slane %v1432_v2, 4  ;;  %v1660_v13 = vrot.slane %v1107_v30, 5  ;;  %v10374_v59 = vrot.slane %v2728_v4, 9  ;;  %v2860_v25 = vrot.slane %v13432_v60, 5  ;;  %v13522_v18 = vpop.permute.xlu0 %3449 }
 0x14d   : > { %v1442_v10 = vor.u32 %v1441_v53, %v1437_v14  ;;  %v2863_v27 = vrot.slane %v13451_v55, 5  ;;  %v10344_v37 = vrot.slane %v1510_v58, 9  ;;  %v1657_v49 = vrot.slane %v1089_v57, 5  ;;  %v13527_v53 = vld [vmem:[#allocation2 + $0xa0] sm:$0xf] }
 0x14e   : > { %v1653_v45 = vrot.slane %v13447_v62, 5  ;;  %3029 = vrot.lane.b32.xlu1 %v10407_v28, %s15708_s22  ;;  %v3754_v30 = vsel %vm3744_vm7, %v3721_v20, %v13266_v56  ;;  %v2861_v60 = vsel %vm12230_vm9, %v10374_v59, %v2860_v25  ;;  %v2862_v7 = vrot.slane %v2860_v25, 4  ;;  %v466_v56 = vld [vmem:[%s12215_s24 + $0x36] sm:$0x3] }
 0x14f   : > { %v1438_v35 = vsel %vm12325_vm14, %v1433_v48, %v1437_v14  ;;  %v1443_v55 = vrot.slane %v1442_v10, 4  ;;  %v1658_v57 = vsel %vm12230_vm9, %v10344_v37, %v1657_v49  ;;  %v1659_v24 = vrot.slane %v1657_v49, 4 }
 0x150   : > { %v2864_v62 = vsel %vm12230_vm9, %v2862_v7, %v2863_v27  ;;  %v10343_v38 = vrot.slane %v1509_v17, 9  ;;  %v1650_v40 = vrot.slane %v13422_v50, 5  ;;  %v526_v12 = vsel %vm12186_vm3, 0, %v525_v46  ;;  %v13534_v17 = vpop.permute.xlu1 %3355 }
 0x151   : > { %v1448_v29 = vsel %vm12325_vm14, %v1443_v55, %v1447_v22  ;;  %v10518_v26 = vcombine.low %v2861_v60, %v2864_v62  ;;  %v1661_v16 = vsel %vm12230_vm9, %v1659_v24, %v1660_v13  ;;  %527 = vst [vmem:[#allocation2 + $0xa8] sm:$0x1] %v526_v12  ;;  %v619_v0 = vunpack.c.l.u8.bf16 %v465_v5  ;;  %v581_v13 = vld [vmem:[#allocation2 + $0xb0] sm:$0x1]  ;;  %v1720_v5 = vld [vmem:[#allocation2 + $0xa4] sm:$0x1] }
 0x152   : > { %v10408_v31 = vcombine.low %v1438_v35, %v1448_v29  ;;  %v3789_v50 = vsel %vm15673_vm12, %v3756_v15, %v13343_v6  ;;  %v1651_v4 = vsel %vm12230_vm9, %v10343_v38, %v1650_v40  ;;  %v1652_v28 = vrot.slane %v1650_v40, 4  ;;  %v2120_v38 = vld [vmem:[#allocation2 + $0x9c] sm:$0xe]  ;;  %v13545_v40 = vpop.permute.xlu0 %3529 }
 0x153   : > { %3619 = vrot.lane.b32.xlu0 %v10518_v26, %s15707_s0  ;;  %v3787_v2 = vsel %vm15673_vm12, %v3754_v30, %v13285_v44  ;;  %v620_v14 = vunpack.c.l.u8.bf16 %v466_v56  ;;  %v849_v58 = vshrl.u32 %v619_v0, 16  ;;  %v852_v20 = vshll.u32 %v619_v0, 16  ;;  %v528_v26 = vld [vmem:[#allocation2 + $0xb4] sm:$0x1] }
 0x154   : > { %3031 = vrot.lane.b32.xlu1 %v10408_v31, %s15708_s22  ;;  %v10424_v22 = vcombine.low %v1658_v57, %v1661_v16  ;;  %v1654_v6 = vsel %vm12230_vm9, %v1652_v28, %v1653_v45  ;;  %v2013_v15 = vshrl.u32 %v1700_v47, 16  ;;  %v2016_v48 = vshll.u32 %v1700_v47, 16  ;;  %v467_v31 = vld [vmem:[%s12215_s24 + $0x38] sm:$0x3]  ;;  %v11955_v28 = vld [vmem:[#allocation2 + $0x4c] sm:$0xf] }
 0x155   : > { %v10423_v59 = vcombine.low %v1651_v4, %v1654_v6  ;;  %v851_v25 = vrot.slane %v849_v58, 7  ;;  %v857_v46 = vshrl.u32 %v620_v14, 16  ;;  %v860_v10 = vshll.u32 %v620_v14, 16  ;;  %v11954_v4 = vld [vmem:[#allocation2 + $0x48] sm:$0xf] }
 0x156   : > { %v2015_v27 = vrot.slane %v2013_v15, 4  ;;  %v2018_v44 = vrot.slane %v2016_v48, 5  ;;  %v2026_v37 = vshrl.u32 %v13527_v53, 16  ;;  %v10439_v49 = vcombine.low %v1700_v47, %v13527_v53  ;;  %v468_v58 = vld [vmem:[%s12215_s24 + $0x3a] sm:$0x3]  ;;  %v13563_v15 = vpop.permute.xlu1 %3451 }
 0x157   : > { %3109 = vrot.lane.b32.xlu0 %v10423_v59, %s15705_s20  ;;  %v854_v30 = vor.u32 %v852_v20, %v851_v25  ;;  %v855_v60 = vrot.slane %v851_v25, 4  ;;  %v859_v45 = vrot.slane %v857_v46, 7  ;;  %v582_v7 = vsel %vm12208_vm5, 0, %v581_v13  ;;  %v11956_v48 = vld [vmem:[#allocation2 + $0x54] sm:$0xf] }
 0x158   : > { %3111 = vrot.lane.b32.xlu1 %v10424_v22, %s15705_s20  ;;  %v3822_v35 = vsel %vm15671_vm4, %v3789_v50, %v13369_v21  ;;  %v1041_v55 = vld [vmem:[#allocation2 + $0xa8] sm:$0xf]  ;;  %v3820_v57 = vsel %vm15671_vm4, %v3787_v2, %v13326_v54  ;;  %583 = vst [vmem:[#allocation2 + $0xb0] sm:$0x1] %v582_v7  ;;  %v2019_v24 = vor.u32 %v2018_v44, %v2015_v27  ;;  %v2022_v62 = vshll.u32 %v13527_v53, 16 }
 0x159   : > { %v862_v56 = vor.u32 %v860_v10, %v859_v45  ;;  %v1042_v12 = vsel %vm12241_vm10, %v854_v30, %v1041_v55  ;;  %v3855_v29 = vsel %vm15672_vm8, %v3822_v35, %v13395_v33  ;;  %v2028_v21 = vrot.slane %v2026_v37, 4  ;;  %v11957_v13 = vld [vmem:[#allocation2 + $0x58] sm:$0xf] }
 0x15a   : > { %1043 = vst [vmem:[#allocation2 + $0xa8] sm:$0xf] %v1042_v12  ;;  %v3853_v54 = vsel %vm15672_vm8, %v3820_v57, %v13351_v43  ;;  %v2020_v16 = vrot.slane %v2019_v24, 4  ;;  %v2024_v0 = vrot.slane %v2022_v62, 5  ;;  %v2032_v47 = vshll.u32 %v1720_v5, 16 }
 0x15b   : > { %v863_v50 = vsel %vm12250_vm11, %v855_v60, %v862_v56  ;;  %3205 = vrot.lane.b32.xlu0 %v10439_v49, %s15701_s16  ;;  %v10385_v2 = vcombine.low %v11954_v4, %v11955_v28  ;;  %v3886_v33 = vsel %vm3876_vm13, %v3853_v54, %v13382_v32  ;;  %v10359_v14 = vrot.slane %v2120_v38, 9 }
 0x15c   : > { %v864_v20 = vrot.slane %v859_v45, 4  ;;  %1044 = vst.msk [vmem:[#allocation2 + $0xac] sm:$0xf] %vm471_vm0, %v863_v50  ;;  %v2029_v43 = vor.u32 %v2028_v21, %v2024_v0  ;;  %v2034_v22 = vrot.slane %v2032_v47, 5  ;;  %v2258_v6 = vrot.slane %v13527_v53, 5  ;;  %11452 = vmatprep.mubr.msk.bf16.mxu0 %vm15667_vm2, %v3886_v33  ;;  %v13569_v53 = vpop.permute.xlu0 %3609 }
 0x15d   : > { %v10386_v59 = vcombine.low %v11956_v48, %v11957_v13  ;;  %v2261_v25 = vrot.slane %v1720_v5, 5  ;;  %v529_v32 = vsel %vm12186_vm3, 0, %v528_v26  ;;  %v621_v46 = vunpack.c.l.u8.bf16 %v467_v31 }
 0x15e   : > { %v2025_v10 = vsel %vm12325_vm14, %v2020_v16, %v2024_v0  ;;  %v2030_v27 = vrot.slane %v2029_v43, 4  ;;  %v2260_v44 = vrot.slane %v2258_v6, 4  ;;  %530 = vst [vmem:[#allocation2 + $0xb4] sm:$0x1] %v529_v32  ;;  %v622_v37 = vunpack.c.l.u8.bf16 %v468_v58  ;;  %v13588_v16 = vpop.permute.xlu1 %3531 }
 0x15f   : > { %v1045_v49 = vld [vmem:[#allocation2 + $0xb0] sm:$0x1]  ;;  %v2259_v30 = vsel %vm12230_vm9, %v10359_v14, %v2258_v6  ;;  %v866_v60 = vshrl.u32 %v621_v46, 16  ;;  %v869_v45 = vshll.u32 %v621_v46, 16  ;;  %v3888_v7 = vsel %vm3876_vm13, %v3855_v29, %v13400_v52  ;;  %v584_v46 = vld [vmem:[#allocation2 + $0xbc] sm:$0x1] }
 0x160   : > { %v1046_v5 = vsel %vm12186_vm3, %v864_v20, %v1045_v49  ;;  %v2035_v35 = vsel %vm12325_vm14, %v2030_v27, %v2034_v22  ;;  %v2262_v55 = vsel %vm12230_vm9, %v2260_v44, %v2261_v25  ;;  %v874_v57 = vshrl.u32 %v622_v37, 16  ;;  %11453 = vmatmul.mubr.msk.bf16.gmra.mrb[8].mxu0 %vm15667_vm2, %v3888_v7  ;;  %v13591_v58 = vpop.permute.xlu0 %3611 }
 0x161   : > { %v1702_v24 = vld [vmem:[#allocation2 + $0xa8] sm:$0xf]  ;;  %1047 = vst [vmem:[#allocation2 + $0xb0] sm:$0x1] %v1046_v5  ;;  %v13584_v62 = vsel %vm15670_vm15, %v10385_v2, %v13413_v39  ;;  %v10455_v38 = vcombine.low %v2025_v10, %v2035_v35  ;;  %v868_v52 = vrot.slane %v866_v60, 7  ;;  %v877_v56 = vshll.u32 %v622_v37, 16 }
 0x162   : > { %v2037_v12 = vshrl.u32 %v1702_v24, 16  ;;  %v2040_v29 = vshll.u32 %v1702_v24, 16  ;;  %v3653_v21 = vsel %vm15670_vm15, %v10386_v59, %v13442_v63  ;;  %v876_v26 = vrot.slane %v874_v57, 7  ;;  %v2309_v54 = vld [vmem:[#allocation2 + $0xa8] sm:$0xf]  ;;  %v13610_v5 = vpop.permute.xlu1 %3021 }
 0x163   : > { %v1703_v0 = vld [vmem:[#allocation2 + $0xac] sm:$0xf]  ;;  %3285 = vrot.lane.b32.xlu0 %v10455_v38, %s15704_s30  ;;  %v2121_v47 = vld [vmem:[#allocation2 + $0xa8] sm:$0xe]  ;;  %v10471_v31 = vcombine.low %v2259_v30, %v2262_v55  ;;  %v871_v50 = vor.u32 %v869_v45, %v868_v52  ;;  %v872_v39 = vrot.slane %v868_v52, 4  ;;  %v2622_v4 = vshrl.u32 %v2309_v54, 16 }
 0x164   : > { %v2039_v28 = vrot.slane %v2037_v12, 4  ;;  %v2042_v2 = vrot.slane %v2040_v29, 5  ;;  %v2050_v33 = vshrl.u32 %v1703_v0, 16  ;;  %v10440_v14 = vcombine.low %v1702_v24, %v1703_v0  ;;  %v13597_v48 = vld [vmem:[#allocation2 + $0xac] sm:$0xf] }
 0x165   : > { %v2046_v20 = vshll.u32 %v1703_v0, 16  ;;  %v2265_v63 = vrot.slane %v1703_v0, 5  ;;  %v879_v43 = vor.u32 %v877_v56, %v876_v26  ;;  %v1048_v22 = vld [vmem:[#allocation2 + $0xb4] sm:$0xf]  ;;  %v13595_v6 = vsel %vm15669_vm1, %v3653_v21, %v13463_v41  ;;  %v13608_v7 = vld [vmem:[#allocation2 + $0xa8] sm:$0xf] }
 0x166   : > { %3207 = vrot.lane.b32.xlu1 %v10440_v14, %s15701_s16  ;;  %v2043_v13 = vor.u32 %v2042_v2, %v2039_v28  ;;  %v2052_v59 = vrot.slane %v2050_v33, 4  ;;  %v10360_v25 = vrot.slane %v2121_v47, 9  ;;  %v1049_v32 = vsel %vm12241_vm10, %v871_v50, %v1048_v22  ;;  %v13619_v21 = vld [vmem:[#allocation2 + $0xac] sm:$0xf] }
 0x167   : > { %v2048_v10 = vrot.slane %v2046_v20, 5  ;;  %v2267_v27 = vrot.slane %v2265_v63, 4  ;;  %3365 = vrot.lane.b32.xlu0 %v10471_v31, %s15702_s21  ;;  %v880_v44 = vsel %vm12250_vm11, %v872_v39, %v879_v43  ;;  %1050 = vst [vmem:[#allocation2 + $0xb4] sm:$0xf] %v1049_v32  ;;  %v2624_v41 = vrot.slane %v2622_v4, 4 }
 0x168   : > { %v1721_v37 = vld [vmem:[#allocation2 + $0xb0] sm:$0x1]  ;;  %v2044_v49 = vrot.slane %v2043_v13, 4  ;;  %1051 = vst.msk [vmem:[#allocation2 + $0xb8] sm:$0xf] %vm471_vm0, %v880_v44  ;;  %v2625_v30 = vshll.u32 %v2309_v54, 16  ;;  %v10487_v45 = vcombine.low %v2309_v54, %v13597_v48  ;;  %v2266_v52 = vsel %vm12230_vm9, %v10360_v25, %v2265_v63  ;;  %v13621_v54 = vpop.permute.xlu0 %3101  ;;  %v13634_v25 = vpop.permute.xlu1 %3023 }
 0x169   : > { %v2635_v60 = vshrl.u32 %v13597_v48, 16  ;;  %v2053_v35 = vor.u32 %v2052_v59, %v2048_v10  ;;  %v2056_v55 = vshll.u32 %v1721_v37, 16  ;;  %v2268_v57 = vrot.slane %v1721_v37, 5  ;;  %v13614_v38 = vld [vmem:[#allocation2 + $0xb0] sm:$0x1] }
 0x16a   : > { %v585_v24 = vsel %vm12208_vm5, 0, %v584_v46  ;;  %v881_v56 = vrot.slane %v876_v26, 4  ;;  %v2627_v12 = vrot.slane %v2625_v30, 5  ;;  %v2631_v29 = vshll.u32 %v13597_v48, 16 }
 0x16b   : > { %586 = vst [vmem:[#allocation2 + $0xbc] sm:$0x1] %v585_v24  ;;  %v2049_v0 = vsel %vm12325_vm14, %v2044_v49, %v2048_v10  ;;  %v2054_v47 = vrot.slane %v2053_v35, 4  ;;  %v2058_v31 = vrot.slane %v2056_v55, 5  ;;  %3461 = vrot.lane.b32.xlu0 %v10487_v45, %s15699_s15  ;;  %v2637_v50 = vrot.slane %v2635_v60, 4 }
 0x16c   : > { %v2269_v39 = vsel %vm12230_vm9, %v2267_v27, %v2268_v57  ;;  %v2628_v26 = vor.u32 %v2627_v12, %v2624_v41  ;;  %v2633_v4 = vrot.slane %v2631_v29, 5  ;;  %v2641_v28 = vshll.u32 %v13614_v38, 16  ;;  %v13643_v60 = vld [vmem:[#allocation2 + $0xb0] sm:$0x1]  ;;  %v13645_v45 = vpop.permute.xlu0 %3197 }
 0x16d   : > { %v2059_v2 = vsel %vm12325_vm14, %v2054_v47, %v2058_v31  ;;  %v1450_v33 = vshrl.u32 %v13608_v7, 16  ;;  %v1453_v14 = vshll.u32 %v13608_v7, 16  ;;  %v1459_v20 = vshll.u32 %v13619_v21, 16 }
 0x16e   : > { %v10456_v63 = vcombine.low %v2049_v0, %v2059_v2  ;;  %v2311_v43 = vld [vmem:[#allocation2 + $0xb4] sm:$0xf]  ;;  %v2629_v22 = vrot.slane %v2628_v26, 4  ;;  %v2638_v13 = vor.u32 %v2637_v50, %v2633_v4  ;;  %v2643_v59 = vrot.slane %v2641_v28, 5 }
 0x16f   : > { %v13636_v32 = vld [vmem:[#allocation2 + $0xb8] sm:$0xf]  ;;  %v2646_v46 = vshrl.u32 %v2311_v43, 16  ;;  %v2649_v10 = vshll.u32 %v2311_v43, 16  ;;  %v1452_v27 = vrot.slane %v1450_v33, 4  ;;  %v1455_v44 = vrot.slane %v1453_v14, 5 }
 0x170   : > { %3287 = vrot.lane.b32.xlu1 %v10456_v63, %s15704_s30  ;;  %v10472_v41 = vcombine.low %v2266_v52, %v2269_v39  ;;  %v2659_v37 = vshrl.u32 %v13636_v32, 16  ;;  %v2655_v49 = vshll.u32 %v13636_v32, 16  ;;  %v2634_v30 = vsel %vm12325_vm14, %v2629_v22, %v2633_v4  ;;  %v2729_v4 = vld [vmem:[#allocation2 + $0xa8] sm:$0xe]  ;;  %v13664_v14 = vld [vmem:[#allocation2 + $0xb4] sm:$0xf] }
 0x171   : > { %v2648_v35 = vrot.slane %v2646_v46, 4  ;;  %v2651_v55 = vrot.slane %v2649_v10, 5  ;;  %v2639_v24 = vrot.slane %v2638_v13, 4  ;;  %v1456_v12 = vor.u32 %v1455_v44, %v1452_v27  ;;  %v13682_v27 = vpop.permute.xlu0 %3277 }
 0x172   : > { %v1052_v57 = vld [vmem:[#allocation2 + $0xbc] sm:$0x1]  ;;  %v13649_v52 = vrot.slane %v2655_v49, 5  ;;  %v2661_v0 = vrot.slane %v2659_v37, 4  ;;  %v13651_v47 = vrot.slane %v1459_v20, 5  ;;  %v1463_v26 = vshrl.u32 %v13619_v21, 16  ;;  %v13666_v20 = vpop.permute.xlu1 %3103 }
 0x173   : > { %v1053_v29 = vsel %vm12186_vm3, %v881_v56, %v1052_v57  ;;  %v2652_v31 = vor.u32 %v2651_v55, %v2648_v35  ;;  %v2644_v50 = vsel %vm12325_vm14, %v2639_v24, %v2643_v59  ;;  %v13655_v39 = vrot.slane %v1456_v12, 4  ;;  %v13674_v59 = vld [vmem:[#allocation2 + $0xb8] sm:$0xf]  ;;  %v2730_v24 = vld [vmem:[#allocation2 + $0xb4] sm:$0xe] }
 0x174   : > { %1054 = vst [vmem:[#allocation2 + $0xbc] sm:$0x1] %v1053_v29  ;;  %3367 = vrot.lane.b32.xlu1 %v10472_v41, %s15702_s21  ;;  %v10488_v28 = vcombine.low %v2311_v43, %v13636_v32  ;;  %v3692_v56 = vsel %vm15669_vm1, %v13584_v62, %v13426_v11  ;;  %v10503_v2 = vcombine.low %v2634_v30, %v2644_v50  ;;  %v1469_v33 = vshll.u32 %v13643_v60, 16 }
 0x175   : > { %v2662_v63 = vor.u32 %v2661_v0, %v13649_v52  ;;  %v3727_v22 = vsel %vm15668_vm6, %v13595_v6, %v13483_v51  ;;  %v1465_v13 = vrot.slane %v1463_v26, 4  ;;  %v3725_v43 = vsel %vm15668_vm6, %v3692_v56, %v13449_v19  ;;  %v1512_v56 = vld [vmem:[#allocation2 + $0xb4] sm:$0xe] }
 0x176   : > { %v2653_v11 = vrot.slane %v2652_v31, 4  ;;  %3541 = vrot.lane.b32.xlu0 %v10503_v2, %s15703_s23  ;;  %v1462_v62 = vsel %vm12325_vm14, %v13655_v39, %v13651_v47  ;;  %v10375_v46 = vrot.slane %v2729_v4, 9  ;;  %v2867_v10 = vrot.slane %v13597_v48, 5  ;;  %v13697_v50 = vpop.permute.xlu1 %3199 }
 0x177   : > { %v1466_v51 = vor.u32 %v1465_v13, %v13651_v47  ;;  %v1471_v6 = vrot.slane %v1469_v33, 5  ;;  %v2870_v19 = vrot.slane %v13614_v38, 5  ;;  %v1474_v44 = vshrl.u32 %v13664_v14, 16 }
 0x178   : > { %3463 = vrot.lane.b32.xlu1 %v10488_v28, %s15699_s15  ;;  %v2868_v41 = vsel %vm12230_vm9, %v10375_v46, %v2867_v10  ;;  %v2869_v37 = vrot.slane %v2867_v10, 4  ;;  %v1477_v49 = vshll.u32 %v13664_v14, 16  ;;  %v1483_v30 = vshll.u32 %v13674_v59, 16 }
 0x179   : > { %v2663_v48 = vrot.slane %v2662_v63, 4  ;;  %v1467_v35 = vrot.slane %v1466_v51, 4  ;;  %v1476_v55 = vrot.slane %v1474_v44, 4  ;;  %v1487_v57 = vshrl.u32 %v13674_v59, 16 }
 0x17a   : > { %v3760_v38 = vsel %vm3744_vm7, %v3727_v22, %v13512_v61  ;;  %v2871_v29 = vsel %vm12230_vm9, %v2869_v37, %v2870_v19  ;;  %v1479_v47 = vrot.slane %v1477_v49, 5  ;;  %v1485_v31 = vrot.slane %v1483_v30, 5  ;;  %v13704_v22 = vpop.permute.xlu0 %3357  ;;  %v1511_v30 = vld [vmem:[#allocation2 + $0xa8] sm:$0xe] }
 0x17b   : > { %v2330_v12 = vld [vmem:[#allocation2 + $0xbc] sm:$0x1]  ;;  %v2658_v39 = vsel %vm12325_vm14, %v2653_v11, %v13649_v52  ;;  %v10519_v4 = vcombine.low %v2868_v41, %v2871_v29  ;;  %v1489_v28 = vrot.slane %v1487_v57, 4  ;;  %v1472_v2 = vsel %vm12325_vm14, %v1467_v35, %v1471_v6 }
 0x17c   : > { %v1109_v0 = vld [vmem:[#allocation2 + $0xbc] sm:$0x1]  ;;  %v2665_v26 = vshll.u32 %v2330_v12, 16  ;;  %v1480_v61 = vor.u32 %v1479_v47, %v1476_v55  ;;  %v10376_v63 = vrot.slane %v2730_v24, 9  ;;  %v2874_v10 = vrot.slane %v13636_v32, 5 }
 0x17d   : > { %v1493_v33 = vshll.u32 %v1109_v0, 16  ;;  %3621 = vrot.lane.b32.xlu0 %v10519_v4, %s15707_s0  ;;  %v1490_v46 = vor.u32 %v1489_v28, %v1485_v31  ;;  %v2877_v51 = vrot.slane %v2330_v12, 5  ;;  %v10346_v19 = vrot.slane %v1512_v56, 9  ;;  %v531_v24 = vld [vmem:[#allocation2 + $0xc0] sm:$0x1]  ;;  %v13719_v12 = vpop.permute.xlu1 %3279 }
 0x17e   : > { %v2667_v13 = vrot.slane %v2665_v26, 5  ;;  %v1481_v52 = vrot.slane %v1480_v61, 4  ;;  %v1671_v44 = vrot.slane %v13674_v59, 5  ;;  %v2875_v37 = vsel %vm12230_vm9, %v10376_v63, %v2874_v10  ;;  %v469_v26 = vld [vmem:[%s12215_s24 + $0x3c] sm:$0x3]  ;;  %v13734_v28 = vpop.permute.xlu0 %3453 }
 0x17f   : > { %v1495_v11 = vrot.slane %v1493_v33, 5  ;;  %v1491_v41 = vrot.slane %v1490_v46, 4  ;;  %v2876_v49 = vrot.slane %v2874_v10, 4  ;;  %v3758_v55 = vsel %vm3744_vm7, %v3725_v43, %v13472_v34  ;;  %v470_v4 = vld [vmem:[%s12215_s24 + $0x3e] sm:$0x3] }
 0x180   : > { %v2668_v6 = vsel %vm12325_vm14, %v2663_v48, %v2667_v13  ;;  %v1486_v32 = vsel %vm12325_vm14, %v1481_v52, %v1485_v31  ;;  %v3793_v57 = vsel %vm15673_vm12, %v3760_v38, %v13534_v17  ;;  %v1673_v47 = vrot.slane %v1671_v44, 4  ;;  %v13732_v38 = vld [vmem:[#allocation2 + $0xb4] sm:$0xf]  ;;  %v13745_v46 = vld [vmem:[#allocation2 + $0xb8] sm:$0xf] }
 0x181   : > { %v10504_v35 = vcombine.low %v2658_v39, %v2668_v6  ;;  %v1496_v48 = vsel %vm12325_vm14, %v1491_v41, %v1495_v11  ;;  %v2878_v29 = vsel %vm12230_vm9, %v2876_v49, %v2877_v51  ;;  %v1674_v39 = vrot.slane %v1109_v0, 5  ;;  %v13753_v6 = vpop.permute.xlu1 %3359 }
 0x182   : > { %v10409_v31 = vcombine.low %v1462_v62, %v1472_v2  ;;  %v10520_v34 = vcombine.low %v2875_v37, %v2878_v29  ;;  %v13730_v17 = vsel %vm12230_vm9, %v10346_v19, %v1671_v44  ;;  %v10345_v43 = vrot.slane %v1511_v30, 9  ;;  %v587_v44 = vld [vmem:[#allocation2 + $0xc8] sm:$0x1] }
 0x183   : > { %3543 = vrot.lane.b32.xlu1 %v10504_v35, %s15703_s23  ;;  %v3791_v56 = vsel %vm15673_vm12, %v3758_v55, %v13492_v3  ;;  %v1664_v0 = vrot.slane %v13619_v21, 5  ;;  %v1667_v61 = vrot.slane %v13643_v60, 5  ;;  %v532_v62 = vsel %vm12186_vm3, 0, %v531_v24  ;;  %v13760_v24 = vpop.permute.xlu0 %3533 }
 0x184   : > { %v10410_v2 = vcombine.low %v1486_v32, %v1496_v48  ;;  %3623 = vrot.lane.b32.xlu0 %v10520_v34, %s15707_s0  ;;  %v3826_v33 = vsel %vm15671_vm4, %v3793_v57, %v13563_v15  ;;  %533 = vst [vmem:[#allocation2 + $0xc0] sm:$0x1] %v532_v62  ;;  %v623_v63 = vunpack.c.l.u8.bf16 %v469_v26  ;;  %v624_v13 = vunpack.c.l.u8.bf16 %v470_v4  ;;  %v1722_v26 = vld [vmem:[#allocation2 + $0xbc] sm:$0x1]  ;;  %v2122_v62 = vld [vmem:[#allocation2 + $0xb4] sm:$0xe] }
 0x185   : > { %v1675_v3 = vsel %vm12230_vm9, %v1673_v47, %v1674_v39  ;;  %v1665_v60 = vsel %vm12230_vm9, %v10345_v43, %v1664_v0  ;;  %v1666_v10 = vrot.slane %v1664_v0, 4  ;;  %v2061_v51 = vshrl.u32 %v13732_v38, 16 }
 0x186   : > { %v883_v52 = vshrl.u32 %v623_v63, 16  ;;  %v886_v11 = vshll.u32 %v623_v63, 16  ;;  %v891_v19 = vshrl.u32 %v624_v13, 16  ;;  %v894_v15 = vshll.u32 %v624_v13, 16  ;;  %v13781_v13 = vld [vmem:[#allocation2 + $0xd0] sm:$0xf] }
 0x187   : > { %3033 = vrot.lane.b32.xlu1 %v10409_v31, %s15708_s22  ;;  %v1668_v41 = vsel %vm12230_vm9, %v1666_v10, %v1667_v61  ;;  %v2063_v37 = vrot.slane %v2061_v51, 4  ;;  %v2064_v49 = vshll.u32 %v13732_v38, 16  ;;  %v2074_v30 = vshrl.u32 %v13745_v46, 16 }
 0x188   : > { %v10426_v35 = vcombine.low %v13730_v17, %v1675_v3  ;;  %v10425_v32 = vcombine.low %v1665_v60, %v1668_v41  ;;  %v885_v55 = vrot.slane %v883_v52, 7  ;;  %v893_v57 = vrot.slane %v891_v19, 7  ;;  %v13783_v3 = vpop.permute.xlu1 %3455  ;;  %v11959_v60 = vld [vmem:[#allocation2 + $0x64] sm:$0xf]  ;;  %v11960_v52 = vld [vmem:[#allocation2 + $0x6c] sm:$0xf] }
 0x189   : > { %v3824_v48 = vsel %vm15671_vm4, %v3791_v56, %v13522_v18  ;;  %v3859_v29 = vsel %vm15672_vm8, %v3826_v33, %v13588_v16  ;;  %v2066_v47 = vrot.slane %v2064_v49, 5  ;;  %v588_v39 = vsel %vm12208_vm5, 0, %v587_v44  ;;  %v534_v18 = vld [vmem:[#allocation2 + $0xcc] sm:$0x1]  ;;  %v590_v41 = vld [vmem:[#allocation2 + $0xd4] sm:$0x1] }
 0x18a   : > { %3113 = vrot.lane.b32.xlu0 %v10425_v32, %s15705_s20  ;;  %v888_v4 = vor.u32 %v886_v11, %v885_v55  ;;  %v889_v31 = vrot.slane %v885_v55, 4  ;;  %v896_v34 = vor.u32 %v894_v15, %v893_v57  ;;  %v10441_v17 = vcombine.low %v13732_v38, %v13745_v46  ;;  %589 = vst [vmem:[#allocation2 + $0xc8] sm:$0x1] %v588_v39  ;;  %v11961_v11 = vld [vmem:[#allocation2 + $0x70] sm:$0xf] }
 0x18b   : > { %3035 = vrot.lane.b32.xlu1 %v10410_v2, %s15708_s22  ;;  %v1055_v43 = vld [vmem:[#allocation2 + $0xc0] sm:$0xf]  ;;  %v3857_v16 = vsel %vm15672_vm8, %v3824_v48, %v13545_v40  ;;  %v2067_v56 = vor.u32 %v2066_v47, %v2063_v37  ;;  %v2070_v0 = vshll.u32 %v13745_v46, 16  ;;  %v2076_v61 = vrot.slane %v2074_v30, 4  ;;  %v13792_v37 = vpop.permute.xlu0 %3613 }
 0x18c   : > { %v897_v2 = vsel %vm12250_vm11, %v889_v31, %v896_v34  ;;  %v1056_v33 = vsel %vm12241_vm10, %v888_v4, %v1055_v43  ;;  %v2080_v63 = vshll.u32 %v1722_v26, 16  ;;  %v3890_v38 = vsel %vm3876_vm13, %v3857_v16, %v13569_v53  ;;  %v11958_v40 = vld [vmem:[#allocation2 + $0x60] sm:$0xf] }
 0x18d   : > { %1057 = vst [vmem:[#allocation2 + $0xc0] sm:$0xf] %v1056_v33  ;;  %1058 = vst.msk [vmem:[#allocation2 + $0xc4] sm:$0xf] %vm471_vm0, %v897_v2  ;;  %v10387_v10 = vcombine.low %v11958_v40, %v11959_v60  ;;  %v2068_v51 = vrot.slane %v2067_v56, 4  ;;  %v2072_v42 = vrot.slane %v2070_v0, 5  ;;  %v10388_v36 = vcombine.low %v11960_v52, %v11961_v11  ;;  %11456 = vmatprep.mubr.msk.bf16.mxu0 %vm15667_vm2, %v3890_v38 }
 0x18e   : > { %v898_v53 = vrot.slane %v893_v57, 4  ;;  %3209 = vrot.lane.b32.xlu0 %v10441_v17, %s15701_s16  ;;  %v10361_v19 = vrot.slane %v2122_v62, 9  ;;  %v2272_v15 = vrot.slane %v13745_v46, 5  ;;  %v535_v44 = vsel %vm12186_vm3, 0, %v534_v18 }
 0x18f   : > { %3115 = vrot.lane.b32.xlu1 %v10426_v35, %s15705_s20  ;;  %v2077_v49 = vor.u32 %v2076_v61, %v2072_v42  ;;  %v2082_v30 = vrot.slane %v2080_v63, 5  ;;  %v2275_v32 = vrot.slane %v1722_v26, 5  ;;  %536 = vst [vmem:[#allocation2 + $0xcc] sm:$0x1] %v535_v44  ;;  %v2707_v55 = vshrl.u32 %v13781_v13, 16  ;;  %s12054_s20 = smov 96  }
 0x190   : > { %v2274_v48 = vrot.slane %v2272_v15, 4  ;;  %v3892_v35 = vsel %vm3876_vm13, %v3859_v29, %v13591_v58  ;;  %v2073_v46 = vsel %vm12325_vm14, %v2068_v51, %v2072_v42  ;;  %v3659_v39 = vsel %vm15670_vm15, %v10388_v36, %v13634_v25  ;;  %v13810_v29 = vpop.permute.xlu1 %3535 }
 0x191   : > { %v1059_v57 = vld [vmem:[#allocation2 + $0xc8] sm:$0x1]  ;;  %v2078_v47 = vrot.slane %v2077_v49, 4  ;;  %11457 = vmatmul.mubr.msk.bf16.gmra.mrb[12].mxu0 %vm15667_vm2, %v3892_v35  ;;  %v591_v26 = vsel %vm12208_vm5, 0, %v590_v41  ;;  %v3656_v31 = vsel %vm15670_vm15, %v10387_v10, %v13610_v5  ;;  %v2273_v58 = vsel %vm12230_vm9, %v10361_v19, %v2272_v15 }
 0x192   : > { %v1060_v4 = vsel %vm12186_vm3, %v898_v53, %v1059_v57  ;;  %592 = vst [vmem:[#allocation2 + $0xd4] sm:$0x1] %v591_v26  ;;  %v2276_v8 = vsel %vm12230_vm9, %v2274_v48, %v2275_v32  ;;  %v2703_v34 = vshll.u32 %v13781_v13, 16  ;;  %v13817_v1 = vrot.slane %v2707_v55, 4  ;;  %v13825_v0 = vpop.permute.xlu0 %3615 }
 0x193   : > { %1061 = vst [vmem:[#allocation2 + $0xc8] sm:$0x1] %v1060_v4  ;;  %v2083_v25 = vsel %vm12325_vm14, %v2078_v47, %v2082_v30  ;;  %v3698_v16 = vsel %vm15669_vm1, %v3659_v39, %v13666_v20  ;;  %v13823_v56 = vsel %vm15669_vm1, %v3656_v31, %v13621_v54  ;;  %v10473_v60 = vcombine.low %v2273_v58, %v2276_v8 }
 0x194   : > { %v1706_v17 = vld [vmem:[#allocation2 + $0xc0] sm:$0xf]  ;;  %v1707_v18 = vld [vmem:[#allocation2 + $0xc4] sm:$0xf]  ;;  %v10457_v5 = vcombine.low %v2073_v46, %v2083_v25  ;;  %v13835_v15 = vrot.slane %v2703_v34, 5  ;;  %v13837_v44 = vpop.permute.xlu1 %3025  ;;  %vm4820_vm0 = vcmask 257024  }
 0x195   : > { %v2123_v43 = vld [vmem:[#allocation2 + $0xc0] sm:$0xe]  ;;  %v2085_v61 = vshrl.u32 %v1706_v17, 16  ;;  %v2088_v62 = vshll.u32 %v1706_v17, 16  ;;  %v2098_v2 = vshrl.u32 %v1707_v18, 16  ;;  %v10442_v33 = vcombine.low %v1706_v17, %v1707_v18 }
 0x196   : > { %v2313_v63 = vld [vmem:[#allocation2 + $0xc0] sm:$0xf]  ;;  %v2094_v38 = vshll.u32 %v1707_v18, 16  ;;  %3289 = vrot.lane.b32.xlu0 %v10457_v5, %s15704_s30  ;;  %v2279_v40 = vrot.slane %v1707_v18, 5  ;;  %v13828_v10 = vld [vmem:[#allocation2 + $0xcc] sm:$0xf]  ;;  %v13843_v39 = vpop.permute.xlu0 %3105  ;;  %v2710_v18 = vor.u32 %v13817_v1, %v13835_v15 }
 0x197   : > { %v2670_v51 = vshrl.u32 %v2313_v63, 16  ;;  %v2087_v20 = vrot.slane %v2085_v61, 4  ;;  %v2090_v42 = vrot.slane %v2088_v62, 5  ;;  %3211 = vrot.lane.b32.xlu1 %v10442_v33, %s15701_s16  ;;  %v2100_v54 = vrot.slane %v2098_v2, 4  ;;  %v13832_v11 = vld [vmem:[#allocation2 + $0xc4] sm:$0xf] }
 0x198   : > { %v2694_v52 = vshrl.u32 %v13828_v10, 16  ;;  %v2096_v36 = vrot.slane %v2094_v38, 5  ;;  %v10362_v53 = vrot.slane %v2123_v43, 9  ;;  %v2697_v19 = vshll.u32 %v13828_v10, 16  ;;  %v13846_v25 = vld [vmem:[#allocation2 + $0xcc] sm:$0xe] }
 0x199   : > { %v2091_v41 = vor.u32 %v2090_v42, %v2087_v20  ;;  %v2281_v49 = vrot.slane %v2279_v40, 4  ;;  %v2672_v32 = vrot.slane %v2670_v51, 4  ;;  %v13839_v55 = vld [vmem:[#allocation2 + $0xd4] sm:$0x1]  ;;  %v2673_v46 = vshll.u32 %v2313_v63, 16 }
 0x19a   : > { %v2696_v30 = vrot.slane %v2694_v52, 4  ;;  %v1723_v48 = vld [vmem:[#allocation2 + $0xc8] sm:$0x1]  ;;  %v2101_v35 = vor.u32 %v2100_v54, %v2096_v36  ;;  %3369 = vrot.lane.b32.xlu0 %v10473_v60, %s15702_s21  ;;  %v2699_v57 = vrot.slane %v2697_v19, 5  ;;  %v2683_v47 = vshrl.u32 %v13832_v11, 16  ;;  %v13861_v60 = vpop.permute.xlu1 %3027 }
 0x19b   : > { %v2092_v26 = vrot.slane %v2091_v41, 4  ;;  %v2104_v4 = vshll.u32 %v1723_v48, 16  ;;  %v2282_v31 = vrot.slane %v1723_v48, 5  ;;  %v10489_v58 = vcombine.low %v2313_v63, %v13832_v11  ;;  %v2331_v2 = vld [vmem:[#allocation2 + $0xc8] sm:$0x1] }
 0x19c   : > { %v2102_v8 = vrot.slane %v2101_v35, 4  ;;  %v2675_v34 = vrot.slane %v2673_v46, 5  ;;  %v2700_v17 = vor.u32 %v2699_v57, %v2696_v30  ;;  %v2713_v61 = vshll.u32 %v13839_v55, 16  ;;  %v2731_v42 = vld [vmem:[#allocation2 + $0xc0] sm:$0xe] }
 0x19d   : > { %v2097_v5 = vsel %vm12325_vm14, %v2092_v26, %v2096_v36  ;;  %v2106_v43 = vrot.slane %v2104_v4, 5  ;;  %v3731_v62 = vsel %vm15668_vm6, %v3698_v16, %v13697_v50  ;;  %v2280_v33 = vsel %vm12230_vm9, %v10362_v53, %v2279_v40  ;;  %v13866_v53 = vpop.permute.xlu0 %3201 }
 0x19e   : > { %v2283_v63 = vsel %vm12230_vm9, %v2281_v49, %v2282_v31  ;;  %3465 = vrot.lane.b32.xlu0 %v10489_v58, %s15699_s15  ;;  %v2676_v38 = vor.u32 %v2675_v34, %v2672_v32  ;;  %v10378_v1 = vrot.slane %v13846_v25, 9  ;;  %v2701_v20 = vrot.slane %v2700_v17, 4  ;;  %v13885_v58 = vpop.permute.xlu1 %3107 }
 0x19f   : > { %v2107_v51 = vsel %vm12325_vm14, %v2102_v8, %v2106_v43  ;;  %v2679_v50 = vshll.u32 %v13832_v11, 16  ;;  %v2685_v16 = vrot.slane %v2683_v47, 4  ;;  %v2711_v40 = vrot.slane %v2710_v18, 4 }
 0x1a0   : > { %v10458_v54 = vcombine.low %v2097_v5, %v2107_v51  ;;  %v2715_v52 = vrot.slane %v2713_v61, 5  ;;  %v2689_v36 = vshll.u32 %v2331_v2, 16  ;;  %v2677_v19 = vrot.slane %v2676_v38, 4  ;;  %v4835_v38 = vld [vmem:[#allocation3 + $0x10] sm:$0x1] }
 0x1a1   : > { %v2681_v41 = vrot.slane %v2679_v50, 5  ;;  %v3729_v49 = vsel %vm15668_vm6, %v13823_v56, %v13645_v45  ;;  %v3764_v30 = vsel %vm3744_vm7, %v3731_v62, %v13719_v12  ;;  %v10474_v32 = vcombine.low %v2280_v33, %v2283_v63  ;;  %v4832_v63 = vld [vmem:[#allocation3 + $0x8] sm:$0x1]  ;;  %v4866_v50 = vld [vmem:[#allocation3 + $0x14] sm:$0x1] }
 0x1a2   : > { %3291 = vrot.lane.b32.xlu1 %v10458_v54, %s15704_s30  ;;  %v2888_v48 = vrot.slane %v13781_v13, 5  ;;  %v10377_v35 = vrot.slane %v2731_v42, 9  ;;  %v2881_v57 = vrot.slane %v13832_v11, 5  ;;  %v10490_v46 = vcombine.low %v13828_v10, %v13781_v13  ;;  %v3282_v17 = vpop.permute.xlu0 %3281 }
 0x1a3   : > { %v2706_v47 = vsel %vm12325_vm14, %v2701_v20, %v13835_v15  ;;  %v2686_v26 = vor.u32 %v2685_v16, %v2681_v41  ;;  %v2691_v45 = vrot.slane %v2689_v36, 5  ;;  %v2716_v12 = vsel %vm12325_vm14, %v2711_v40, %v2715_v52 }
 0x1a4   : > { %v2883_v56 = vrot.slane %v2881_v57, 4  ;;  %v2884_v4 = vrot.slane %v2331_v2, 5  ;;  %v3762_v31 = vsel %vm3744_vm7, %v3729_v49, %v13682_v27  ;;  %v2682_v11 = vsel %vm12325_vm14, %v2677_v19, %v2681_v41  ;;  %v11962_v49 = vld [vmem:[#allocation2 + $0x78] sm:$0xf] }
 0x1a5   : > { %v2687_v13 = vrot.slane %v2686_v26, 4  ;;  %v2891_v10 = vrot.slane %v13839_v55, 5  ;;  %v3795_v15 = vsel %vm15673_vm12, %v3762_v31, %v13704_v22  ;;  %v2890_v25 = vrot.slane %v2888_v48, 4  ;;  %v11964_v26 = vld [vmem:[#allocation2 + $0x84] sm:$0xf] }
 0x1a6   : > { %3371 = vrot.lane.b32.xlu1 %v10474_v32, %s15702_s21  ;;  %v2882_v8 = vsel %vm12230_vm9, %v10377_v35, %v2881_v57  ;;  %v3797_v27 = vsel %vm15673_vm12, %v3764_v30, %v13753_v6  ;;  %v3828_v34 = vsel %vm15671_vm4, %v3795_v15, %v13734_v28  ;;  %v2885_v55 = vsel %vm12230_vm9, %v2883_v56, %v2884_v4  ;;  %v3204_v2 = vpop.permute.xlu1 %3203  ;;  %v3362_v33 = vpop.permute.xlu0 %3361  ;;  %v11963_v30 = vld [vmem:[#allocation2 + $0x7c] sm:$0xf] }
 0x1a7   : > { %v2692_v18 = vsel %vm12325_vm14, %v2687_v13, %v2691_v45  ;;  %v3830_v22 = vsel %vm15671_vm4, %v3797_v27, %v13783_v3  ;;  %v3861_v5 = vsel %vm15672_vm8, %v3828_v34, %v13760_v24  ;;  %v10506_v62 = vcombine.low %v2706_v47, %v2716_v12  ;;  %v11965_v45 = vld [vmem:[#allocation2 + $0x88] sm:$0xf] }
 0x1a8   : > { %v10505_v43 = vcombine.low %v2682_v11, %v2692_v18  ;;  %v3863_v6 = vsel %vm15672_vm8, %v3830_v22, %v13810_v29  ;;  %v3894_v28 = vsel %vm3876_vm13, %v3861_v5, %v13792_v37  ;;  %v10521_v3 = vcombine.low %v2882_v8, %v2885_v55 }
 0x1a9   : > { %11460 = vmatprep.mubr.msk.bf16.mxu0 %vm15667_vm2, %v3894_v28  ;;  %v3896_v61 = vsel %vm3876_vm13, %v3863_v6, %v13825_v0  ;;  %v10393_v24 = vcombine.low %v13608_v7, %v13619_v21  ;;  %v2889_v29 = vsel %vm12230_vm9, %v10378_v1, %v2888_v48  ;;  %v2892_v37 = vsel %vm12230_vm9, %v2890_v25, %v2891_v10  ;;  %v4863_v1 = vld [vmem:[#allocation3 + $0xc] sm:$0x1]  ;;  %v4838_v28 = vld [vmem:[#allocation3 + $0x18] sm:$0x1] }
 0x1aa   : > { %3467 = vrot.lane.b32.xlu1 %v10490_v46, %s15699_s15  ;;  %3545 = vrot.lane.b32.xlu0 %v10505_v43, %s15703_s23  ;;  %v10394_v0 = vcombine.low %v13664_v14, %v13674_v59  ;;  %v10522_v51 = vcombine.low %v2889_v29, %v2892_v37  ;;  %v15709_v20 = vmov 0   ;;  %vm4822_vm3 = vcmask 253952   ;;  %v3458_v41 = vpop.permute.xlu0 %3457  ;;  %s15677_s15 = smov 64  }
 0x1ab   : > { %11461 = vmatmul.mubr.msk.bf16.gmra.mrb[16].mxu0 %vm15667_vm2, %v3896_v61  ;;  %4821 = vst.msk [vmem:[#allocation3] sm:$0xf] %vm4820_vm0, %v15709_v20  ;;  %4825 = vst.msk [vmem:[#allocation3 + $0x48] sm:$0xf] %vm4820_vm0, %v15709_v20  ;;  %vm15710_vm5 = vsmask.f32 256  ;;  %v10389_v32 = vcombine.low %v11962_v49, %v11963_v30  ;;  %v10390_v12 = vcombine.low %v11964_v26, %v11965_v45 }
 0x1ac   : > { %vm13932_vm10 = vmand %vm4822_vm3, %vm15710_vm5  ;;  %4823 = vst.msk [vmem:[#allocation3 + $0x4] sm:$0x1] %vm4822_vm3, %v15709_v20  ;;  %vm15713_vm11 = vsmask.f32 7938  ;;  %v4869_v61 = vld [vmem:[#allocation3 + $0x1c] sm:$0x1] }
 0x1ad   : > { %4826 = vst.msk [vmem:[#allocation3 + $0x4c] sm:$0x1] %vm4822_vm3, %v15709_v20  ;;  %v4833_v54 = vsel %vm13932_vm10, 0, %v4832_v63  ;;  %vm13941_vm2 = vmand %vm4822_vm3, %vm15713_vm11  ;;  %v4836_v52 = vsel %vm13932_vm10, 0, %v4835_v38  ;;  %v3662_v46 = vsel %vm15670_vm15, %v10389_v32, %v13837_v44  ;;  %v3665_v10 = vsel %vm15670_vm15, %v10390_v12, %v13861_v60  ;;  %v13986_v63 = vld [vmem:[%s15718_s2] ss:$0 sm:$0xff] }
 0x1ae   : > { %3547 = vrot.lane.b32.xlu1 %v10506_v62, %s15703_s23  ;;  %3625 = vrot.lane.b32.xlu0 %v10521_v3, %s15707_s0  ;;  %4834 = vst [vmem:[#allocation3 + $0x8] sm:$0x1] %v4833_v54  ;;  %v4864_v36 = vsel %vm13941_vm2, 0, %v4863_v1  ;;  %4837 = vst [vmem:[#allocation3 + $0x10] sm:$0x1] %v4836_v52  ;;  %v4867_v19 = vsel %vm13941_vm2, 0, %v4866_v50  ;;  %v3700_v56 = vsel %vm15669_vm1, %v3662_v46, %v13843_v39  ;;  %v4232_v1 = vlaneseq }
 0x1af   : > { %4865 = vst [vmem:[#allocation3 + $0xc] sm:$0x1] %v4864_v36  ;;  %4868 = vst [vmem:[#allocation3 + $0x14] sm:$0x1] %v4867_v19  ;;  %v3733_v4 = vsel %vm15668_vm6, %v3700_v56, %v13866_v53  ;;  %v3702_v39 = vsel %vm15669_vm1, %v3665_v10, %v13885_v58  ;;  %vm15716_vm3 = vcmask 220160   ;;  %v4839_v62 = vsel %vm13932_vm10, 0, %v4838_v28 }
 0x1b0   : > { %v3284_v42 = vpop.permute.xlu1 %3283  ;;  %v3766_v31 = vsel %vm3744_vm7, %v3733_v4, %v3282_v17  ;;  %v3735_v53 = vsel %vm15668_vm6, %v3702_v39, %v3204_v2  ;;  %vm15717_vm5 = vmmov %vm15716_vm3  ;;  %v4870_v3 = vsel %vm13941_vm2, 0, %v4869_v61  ;;  %4840 = vst [vmem:[#allocation3 + $0x18] sm:$0x1] %v4839_v62  ;;  %v12052_v38 = vmov 1983009808   ;;  %s15679_s23 = smov 32  }
 0x1b1   : > { %v3799_v11 = vsel %vm15673_vm12, %v3766_v31, %v3362_v33  ;;  %v3768_v34 = vsel %vm3744_vm7, %v3735_v53, %v3284_v42  ;;  %4871 = vst [vmem:[#allocation3 + $0x1c] sm:$0x1] %v4870_v3  ;;  %v13990_v49 = vshrl.u32 %v4232_v1, 7  ;;  %v11966_v32 = vld [vmem:[#allocation2 + $0x90] sm:$0xf]  ;;  %vm5212_vm11 = vcmask 1042434  }
 0x1b2   : > { %3627 = vrot.lane.b32.xlu1 %v10522_v51, %s15707_s0  ;;  %v3832_v44 = vsel %vm15671_vm4, %v3799_v11, %v3458_v41  ;;  %v4829_v27 = vld [vmem:[#allocation3] sm:$0x1]  ;;  %v4230_v51 = vunpack.c.l.s4 %v12052_v38  ;;  %v11968_v26 = vld [vmem:[#allocation2 + $0x9c] sm:$0xf]  ;;  %v11969_v45 = vld [vmem:[#allocation2 + $0xa0] sm:$0xf] }
 0x1b3   : > { %v4860_v35 = vld [vmem:[#allocation3 + $0x4] sm:$0x1]  ;;  %v4830_v60 = vsel %vm13932_vm10, 0, %v4829_v27  ;;  %v10392_v12 = vcombine.low %v11968_v26, %v11969_v45 }
 0x1b4   : > { %v3364_v48 = vpop.permute.xlu1 %3363  ;;  %v4861_v57 = vsel %vm13941_vm2, 0, %v4860_v35  ;;  %4831 = vst [vmem:[#allocation3] sm:$0x1] %v4830_v60  ;;  %v4231_v41 = vunpack.c.0.s8 %v4230_v51 }
 0x1b5   : > { %4862 = vst [vmem:[#allocation3 + $0x4] sm:$0x1] %v4861_v57  ;;  %v3801_v18 = vsel %vm15673_vm12, %v3768_v34, %v3364_v48  ;;  %v11967_v48 = vld [vmem:[#allocation2 + $0x94] sm:$0xf] }
 0x1b6   : > { %v3538_v47 = vpop.permute.xlu0 %3537  ;;  %v10391_v35 = vcombine.low %v11966_v32, %v11967_v48 }
 0x1b7   : > { %v3865_v15 = vsel %vm15672_vm8, %v3832_v44, %v3538_v47 }
 0x1b8   : > { %v3460_v13 = vpop.permute.xlu1 %3459 }
 0x1b9   : > { %v3834_v55 = vsel %vm15671_vm4, %v3801_v18, %v3460_v13 }
 0x1bc   : > { %v3540_v17 = vpop.permute.xlu1 %3539 }
 0x1bd   : > { %v3867_v22 = vsel %vm15672_vm8, %v3834_v55, %v3540_v17 }
 0x1be   : > { %v3618_v25 = vpop.permute.xlu0 %3617 }
 0x1bf   : > { %v3898_v8 = vsel %vm3876_vm13, %v3865_v15, %v3618_v25  ;;  %v13997_v15 = vsub.s32 %v4231_v41, %v13990_v49 }
 0x1c0   : > { %11464 = vmatprep.mubr.msk.bf16.mxu0 %vm15716_vm3, %v3898_v8  ;;  %v3030_v43 = vpop.permute.xlu1 %3029  ;;  %vm5215_vm3 = vcmask 1043459  }
 0x1c1   : > { %v3668_v8 = vsel %vm15670_vm15, %v10391_v35, %v3030_v43 }
 0x1c5   : > { %v3620_v5 = vpop.permute.xlu0 %3619 }
 0x1c6   : > { %v3900_v58 = vsel %vm3876_vm13, %v3867_v22, %v3620_v5  ;;  %v3032_v2 = vpop.permute.xlu1 %3031 }
 0x1c7   : > { %11465 = vmatmul.mubr.msk.bf16.gmra.mrb[20].mxu0 %vm15717_vm5, %v3900_v58  ;;  %v3671_v53 = vsel %vm15670_vm15, %v10392_v12, %v3032_v2  ;;  %vm15674_vm5 = vcmask 1044484   ;;  %vm5227_vm15 = vcmask 1047559  }
 0x1c9   : > { %v3110_v6 = vpop.permute.xlu0 %3109 }
 0x1ca   : > { %v3112_v37 = vpop.permute.xlu1 %3111  ;;  %v3704_v27 = vsel %vm15669_vm1, %v3668_v8, %v3110_v6 }
 0x1cb   : > { %v3706_v58 = vsel %vm15669_vm1, %v3671_v53, %v3112_v37  ;;  %vm15719_vm1 = vcmask 220160  }
 0x1cd   : > { %v3206_v29 = vpop.permute.xlu0 %3205 }
 0x1ce   : > { %v3737_v60 = vsel %vm15668_vm6, %v3704_v27, %v3206_v29 }
 0x1d5   : > { %v3286_v33 = vpop.permute.xlu0 %3285 }
 0x1d6   : > { %v3770_v18 = vsel %vm3744_vm7, %v3737_v60, %v3286_v33 }
 0x1d8   : > { %v3208_v50 = vpop.permute.xlu1 %3207 }
 0x1d9   : > { %v3366_v42 = vpop.permute.xlu0 %3365  ;;  %v3739_v38 = vsel %vm15668_vm6, %v3706_v58, %v3208_v50  ;;  %vm15675_vm6 = vcmask 1045509  }
 0x1da   : > { %v3803_v28 = vsel %vm15673_vm12, %v3770_v18, %v3366_v42 }
 0x1dc   : > { %v11446_v54 = vpop.f32.mrb[0].mxu0 }
 0x1dd   : > { %v4014_v52 = vadd.f32 %v11446_v54, %v13986_v63  ;;  %v4005_v36 = vpop.f32.mrb[1].mxu0  ;;  %v3462_v10 = vpop.permute.xlu0 %3461 }
 0x1de   : > { %v4006_v19 = vadd.f32 %v13986_v63, %v4005_v36  ;;  %v11447_v30 = vpop.f32.mrb[2].mxu0  ;;  %v3836_v29 = vsel %vm15671_vm4, %v3803_v28, %v3462_v10 }
 0x1df   : > { %v4134_v57 = vmax.f32 %v4014_v52, 0.0  ;;  %v4017_v46 = vadd.f32 %v11447_v30, %v13986_v63  ;;  %v4008_v47 = vpop.f32.mrb[3].mxu0 }
 0x1e0   : > { %v4132_v56 = vmax.f32 %v4006_v19, 0.0  ;;  %v4009_v4 = vadd.f32 %v13986_v63, %v4008_v47 }
 0x1e1   : > { %v4166_v31 = vmin.f32 %v4134_v57, 10.0  ;;  %v4135_v11 = vmax.f32 %v4017_v46, 0.0 }
 0x1e2   : > { %v13994_v13 = vpop.permute.xlu1 %3287  ;;  %v4164_v44 = vmin.f32 %v4132_v56, 10.0  ;;  %v4133_v25 = vmax.f32 %v4009_v4, 0.0 }
 0x1e3   : > { %v4167_v39 = vmin.f32 %v4135_v11, 10.0  ;;  %v3772_v58 = vsel %vm3744_vm7, %v3739_v38, %v13994_v13 }
 0x1e4   : > { %v4196_v34 = vmax.f32 %v4164_v44, %v4166_v31  ;;  %v4165_v17 = vmin.f32 %v4133_v25, 10.0 }
 0x1e6   : > { %v4228_v55 = vcombine.high %v4196_v34, %v4196_v34  ;;  %v4235_v22 = vrot.slane %v4196_v34, %v13997_v15  ;;  %v4197_v5 = vmax.f32 %v4165_v17, %v4167_v39  ;;  %v3368_v43 = vpop.permute.xlu1 %3367 }
 0x1e8   : > { %v3542_v61 = vpop.permute.xlu0 %3541  ;;  %v4242_v62 = vrot.slane %v4228_v55, %v13997_v15  ;;  %v4243_v3 = vcombine.high %v4235_v22, %v4235_v22  ;;  %v10542_v6 = vrot.slane %v4235_v22, 9  ;;  %v4245_v2 = vcombine.high %v4197_v5, %v4197_v5 }
 0x1e9   : > { %v4252_v33 = vrot.slane %v4197_v5, %v13997_v15  ;;  %v3869_v42 = vsel %vm15672_vm8, %v3836_v29, %v3542_v61 }
 0x1ea   : > { %v4244_v51 = vcombine.high %v4242_v62, %v4242_v62  ;;  %v10543_v1 = vrot.slane %v4243_v3, 9  ;;  %v10544_v54 = vrot.slane %v4242_v62, 9  ;;  %v4756_v37 = vmax.f32 %v4235_v22, %v10542_v6  ;;  %v3464_v47 = vpop.permute.xlu1 %3463 }
 0x1eb   : > { %v4259_v52 = vrot.slane %v4245_v2, %v13997_v15  ;;  %v4260_v36 = vcombine.high %v4252_v33, %v4252_v33  ;;  %v10546_v19 = vrot.slane %v4252_v33, 9  ;;  %v3805_v6 = vsel %vm15673_vm12, %v3772_v58, %v3368_v43 }
 0x1ec   : > { %v10545_v41 = vrot.slane %v4244_v51, 9  ;;  %v4757_v30 = vmax.f32 %v4243_v3, %v10543_v1  ;;  %v4758_v50 = vmax.f32 %v4242_v62, %v10544_v54  ;;  %v11217_v32 = vpack.c.bf16 %v4756_v37, %v4756_v37  ;;  %v5358_v3 = vld [vmem:[#allocation3 + $0xc] sm:$0x1] }
 0x1ed   : > { %v4261_v48 = vcombine.high %v4259_v52, %v4259_v52  ;;  %v10547_v35 = vrot.slane %v4260_v36, 9  ;;  %v10548_v57 = vrot.slane %v4259_v52, 9  ;;  %v4760_v46 = vmax.f32 %v4252_v33, %v10546_v19 }
 0x1ee   : > { %v4759_v26 = vmax.f32 %v4244_v51, %v10545_v41  ;;  %v11218_v45 = vpack.c.bf16 %v4757_v30, %v4757_v30  ;;  %v11219_v12 = vpack.c.bf16 %v4758_v50, %v4758_v50  ;;  %v5146_v56 = vunpack.c.l.b16 %v11217_v32  ;;  %v5355_v32 = vld [vmem:[#allocation3 + $0x8] sm:$0xf] }
 0x1ef   : > { %v3622_v4 = vpop.permute.xlu0 %3621  ;;  %v10549_v31 = vrot.slane %v4261_v48, 9  ;;  %v4761_v11 = vmax.f32 %v4260_v36, %v10547_v35  ;;  %v4762_v10 = vmax.f32 %v4259_v52, %v10548_v57  ;;  %v11221_v44 = vpack.c.bf16 %v4760_v46, %v4760_v46  ;;  %v5597_v46 = vld [vmem:[#allocation3] sm:$0xe] }
 0x1f0   : > { %v3902_v25 = vsel %vm3876_vm13, %v3869_v42, %v3622_v4  ;;  %v11220_v8 = vpack.c.bf16 %v4759_v26, %v4759_v26  ;;  %v5147_v39 = vunpack.c.l.b16 %v11218_v45  ;;  %v5148_v53 = vunpack.c.l.b16 %v11219_v12  ;;  %v4841_v26 = vld [vmem:[#allocation3 + $0x20] sm:$0x1]  ;;  %v4872_v45 = vld [vmem:[#allocation3 + $0x24] sm:$0x1] }
 0x1f1   : > { %11468 = vmatprep.mubr.msk.bf16.mxu0 %vm15719_vm1, %v3902_v25  ;;  %v5210_v27 = vrot.slane %v5146_v56, 7  ;;  %v4763_v34 = vmax.f32 %v4261_v48, %v10549_v31  ;;  %v11222_v17 = vpack.c.bf16 %v4761_v11, %v4761_v11  ;;  %v11223_v60 = vpack.c.bf16 %v4762_v10, %v4762_v10 }
 0x1f2   : > { %v5149_v18 = vunpack.c.l.b16 %v11220_v8  ;;  %v5211_v55 = vrot.slane %v5147_v39, 6  ;;  %v5214_v22 = vrot.slane %v5148_v53, 5  ;;  %v5150_v5 = vunpack.c.l.b16 %v11221_v44 }
 0x1f3   : > { %v5151_v28 = vunpack.c.l.b16 %v11222_v17  ;;  %v5152_v61 = vunpack.c.l.b16 %v11223_v60  ;;  %v11281_v62 = vpack.c.bf16 %v4763_v34, %v4763_v34  ;;  %vm15676_vm1 = vcmask 1046534  }
 0x1f4   : > { %v5213_v29 = vsel %vm5212_vm11, %v5211_v55, %v5210_v27  ;;  %v5217_v33 = vrot.slane %v5149_v18, 4  ;;  %v3838_v51 = vsel %vm15671_vm4, %v3805_v6, %v3464_v47  ;;  %v5220_v54 = vrot.slane %v5150_v5, 3  ;;  %v5598_v47 = vld [vmem:[#allocation3 + $0x4] sm:$0x1] }
 0x1f5   : > { %v3544_v2 = vpop.permute.xlu1 %3543  ;;  %v5216_v1 = vsel %vm5215_vm3, %v5214_v22, %v5213_v29  ;;  %v5223_v42 = vrot.slane %v5151_v28, 2  ;;  %v5359_v43 = vsel %vm13932_vm10, %v11281_v62, %v5358_v3  ;;  %v5226_v19 = vrot.slane %v5152_v61, 1 }
 0x1f6   : > { %v3871_v37 = vsel %vm15672_vm8, %v3838_v51, %v3544_v2  ;;  %v3624_v13 = vpop.permute.xlu0 %3623  ;;  %v5219_v38 = vsel %vm15674_vm5, %v5217_v33, %v5216_v1  ;;  %5360 = vst [vmem:[#allocation3 + $0xc] sm:$0x1] %v5359_v43  ;;  %vm15720_vm4 = vcmask 220160   ;;  %vm15721_vm8 = vsmask.f32 7938 }
 0x1f7   : > { %v3904_v52 = vsel %vm3876_vm13, %v3871_v37, %v3624_v13  ;;  %v5222_v36 = vsel %vm15675_vm6, %v5220_v54, %v5219_v38  ;;  %vm14032_vm12 = vmand %vm4820_vm0, %vm15721_vm8  ;;  %v4842_v56 = vsel %vm13932_vm10, 0, %v4841_v26  ;;  %v10686_v4 = vrot.slane %v5597_v46, 9  ;;  %v5440_v13 = vld [vmem:[#allocation3] sm:$0xf] }
 0x1f8   : > { %11469 = vmatmul.mubr.msk.bf16.gmra.mrb[24].mxu0 %vm15720_vm4, %v3904_v52  ;;  %v5225_v41 = vsel %vm15676_vm1, %v5223_v42, %v5222_v36  ;;  %v5631_v31 = vrot.slane %v5598_v47, 5  ;;  %4843 = vst [vmem:[#allocation3 + $0x20] sm:$0x1] %v4842_v56  ;;  %v4873_v11 = vsel %vm13941_vm2, 0, %v4872_v45  ;;  %vm5435_vm4 = vcmask 261120  }
 0x1f9   : > { %v5228_v30 = vsel %vm5227_vm15, %v5226_v19, %v5225_v41  ;;  %v14036_v35 = vpop.permute.xlu1 %3033  ;;  %4874 = vst [vmem:[#allocation3 + $0x24] sm:$0x1] %v4873_v11  ;;  %v5457_v19 = vshrl.u32 %v5440_v13, 16  ;;  %vm15724_vm8 = vcmask 23552   ;;  %vm15725_vm0 = vcmask 48128  }
 0x1fa   : > { %v5320_v48 = vpack.c.b16 %v5228_v30, %v5228_v30  ;;  %v5632_v22 = vsel %vm12230_vm9, %v10686_v4, %v5631_v31 }
 0x1fc   : > { %v5356_v57 = vsel %vm14032_vm12, %v5320_v48, %v5355_v32  ;;  %v14040_v12 = vpop.permute.xlu0 %3113  ;;  %v5460_v48 = vshll.u32 %v5440_v13, 16 }
 0x1fd   : > { %5357 = vst [vmem:[#allocation3 + $0x8] sm:$0xf] %v5356_v57  ;;  %v14046_v44 = vpop.permute.xlu1 %3035  ;;  %v5600_v39 = vld [vmem:[#allocation3 + $0xc] sm:$0x1] }
 0x1fe   : > { %v5635_v61 = vrot.slane %v5600_v39, 5 }
 0x200   : > { %v11450_v10 = vpop.f32.mrb[4].mxu0  ;;  %v14050_v34 = vpop.permute.xlu0 %3209 }
 0x201   : > { %v4030_v25 = vadd.f32 %v11450_v10, %v13986_v63  ;;  %v4021_v8 = vpop.f32.mrb[5].mxu0  ;;  %v14058_v33 = vpop.permute.xlu1 %3115 }
 0x202   : > { %v4022_v53 = vadd.f32 %v13986_v63, %v4021_v8  ;;  %v11451_v27 = vpop.f32.mrb[6].mxu0  ;;  %v14072_v8 = vrot.slane %v5457_v19, 4 }
 0x203   : > { %v4138_v17 = vmax.f32 %v4030_v25, 0.0  ;;  %v4033_v60 = vadd.f32 %v11451_v27, %v13986_v63  ;;  %v4024_v18 = vpop.f32.mrb[7].mxu0 }
 0x204   : > { %v5599_v55 = vld [vmem:[#allocation3 + $0x8] sm:$0xe]  ;;  %v4136_v5 = vmax.f32 %v4022_v53, 0.0  ;;  %v4025_v58 = vadd.f32 %v13986_v63, %v4024_v18 }
 0x205   : > { %v10687_v28 = vrot.slane %v5599_v55, 9  ;;  %v4170_v62 = vmin.f32 %v4138_v17, 10.0  ;;  %v4139_v3 = vmax.f32 %v4033_v60, 0.0  ;;  %v11594_v38 = vld [vmem:[#allocation3] ss:$8 sps:$4 sm:$0xff]   ;;  %v14074_v17 = vrot.slane %v5460_v48, 5 }
 0x206   : > { %v4168_v6 = vmin.f32 %v4136_v5, 10.0  ;;  %v4137_v2 = vmax.f32 %v4025_v58, 0.0  ;;  %5436 = vst.msk [vmem:[#allocation6] sm:$0xff] %vm5435_vm4, %v11594_v38  ;;  %v5442_v19 = vld [vmem:[#allocation3 + $0x8] sm:$0xf] }
 0x207   : > { %v5636_v29 = vsel %vm12230_vm9, %v10687_v28, %v5635_v61  ;;  %v4171_v51 = vmin.f32 %v4139_v3, 10.0 }
 0x208   : > { %v10694_v1 = vcombine.low %v5632_v22, %v5636_v29  ;;  %v4198_v54 = vmax.f32 %v4168_v6, %v4170_v62  ;;  %v4169_v37 = vmin.f32 %v4137_v2, 10.0  ;;  %v14060_v42 = vpop.permute.xlu0 %3289 }
 0x209   : > { %v14066_v57 = vpop.permute.xlu1 %3211 }
 0x20a   : > { %5673 = vrot.lane.b32.xlu1 %v10694_v1, %s15677_s15  ;;  %v4262_v43 = vcombine.high %v4198_v54, %v4198_v54  ;;  %v4269_v52 = vrot.slane %v4198_v54, %v13997_v15  ;;  %v4199_v36 = vmax.f32 %v4169_v37, %v4171_v51  ;;  %v3674_v51 = vsel %vm15724_vm8, %v10393_v24, %v14036_v35 }
 0x20c   : > { %v4276_v41 = vrot.slane %v4262_v43, %v13997_v15  ;;  %v4277_v30 = vcombine.high %v4269_v52, %v4269_v52  ;;  %v10550_v32 = vrot.slane %v4269_v52, 9  ;;  %v4279_v46 = vcombine.high %v4199_v36, %v4199_v36  ;;  %v14069_v31 = vpop.permute.xlu0 %3369 }
 0x20d   : > { %v4286_v47 = vrot.slane %v4199_v36, %v13997_v15 }
 0x20e   : > { %v4278_v26 = vcombine.high %v4276_v41, %v4276_v41  ;;  %v10551_v45 = vrot.slane %v4277_v30, 9  ;;  %v10552_v56 = vrot.slane %v4276_v41, 9  ;;  %v4764_v4 = vmax.f32 %v4269_v52, %v10550_v32 }
 0x20f   : > { %v4293_v11 = vrot.slane %v4279_v46, %v13997_v15  ;;  %v4294_v10 = vcombine.high %v4286_v47, %v4286_v47  ;;  %v10554_v25 = vrot.slane %v4286_v47, 9  ;;  %v5364_v46 = vld [vmem:[#allocation3 + $0x14] sm:$0x1] }
 0x210   : > { %v10553_v39 = vrot.slane %v4278_v26, 9  ;;  %v4765_v53 = vmax.f32 %v4277_v30, %v10551_v45  ;;  %v4766_v27 = vmax.f32 %v4276_v41, %v10552_v56  ;;  %v11225_v60 = vpack.c.bf16 %v4764_v4, %v4764_v4  ;;  %v3466_v13 = vpop.permute.xlu0 %3465  ;;  %v4875_v45 = vld [vmem:[#allocation3 + $0x2c] sm:$0x1] }
 0x211   : > { %v4295_v18 = vcombine.high %v4293_v11, %v4293_v11  ;;  %v10555_v55 = vrot.slane %v4294_v10, 9  ;;  %v10556_v22 = vrot.slane %v4293_v11, 9  ;;  %v4768_v61 = vmax.f32 %v4286_v47, %v10554_v25 }
 0x212   : > { %v4767_v5 = vmax.f32 %v4278_v26, %v10553_v39  ;;  %v11226_v58 = vpack.c.bf16 %v4765_v53, %v4765_v53  ;;  %v11227_v28 = vpack.c.bf16 %v4766_v27, %v4766_v27  ;;  %v5154_v3 = vunpack.c.l.b16 %v11225_v60  ;;  %v4844_v26 = vld [vmem:[#allocation3 + $0x28] sm:$0x1] }
 0x213   : > { %v10557_v6 = vrot.slane %v4295_v18, 9  ;;  %v4769_v2 = vmax.f32 %v4294_v10, %v10555_v55  ;;  %v4770_v29 = vmax.f32 %v4293_v11, %v10556_v22  ;;  %v11229_v52 = vpack.c.bf16 %v4768_v61, %v4768_v61 }
 0x214   : > { %v14076_v62 = vpop.permute.xlu1 %3291  ;;  %v11228_v1 = vpack.c.bf16 %v4767_v5, %v4767_v5  ;;  %v5155_v54 = vunpack.c.l.b16 %v11226_v58  ;;  %v5156_v37 = vunpack.c.l.b16 %v11227_v28  ;;  %v5229_v38 = vrot.slane %v5154_v3, 7 }
 0x215   : > { %v4771_v43 = vmax.f32 %v4295_v18, %v10557_v6  ;;  %v11230_v36 = vpack.c.bf16 %v4769_v2, %v4769_v2  ;;  %v11231_v48 = vpack.c.bf16 %v4770_v29, %v4770_v29  ;;  %v3708_v47 = vsel %vm15725_vm0, %v3674_v51, %v14040_v12 }
 0x216   : > { %v5157_v41 = vunpack.c.l.b16 %v11228_v1  ;;  %v5230_v30 = vrot.slane %v5155_v54, 6  ;;  %v5232_v32 = vrot.slane %v5156_v37, 5  ;;  %v5158_v21 = vunpack.c.l.b16 %v11229_v52 }
 0x217   : > { %v5159_v24 = vunpack.c.l.b16 %v11230_v36  ;;  %v11282_v35 = vpack.c.bf16 %v4771_v43, %v4771_v43  ;;  %v5160_v11 = vunpack.c.l.b16 %v11231_v48  ;;  %v5471_v10 = vshrl.u32 %v5442_v19, 16 }
 0x218   : > { %v3372_v7 = vpop.permute.xlu1 %3371  ;;  %v5231_v56 = vsel %vm5212_vm11, %v5230_v30, %v5229_v38  ;;  %v5234_v4 = vrot.slane %v5157_v41, 4  ;;  %v5236_v39 = vrot.slane %v5158_v21, 3  ;;  %v5474_v27 = vshll.u32 %v5442_v19, 16 }
 0x219   : > { %v5233_v25 = vsel %vm5215_vm3, %v5232_v32, %v5231_v56  ;;  %v5365_v53 = vsel %vm13932_vm10, %v11282_v35, %v5364_v46  ;;  %v5238_v60 = vrot.slane %v5159_v24, 2  ;;  %v4845_v18 = vsel %vm13932_vm10, 0, %v4844_v26  ;;  %v5883_v46 = vld [vmem:[#allocation3 + $0x8] sm:$0xe] }
 0x21a   : > { %v5235_v12 = vsel %vm15674_vm5, %v5234_v4, %v5233_v25  ;;  %5366 = vst [vmem:[#allocation3 + $0x14] sm:$0x1] %v5365_v53  ;;  %v4876_v55 = vsel %vm13941_vm2, 0, %v4875_v45  ;;  %v3677_v22 = vsel %vm15724_vm8, %v10394_v0, %v14046_v44  ;;  %vm15726_vm0 = vcmask 72704   ;;  %4846 = vst [vmem:[#allocation3 + $0x28] sm:$0x1] %v4845_v18 }
 0x21b   : > { %v3741_v5 = vsel %vm15726_vm0, %v3708_v47, %v14050_v34  ;;  %v5237_v61 = vsel %vm15675_vm6, %v5236_v39, %v5235_v12  ;;  %v5240_v3 = vrot.slane %v5160_v11, 1  ;;  %4877 = vst [vmem:[#allocation3 + $0x2c] sm:$0x1] %v4876_v55  ;;  %vm15727_vm5 = vcmask 121856   ;;  %v5361_v0 = vld [vmem:[#allocation3 + $0x10] sm:$0xf] }
 0x21c   : > { %v3468_v58 = vpop.permute.xlu1 %3467  ;;  %v3546_v28 = vpop.permute.xlu0 %3545  ;;  %v3774_v6 = vsel %vm3744_vm7, %v3741_v5, %v14060_v42  ;;  %v5239_v2 = vsel %vm15676_vm1, %v5238_v60, %v5237_v61  ;;  %v5441_v44 = vld [vmem:[#allocation3 + $0x4] sm:$0x1]  ;;  %v5473_v34 = vrot.slane %v5471_v10, 4  ;;  %v5476_v29 = vrot.slane %v5474_v27, 5 }
 0x21d   : > { %v3807_v14 = vsel %vm15727_vm5, %v3774_v6, %v14069_v31  ;;  %v5241_v59 = vsel %vm5227_vm15, %v5240_v3, %v5239_v2  ;;  %vm15728_vm8 = vcmask 48128   ;;  %vm15729_vm0 = vcmask 146432   ;;  %v5736_v3 = vld [vmem:[#allocation3 + $0xc] sm:$0x1] }
 0x21e   : > { %v3710_v51 = vsel %vm15728_vm8, %v3677_v22, %v14058_v33  ;;  %v3840_v1 = vsel %vm15729_vm0, %v3807_v14, %v3466_v13  ;;  %v5322_v54 = vpack.c.b16 %v5241_v59, %v5241_v59  ;;  %vm15730_vm6 = vcmask 72704   ;;  %v5443_v13 = vld [vmem:[#allocation3 + $0xc] sm:$0x1] }
 0x21f   : > { %v3743_v42 = vsel %vm15730_vm6, %v3710_v51, %v14066_v57  ;;  %vm15731_vm1 = vcmask 171008   ;;  %v5463_v31 = vor.u32 %v14074_v17, %v14072_v8  ;;  %v5466_v19 = vshll.u32 %v5441_v44, 16 }
 0x220   : > { %v3548_v37 = vpop.permute.xlu1 %3547  ;;  %v3873_v38 = vsel %vm15731_vm1, %v3840_v1, %v3546_v28  ;;  %v3626_v43 = vpop.permute.xlu0 %3625  ;;  %v3776_v52 = vsel %vm3744_vm7, %v3743_v42, %v14076_v62  ;;  %v5362_v33 = vsel %vm14032_vm12, %v5322_v54, %v5361_v0  ;;  %vm15732_vm6 = vcmask 220160   ;;  %vm15733_vm1 = vmmov %vm15729_vm0  ;;  %v5735_v62 = vld [vmem:[#allocation3 + $0x8] sm:$0xf]  ;;  %v4847_v1 = vld [vmem:[#allocation3 + $0x30] sm:$0x1] }
 0x221   : > { %v3906_v36 = vsel %vm3876_vm13, %v3873_v38, %v3626_v43  ;;  %v3809_v41 = vsel %vm15727_vm5, %v3776_v52, %v3372_v7  ;;  %5363 = vst [vmem:[#allocation3 + $0x10] sm:$0xf] %v5362_v33  ;;  %v5477_v57 = vor.u32 %v5476_v29, %v5473_v34  ;;  %vm15734_vm8 = vcmask 171008   ;;  %vm15735_vm7 = vmmov %vm15732_vm6  ;;  %v5884_v7 = vld [vmem:[#allocation3 + $0xc] sm:$0x1] }
 0x222   : > { %11472 = vmatprep.mubr.msk.bf16.mxu0 %vm15732_vm6, %v3906_v36  ;;  %v3842_v30 = vsel %vm15733_vm1, %v3809_v41, %v3468_v58  ;;  %v5480_v32 = vshll.u32 %v5443_v13, 16  ;;  %v5464_v47 = vrot.slane %v5463_v31, 4  ;;  %v5468_v21 = vrot.slane %v5466_v19, 5  ;;  %v5886_v35 = vld [vmem:[#allocation3 + $0x14] sm:$0x1] }
 0x223   : > { %v3875_v8 = vsel %vm15734_vm8, %v3842_v30, %v3548_v37  ;;  %v5478_v24 = vrot.slane %v5477_v57, 4  ;;  %v5752_v26 = vshrl.u32 %v5735_v62, 16  ;;  %v5755_v45 = vshll.u32 %v5735_v62, 16  ;;  %v5738_v6 = vld [vmem:[#allocation3 + $0x14] sm:$0x1] }
 0x224   : > { %v3628_v17 = vpop.permute.xlu1 %3627  ;;  %v10706_v56 = vrot.slane %v5883_v46, 9  ;;  %v5482_v4 = vrot.slane %v5480_v32, 5  ;;  %v5469_v25 = vsel %vm12325_vm14, %v5464_v47, %v5468_v21  ;;  %v5917_v39 = vrot.slane %v5884_v7, 5  ;;  %v4878_v54 = vld [vmem:[#allocation3 + $0x34] sm:$0x1] }
 0x225   : > { %v3908_v48 = vsel %vm3876_vm13, %v3875_v8, %v3628_v17  ;;  %v5921_v27 = vrot.slane %v5886_v35, 5  ;;  %v5754_v60 = vrot.slane %v5752_v26, 4  ;;  %v5757_v18 = vrot.slane %v5755_v45, 5 }
 0x226   : > { %11473 = vmatmul.mubr.msk.bf16.gmra.mrb[28].mxu0 %vm15735_vm7, %v3908_v48  ;;  %v5483_v12 = vsel %vm12325_vm14, %v5478_v24, %v5482_v4  ;;  %v5918_v55 = vsel %vm12230_vm9, %v10706_v56, %v5917_v39  ;;  %v5761_v44 = vshll.u32 %v5736_v3, 16  ;;  %v5775_v34 = vshll.u32 %v5738_v6, 16 }
 0x227   : > { %v10682_v28 = vcombine.low %v5469_v25, %v5483_v12  ;;  %v5758_v14 = vor.u32 %v5757_v18, %v5754_v60  ;;  %v4848_v43 = vsel %vm13932_vm10, 0, %v4847_v1  ;;  %v4879_v31 = vsel %vm13941_vm2, 0, %v4878_v54 }
 0x228   : > { %v11590_v11 = vld [vmem:[#allocation3 + $0x8] ss:$8 sps:$4 sm:$0xff]   ;;  %4849 = vst [vmem:[#allocation3 + $0x30] sm:$0x1] %v4848_v43  ;;  %4880 = vst [vmem:[#allocation3 + $0x34] sm:$0x1] %v4879_v31 }
 0x229   : > { %v5885_v10 = vld [vmem:[#allocation3 + $0x10] sm:$0xe]  ;;  %5718 = vrot.lane.b32.xlu1 %v11590_v11, %s12054_s20  ;;  %v5759_v42 = vrot.slane %v5758_v14, 4  ;;  %v5763_v33 = vrot.slane %v5761_v44, 5  ;;  %v5777_v19 = vrot.slane %v5775_v34, 5  ;;  %vm15736_vm13 = vcmask 1044484  }
 0x22a   : > { %v10707_v53 = vrot.slane %v5885_v10, 9  ;;  %v5737_v5 = vld [vmem:[#allocation3 + $0x10] sm:$0xf]  ;;  %vm15737_vm0 = vcmask 1045509   ;;  %vm15738_vm5 = vcmask 1046534   ;;  %vm15739_vm6 = vmmov %vm15736_vm13 }
 0x22b   : > { %v5766_v61 = vshrl.u32 %v5737_v5, 16  ;;  %v5769_v2 = vshll.u32 %v5737_v5, 16  ;;  %v5764_v32 = vsel %vm12325_vm14, %v5759_v42, %v5763_v33  ;;  %vm15740_vm1 = vmmov %vm15737_vm0 }
 0x22c   : > { %v5922_v22 = vsel %vm12230_vm9, %v10707_v53, %v5921_v27  ;;  %vm15741_vm8 = vmmov %vm15738_vm5 }
 0x22d   : > { %v10714_v58 = vcombine.low %v5918_v55, %v5922_v22  ;;  %5580 = vrot.lane.b32.xlu1 %v10682_v28, %s15679_s23  ;;  %v5768_v59 = vrot.slane %v5766_v61, 4  ;;  %v5771_v0 = vrot.slane %v5769_v2, 5  ;;  %vm15743_vm7 = vmmov %vm15739_vm6 }
 0x22f   : > { %5959 = vrot.lane.b32.xlu0 %v10714_v58, %s15679_s23  ;;  %v5772_v29 = vor.u32 %v5771_v0, %v5768_v59  ;;  %s15746_s23 = smov 64  }
 0x231   : > { %v5773_v13 = vrot.slane %v5772_v29, 4 }
 0x233   : > { %v11454_v51 = vpop.f32.mrb[8].mxu0  ;;  %v5778_v62 = vsel %vm12325_vm14, %v5773_v13, %v5777_v19 }
 0x234   : > { %v4046_v37 = vadd.f32 %v11454_v51, %v13986_v63  ;;  %v4037_v38 = vpop.f32.mrb[9].mxu0  ;;  %v10702_v47 = vcombine.low %v5764_v32, %v5778_v62 }
 0x235   : > { %v4038_v52 = vadd.f32 %v13986_v63, %v4037_v38  ;;  %v11455_v36 = vpop.f32.mrb[10].mxu0 }
 0x236   : > { %v4142_v41 = vmax.f32 %v4046_v37, 0.0  ;;  %v4049_v57 = vadd.f32 %v11455_v36, %v13986_v63  ;;  %v4040_v30 = vpop.f32.mrb[11].mxu0  ;;  %5879 = vst.msk [vmem:[#allocation6 + $0x8] sm:$0xff] %vm5435_vm4, %v10702_v47 }
 0x237   : > { %v4140_v8 = vmax.f32 %v4038_v52, 0.0  ;;  %v4041_v17 = vadd.f32 %v13986_v63, %v4040_v30  ;;  %v5370_v30 = vld [vmem:[#allocation3 + $0x1c] sm:$0x1] }
 0x238   : > { %v4174_v48 = vmin.f32 %v4142_v41, 10.0  ;;  %v4143_v46 = vmax.f32 %v4049_v57, 0.0 }
 0x239   : > { %v4172_v21 = vmin.f32 %v4140_v8, 10.0  ;;  %v4141_v24 = vmax.f32 %v4041_v17, 0.0 }
 0x23a   : > { %v4175_v7 = vmin.f32 %v4143_v46, 10.0 }
 0x23b   : > { %v4200_v35 = vmax.f32 %v4172_v21, %v4174_v48  ;;  %v4173_v26 = vmin.f32 %v4141_v24, 10.0 }
 0x23d   : > { %v4296_v45 = vcombine.high %v4200_v35, %v4200_v35  ;;  %v4303_v56 = vrot.slane %v4200_v35, %v13997_v15  ;;  %v4201_v4 = vmax.f32 %v4173_v26, %v4175_v7 }
 0x23f   : > { %v4310_v11 = vrot.slane %v4296_v45, %v13997_v15  ;;  %v4311_v10 = vcombine.high %v4303_v56, %v4303_v56  ;;  %v10558_v25 = vrot.slane %v4303_v56, 9  ;;  %v4313_v39 = vcombine.high %v4201_v4, %v4201_v4 }
 0x240   : > { %v4320_v53 = vrot.slane %v4201_v4, %v13997_v15  ;;  %v5367_v4 = vld [vmem:[#allocation3 + $0x18] sm:$0xf] }
 0x241   : > { %v4312_v27 = vcombine.high %v4310_v11, %v4310_v11  ;;  %v10559_v12 = vrot.slane %v4311_v10, 9  ;;  %v10560_v60 = vrot.slane %v4310_v11, 9  ;;  %v4772_v18 = vmax.f32 %v4303_v56, %v10558_v25 }
 0x242   : > { %v4327_v55 = vrot.slane %v4313_v39, %v13997_v15  ;;  %v4328_v22 = vcombine.high %v4320_v53, %v4320_v53  ;;  %v10562_v5 = vrot.slane %v4320_v53, 9 }
 0x243   : > { %v10561_v58 = vrot.slane %v4312_v27, 9  ;;  %v4773_v28 = vmax.f32 %v4311_v10, %v10559_v12  ;;  %v4774_v61 = vmax.f32 %v4310_v11, %v10560_v60  ;;  %v11233_v3 = vpack.c.bf16 %v4772_v18, %v4772_v18  ;;  %v6020_v10 = vld [vmem:[#allocation3 + $0x10] sm:$0xf]  ;;  %v5602_v12 = vld [vmem:[#allocation3 + $0x14] sm:$0x1] }
 0x244   : > { %v4329_v6 = vcombine.high %v4327_v55, %v4327_v55  ;;  %v10563_v2 = vrot.slane %v4328_v22, 9  ;;  %v10564_v14 = vrot.slane %v4327_v55, 9  ;;  %v4776_v59 = vmax.f32 %v4320_v53, %v10562_v5 }
 0x245   : > { %v4775_v0 = vmax.f32 %v4312_v27, %v10561_v58  ;;  %v11234_v44 = vpack.c.bf16 %v4773_v28, %v4773_v28  ;;  %v11235_v34 = vpack.c.bf16 %v4774_v61, %v4774_v61  ;;  %v5162_v29 = vunpack.c.l.b16 %v11233_v3  ;;  %v5601_v27 = vld [vmem:[#allocation3 + $0x10] sm:$0xe]  ;;  %v6021_v58 = vld [vmem:[#allocation3 + $0x14] sm:$0x1] }
 0x246   : > { %v10565_v51 = vrot.slane %v4329_v6, 9  ;;  %v4777_v1 = vmax.f32 %v4328_v22, %v10563_v2  ;;  %v4778_v54 = vmax.f32 %v4327_v55, %v10564_v14  ;;  %v11237_v42 = vpack.c.bf16 %v4776_v59, %v4776_v59 }
 0x247   : > { %v11236_v37 = vpack.c.bf16 %v4775_v0, %v4775_v0  ;;  %v5163_v38 = vunpack.c.l.b16 %v11234_v44  ;;  %v5164_v43 = vunpack.c.l.b16 %v11235_v34  ;;  %v5242_v19 = vrot.slane %v5162_v29, 7 }
 0x248   : > { %v4779_v31 = vmax.f32 %v4329_v6, %v10565_v51  ;;  %v11238_v52 = vpack.c.bf16 %v4777_v1, %v4777_v1  ;;  %v11239_v36 = vpack.c.bf16 %v4778_v54, %v4778_v54  ;;  %v5166_v33 = vunpack.c.l.b16 %v11237_v42  ;;  %v6176_v54 = vld [vmem:[#allocation3 + $0x10] sm:$0xe] }
 0x249   : > { %v5165_v13 = vunpack.c.l.b16 %v11236_v37  ;;  %v5243_v41 = vrot.slane %v5163_v38, 6  ;;  %v5245_v57 = vrot.slane %v5164_v43, 5  ;;  %v6037_v39 = vshrl.u32 %v6020_v10, 16 }
 0x24a   : > { %v5167_v8 = vunpack.c.l.b16 %v11238_v52  ;;  %v5168_v17 = vunpack.c.l.b16 %v11239_v36  ;;  %v11283_v32 = vpack.c.bf16 %v4779_v31, %v4779_v31  ;;  %v5249_v47 = vrot.slane %v5166_v33, 3  ;;  %v6177_v33 = vld [vmem:[#allocation3 + $0x14] sm:$0x1] }
 0x24b   : > { %v5244_v62 = vsel %vm5212_vm11, %v5243_v41, %v5242_v19  ;;  %v5247_v48 = vrot.slane %v5165_v13, 4  ;;  %v6040_v53 = vshll.u32 %v6020_v10, 16  ;;  %v6039_v60 = vrot.slane %v6037_v39, 4 }
 0x24c   : > { %v5246_v46 = vsel %vm5215_vm3, %v5245_v57, %v5244_v62  ;;  %v5371_v21 = vsel %vm13932_vm10, %v11283_v32, %v5370_v30  ;;  %v5251_v7 = vrot.slane %v5167_v8, 2  ;;  %v5253_v26 = vrot.slane %v5168_v17, 1 }
 0x24d   : > { %v5248_v24 = vsel %vm15736_vm13, %v5247_v48, %v5246_v46  ;;  %5372 = vst [vmem:[#allocation3 + $0x1c] sm:$0x1] %v5371_v21  ;;  %v6042_v18 = vrot.slane %v6040_v53, 5  ;;  %v10688_v22 = vrot.slane %v5601_v27, 9  ;;  %v5639_v5 = vrot.slane %v5602_v12, 5  ;;  %vm15744_vm13 = vmmov %vm15737_vm0 }
 0x24e   : > { %v5250_v35 = vsel %vm15737_vm0, %v5249_v47, %v5248_v24  ;;  %v6046_v51 = vshll.u32 %v6021_v58, 16  ;;  %v10726_v41 = vrot.slane %v6176_v54, 9  ;;  %v4850_v48 = vld [vmem:[#allocation3 + $0x38] sm:$0x1]  ;;  %v4881_v46 = vld [vmem:[#allocation3 + $0x3c] sm:$0x1]  ;;  %vm15745_vm0 = vmmov %vm15738_vm5 }
 0x24f   : > { %v5252_v45 = vsel %vm15738_vm5, %v5251_v7, %v5250_v35  ;;  %v6043_v59 = vor.u32 %v6042_v18, %v6039_v60  ;;  %v5640_v34 = vsel %vm12230_vm9, %v10688_v22, %v5639_v5  ;;  %v6210_v47 = vrot.slane %v6177_v33, 5 }
 0x250   : > { %v5254_v56 = vsel %vm5227_vm15, %v5253_v26, %v5252_v45  ;;  %v6048_v19 = vrot.slane %v6046_v51, 5  ;;  %v4851_v26 = vsel %vm13932_vm10, 0, %v4850_v48  ;;  %v4882_v45 = vsel %vm13941_vm2, 0, %v4881_v46  ;;  %v11602_v48 = vld [vmem:[%s15635_s3 + $0x58] sm:$0xff]  }
 0x251   : > { %v5324_v11 = vpack.c.b16 %v5254_v56, %v5254_v56  ;;  %v6044_v31 = vrot.slane %v6043_v59, 4  ;;  %4852 = vst [vmem:[#allocation3 + $0x38] sm:$0x1] %v4851_v26  ;;  %4883 = vst [vmem:[#allocation3 + $0x3c] sm:$0x1] %v4882_v45  ;;  %v6211_v10 = vsel %vm12230_vm9, %v10726_v41, %v6210_v47  ;;  %vm5592_vm5 = vcmask 523520  }
 0x253   : > { %v5368_v25 = vsel %vm14032_vm12, %v5324_v11, %v5367_v4  ;;  %v6049_v62 = vsel %vm12325_vm14, %v6044_v31, %v6048_v19 }
 0x254   : > { %5369 = vst [vmem:[#allocation3 + $0x18] sm:$0xf] %v5368_v25  ;;  %v5604_v55 = vld [vmem:[#allocation3 + $0x1c] sm:$0x1] }
 0x255   : > { %v6023_v28 = vld [vmem:[#allocation3 + $0x1c] sm:$0x1]  ;;  %v5643_v2 = vrot.slane %v5604_v55, 5 }
 0x256   : > { %v6060_v1 = vshll.u32 %v6023_v28, 16  ;;  %v6179_v43 = vld [vmem:[#allocation3 + $0x1c] sm:$0x1] }
 0x257   : > { %v6214_v30 = vrot.slane %v6179_v43, 5 }
 0x258   : > { %v6062_v17 = vrot.slane %v6060_v1, 5 }
 0x25b   : > { %v11591_v61 = vld [vmem:[#allocation3 + $0x10] ss:$8 sps:$4 sm:$0xff]  }
 0x25c   : > { %v5603_v3 = vld [vmem:[#allocation3 + $0x18] sm:$0xe]  ;;  %6004 = vrot.lane.b32.xlu0 %v11591_v61, %s15677_s15 }
 0x25d   : > { %v10689_v6 = vrot.slane %v5603_v3, 9  ;;  %v6022_v14 = vld [vmem:[#allocation3 + $0x18] sm:$0xf]  ;;  %v11596_v3 = vld [vmem:[%s15635_s3 + $0x40] sm:$0xff]  }
 0x25e   : > { %v6051_v0 = vshrl.u32 %v6022_v14, 16  ;;  %v6054_v44 = vshll.u32 %v6022_v14, 16  ;;  %v11613_v52 = vld [vmem:[#allocation3 + $0x10] ss:$8 sps:$4 sm:$0xff]   ;;  %11323 = vmatprep.subr.bf16.mxu1 %v11596_v3 }
 0x25f   : > { %v5644_v29 = vsel %vm12230_vm9, %v10689_v6, %v5643_v2  ;;  %v6178_v13 = vld [vmem:[#allocation3 + $0x18] sm:$0xe]  ;;  %5437 = vst.msk [vmem:[#allocation6 + $0x18] sm:$0xff] %vm5435_vm4, %v11613_v52  ;;  %v11597_v6 = vld [vmem:[%s15635_s3] sm:$0xff]  }
 0x260   : > { %v10695_v42 = vcombine.low %v5640_v34, %v5644_v29  ;;  %v6053_v37 = vrot.slane %v6051_v0, 4  ;;  %v6056_v38 = vrot.slane %v6054_v44, 5  ;;  %v10727_v57 = vrot.slane %v6178_v13, 9  ;;  %v14200_v0 = vld [vmem:[#allocation3 + $0x10] sm:$0xf]  ;;  %11324 = vmatpush3.bf16.msra.mxu1 %v11597_v6 }
 0x261   : > { %v11599_v44 = vld [vmem:[%s15635_s3 + $0x8] sm:$0xff]   ;;  %v5446_v54 = vld [vmem:[#allocation3 + $0x18] sm:$0xf]  ;;  %v5488_v43 = vshll.u32 %v14200_v0, 16 }
 0x262   : > { %5675 = vrot.lane.b32.xlu1 %v10695_v42, %s15677_s15  ;;  %v6057_v36 = vor.u32 %v6056_v38, %v6053_v37  ;;  %v6215_v21 = vsel %vm12230_vm9, %v10727_v57, %v6214_v30  ;;  %v11600_v42 = vld [vmem:[%s15635_s3 + $0x50] sm:$0xff]   ;;  %v5485_v38 = vshrl.u32 %v14200_v0, 16  ;;  %v5499_v57 = vshrl.u32 %v5446_v54, 16  ;;  %s15742_s15 = smov 32  }
 0x263   : > { %v10734_v27 = vcombine.low %v6211_v10, %v6215_v21  ;;  %v11601_v30 = vld [vmem:[%s15635_s3 + $0x10] sm:$0xff]  }
 0x264   : > { %v6058_v8 = vrot.slane %v6057_v36, 4  ;;  %v11458_v32 = vpop.f32.mrb[12].mxu0 }
 0x265   : > { %v4062_v24 = vadd.f32 %v11458_v32, %v13986_v63  ;;  %v4053_v7 = vpop.f32.mrb[13].mxu0  ;;  %6256 = vst.msk [vmem:[#allocation6 + $0x10] sm:$0xff] %vm5435_vm4, %v10734_v27  ;;  %v5502_v27 = vshll.u32 %v5446_v54, 16  ;;  %v5490_v54 = vrot.slane %v5488_v43, 5 }
 0x266   : > { %v6063_v35 = vsel %vm12325_vm14, %v6058_v8, %v6062_v17  ;;  %v4054_v56 = vadd.f32 %v13986_v63, %v4053_v7  ;;  %v11459_v4 = vpop.f32.mrb[14].mxu0 }
 0x267   : > { %v10722_v11 = vcombine.low %v6049_v62, %v6063_v35  ;;  %v4146_v25 = vmax.f32 %v4062_v24, 0.0  ;;  %v4065_v39 = vadd.f32 %v11459_v4, %v13986_v63  ;;  %v4056_v53 = vpop.f32.mrb[15].mxu0 }
 0x268   : > { %v4144_v12 = vmax.f32 %v4054_v56, 0.0  ;;  %v4057_v60 = vadd.f32 %v13986_v63, %v4056_v53  ;;  %v11598_v63 = vld [vmem:[%s15635_s3 + $0x48] sm:$0xff]  }
 0x269   : > { %6160 = vrot.lane.b32.xlu0 %v10722_v11, %s12054_s20  ;;  %v4178_v18 = vmin.f32 %v4146_v25, 10.0  ;;  %v4147_v55 = vmax.f32 %v4065_v39, 0.0  ;;  %11325 = vmatprep.subr.bf16.mxu1 %v11598_v63 }
 0x26a   : > { %v4176_v22 = vmin.f32 %v4144_v12, 10.0  ;;  %v4145_v5 = vmax.f32 %v4057_v60, 0.0  ;;  %11326 = vmatpush3.bf16.msra.mxu1 %v11599_v44  ;;  %v5501_v44 = vrot.slane %v5499_v57, 4 }
 0x26b   : > { %v4179_v58 = vmin.f32 %v4147_v55, 10.0  ;;  %11327 = vmatprep.subr.bf16.mxu1 %v11600_v42 }
 0x26c   : > { %v4202_v28 = vmax.f32 %v4176_v22, %v4178_v18  ;;  %v4177_v61 = vmin.f32 %v4145_v5, 10.0 }
 0x26e   : > { %v4330_v2 = vcombine.high %v4202_v28, %v4202_v28  ;;  %v4337_v14 = vrot.slane %v4202_v28, %v13997_v15  ;;  %v4203_v59 = vmax.f32 %v4177_v61, %v4179_v58  ;;  %11328 = vmatpush3.bf16.msra.mxu1 %v11601_v30  ;;  %v5376_v61 = vld [vmem:[#allocation3 + $0x24] sm:$0x1] }
 0x26f   : > { %11329 = vmatprep.subr.bf16.mxu1 %v11602_v48  ;;  %v5373_v48 = vld [vmem:[#allocation3 + $0x20] sm:$0xf] }
 0x270   : > { %v4344_v34 = vrot.slane %v4330_v2, %v13997_v15  ;;  %v4345_v29 = vcombine.high %v4337_v14, %v4337_v14  ;;  %v10566_v51 = vrot.slane %v4337_v14, 9  ;;  %v4347_v1 = vcombine.high %v4203_v59, %v4203_v59 }
 0x271   : > { %v4354_v37 = vrot.slane %v4203_v59, %v13997_v15  ;;  %v5487_v2 = vrot.slane %v5485_v38, 4 }
 0x272   : > { %v4346_v31 = vcombine.high %v4344_v34, %v4344_v34  ;;  %v10567_v52 = vrot.slane %v4345_v29, 9  ;;  %v10568_v36 = vrot.slane %v4344_v34, 9  ;;  %v4780_v33 = vmax.f32 %v4337_v14, %v10566_v51  ;;  %v11603_v14 = vld [vmem:[%s15635_s3 + $0x18] sm:$0xff]  }
 0x273   : > { %v4361_v13 = vrot.slane %v4347_v1, %v13997_v15  ;;  %v4362_v19 = vcombine.high %v4354_v37, %v4354_v37  ;;  %v10570_v41 = vrot.slane %v4354_v37, 9  ;;  %11330 = vmatpush3.bf16.msra.mxu1 %v11603_v14 }
 0x274   : > { %v10569_v8 = vrot.slane %v4346_v31, 9  ;;  %v4781_v17 = vmax.f32 %v4345_v29, %v10567_v52  ;;  %v4782_v32 = vmax.f32 %v4344_v34, %v10568_v36  ;;  %v11241_v62 = vpack.c.bf16 %v4780_v33, %v4780_v33  ;;  %v14234_v33 = vld [vmem:[%s15718_s2] ss:$0 sm:$0xff] }
 0x275   : > { %v4363_v46 = vcombine.high %v4361_v13, %v4361_v13  ;;  %v10571_v47 = vrot.slane %v4362_v19, 9  ;;  %v10572_v21 = vrot.slane %v4361_v13, 9  ;;  %v4784_v24 = vmax.f32 %v4354_v37, %v10570_v41  ;;  %v11605_v41 = vld [vmem:[%s15635_s3 + $0x20] sm:$0xff]  }
 0x276   : > { %v4783_v7 = vmax.f32 %v4346_v31, %v10569_v8  ;;  %v11242_v35 = vpack.c.bf16 %v4781_v17, %v4781_v17  ;;  %v11243_v26 = vpack.c.bf16 %v4782_v32, %v4782_v32  ;;  %v5170_v45 = vunpack.c.l.b16 %v11241_v62  ;;  %v11604_v31 = vld [vmem:[%s15635_s3 + $0x60] sm:$0xff]   ;;  %v5445_v17 = vld [vmem:[#allocation3 + $0x14] sm:$0x1] }
 0x277   : > { %v10573_v56 = vrot.slane %v4363_v46, 9  ;;  %v4785_v4 = vmax.f32 %v4362_v19, %v10571_v47  ;;  %v4786_v11 = vmax.f32 %v4361_v13, %v10572_v21  ;;  %v11245_v10 = vpack.c.bf16 %v4784_v24, %v4784_v24  ;;  %v5447_v19 = vld [vmem:[#allocation3 + $0x1c] sm:$0x1]  ;;  %11331 = vmatprep.subr.bf16.mxu1 %v11604_v31 }
 0x278   : > { %v11244_v25 = vpack.c.bf16 %v4783_v7, %v4783_v7  ;;  %v5171_v39 = vunpack.c.l.b16 %v11242_v35  ;;  %v5172_v53 = vunpack.c.l.b16 %v11243_v26  ;;  %v5255_v5 = vrot.slane %v5170_v45, 7  ;;  %11332 = vmatpush3.bf16.msra.mxu1 %v11605_v41  ;;  %v11612_v41 = vld [vmem:[%s15635_s3 + $0x38] sm:$0xff]  }
 0x279   : > { %v4787_v12 = vmax.f32 %v4363_v46, %v10573_v56  ;;  %v11246_v60 = vpack.c.bf16 %v4785_v4, %v4785_v4  ;;  %v11247_v18 = vpack.c.bf16 %v4786_v11, %v4786_v11  ;;  %v5174_v55 = vunpack.c.l.b16 %v11245_v10  ;;  %v11606_v56 = vld [vmem:[%s15635_s3 + $0x68] sm:$0xff]  }
 0x27a   : > { %v5173_v22 = vunpack.c.l.b16 %v11244_v25  ;;  %v5256_v58 = vrot.slane %v5171_v39, 6  ;;  %v5258_v28 = vrot.slane %v5172_v53, 5  ;;  %v5504_v34 = vrot.slane %v5502_v27, 5  ;;  %v11607_v25 = vld [vmem:[%s15635_s3 + $0x28] sm:$0xff]   ;;  %11333 = vmatprep.subr.bf16.mxu1 %v11606_v56 }
 0x27b   : > { %v5175_v3 = vunpack.c.l.b16 %v11246_v60  ;;  %v5176_v6 = vunpack.c.l.b16 %v11247_v18  ;;  %v11284_v63 = vpack.c.bf16 %v4787_v12, %v4787_v12  ;;  %v5262_v51 = vrot.slane %v5174_v55, 3  ;;  %v14253_v60 = vld [vmem:[#allocation3 + $0x18] sm:$0xf]  ;;  %v14255_v55 = vld [vmem:[#allocation3 + $0x1c] sm:$0x1] }
 0x27c   : > { %v5257_v59 = vsel %vm5212_vm11, %v5256_v58, %v5255_v5  ;;  %v5260_v0 = vrot.slane %v5173_v22, 4  ;;  %v5505_v32 = vor.u32 %v5504_v34, %v5501_v44  ;;  %v5491_v24 = vor.u32 %v5490_v54, %v5487_v2  ;;  %11334 = vmatpush3.bf16.msra.mxu1 %v11607_v25 }
 0x27d   : > { %v5259_v29 = vsel %vm5215_vm3, %v5258_v28, %v5257_v59  ;;  %v5377_v1 = vsel %vm13932_vm10, %v11284_v63, %v5376_v61  ;;  %v5264_v37 = vrot.slane %v5175_v3, 2  ;;  %v5266_v36 = vrot.slane %v5176_v6, 1  ;;  %v14257_v28 = vld [vmem:[#allocation3 + $0x18] sm:$0xe] }
 0x27e   : > { %v5261_v42 = vsel %vm15739_vm6, %v5260_v0, %v5259_v29  ;;  %5378 = vst [vmem:[#allocation3 + $0x24] sm:$0x1] %v5377_v1  ;;  %v11462_v38 = vpop.f32.mrb[16].mxu0  ;;  %v5508_v45 = vshll.u32 %v5447_v19, 16  ;;  %v5494_v10 = vshll.u32 %v5445_v17, 16  ;;  %v5506_v12 = vrot.slane %v5505_v32, 4 }
 0x27f   : > { %v5263_v52 = vsel %vm15740_vm1, %v5262_v51, %v5261_v42  ;;  %v4078_v43 = vadd.f32 %v14234_v33, %v11462_v38  ;;  %v4069_v13 = vpop.f32.mrb[17].mxu0  ;;  %v5492_v22 = vrot.slane %v5491_v24, 4  ;;  %v11608_v3 = vld [vmem:[%s15635_s3 + $0x70] sm:$0xff]   ;;  %v5780_v2 = vshrl.u32 %v14253_v60, 16  ;;  %v4884_v19 = vld [vmem:[#allocation3 + $0x44] sm:$0x1] }
 0x280   : > { %v5265_v57 = vsel %vm15741_vm8, %v5264_v37, %v5263_v52  ;;  %v4070_v30 = vadd.f32 %v14234_v33, %v4069_v13  ;;  %v11463_v8 = vpop.f32.mrb[18].mxu0  ;;  %v5510_v61 = vrot.slane %v5508_v45, 5  ;;  %v5496_v6 = vrot.slane %v5494_v10, 5  ;;  %v11609_v63 = vld [vmem:[%s15635_s3 + $0x30] sm:$0xff]   ;;  %11335 = vmatprep.subr.bf16.mxu1 %v11608_v3  ;;  %v11611_v52 = vld [vmem:[%s15635_s3 + $0x78] sm:$0xff]   ;;  %vm15748_vm8 = vmmov %vm15744_vm13 }
 0x281   : > { %v5267_v62 = vsel %vm5227_vm15, %v5266_v36, %v5265_v57  ;;  %v4150_v46 = vmax.f32 %v4078_v43, 0.0  ;;  %v4081_v47 = vadd.f32 %v14234_v33, %v11463_v8  ;;  %v4072_v21 = vpop.f32.mrb[19].mxu0  ;;  %v10708_v29 = vrot.slane %v14257_v28, 9  ;;  %11336 = vmatpush3.bf16.msra.mxu1 %v11609_v63 }
 0x282   : > { %v5326_v7 = vpack.c.b16 %v5267_v62, %v5267_v62  ;;  %v4148_v35 = vmax.f32 %v4070_v30, 0.0  ;;  %v4073_v26 = vadd.f32 %v14234_v33, %v4072_v21  ;;  %v5511_v34 = vsel %vm12325_vm14, %v5506_v12, %v5510_v61  ;;  %11337 = vmatprep.subr.bf16.mxu1 %v11611_v52 }
 0x283   : > { %v4182_v4 = vmin.f32 %v4150_v46, 10.0  ;;  %v4151_v11 = vmax.f32 %v4081_v47, 0.0  ;;  %v5925_v51 = vrot.slane %v14255_v55, 5  ;;  %v5497_v1 = vsel %vm12325_vm14, %v5492_v22, %v5496_v6 }
 0x284   : > { %v5374_v39 = vsel %vm14032_vm12, %v5326_v7, %v5373_v48  ;;  %v4180_v53 = vmin.f32 %v4148_v35, 10.0  ;;  %v4149_v27 = vmax.f32 %v4073_v26, 0.0  ;;  %v5783_v54 = vshll.u32 %v14253_v60, 16 }
 0x285   : > { %5375 = vst [vmem:[#allocation3 + $0x20] sm:$0xf] %v5374_v39  ;;  %v4183_v18 = vmin.f32 %v4151_v11, 10.0  ;;  %v14267_v44 = vld [vmem:[#allocation3 + $0x24] sm:$0x1]  ;;  %v10683_v13 = vcombine.low %v5497_v1, %v5511_v34  ;;  %v14285_v57 = vrot.slane %v5780_v2, 4  ;;  %11338 = vmatpush3.bf16.msra.mxu1 %v11612_v41 }
 0x286   : > { %v4204_v5 = vmax.f32 %v4180_v53, %v4182_v4  ;;  %v4181_v58 = vmin.f32 %v4149_v27, 10.0  ;;  %v5929_v43 = vrot.slane %v14267_v44, 5  ;;  %v4885_v21 = vsel %vm13941_vm2, 0, %v4884_v19  ;;  %v5382_v34 = vld [vmem:[#allocation3 + $0x2c] sm:$0x1] }
 0x287   : > { %4886 = vst [vmem:[#allocation3 + $0x44] sm:$0x1] %v4885_v21  ;;  %vm5685_vm6 = vcmask 785920   ;;  %vm5730_vm1 = vcmask 1048320  }
 0x288   : > { %v4364_v14 = vcombine.high %v4204_v5, %v4204_v5  ;;  %v4371_v59 = vrot.slane %v4204_v5, %v13997_v15  ;;  %v4205_v0 = vmax.f32 %v4181_v58, %v4183_v18 }
 0x28a   : > { %v4378_v42 = vrot.slane %v4364_v14, %v13997_v15  ;;  %v4379_v37 = vcombine.high %v4371_v59, %v4371_v59  ;;  %v10574_v38 = vrot.slane %v4371_v59, 9  ;;  %v4381_v31 = vcombine.high %v4205_v0, %v4205_v0 }
 0x28b   : > { %v4388_v36 = vrot.slane %v4205_v0, %v13997_v15 }
 0x28c   : > { %v4380_v30 = vcombine.high %v4378_v42, %v4378_v42  ;;  %v10575_v8 = vrot.slane %v4379_v37, 9  ;;  %v10576_v17 = vrot.slane %v4378_v42, 9  ;;  %v4788_v32 = vmax.f32 %v4371_v59, %v10574_v38  ;;  %v11592_v62 = vld [vmem:[#allocation3 + $0x18] ss:$8 sps:$4 sm:$0xff]  }
 0x28d   : > { %v4395_v48 = vrot.slane %v4381_v31, %v13997_v15  ;;  %v4396_v46 = vcombine.high %v4388_v36, %v4388_v36  ;;  %v10578_v47 = vrot.slane %v4388_v36, 9  ;;  %5720 = vrot.lane.b32.xlu1 %v11592_v62, %s12054_s20  ;;  %v5889_v22 = vld [vmem:[#allocation3 + $0x20] sm:$0xe]  ;;  %v5785_v31 = vrot.slane %v5783_v54, 5  ;;  %v4853_v54 = vld [vmem:[#allocation3 + $0x40] sm:$0x1] }
 0x28e   : > { %v10577_v24 = vrot.slane %v4380_v30, 9  ;;  %v4789_v7 = vmax.f32 %v4379_v37, %v10575_v8  ;;  %v4790_v35 = vmax.f32 %v4378_v42, %v10576_v17  ;;  %v11249_v26 = vpack.c.bf16 %v4788_v32, %v4788_v32 }
 0x28f   : > { %v4397_v45 = vcombine.high %v4395_v48, %v4395_v48  ;;  %v10579_v56 = vrot.slane %v4396_v46, 9  ;;  %v10580_v4 = vrot.slane %v4395_v48, 9  ;;  %v4792_v11 = vmax.f32 %v4388_v36, %v10578_v47  ;;  %v5740_v47 = vld [vmem:[#allocation3 + $0x1c] sm:$0x1] }
 0x290   : > { %v4791_v10 = vmax.f32 %v4380_v30, %v10577_v24  ;;  %v11250_v25 = vpack.c.bf16 %v4789_v7, %v4789_v7  ;;  %v11251_v39 = vpack.c.bf16 %v4790_v35, %v4790_v35  ;;  %v5178_v53 = vunpack.c.l.b16 %v11249_v26  ;;  %v5379_v24 = vld [vmem:[#allocation3 + $0x28] sm:$0xf]  ;;  %v5742_v26 = vld [vmem:[#allocation3 + $0x24] sm:$0x1] }
 0x291   : > { %v10581_v27 = vrot.slane %v4397_v45, 9  ;;  %v4793_v12 = vmax.f32 %v4396_v46, %v10579_v56  ;;  %v4794_v60 = vmax.f32 %v4395_v48, %v10580_v4  ;;  %v11253_v18 = vpack.c.bf16 %v4792_v11, %v4792_v11  ;;  %5582 = vrot.lane.b32.xlu1 %v10683_v13, %s15742_s15  ;;  %v5674_v46 = vpop.permute.xlu1 %5673  ;;  %v6024_v4 = vld [vmem:[#allocation3 + $0x20] sm:$0xf] }
 0x292   : > { %v11252_v5 = vpack.c.bf16 %v4791_v10, %v4791_v10  ;;  %v5179_v58 = vunpack.c.l.b16 %v11250_v25  ;;  %v5180_v61 = vunpack.c.l.b16 %v11251_v39  ;;  %v5268_v3 = vrot.slane %v5178_v53, 7  ;;  %v5605_v53 = vld [vmem:[#allocation3 + $0x20] sm:$0xe] }
 0x293   : > { %v4795_v6 = vmax.f32 %v4397_v45, %v10581_v27  ;;  %v11254_v63 = vpack.c.bf16 %v4793_v12, %v4793_v12  ;;  %v11255_v2 = vpack.c.bf16 %v4794_v60, %v4794_v60  ;;  %v5182_v14 = vunpack.c.l.b16 %v11253_v18 }
 0x294   : > { %v5181_v59 = vunpack.c.l.b16 %v11252_v5  ;;  %v5269_v0 = vrot.slane %v5179_v58, 6  ;;  %v5271_v44 = vrot.slane %v5180_v61, 5  ;;  %v10709_v1 = vrot.slane %v5889_v22, 9  ;;  %v5606_v5 = vld [vmem:[#allocation3 + $0x24] sm:$0x1] }
 0x295   : > { %v5183_v42 = vunpack.c.l.b16 %v11254_v63  ;;  %v5184_v37 = vunpack.c.l.b16 %v11255_v2  ;;  %v11285_v38 = vpack.c.bf16 %v4795_v6, %v4795_v6  ;;  %v5275_v41 = vrot.slane %v5182_v14, 3  ;;  %v5741_v58 = vld [vmem:[#allocation3 + $0x20] sm:$0xf] }
 0x296   : > { %v5270_v52 = vsel %vm5212_vm11, %v5269_v0, %v5268_v3  ;;  %v5273_v36 = vrot.slane %v5181_v59, 4  ;;  %v5930_v19 = vsel %vm12230_vm9, %v10709_v1, %v5929_v43  ;;  %v5926_v8 = vsel %vm12230_vm9, %v10708_v29, %v5925_v51 }
 0x297   : > { %v5272_v13 = vsel %vm5215_vm3, %v5271_v44, %v5270_v52  ;;  %v5383_v30 = vsel %vm13932_vm10, %v11285_v38, %v5382_v34  ;;  %v5277_v32 = vrot.slane %v5183_v42, 2  ;;  %v10715_v62 = vcombine.low %v5926_v8, %v5930_v19  ;;  %v4856_v34 = vld [vmem:[#allocation3 + $0x48] sm:$0x1]  ;;  %v14324_v19 = vld [vmem:[#allocation3 + $0x20] sm:$0xf] }
 0x298   : > { %v5274_v17 = vsel %vm15743_vm7, %v5273_v36, %v5272_v13  ;;  %5384 = vst [vmem:[#allocation3 + $0x2c] sm:$0x1] %v5383_v30  ;;  %v5279_v48 = vrot.slane %v5184_v37, 1  ;;  %v5786_v21 = vor.u32 %v5785_v31, %v14285_v57  ;;  %v4854_v29 = vsel %vm13932_vm10, 0, %v4853_v54  ;;  %v4887_v30 = vld [vmem:[#allocation3 + $0x4c] sm:$0x1] }
 0x299   : > { %v5276_v43 = vsel %vm15744_vm13, %v5275_v41, %v5274_v17  ;;  %5961 = vrot.lane.b32.xlu0 %v10715_v62, %s15742_s15  ;;  %4855 = vst [vmem:[#allocation3 + $0x40] sm:$0x1] %v4854_v29  ;;  %v5789_v11 = vshll.u32 %v5740_v47, 16  ;;  %v5803_v61 = vshll.u32 %v5742_v26, 16  ;;  %v6065_v63 = vshrl.u32 %v6024_v4, 16 }
 0x29a   : > { %v5278_v55 = vsel %vm15745_vm0, %v5277_v32, %v5276_v43  ;;  %v11466_v28 = vpop.f32.mrb[20].mxu0  ;;  %v14315_v12 = vrot.slane %v5786_v21, 4  ;;  %v6068_v2 = vshll.u32 %v6024_v4, 16  ;;  %v10690_v0 = vrot.slane %v5605_v53, 9 }
 0x29b   : > { %v5280_v51 = vsel %vm5227_vm15, %v5279_v48, %v5278_v55  ;;  %v4094_v7 = vadd.f32 %v14234_v33, %v11466_v28  ;;  %v4085_v35 = vpop.f32.mrb[21].mxu0  ;;  %v5719_v27 = vpop.permute.xlu1 %5718  ;;  %v14320_v44 = vrot.slane %v5789_v11, 5  ;;  %v5647_v42 = vrot.slane %v5606_v5, 5 }
 0x29c   : > { %v5328_v45 = vpack.c.b16 %v5280_v51, %v5280_v51  ;;  %v4086_v56 = vadd.f32 %v14234_v33, %v4085_v35  ;;  %v11467_v57 = vpop.f32.mrb[22].mxu0  ;;  %v5794_v31 = vshrl.u32 %v5741_v58, 16  ;;  %v14330_v41 = vrot.slane %v5803_v61, 5 }
 0x29d   : > { %v4154_v10 = vmax.f32 %v4094_v7, 0.0  ;;  %v4097_v25 = vadd.f32 %v14234_v33, %v11467_v57  ;;  %v4088_v39 = vpop.f32.mrb[23].mxu0  ;;  %v5792_v13 = vsel %vm12325_vm14, %v14315_v12, %v14320_v44  ;;  %v14332_v8 = vrot.slane %v6065_v63, 4  ;;  %v6180_v12 = vld [vmem:[#allocation3 + $0x20] sm:$0xe] }
 0x29e   : > { %v5380_v60 = vsel %vm14032_vm12, %v5328_v45, %v5379_v24  ;;  %v4152_v18 = vmax.f32 %v4086_v56, 0.0  ;;  %v4089_v22 = vadd.f32 %v14234_v33, %v4088_v39  ;;  %v14334_v54 = vrot.slane %v6068_v2, 5 }
 0x29f   : > { %5381 = vst [vmem:[#allocation3 + $0x28] sm:$0xf] %v5380_v60  ;;  %v4186_v3 = vmin.f32 %v4154_v10, 10.0  ;;  %v4155_v6 = vmax.f32 %v4097_v25, 0.0  ;;  %v5581_v38 = vpop.permute.xlu1 %5580  ;;  %v5797_v17 = vshll.u32 %v5741_v58, 16  ;;  %v4857_v32 = vsel %vm13932_vm10, 0, %v4856_v34 }
 0x2a0   : > { %v4184_v14 = vmin.f32 %v4152_v18, 10.0  ;;  %v4153_v59 = vmax.f32 %v4089_v22, 0.0  ;;  %5593 = vst.msk [vmem:[#allocation6] sm:$0xff] %vm5592_vm5, %v5581_v38  ;;  %v5608_v47 = vld [vmem:[#allocation3 + $0x2c] sm:$0x1]  ;;  %v14342_v21 = vsel %vm12230_vm9, %v10690_v0, %v5647_v42  ;;  %v5513_v55 = vshrl.u32 %v14324_v19, 16 }
 0x2a1   : > { %v4187_v1 = vmin.f32 %v4155_v6, 10.0  ;;  %v5960_v37 = vpop.permute.xlu0 %5959  ;;  %5686 = vst.msk [vmem:[#allocation6] sm:$0xff] %vm5685_vm6, %v5674_v46  ;;  %4858 = vst [vmem:[#allocation3 + $0x48] sm:$0x1] %v4857_v32  ;;  %v5516_v46 = vshll.u32 %v14324_v19, 16  ;;  %v14347_v28 = vrot.slane %v5794_v31, 4  ;;  %v6071_v4 = vor.u32 %v14334_v54, %v14332_v8 }
 0x2a2   : > { %v4206_v52 = vmax.f32 %v4184_v14, %v4186_v3  ;;  %v4185_v36 = vmin.f32 %v4153_v59, 10.0  ;;  %5971 = vst.msk [vmem:[#allocation6 + $0x8] sm:$0xff] %vm5592_vm5, %v5960_v37  ;;  %v4888_v29 = vsel %vm13941_vm2, 0, %v4887_v30  ;;  %v5651_v57 = vrot.slane %v5608_v47, 5  ;;  %vm15747_vm2 = vmmov %vm15743_vm7 }
 0x2a3   : > { %5731 = vst.msk [vmem:[#allocation6] sm:$0xff] %vm5730_vm1, %v5719_v27  ;;  %4889 = vst [vmem:[#allocation3 + $0x4c] sm:$0x1] %v4888_v29  ;;  %v14355_v11 = vrot.slane %v5797_v17, 5 }
 0x2a4   : > { %v4398_v62 = vcombine.high %v4206_v52, %v4206_v52  ;;  %v4405_v43 = vrot.slane %v4206_v52, %v13997_v15  ;;  %v4207_v48 = vmax.f32 %v4185_v36, %v4187_v1  ;;  %vm15749_vm7 = vmmov %vm15745_vm0 }
 0x2a5   : > { %vm15750_vm13 = vmmov %vm15747_vm2 }
 0x2a6   : > { %v4412_v51 = vrot.slane %v4398_v62, %v13997_v15  ;;  %v4413_v24 = vcombine.high %v4405_v43, %v4405_v43  ;;  %v10582_v7 = vrot.slane %v4405_v43, 9  ;;  %v4415_v35 = vcombine.high %v4207_v48, %v4207_v48  ;;  %v11593_v26 = vld [vmem:[#allocation3 + $0x20] ss:$8 sps:$4 sm:$0xff]   ;;  %vm15751_vm0 = vmmov %vm15748_vm8 }
 0x2a7   : > { %v4422_v45 = vrot.slane %v4207_v48, %v13997_v15  ;;  %v5607_v56 = vld [vmem:[#allocation3 + $0x28] sm:$0xe]  ;;  %6006 = vrot.lane.b32.xlu0 %v11593_v26, %s15746_s23 }
 0x2a8   : > { %v4414_v10 = vcombine.high %v4412_v51, %v4412_v51  ;;  %v10583_v25 = vrot.slane %v4413_v24, 9  ;;  %v10584_v40 = vrot.slane %v4412_v51, 9  ;;  %v4796_v39 = vmax.f32 %v4405_v43, %v10582_v7  ;;  %v11616_v3 = vld [vmem:[#allocation3 + $0x20] ss:$8 sps:$4 sm:$0xff]   ;;  %v5388_v7 = vld [vmem:[#allocation3 + $0x34] sm:$0x1] }
 0x2a9   : > { %v4429_v53 = vrot.slane %v4415_v35, %v13997_v15  ;;  %v4430_v27 = vcombine.high %v4422_v45, %v4422_v45  ;;  %v10586_v60 = vrot.slane %v4422_v45, 9  ;;  %v10691_v18 = vrot.slane %v5607_v56, 9  ;;  %5438 = vst.msk [vmem:[#allocation6 + $0x30] sm:$0xff] %vm5435_vm4, %v11616_v3  ;;  %v6026_v47 = vld [vmem:[#allocation3 + $0x28] sm:$0xf] }
 0x2aa   : > { %v10585_v22 = vrot.slane %v4414_v10, 9  ;;  %v4797_v5 = vmax.f32 %v4413_v24, %v10583_v25  ;;  %v4798_v58 = vmax.f32 %v4412_v51, %v10584_v40  ;;  %v11257_v61 = vpack.c.bf16 %v4796_v39, %v4796_v39 }
 0x2ab   : > { %v4431_v6 = vcombine.high %v4429_v53, %v4429_v53  ;;  %v10587_v63 = vrot.slane %v4430_v27, 9  ;;  %v10588_v2 = vrot.slane %v4429_v53, 9  ;;  %v4800_v14 = vmax.f32 %v4422_v45, %v10586_v60 }
 0x2ac   : > { %v4799_v59 = vmax.f32 %v4414_v10, %v10585_v22  ;;  %v11258_v0 = vpack.c.bf16 %v4797_v5, %v4797_v5  ;;  %v11259_v34 = vpack.c.bf16 %v4798_v58, %v4798_v58  ;;  %v5186_v1 = vunpack.c.l.b16 %v11257_v61  ;;  %v6027_v58 = vld [vmem:[#allocation3 + $0x2c] sm:$0x1] }
 0x2ad   : > { %v10589_v42 = vrot.slane %v4431_v6, 9  ;;  %v4801_v37 = vmax.f32 %v4430_v27, %v10587_v63  ;;  %v4802_v38 = vmax.f32 %v4429_v53, %v10588_v2  ;;  %v11261_v31 = vpack.c.bf16 %v4800_v14, %v4800_v14  ;;  %v5450_v27 = vld [vmem:[#allocation3 + $0x28] sm:$0xf] }
 0x2ae   : > { %v11260_v52 = vpack.c.bf16 %v4799_v59, %v4799_v59  ;;  %v5187_v36 = vunpack.c.l.b16 %v11258_v0  ;;  %v5188_v30 = vunpack.c.l.b16 %v11259_v34  ;;  %v5281_v17 = vrot.slane %v5186_v1, 7 }
 0x2af   : > { %v4803_v32 = vmax.f32 %v4431_v6, %v10589_v42  ;;  %v11262_v62 = vpack.c.bf16 %v4801_v37, %v4801_v37  ;;  %v11263_v43 = vpack.c.bf16 %v4802_v38, %v4802_v38  ;;  %v5190_v48 = vunpack.c.l.b16 %v11261_v31  ;;  %v5385_v42 = vld [vmem:[#allocation3 + $0x30] sm:$0xf] }
 0x2b0   : > { %v5189_v29 = vunpack.c.l.b16 %v11260_v52  ;;  %v5282_v51 = vrot.slane %v5187_v36, 6  ;;  %v5284_v24 = vrot.slane %v5188_v30, 5  ;;  %v5652_v35 = vsel %vm12230_vm9, %v10691_v18, %v5651_v57  ;;  %v6025_v18 = vld [vmem:[#allocation3 + $0x24] sm:$0x1] }
 0x2b1   : > { %v5191_v26 = vunpack.c.l.b16 %v11262_v62  ;;  %v5192_v45 = vunpack.c.l.b16 %v11263_v43  ;;  %v11286_v56 = vpack.c.bf16 %v4803_v32, %v4803_v32  ;;  %v5800_v10 = vor.u32 %v14355_v11, %v14347_v28  ;;  %v5451_v62 = vld [vmem:[#allocation3 + $0x2c] sm:$0x1] }
 0x2b2   : > { %v5283_v25 = vsel %vm5212_vm11, %v5282_v51, %v5281_v17  ;;  %v5286_v40 = vrot.slane %v5189_v29, 4  ;;  %v10696_v39 = vcombine.low %v14342_v21, %v5652_v35  ;;  %v6079_v53 = vshrl.u32 %v6026_v47, 16  ;;  %v5449_v17 = vld [vmem:[#allocation3 + $0x24] sm:$0x1]  ;;  %v6183_v35 = vld [vmem:[#allocation3 + $0x2c] sm:$0x1] }
 0x2b3   : > { %v5285_v60 = vsel %vm5215_vm3, %v5284_v24, %v5283_v25  ;;  %v5288_v22 = vrot.slane %v5190_v48, 3  ;;  %v5290_v5 = vrot.slane %v5191_v26, 2  ;;  %v5389_v57 = vsel %vm13932_vm10, %v11286_v56, %v5388_v7  ;;  %v5743_v24 = vld [vmem:[#allocation3 + $0x28] sm:$0xf] }
 0x2b4   : > { %v5287_v61 = vsel %vm15747_vm2, %v5286_v40, %v5285_v60  ;;  %v5292_v3 = vrot.slane %v5192_v45, 1  ;;  %5390 = vst [vmem:[#allocation3 + $0x34] sm:$0x1] %v5389_v57  ;;  %5677 = vrot.lane.b32.xlu1 %v10696_v39, %s15746_s23  ;;  %v6081_v28 = vrot.slane %v6079_v53, 4  ;;  %v6082_v11 = vshll.u32 %v6026_v47, 16  ;;  %vm15752_vm2 = vmmov %vm15749_vm7 }
 0x2b5   : > { %v5289_v21 = vsel %vm15748_vm8, %v5288_v22, %v5287_v61  ;;  %v5527_v6 = vshrl.u32 %v5450_v27, 16  ;;  %v5530_v63 = vshll.u32 %v5450_v27, 16  ;;  %v5801_v2 = vrot.slane %v5800_v10, 4  ;;  %v6182_v7 = vld [vmem:[#allocation3 + $0x28] sm:$0xe]  ;;  %vm15753_vm8 = vmmov %vm15750_vm13 }
 0x2b6   : > { %v5291_v14 = vsel %vm15749_vm7, %v5290_v5, %v5289_v21  ;;  %v6074_v59 = vshll.u32 %v6025_v18, 16  ;;  %v6084_v0 = vrot.slane %v6082_v11, 5  ;;  %v6088_v34 = vshll.u32 %v6027_v58, 16  ;;  %v5891_v26 = vld [vmem:[#allocation3 + $0x28] sm:$0xe]  ;;  %vm15754_vm7 = vmmov %vm15751_vm0 }
 0x2b7   : > { %v5293_v1 = vsel %vm5227_vm15, %v5292_v3, %v5291_v14  ;;  %v5529_v37 = vrot.slane %v5527_v6, 4  ;;  %v5532_v38 = vrot.slane %v5530_v63, 5  ;;  %v5806_v31 = vsel %vm12325_vm14, %v5801_v2, %v14330_v41  ;;  %v5892_v45 = vld [vmem:[#allocation3 + $0x2c] sm:$0x1] }
 0x2b8   : > { %v5330_v52 = vpack.c.b16 %v5293_v1, %v5293_v1  ;;  %v6072_v36 = vrot.slane %v6071_v4, 4  ;;  %v6085_v30 = vor.u32 %v6084_v0, %v6081_v28  ;;  %v10703_v32 = vcombine.low %v5792_v13, %v5806_v31  ;;  %v5744_v31 = vld [vmem:[#allocation3 + $0x2c] sm:$0x1] }
 0x2b9   : > { %v5515_v43 = vrot.slane %v5513_v55, 4  ;;  %v5518_v41 = vrot.slane %v5516_v46, 5  ;;  %v6076_v8 = vrot.slane %v6074_v59, 5  ;;  %v6090_v4 = vrot.slane %v6088_v34, 5  ;;  %v6181_v55 = vld [vmem:[#allocation3 + $0x24] sm:$0x1] }
 0x2ba   : > { %v5386_v48 = vsel %vm14032_vm12, %v5330_v52, %v5385_v42  ;;  %v6086_v54 = vrot.slane %v6085_v30, 4  ;;  %5880 = vst.msk [vmem:[#allocation6 + $0x20] sm:$0xff] %vm5435_vm4, %v10703_v32  ;;  %v5522_v47 = vshll.u32 %v5449_v17, 16  ;;  %v5533_v29 = vor.u32 %v5532_v38, %v5529_v37 }
 0x2bb   : > { %5387 = vst [vmem:[#allocation3 + $0x30] sm:$0xf] %v5386_v48  ;;  %v6077_v44 = vsel %vm12325_vm14, %v6072_v36, %v6076_v8  ;;  %v5536_v19 = vshll.u32 %v5451_v62, 16  ;;  %v5519_v51 = vor.u32 %v5518_v41, %v5515_v43  ;;  %v10728_v56 = vrot.slane %v6180_v12, 9  ;;  %v5894_v39 = vld [vmem:[#allocation3 + $0x34] sm:$0x1] }
 0x2bc   : > { %v6091_v13 = vsel %vm12325_vm14, %v6086_v54, %v6090_v4  ;;  %v5524_v10 = vrot.slane %v5522_v47, 5  ;;  %v5534_v25 = vrot.slane %v5533_v29, 4  ;;  %v6218_v40 = vrot.slane %v6181_v55, 5  ;;  %v5746_v52 = vld [vmem:[#allocation3 + $0x34] sm:$0x1] }
 0x2bd   : > { %v10723_v46 = vcombine.low %v6077_v44, %v6091_v13  ;;  %v5808_v53 = vshrl.u32 %v5743_v24, 16  ;;  %v5811_v27 = vshll.u32 %v5743_v24, 16  ;;  %v10729_v60 = vrot.slane %v6182_v7, 9 }
 0x2be   : > { %v6222_v22 = vrot.slane %v6183_v35, 5  ;;  %v10710_v5 = vrot.slane %v5891_v26, 9  ;;  %v5933_v57 = vrot.slane %v5892_v45, 5  ;;  %v5520_v18 = vrot.slane %v5519_v51, 4 }
 0x2bf   : > { %6162 = vrot.lane.b32.xlu0 %v10723_v46, %s12054_s20  ;;  %v5538_v58 = vrot.slane %v5536_v19, 5  ;;  %v6219_v28 = vsel %vm12230_vm9, %v10728_v56, %v6218_v40  ;;  %v5937_v6 = vrot.slane %v5894_v39, 5  ;;  %v5810_v14 = vrot.slane %v5808_v53, 4 }
 0x2c0   : > { %v6223_v11 = vsel %vm12230_vm9, %v10729_v60, %v6222_v22  ;;  %v5813_v59 = vrot.slane %v5811_v27, 5  ;;  %v5934_v0 = vsel %vm12230_vm9, %v10710_v5, %v5933_v57  ;;  %v5525_v1 = vsel %vm12325_vm14, %v5520_v18, %v5524_v10 }
 0x2c1   : > { %v5539_v63 = vsel %vm12325_vm14, %v5534_v25, %v5538_v58  ;;  %v10735_v2 = vcombine.low %v6219_v28, %v6223_v11  ;;  %v5817_v32 = vshll.u32 %v5744_v31, 16  ;;  %v5831_v41 = vshll.u32 %v5746_v52, 16 }
 0x2c2   : > { %v11595_v61 = vld [vmem:[#allocation3 + $0x28] ss:$8 sps:$4 sm:$0xff]   ;;  %v10684_v38 = vcombine.low %v5525_v1, %v5539_v63  ;;  %v5814_v30 = vor.u32 %v5813_v59, %v5810_v14 }
 0x2c3   : > { %v5893_v3 = vld [vmem:[#allocation3 + $0x30] sm:$0xe]  ;;  %5722 = vrot.lane.b32.xlu1 %v11595_v61, %s12054_s20  ;;  %6257 = vst.msk [vmem:[#allocation6 + $0x28] sm:$0xff] %vm5435_vm4, %v10735_v2  ;;  %v5819_v44 = vrot.slane %v5817_v32, 5  ;;  %v5833_v51 = vrot.slane %v5831_v41, 5 }
 0x2c4   : > { %v10711_v21 = vrot.slane %v5893_v3, 9  ;;  %v5745_v42 = vld [vmem:[#allocation3 + $0x30] sm:$0xf]  ;;  %v5815_v4 = vrot.slane %v5814_v30, 4 }
 0x2c5   : > { %v5822_v36 = vshrl.u32 %v5745_v42, 16  ;;  %v5825_v17 = vshll.u32 %v5745_v42, 16 }
 0x2c6   : > { %v5938_v34 = vsel %vm12230_vm9, %v10711_v21, %v5937_v6  ;;  %v5820_v56 = vsel %vm12325_vm14, %v5815_v4, %v5819_v44 }
 0x2c7   : > { %v10716_v37 = vcombine.low %v5934_v0, %v5938_v34  ;;  %5584 = vrot.lane.b32.xlu1 %v10684_v38, %s15742_s15  ;;  %v5824_v62 = vrot.slane %v5822_v36, 4  ;;  %v5827_v43 = vrot.slane %v5825_v17, 5 }
 0x2c9   : > { %5963 = vrot.lane.b32.xlu0 %v10716_v37, %s15742_s15  ;;  %v5828_v47 = vor.u32 %v5827_v43, %v5824_v62 }
 0x2cb   : > { %v11470_v48 = vpop.f32.mrb[24].mxu0  ;;  %v5829_v46 = vrot.slane %v5828_v47, 4 }
 0x2cc   : > { %v4110_v8 = vadd.f32 %v14234_v33, %v11470_v48  ;;  %v4101_v54 = vpop.f32.mrb[25].mxu0 }
 0x2cd   : > { %v4102_v29 = vadd.f32 %v14234_v33, %v4101_v54  ;;  %v11471_v12 = vpop.f32.mrb[26].mxu0  ;;  %v5834_v10 = vsel %vm12325_vm14, %v5829_v46, %v5833_v51  ;;  %v5394_v51 = vld [vmem:[#allocation3 + $0x3c] sm:$0x1] }
 0x2ce   : > { %v4158_v13 = vmax.f32 %v4110_v8, 0.0  ;;  %v4113_v19 = vadd.f32 %v14234_v33, %v11471_v12  ;;  %v4104_v55 = vpop.f32.mrb[27].mxu0  ;;  %v6005_v35 = vpop.permute.xlu0 %6004  ;;  %v10704_v39 = vcombine.low %v5820_v56, %v5834_v10  ;;  %v6260_v10 = vld [vmem:[#allocation6] sm:$0xff] }
 0x2cf   : > { %v4156_v24 = vmax.f32 %v4102_v29, 0.0  ;;  %v4105_v7 = vadd.f32 %v14234_v33, %v4104_v55  ;;  %6016 = vst.msk [vmem:[#allocation6 + $0x8] sm:$0xff] %vm5685_vm6, %v6005_v35 }
 0x2d0   : > { %v4190_v26 = vmin.f32 %v4158_v13, 10.0  ;;  %v4159_v45 = vmax.f32 %v4113_v19, 0.0  ;;  %5881 = vst.msk [vmem:[#allocation6 + $0x38] sm:$0xff] %vm5435_vm4, %v10704_v39 }
 0x2d1   : > { %v4188_v25 = vmin.f32 %v4156_v24, 10.0  ;;  %v4157_v40 = vmax.f32 %v4105_v7, 0.0 }
 0x2d2   : > { %v4191_v53 = vmin.f32 %v4159_v45, 10.0 }
 0x2d3   : > { %v4208_v27 = vmax.f32 %v4188_v25, %v4190_v26  ;;  %v4189_v60 = vmin.f32 %v4157_v40, 10.0 }
 0x2d5   : > { %v4432_v33 = vcombine.high %v4208_v27, %v4208_v27  ;;  %v4439_v22 = vrot.slane %v4208_v27, %v13997_v15  ;;  %v4209_v5 = vmax.f32 %v4189_v60, %v4191_v53 }
 0x2d7   : > { %v4446_v57 = vrot.slane %v4432_v33, %v13997_v15  ;;  %v4447_v18 = vcombine.high %v4439_v22, %v4439_v22  ;;  %v10590_v58 = vrot.slane %v4439_v22, 9  ;;  %v4449_v61 = vcombine.high %v4209_v5, %v4209_v5 }
 0x2d8   : > { %v4456_v3 = vrot.slane %v4209_v5, %v13997_v15 }
 0x2d9   : > { %v4448_v28 = vcombine.high %v4446_v57, %v4446_v57  ;;  %v10591_v11 = vrot.slane %v4447_v18, 9  ;;  %v10592_v21 = vrot.slane %v4446_v57, 9  ;;  %v4804_v6 = vmax.f32 %v4439_v22, %v10590_v58  ;;  %v5452_v58 = vld [vmem:[#allocation3 + $0x30] sm:$0xf] }
 0x2da   : > { %v4463_v63 = vrot.slane %v4449_v61, %v13997_v15  ;;  %v4464_v2 = vcombine.high %v4456_v3, %v4456_v3  ;;  %v10594_v14 = vrot.slane %v4456_v3, 9 }
 0x2db   : > { %v6161_v59 = vpop.permute.xlu0 %6160  ;;  %v10593_v0 = vrot.slane %v4448_v28, 9  ;;  %v4805_v34 = vmax.f32 %v4447_v18, %v10591_v11  ;;  %v4806_v1 = vmax.f32 %v4446_v57, %v10592_v21  ;;  %v11265_v42 = vpack.c.bf16 %v4804_v6, %v4804_v6  ;;  %v5391_v57 = vld [vmem:[#allocation3 + $0x38] sm:$0xf]  ;;  %v5610_v11 = vld [vmem:[#allocation3 + $0x34] sm:$0x1] }
 0x2dc   : > { %6172 = vst.msk [vmem:[#allocation6 + $0x8] sm:$0xff] %vm5730_vm1, %v6161_v59  ;;  %v4465_v37 = vcombine.high %v4463_v63, %v4463_v63  ;;  %v10595_v38 = vrot.slane %v4464_v2, 9  ;;  %v10596_v31 = vrot.slane %v4463_v63, 9  ;;  %v4808_v52 = vmax.f32 %v4456_v3, %v10594_v14  ;;  %v5609_v21 = vld [vmem:[#allocation3 + $0x30] sm:$0xe] }
 0x2dd   : > { %v4807_v36 = vmax.f32 %v4448_v28, %v10593_v0  ;;  %v11266_v30 = vpack.c.bf16 %v4805_v34, %v4805_v34  ;;  %v11267_v17 = vpack.c.bf16 %v4806_v1, %v4806_v1  ;;  %v5194_v32 = vunpack.c.l.b16 %v11265_v42  ;;  %v6184_v42 = vld [vmem:[#allocation3 + $0x30] sm:$0xe] }
 0x2de   : > { %v10597_v62 = vrot.slane %v4465_v37, 9  ;;  %v4809_v43 = vmax.f32 %v4464_v2, %v10595_v38  ;;  %v4810_v41 = vmax.f32 %v4463_v63, %v10596_v31  ;;  %v11269_v48 = vpack.c.bf16 %v4808_v52, %v4808_v52  ;;  %v5453_v2 = vld [vmem:[#allocation3 + $0x34] sm:$0x1] }
 0x2df   : > { %v11268_v8 = vpack.c.bf16 %v4807_v36, %v4807_v36  ;;  %v5195_v54 = vunpack.c.l.b16 %v11266_v30  ;;  %v5196_v4 = vunpack.c.l.b16 %v11267_v17  ;;  %v5294_v19 = vrot.slane %v5194_v32, 7  ;;  %v11618_v36 = vld [vmem:[%s15635_s3 + $0x80] sm:$0xff]  }
 0x2e0   : > { %v4811_v47 = vmax.f32 %v4465_v37, %v10597_v62  ;;  %v11270_v29 = vpack.c.bf16 %v4809_v43, %v4809_v43  ;;  %v11271_v12 = vpack.c.bf16 %v4810_v41, %v4810_v41  ;;  %v5198_v44 = vunpack.c.l.b16 %v11269_v48  ;;  %v6185_v62 = vld [vmem:[#allocation3 + $0x34] sm:$0x1]  ;;  %11476 = vmatprep.subr.bf16.mxu1 %v11618_v36 }
 0x2e1   : > { %v5197_v13 = vunpack.c.l.b16 %v11268_v8  ;;  %v5295_v55 = vrot.slane %v5195_v54, 6  ;;  %v5297_v46 = vrot.slane %v5196_v4, 5  ;;  %v5541_v3 = vshrl.u32 %v5452_v58, 16 }
 0x2e2   : > { %v5199_v24 = vunpack.c.l.b16 %v11270_v29  ;;  %v5200_v7 = vunpack.c.l.b16 %v11271_v12  ;;  %v11287_v35 = vpack.c.bf16 %v4811_v47, %v4811_v47  ;;  %v5301_v40 = vrot.slane %v5198_v44, 3 }
 0x2e3   : > { %v6261_v26 = vld [vmem:[#allocation6 + $0x8] sm:$0xff]  ;;  %v5296_v45 = vsel %vm5212_vm11, %v5295_v55, %v5294_v19  ;;  %v5299_v56 = vrot.slane %v5197_v13, 4  ;;  %v5544_v28 = vshll.u32 %v5452_v58, 16  ;;  %v5655_v63 = vrot.slane %v5610_v11, 5 }
 0x2e4   : > { %6467 = vmatprep.mubr.bf16.mxu1 %v6261_v26  ;;  %v5298_v25 = vsel %vm5215_vm3, %v5297_v46, %v5296_v45  ;;  %v5395_v39 = vsel %vm13932_vm10, %v11287_v35, %v5394_v51  ;;  %v5303_v27 = vrot.slane %v5199_v24, 2  ;;  %v5305_v33 = vrot.slane %v5200_v7, 1  ;;  %v11971_v35 = vld [vmem:[%s15718_s2] ss:$0 sm:$0xff] }
 0x2e5   : > { %6468 = vmatmul.mubr.bf16.vlgmr.msra.gmra.mrb[0].mxu1 %v6260_v10  ;;  %v5300_v53 = vsel %vm15750_vm13, %v5299_v56, %v5298_v25  ;;  %5396 = vst [vmem:[#allocation3 + $0x3c] sm:$0x1] %v5395_v39  ;;  %v5543_v14 = vrot.slane %v5541_v3, 4  ;;  %v5546_v59 = vrot.slane %v5544_v28, 5  ;;  %v10692_v0 = vrot.slane %v5609_v21, 9  ;;  %vm15755_vm13 = vmmov %vm15752_vm2 }
 0x2e6   : > { %v5302_v60 = vsel %vm15751_vm0, %v5301_v40, %v5300_v53  ;;  %v5550_v48 = vshll.u32 %v5453_v2, 16  ;;  %v10730_v54 = vrot.slane %v6184_v42, 9  ;;  %11477 = vmatpush3.bf16.msra.mxu1 %v11618_v36  ;;  %v6226_v19 = vrot.slane %v6185_v62, 5 }
 0x2e7   : > { %v5304_v22 = vsel %vm15752_vm2, %v5303_v27, %v5302_v60  ;;  %v5547_v30 = vor.u32 %v5546_v59, %v5543_v14  ;;  %v5656_v43 = vsel %vm12230_vm9, %v10692_v0, %v5655_v63 }
 0x2e8   : > { %v5306_v5 = vsel %vm5227_vm15, %v5305_v33, %v5304_v22  ;;  %v5552_v56 = vrot.slane %v5550_v48, 5  ;;  %v6227_v10 = vsel %vm12230_vm9, %v10730_v54, %v6226_v19  ;;  %v5676_v22 = vpop.permute.xlu1 %5675 }
 0x2e9   : > { %v5332_v18 = vpack.c.b16 %v5306_v5, %v5306_v5  ;;  %v5548_v46 = vrot.slane %v5547_v30, 4 }
 0x2eb   : > { %v5392_v61 = vsel %vm14032_vm12, %v5332_v18, %v5391_v57 }
 0x2ec   : > { %5393 = vst [vmem:[#allocation3 + $0x38] sm:$0xf] %v5392_v61  ;;  %v5612_v6 = vld [vmem:[#allocation3 + $0x3c] sm:$0x1]  ;;  %v5553_v61 = vsel %vm12325_vm14, %v5548_v46, %v5552_v56 }
 0x2ed   : > { %v5659_v34 = vrot.slane %v5612_v6, 5  ;;  %v5455_v1 = vld [vmem:[#allocation3 + $0x3c] sm:$0x1] }
 0x2ee   : > { %v6187_v8 = vld [vmem:[#allocation3 + $0x3c] sm:$0x1]  ;;  %v5564_v12 = vshll.u32 %v5455_v1, 16 }
 0x2ef   : > { %v6230_v7 = vrot.slane %v6187_v8, 5 }
 0x2f0   : > { %v5566_v53 = vrot.slane %v5564_v12, 5 }
 0x2f3   : > { %v11610_v37 = vld [vmem:[#allocation3 + $0x30] ss:$8 sps:$4 sm:$0xff]  }
 0x2f4   : > { %v5611_v38 = vld [vmem:[#allocation3 + $0x38] sm:$0xe]  ;;  %6008 = vrot.lane.b32.xlu0 %v11610_v37, %s15746_s23 }
 0x2f5   : > { %v10693_v31 = vrot.slane %v5611_v38, 9  ;;  %v5454_v52 = vld [vmem:[#allocation3 + $0x38] sm:$0xf] }
 0x2f6   : > { %v5555_v17 = vshrl.u32 %v5454_v52, 16  ;;  %v5558_v32 = vshll.u32 %v5454_v52, 16  ;;  %v11617_v44 = vld [vmem:[#allocation3 + $0x30] ss:$8 sps:$4 sm:$0xff]  }
 0x2f7   : > { %v5660_v41 = vsel %vm12230_vm9, %v10693_v31, %v5659_v34  ;;  %v6186_v13 = vld [vmem:[#allocation3 + $0x38] sm:$0xe]  ;;  %5439 = vst.msk [vmem:[#allocation6 + $0x48] sm:$0xff] %vm5435_vm4, %v11617_v44 }
 0x2f8   : > { %v10697_v4 = vcombine.low %v5656_v43, %v5660_v41  ;;  %v5557_v47 = vrot.slane %v5555_v17, 4  ;;  %v5560_v29 = vrot.slane %v5558_v32, 5  ;;  %v10731_v24 = vrot.slane %v6186_v13, 9 }
 0x2f9   : > { %v11474_v55 = vpop.f32.mrb[28].mxu0 }
 0x2fa   : > { %5679 = vrot.lane.b32.xlu1 %v10697_v4, %s15746_s23  ;;  %v5561_v51 = vor.u32 %v5560_v29, %v5557_v47  ;;  %v4126_v26 = vadd.f32 %v11971_v35, %v11474_v55  ;;  %v4117_v45 = vpop.f32.mrb[29].mxu0  ;;  %v6231_v27 = vsel %vm12230_vm9, %v10731_v24, %v6230_v7  ;;  %v6030_v55 = vld [vmem:[#allocation3 + $0x38] sm:$0xf] }
 0x2fb   : > { %v4118_v25 = vadd.f32 %v11971_v35, %v4117_v45  ;;  %v11475_v40 = vpop.f32.mrb[30].mxu0  ;;  %v10736_v57 = vcombine.low %v6227_v10, %v6231_v27 }
 0x2fc   : > { %v5562_v39 = vrot.slane %v5561_v51, 4  ;;  %v4162_v60 = vmax.f32 %v4126_v26, 0.0  ;;  %v4129_v33 = vadd.f32 %v11971_v35, %v11475_v40  ;;  %v4120_v5 = vpop.f32.mrb[31].mxu0 }
 0x2fd   : > { %v4160_v18 = vmax.f32 %v4118_v25, 0.0  ;;  %v4121_v58 = vadd.f32 %v11971_v35, %v4120_v5  ;;  %6258 = vst.msk [vmem:[#allocation6 + $0x40] sm:$0xff] %vm5435_vm4, %v10736_v57  ;;  %v6028_v5 = vld [vmem:[#allocation3 + $0x30] sm:$0xf] }
 0x2fe   : > { %v5567_v3 = vsel %vm12325_vm14, %v5562_v39, %v5566_v53  ;;  %v4194_v28 = vmin.f32 %v4162_v60, 10.0  ;;  %v4163_v11 = vmax.f32 %v4129_v33, 0.0  ;;  %v6107_v53 = vshrl.u32 %v6030_v55, 16 }
 0x2ff   : > { %v10685_v21 = vcombine.low %v5553_v61, %v5567_v3  ;;  %v4192_v6 = vmin.f32 %v4160_v18, 10.0  ;;  %v4161_v63 = vmax.f32 %v4121_v58, 0.0  ;;  %v5721_v14 = vpop.permute.xlu1 %5720  ;;  %v5400_v3 = vld [vmem:[#allocation3 + $0x44] sm:$0x1] }
 0x300   : > { %v4195_v2 = vmin.f32 %v4163_v11, 10.0 }
 0x301   : > { %5586 = vrot.lane.b32.xlu1 %v10685_v21, %s15742_s15  ;;  %v4210_v59 = vmax.f32 %v4192_v6, %v4194_v28  ;;  %v4193_v0 = vmin.f32 %v4161_v63, 10.0  ;;  %v6110_v6 = vshll.u32 %v6030_v55, 16  ;;  %v6034_v63 = vld [vmem:[#allocation3 + $0x48] sm:$0xf] }
 0x303   : > { %v4466_v34 = vcombine.high %v4210_v59, %v4210_v59  ;;  %v4473_v1 = vrot.slane %v4210_v59, %v13997_v15  ;;  %v4211_v42 = vmax.f32 %v4193_v0, %v4195_v2  ;;  %v5583_v37 = vpop.permute.xlu1 %5582  ;;  %v6093_v59 = vshrl.u32 %v6028_v5, 16 }
 0x304   : > { %5594 = vst.msk [vmem:[#allocation6 + $0x18] sm:$0xff] %vm5592_vm5, %v5583_v37 }
 0x305   : > { %v4480_v38 = vrot.slane %v4466_v34, %v13997_v15  ;;  %v4481_v31 = vcombine.high %v4473_v1, %v4473_v1  ;;  %v10598_v52 = vrot.slane %v4473_v1, 9  ;;  %v4483_v36 = vcombine.high %v4211_v42, %v4211_v42  ;;  %5687 = vst.msk [vmem:[#allocation6 + $0x18] sm:$0xff] %vm5685_vm6, %v5676_v22 }
 0x306   : > { %v4490_v30 = vrot.slane %v4211_v42, %v13997_v15  ;;  %5732 = vst.msk [vmem:[#allocation6 + $0x18] sm:$0xff] %vm5730_vm1, %v5721_v14  ;;  %v6096_v42 = vshll.u32 %v6028_v5, 16  ;;  %v6095_v16 = vrot.slane %v6093_v59, 4 }
 0x307   : > { %v4482_v17 = vcombine.high %v4480_v38, %v4480_v38  ;;  %v10599_v32 = vrot.slane %v4481_v31, 9  ;;  %v10600_v62 = vrot.slane %v4480_v38, 9  ;;  %v4812_v43 = vmax.f32 %v4473_v1, %v10598_v52 }
 0x308   : > { %v4497_v41 = vrot.slane %v4483_v36, %v13997_v15  ;;  %v4498_v48 = vcombine.high %v4490_v30, %v4490_v30  ;;  %v10602_v8 = vrot.slane %v4490_v30, 9  ;;  %v6138_v52 = vshll.u32 %v6034_v63, 16 }
 0x309   : > { %v10601_v54 = vrot.slane %v4482_v17, 9  ;;  %v4813_v4 = vmax.f32 %v4481_v31, %v10599_v32  ;;  %v4814_v47 = vmax.f32 %v4480_v38, %v10600_v62  ;;  %v11273_v29 = vpack.c.bf16 %v4812_v43, %v4812_v43  ;;  %v5397_v43 = vld [vmem:[#allocation3 + $0x40] sm:$0xf] }
 0x30a   : > { %v4499_v12 = vcombine.high %v4497_v41, %v4497_v41  ;;  %v10603_v44 = vrot.slane %v4498_v48, 9  ;;  %v10604_v13 = vrot.slane %v4497_v41, 9  ;;  %v4816_v19 = vmax.f32 %v4490_v30, %v10602_v8 }
 0x30b   : > { %v4815_v46 = vmax.f32 %v4482_v17, %v10601_v54  ;;  %v11274_v51 = vpack.c.bf16 %v4813_v4, %v4813_v4  ;;  %v11275_v24 = vpack.c.bf16 %v4814_v47, %v4814_v47  ;;  %v5202_v7 = vunpack.c.l.b16 %v11273_v29  ;;  %v5962_v10 = vpop.permute.xlu0 %5961  ;;  %v6035_v54 = vld [vmem:[#allocation3 + $0x4c] sm:$0x1]  ;;  %v6031_v47 = vld [vmem:[#allocation3 + $0x3c] sm:$0x1] }
 0x30c   : > { %v10605_v35 = vrot.slane %v4499_v12, 9  ;;  %v4817_v26 = vmax.f32 %v4498_v48, %v10603_v44  ;;  %v4818_v45 = vmax.f32 %v4497_v41, %v10604_v13  ;;  %v11277_v56 = vpack.c.bf16 %v4816_v19, %v4816_v19  ;;  %5972 = vst.msk [vmem:[#allocation6 + $0x20] sm:$0xff] %vm5592_vm5, %v5962_v10  ;;  %v6029_v48 = vld [vmem:[#allocation3 + $0x34] sm:$0x1]  ;;  %v5747_v44 = vld [vmem:[#allocation3 + $0x38] sm:$0xf] }
 0x30d   : > { %v11276_v25 = vpack.c.bf16 %v4815_v46, %v4815_v46  ;;  %v5203_v40 = vunpack.c.l.b16 %v11274_v51  ;;  %v5204_v39 = vunpack.c.l.b16 %v11275_v24  ;;  %v5307_v18 = vrot.slane %v5202_v7, 7  ;;  %v6190_v51 = vld [vmem:[#allocation3 + $0x48] sm:$0xe]  ;;  %v5896_v10 = vld [vmem:[#allocation3 + $0x3c] sm:$0x1] }
 0x30e   : > { %v4819_v27 = vmax.f32 %v4499_v12, %v10605_v35  ;;  %v11278_v60 = vpack.c.bf16 %v4817_v26, %v4817_v26  ;;  %v11279_v33 = vpack.c.bf16 %v4818_v45, %v4818_v45  ;;  %v5206_v22 = vunpack.c.l.b16 %v11277_v56  ;;  %v6191_v56 = vld [vmem:[#allocation3 + $0x4c] sm:$0x1] }
 0x30f   : > { %v5205_v57 = vunpack.c.l.b16 %v11276_v25  ;;  %v5308_v58 = vrot.slane %v5203_v40, 6  ;;  %v5310_v61 = vrot.slane %v5204_v39, 5  ;;  %v6135_v31 = vshrl.u32 %v6034_v63, 16  ;;  %v5895_v39 = vld [vmem:[#allocation3 + $0x38] sm:$0xe] }
 0x310   : > { %v5207_v28 = vunpack.c.l.b16 %v11278_v60  ;;  %v5208_v11 = vunpack.c.l.b16 %v11279_v33  ;;  %v11288_v21 = vpack.c.bf16 %v4819_v27, %v4819_v27  ;;  %v5314_v34 = vrot.slane %v5206_v22, 3 }
 0x311   : > { %v5309_v2 = vsel %vm5212_vm11, %v5308_v58, %v5307_v18  ;;  %v5312_v14 = vrot.slane %v5205_v57, 4  ;;  %v6109_v17 = vrot.slane %v6107_v53, 4  ;;  %v6112_v32 = vrot.slane %v6110_v6, 5  ;;  %v5748_v53 = vld [vmem:[#allocation3 + $0x3c] sm:$0x1] }
 0x312   : > { %v5311_v0 = vsel %vm5215_vm3, %v5310_v61, %v5309_v2  ;;  %v5401_v1 = vsel %vm13932_vm10, %v11288_v21, %v5400_v3  ;;  %v5316_v38 = vrot.slane %v5207_v28, 2  ;;  %v5318_v30 = vrot.slane %v5208_v11, 1 }
 0x313   : > { %v5313_v37 = vsel %vm15753_vm8, %v5312_v14, %v5311_v0  ;;  %5402 = vst [vmem:[#allocation3 + $0x44] sm:$0x1] %v5401_v1  ;;  %v6098_v8 = vrot.slane %v6096_v42, 5  ;;  %v6137_v29 = vrot.slane %v6135_v31, 4  ;;  %v6140_v12 = vrot.slane %v6138_v52, 5 }
 0x314   : > { %v5315_v36 = vsel %vm15754_vm7, %v5314_v34, %v5313_v37  ;;  %v6113_v13 = vor.u32 %v6112_v32, %v6109_v17  ;;  %v6102_v55 = vshll.u32 %v6029_v48, 16  ;;  %v6144_v46 = vshll.u32 %v6035_v54, 16  ;;  %v11619_v17 = vld [vmem:[%s15635_s3 + $0x88] sm:$0xff]  }
 0x315   : > { %v5317_v62 = vsel %vm15755_vm13, %v5316_v38, %v5315_v36  ;;  %v6099_v24 = vor.u32 %v6098_v8, %v6095_v16  ;;  %v6116_v7 = vshll.u32 %v6031_v47, 16  ;;  %v5836_v26 = vshrl.u32 %v5747_v44, 16  ;;  %11478 = vmatprep.subr.bf16.mxu1 %v11619_v17 }
 0x316   : > { %v5319_v41 = vsel %vm5227_vm15, %v5318_v30, %v5317_v62  ;;  %v5839_v45 = vshll.u32 %v5747_v44, 16  ;;  %v6141_v25 = vor.u32 %v6140_v12, %v6137_v29  ;;  %v6114_v40 = vrot.slane %v6113_v13, 4  ;;  %11479 = vmatpush3.bf16.msra.mxu1 %v11619_v17 }
 0x317   : > { %v5334_v4 = vpack.c.b16 %v5319_v41, %v5319_v41  ;;  %v6104_v27 = vrot.slane %v6102_v55, 5  ;;  %v14480_v50 = vrot.slane %v6144_v46, 5  ;;  %v10733_v60 = vrot.slane %v6190_v51, 9 }
 0x318   : > { %v6238_v33 = vrot.slane %v6191_v56, 5  ;;  %v6100_v22 = vrot.slane %v6099_v24, 4  ;;  %v6118_v5 = vrot.slane %v6116_v7, 5  ;;  %v5838_v57 = vrot.slane %v5836_v26, 4 }
 0x319   : > { %v5398_v19 = vsel %vm14032_vm12, %v5334_v4, %v5397_v43  ;;  %v6007_v35 = vpop.permute.xlu0 %6006  ;;  %v5841_v18 = vrot.slane %v5839_v45, 5  ;;  %v10712_v58 = vrot.slane %v5895_v39, 9  ;;  %v5941_v61 = vrot.slane %v5896_v10, 5 }
 0x31a   : > { %5399 = vst [vmem:[#allocation3 + $0x40] sm:$0xf] %v5398_v19  ;;  %6017 = vst.msk [vmem:[#allocation6 + $0x20] sm:$0xff] %vm5685_vm6, %v6007_v35  ;;  %v6142_v3 = vrot.slane %v6141_v25, 4  ;;  %v5845_v28 = vshll.u32 %v5748_v53, 16  ;;  %v6119_v11 = vsel %vm12325_vm14, %v6114_v40, %v6118_v5  ;;  %v6105_v0 = vsel %vm12325_vm14, %v6100_v22, %v6104_v27  ;;  %v6263_v5 = vld [vmem:[#allocation6 + $0x18] sm:$0xff] }
 0x31b   : > { %v5898_v21 = vld [vmem:[#allocation3 + $0x44] sm:$0x1]  ;;  %v5842_v42 = vor.u32 %v5841_v18, %v5838_v57  ;;  %v6239_v37 = vsel %vm12230_vm9, %v10733_v60, %v6238_v33  ;;  %v10724_v38 = vcombine.low %v6105_v0, %v6119_v11  ;;  %v5942_v55 = vsel %vm12230_vm9, %v10712_v58, %v5941_v61 }
 0x31c   : > { %v6033_v6 = vld [vmem:[#allocation3 + $0x44] sm:$0x1]  ;;  %v5945_v32 = vrot.slane %v5898_v21, 5  ;;  %v6147_v45 = vsel %vm12325_vm14, %v6142_v3, %v14480_v50  ;;  %v5847_v56 = vrot.slane %v5845_v28, 5  ;;  %vm6761_vm15 = vcmask 518146  }
 0x31d   : > { %v6189_v63 = vld [vmem:[#allocation3 + $0x44] sm:$0x1]  ;;  %v6130_v62 = vshll.u32 %v6033_v6, 16  ;;  %v5843_v46 = vrot.slane %v5842_v42, 4  ;;  %vm15756_vm12 = vsmask.f32 256 }
 0x31e   : > { %v5750_v14 = vld [vmem:[#allocation3 + $0x44] sm:$0x1]  ;;  %v6234_v4 = vrot.slane %v6189_v63, 5  ;;  %vm6982_vm7 = vsmask.f32 1280 }
 0x31f   : > { %v5859_v44 = vshll.u32 %v5750_v14, 16  ;;  %v6132_v26 = vrot.slane %v6130_v62, 5  ;;  %v5848_v40 = vsel %vm12325_vm14, %v5843_v46, %v5847_v56  ;;  %v6262_v0 = vld [vmem:[#allocation6 + $0x10] sm:$0xff]  ;;  %vm6983_vm13 = vsmask.f32 3336 }
 0x320   : > { %v6755_v56 = vld [vmem:[#allocation4 + $0x10] sm:$0x1] }
 0x321   : > { %v11614_v2 = vld [vmem:[#allocation3 + $0x40] ss:$8 sps:$4 sm:$0xff]   ;;  %v5861_v25 = vrot.slane %v5859_v44, 5 }
 0x322   : > { %v11615_v59 = vld [vmem:[#allocation3 + $0x38] ss:$8 sps:$4 sm:$0xff]   ;;  %6010 = vrot.lane.b32.xlu0 %v11614_v2, %s15746_s23 }
 0x323   : > { %v5897_v34 = vld [vmem:[#allocation3 + $0x40] sm:$0xe]  ;;  %5724 = vrot.lane.b32.xlu1 %v11615_v59, %s12054_s20 }
 0x324   : > { %v6032_v1 = vld [vmem:[#allocation3 + $0x40] sm:$0xf]  ;;  %v10713_v31 = vrot.slane %v5897_v34, 9  ;;  %v6265_v34 = vld [vmem:[#allocation6 + $0x28] sm:$0xff] }
 0x325   : > { %v6121_v52 = vshrl.u32 %v6032_v1, 16  ;;  %v6124_v36 = vshll.u32 %v6032_v1, 16  ;;  %v5749_v30 = vld [vmem:[#allocation3 + $0x40] sm:$0xf]  ;;  %v6268_v1 = vld [vmem:[#allocation6 + $0x40] sm:$0xff] }
 0x326   : > { %v5850_v43 = vshrl.u32 %v5749_v30, 16  ;;  %v5853_v41 = vshll.u32 %v5749_v30, 16  ;;  %v6188_v48 = vld [vmem:[#allocation3 + $0x40] sm:$0xe]  ;;  %v5946_v47 = vsel %vm12230_vm9, %v10713_v31, %v5945_v32  ;;  %6164 = vrot.lane.b32.xlu0 %v10724_v38, %s12054_s20  ;;  %v5678_v60 = vpop.permute.xlu1 %5677 }
 0x327   : > { %v6123_v16 = vrot.slane %v6121_v52, 4  ;;  %v6126_v8 = vrot.slane %v6124_v36, 5  ;;  %v10732_v54 = vrot.slane %v6188_v48, 9  ;;  %v10717_v7 = vcombine.low %v5942_v55, %v5946_v47 }
 0x328   : > { %v5852_v29 = vrot.slane %v5850_v43, 4  ;;  %v5855_v12 = vrot.slane %v5853_v41, 5 }
 0x329   : > { %v6127_v13 = vor.u32 %v6126_v8, %v6123_v16  ;;  %v6235_v19 = vsel %vm12230_vm9, %v10732_v54, %v6234_v4  ;;  %vm6737_vm9 = vcmask 518144   ;;  %v6749_v16 = vld [vmem:[#allocation4 + $0x8] sm:$0x1]  ;;  %v6770_v54 = vld [vmem:[#allocation4 + $0x8] sm:$0x4] }
 0x32a   : > { %v5856_v51 = vor.u32 %v5855_v12, %v5852_v29  ;;  %v10737_v24 = vcombine.low %v6235_v19, %v6239_v37  ;;  %5965 = vrot.lane.b32.xlu0 %v10717_v7, %s15742_s15  ;;  %6738 = vst.msk [vmem:[#allocation4] sm:$0x7] %vm6737_vm9, %v15709_v20  ;;  %6740 = vst.msk [vmem:[#allocation4 + $0x14] sm:$0x7] %vm6737_vm9, %v15709_v20  ;;  %v6746_v7 = vld [vmem:[#allocation4 + $0x4] sm:$0x1] }
 0x32b   : > { %v6128_v35 = vrot.slane %v6127_v13, 4 }
 0x32c   : > { %v5857_v10 = vrot.slane %v5856_v51, 4  ;;  %6259 = vst.msk [vmem:[#allocation6 + $0x58] sm:$0xff] %vm5435_vm4, %v10737_v24 }
 0x32d   : > { %v6133_v23 = vsel %vm12325_vm14, %v6128_v35, %v6132_v26  ;;  %v6767_v35 = vld [vmem:[#allocation4 + $0x4] sm:$0x4] }
 0x32e   : > { %v5862_v39 = vsel %vm12325_vm14, %v5857_v10, %v5861_v25  ;;  %v10725_v53 = vcombine.low %v6133_v23, %v6147_v45  ;;  %vm6741_vm14 = vcmask 516096   ;;  %v6776_v10 = vld [vmem:[#allocation4 + $0x10] sm:$0x4] }
 0x32f   : > { %v10705_v27 = vcombine.low %v5848_v40, %v5862_v39  ;;  %vm14543_vm10 = vmand %vm6741_vm14, %vm15756_vm12  ;;  %v6752_v40 = vld [vmem:[#allocation4 + $0xc] sm:$0x1]  ;;  %v6773_v39 = vld [vmem:[#allocation4 + $0xc] sm:$0x4]  ;;  %vm6987_vm14 = vsmask.f32 7448 }
 0x330   : > { %6166 = vrot.lane.b32.xlu0 %v10725_v53, %s12054_s20  ;;  %v6750_v4 = vsel %vm14543_vm10, 0, %v6749_v16  ;;  %v6747_v26 = vsel %vm14543_vm10, 0, %v6746_v7  ;;  %v6756_v25 = vsel %vm14543_vm10, 0, %v6755_v56  ;;  %v6753_v53 = vsel %vm14543_vm10, 0, %v6752_v40  ;;  %s11213_s20 = sshll.u32 %s12151_s29, 4  ;;  %s12059_s29 = smov [#allocation8]  }
 0x331   : > { %5882 = vst.msk [vmem:[#allocation6 + $0x50] sm:$0xff] %vm5435_vm4, %v10705_v27  ;;  %v6163_v50 = vpop.permute.xlu0 %6162  ;;  %6751 = vst [vmem:[#allocation4 + $0x8] sm:$0x1] %v6750_v4  ;;  %v6743_v12 = vld [vmem:[#allocation4] sm:$0x1]  ;;  %s15590_s30 = scalar_lea.hbm %s15645_s13, %s11213_s20  ;;  %s11982_s1 = sshll.u32 %s12059_s29, 4  ;;  %s11983_s1 = int_to_ptr.vmem [resolvable:$false] %s11982_s1 }
 0x332   : > { %6173 = vst.msk [vmem:[#allocation6 + $0x20] sm:$0xff] %vm5730_vm1, %v6163_v50  ;;  %v6758_v44 = vld [vmem:[#allocation4 + $0x14] sm:$0x1]  ;;  %v6764_v13 = vld [vmem:[#allocation4] sm:$0x4]  ;;  %v6744_v19 = vsel %vm14543_vm10, 0, %v6743_v12 }
 0x333   : > { %v6271_v52 = vld [vmem:[#allocation6 + $0x58] sm:$0xff]  ;;  %v6759_v55 = vsel %vm14543_vm10, 0, %v6758_v44  ;;  %v6779_v51 = vld [vmem:[#allocation4 + $0x14] sm:$0x4]  ;;  %6745 = vst [vmem:[#allocation4] sm:$0x1] %v6744_v19 }
 0x334   : > { %6760 = vst [vmem:[#allocation4 + $0x14] sm:$0x1] %v6759_v55  ;;  %6748 = vst [vmem:[#allocation4 + $0x4] sm:$0x1] %v6747_v26  ;;  %v11622_v50 = vld [vmem:[%s15637_s5 + $0x40] sm:$0xff]   ;;  %s11984_s2 = scalar_lea.vmem %s11983_s1, 32 }
 0x335   : > { %v5723_v33 = vpop.permute.xlu1 %5722  ;;  %6757 = vst [vmem:[#allocation4 + $0x10] sm:$0x1] %v6756_v25  ;;  %6754 = vst [vmem:[#allocation4 + $0xc] sm:$0x1] %v6753_v53  ;;  %11369 = vmatprep.subr.bf16.mxu0 %v11622_v50 }
 0x339   : > { %v6264_v22 = vld [vmem:[#allocation6 + $0x20] sm:$0xff]  ;;  %v5585_v18 = vpop.permute.xlu1 %5584 }
 0x33a   : > { %6475 = vmatprep.mubr.bf16.mxu1 %v6264_v22  ;;  %5595 = vst.msk [vmem:[#allocation6 + $0x30] sm:$0xff] %vm5592_vm5, %v5585_v18  ;;  %v11625_v22 = vld [vmem:[%s15637_s5 + $0x8] sm:$0xff]   ;;  %v11626_v18 = vld [vmem:[%s15637_s5 + $0x50] sm:$0xff]  }
 0x33b   : > { %v5964_v57 = vpop.permute.xlu0 %5963  ;;  %6476 = vmatmul.mubr.bf16.gmra.mrb[4].mxu1 %v6263_v5  ;;  %5688 = vst.msk [vmem:[#allocation6 + $0x30] sm:$0xff] %vm5685_vm6, %v5678_v60  ;;  %v11623_v60 = vld [vmem:[%s15637_s5] sm:$0xff]  }
 0x33c   : > { %5973 = vst.msk [vmem:[#allocation6 + $0x38] sm:$0xff] %vm5592_vm5, %v5964_v57  ;;  %11370 = vmatpush3.bf16.msra.mxu0 %v11623_v60  ;;  %v11632_v5 = vld [vmem:[%s15637_s5 + $0xc0] sm:$0xff]  }
 0x33d   : > { %5733 = vst.msk [vmem:[#allocation6 + $0x30] sm:$0xff] %vm5730_vm1, %v5723_v33  ;;  %v11624_v33 = vld [vmem:[%s15637_s5 + $0x48] sm:$0xff]   ;;  %v11633_v57 = vld [vmem:[%s15637_s5 + $0x80] sm:$0xff]   ;;  %11391 = vmatprep.subr.bf16.mxu1 %v11632_v5 }
 0x33e   : > { %11371 = vmatprep.subr.bf16.mxu0 %v11624_v33 }
 0x340   : > { %11372 = vmatpush3.bf16.msra.mxu0 %v11625_v22 }
 0x341   : > { %11373 = vmatprep.subr.bf16.mxu0 %v11626_v18 }
 0x344   : > { %v6266_v2 = vld [vmem:[#allocation6 + $0x30] sm:$0xff] }
 0x366   : > { %v6009_v9 = vpop.permute.xlu0 %6008 }
 0x367   : > { %6018 = vst.msk [vmem:[#allocation6 + $0x38] sm:$0xff] %vm5685_vm6, %v6009_v9  ;;  %v11636_v9 = vld [vmem:[%s15637_s5 + $0xc8] sm:$0xff]  }
 0x36c   : > { %v5680_v58 = vpop.permute.xlu1 %5679 }
 0x373   : > { %v5587_v61 = vpop.permute.xlu1 %5586 }
 0x374   : > { %5596 = vst.msk [vmem:[#allocation6 + $0x48] sm:$0xff] %vm5592_vm5, %v5587_v61  ;;  %v11627_v61 = vld [vmem:[%s15637_s5 + $0x10] sm:$0xff]  }
 0x375   : > { %5689 = vst.msk [vmem:[#allocation6 + $0x48] sm:$0xff] %vm5685_vm6, %v5680_v58  ;;  %v11637_v58 = vld [vmem:[%s15637_s5 + $0x88] sm:$0xff]   ;;  %11374 = vmatpush3.bf16.msra.mxu0 %v11627_v61 }
 0x394   : > { %v6011_v3 = vpop.permute.xlu0 %6010 }
 0x395   : > { %v5725_v28 = vpop.permute.xlu1 %5724 }
 0x396   : > { %5734 = vst.msk [vmem:[#allocation6 + $0x48] sm:$0xff] %vm5730_vm1, %v5725_v28  ;;  %v11628_v28 = vld [vmem:[%s15637_s5 + $0x58] sm:$0xff]  }
 0x397   : > { %11375 = vmatprep.subr.bf16.mxu0 %v11628_v28 }
 0x398   : > { %v6165_v11 = vpop.permute.xlu0 %6164 }
 0x399   : > { %6174 = vst.msk [vmem:[#allocation6 + $0x38] sm:$0xff] %vm5730_vm1, %v6165_v11  ;;  %v11639_v11 = vld [vmem:[%s15637_s5 + $0x90] sm:$0xff]  }
 0x39c   : > { %v5966_v21 = vpop.permute.xlu0 %5965 }
 0x39d   : > { %5974 = vst.msk [vmem:[#allocation6 + $0x50] sm:$0xff] %vm5592_vm5, %v5966_v21  ;;  %v6269_v59 = vld [vmem:[#allocation6 + $0x48] sm:$0xff]  ;;  %v11629_v21 = vld [vmem:[%s15637_s5 + $0x18] sm:$0xff]  }
 0x39e   : > { %6019 = vst.msk [vmem:[#allocation6 + $0x50] sm:$0xff] %vm5685_vm6, %v6011_v3  ;;  %v11638_v3 = vld [vmem:[%s15637_s5 + $0xd0] sm:$0xff]   ;;  %11376 = vmatpush3.bf16.msra.mxu0 %v11629_v21  ;;  %vm6900_vm6 = vsmask.f32 2306 }
 0x39f   : > { %vm14661_vm0 = vmand %vm6737_vm9, %vm6900_vm6  ;;  %vm6985_vm9 = vsmask.f32 5392 }
 0x3a0   : > { %v6267_v63 = vld [vmem:[#allocation6 + $0x38] sm:$0xff] }
 0x3a1   : > { %6483 = vmatprep.mubr.bf16.mxu1 %v6267_v63  ;;  %v11631_v63 = vld [vmem:[%s15637_s5 + $0x20] sm:$0xff]  }
 0x3a2   : > { %v6167_v6 = vpop.permute.xlu0 %6166  ;;  %6484 = vmatmul.mubr.bf16.gmra.mrb[8].mxu1 %v6266_v2  ;;  %v11634_v2 = vld [vmem:[%s15637_s5 + $0x68] sm:$0xff]  }
 0x3a3   : > { %6175 = vst.msk [vmem:[#allocation6 + $0x50] sm:$0xff] %vm5730_vm1, %v6167_v6  ;;  %v11630_v6 = vld [vmem:[%s15637_s5 + $0x60] sm:$0xff]   ;;  %vm15761_vm1 = vmmov %vm15753_vm8  ;;  %vm7107_vm8 = vcmask 1040384  }
 0x3a4   : > { %11377 = vmatprep.subr.bf16.mxu0 %v11630_v6  ;;  %vm15764_vm2 = vmmov %vm15761_vm1 }
 0x3a5   : > { %11378 = vmatpush3.bf16.msra.mxu0 %v11631_v63  ;;  %vm15767_vm12 = vmmov %vm15761_vm1 }
 0x3a6   : > { %11379 = vmatprep.subr.bf16.mxu0 %v11634_v2  ;;  %vm15773_vm6 = vmmov %vm15761_vm1 }
 0x3aa   : > { %v6270_v14 = vld [vmem:[#allocation6 + $0x50] sm:$0xff] }
 0x3ab   : > { %6491 = vmatprep.mubr.bf16.mxu1 %v6270_v14  ;;  %v11635_v14 = vld [vmem:[%s15637_s5 + $0x28] sm:$0xff]  }
 0x3ac   : > { %6492 = vmatmul.mubr.bf16.gmra.mrb[12].mxu1 %v6269_v59  ;;  %11380 = vmatpush3.bf16.msra.mxu0 %v11635_v14 }
 0x3ad   : > { %11480 = vmatprep.mubr.msk.bf16.mxu1 %vm5435_vm4, %v6262_v0 }
 0x3b4   : > { %11481 = vmatmul.mubr.msk.bf16.vlgmr.msra.gmra.mrb[16].mxu1 %vm5435_vm4, %v6265_v34 }
 0x3b5   : > { %11484 = vmatprep.mubr.msk.bf16.mxu1 %vm5435_vm4, %v6268_v1  ;;  %11392 = vmatpush3.bf16.msra.mxu1 %v11633_v57 }
 0x3b6   : > { %11393 = vmatprep.subr.bf16.mxu1 %v11636_v9 }
 0x3b8   : > { %v11339_v42 = vpop.f32.mrb[0].mxu1 }
 0x3b9   : > { %v11340_v37 = vpop.f32.mrb[1].mxu1  ;;  %11394 = vmatpush3.bf16.msra.mxu1 %v11637_v58 }
 0x3ba   : > { %v14529_v38 = vadd.f32 %v11340_v37, %v11339_v42  ;;  %v11342_v31 = vpop.f32.mrb[2].mxu1  ;;  %11395 = vmatprep.subr.bf16.mxu1 %v11638_v3 }
 0x3bb   : > { %v11343_v36 = vpop.f32.mrb[3].mxu1 }
 0x3bc   : > { %11485 = vmatmul.mubr.msk.bf16.gmra.mrb[20].mxu1 %vm5435_vm4, %v6271_v52  ;;  %v14532_v30 = vadd.f32 %v11343_v36, %v11342_v31  ;;  %vm6762_vm4 = vsmask.f32 7946 }
 0x3bd   : > { %vm14549_vm5 = vmand %vm6761_vm15, %vm6762_vm4  ;;  %11396 = vmatpush3.bf16.msra.mxu1 %v11639_v11 }
 0x3be   : > { %v6771_v29 = vsel %vm14549_vm5, 0, %v6770_v54  ;;  %v6765_v46 = vsel %vm14549_vm5, 0, %v6764_v13  ;;  %v6780_v24 = vsel %vm14549_vm5, 0, %v6779_v51  ;;  %v6768_v45 = vsel %vm14549_vm5, 0, %v6767_v35  ;;  %v10738_v54 = vld [vmem:[%s15636_s4] ss:$0 sm:$0xff]  ;;  %vm14692_vm15 = vmor %vm7107_vm8, %vm5212_vm11 }
 0x3bf   : > { %6772 = vst [vmem:[#allocation4 + $0x8] sm:$0x4] %v6771_v29  ;;  %6766 = vst [vmem:[#allocation4] sm:$0x4] %v6765_v46  ;;  %v6777_v23 = vsel %vm14549_vm5, 0, %v6776_v10  ;;  %v6774_v27 = vsel %vm14549_vm5, 0, %v6773_v39  ;;  %v6470_v29 = vadd.f32 %v14529_v38, %v10738_v54  ;;  %v6473_v7 = vadd.f32 %v14532_v30, %v10738_v54 }
 0x3c0   : > { %6781 = vst [vmem:[#allocation4 + $0x14] sm:$0x4] %v6780_v24  ;;  %6769 = vst [vmem:[#allocation4 + $0x4] sm:$0x4] %v6768_v45 }
 0x3c1   : > { %6778 = vst [vmem:[#allocation4 + $0x10] sm:$0x4] %v6777_v23  ;;  %6775 = vst [vmem:[#allocation4 + $0xc] sm:$0x4] %v6774_v27 }
 0x3c2   : > { %vm14703_vm10 = vmor %vm14692_vm15, %vm15767_vm12  ;;  %vm8082_vm12 = vcmask 1041409  }
 0x3c3   : > { %vm14711_vm4 = vmor %vm6982_vm7, %vm6983_vm13  ;;  %vm7065_vm13 = vcmask 1048064  }
 0x3c4   : > { %vm15772_vm5 = vmmov %vm15761_vm1 }
 0x3c6   : > { %v10793_v36 = vld.sshfl [vmem:[#allocation4] sm:$0x13 pattern:$0x76325410] }
 0x3c7   : > { %v6990_v16 = vshrl.u32 %v10793_v36, 16  ;;  %v6993_v8 = vshll.u32 %v10793_v36, 16  ;;  %v6957_v46 = vcombine.high %v10793_v36, %v10793_v36  ;;  %v14638_v27 = vld.sshfl [vmem:[#allocation4] sm:$0x12 pattern:$0x76325410] }
 0x3c8   : > { %v14643_v58 = vld.sshfl [vmem:[#allocation4 + $0x14] sm:$0x13 pattern:$0x76325410]  ;;  %v7082_v21 = vcombine.high %v14638_v27, %v14638_v27 }
 0x3c9   : > { %v6992_v12 = vrot.slane %v6990_v16, 6  ;;  %v6995_v44 = vrot.slane %v6993_v8, 7  ;;  %v14636_v23 = vshll.u32 %v6957_v46, 16 }
 0x3cb   : > { %v7001_v9 = vrot.slane %v14636_v23, 7 }
 0x40e   : > { %v11345_v17 = vpop.f32.mrb[4].mxu1 }
 0x40f   : > { %v11346_v32 = vpop.f32.mrb[5].mxu1 }
 0x410   : > { %v14534_v62 = vadd.f32 %v11346_v32, %v11345_v17  ;;  %v11348_v43 = vpop.f32.mrb[6].mxu1 }
 0x411   : > { %v11349_v41 = vpop.f32.mrb[7].mxu1 }
 0x412   : > { %v14536_v48 = vadd.f32 %v11349_v41, %v11348_v43  ;;  %v6478_v4 = vadd.f32 %v14534_v62, %v10738_v54  ;;  %v6996_v62 = vor.u32 %v6995_v44, %v6992_v12 }
 0x414   : > { %v6481_v55 = vadd.f32 %v14536_v48, %v10738_v54  ;;  %v14640_v30 = vrot.slane %v6996_v62, 2 }
 0x475   : > { %v11351_v59 = vpop.f32.mrb[8].mxu1 }
 0x476   : > { %v11352_v0 = vpop.f32.mrb[9].mxu1 }
 0x477   : > { %v11353_v34 = vadd.f32 %v11352_v0, %v11351_v59  ;;  %v11354_v1 = vpop.f32.mrb[10].mxu1 }
 0x478   : > { %v11355_v42 = vpop.f32.mrb[11].mxu1 }
 0x479   : > { %v11356_v37 = vadd.f32 %v11355_v42, %v11354_v1  ;;  %v6486_v33 = vadd.f32 %v11353_v34, %v10738_v54  ;;  %v7481_v42 = vshrl.u32 %v14643_v58, 16 }
 0x47b   : > { %v6489_v11 = vadd.f32 %v11356_v37, %v10738_v54 }
 0x47f   : > { %v11357_v31 = vpop.f32.mrb[12].mxu1 }
 0x480   : > { %v11358_v52 = vpop.f32.mrb[13].mxu1 }
 0x481   : > { %v11359_v17 = vadd.f32 %v11358_v52, %v11357_v31  ;;  %v11360_v32 = vpop.f32.mrb[14].mxu1 }
 0x482   : > { %v11361_v43 = vpop.f32.mrb[15].mxu1 }
 0x483   : > { %v11362_v41 = vadd.f32 %v11361_v43, %v11360_v32  ;;  %v6494_v53 = vadd.f32 %v11359_v17, %v10738_v54 }
 0x485   : > { %v6497_v18 = vadd.f32 %v11362_v41, %v10738_v54 }
 0x487   : > { %v11482_v47 = vpop.f32.mrb[16].mxu1 }
 0x488   : > { %v6543_v13 = vadd.f32 %v11482_v47, %v6478_v4  ;;  %v6534_v19 = vpop.f32.mrb[17].mxu1 }
 0x489   : > { %v6535_v51 = vadd.f32 %v6534_v19, %v6470_v29  ;;  %v11483_v24 = vpop.f32.mrb[18].mxu1 }
 0x48a   : > { %v6567_v35 = vmax.f32 %v6543_v13, 0.0  ;;  %v6546_v26 = vadd.f32 %v11483_v24, %v6481_v55  ;;  %v6537_v45 = vpop.f32.mrb[19].mxu1 }
 0x48b   : > { %v6565_v56 = vmax.f32 %v6535_v51, 0.0  ;;  %v6538_v10 = vadd.f32 %v6537_v45, %v6473_v7 }
 0x48c   : > { %v6568_v25 = vmax.f32 %v6546_v26, 0.0  ;;  %v6575_v40 = vmin.f32 %v6567_v35, 10.0 }
 0x48d   : > { %v6566_v38 = vmax.f32 %v6538_v10, 0.0  ;;  %v6573_v48 = vmin.f32 %v6565_v56, 10.0 }
 0x48e   : > { %v6576_v39 = vmin.f32 %v6568_v25, 10.0 }
 0x48f   : > { %v6574_v50 = vmin.f32 %v6566_v38, 10.0  ;;  %v11486_v60 = vpop.f32.mrb[20].mxu1 }
 0x490   : > { %v6582_v22 = vmax.f32 %v6575_v40, %v6576_v39  ;;  %v6559_v5 = vadd.f32 %v11486_v60, %v6494_v53  ;;  %v6550_v57 = vpop.f32.mrb[21].mxu1 }
 0x491   : > { %v6581_v61 = vmax.f32 %v6573_v48, %v6574_v50  ;;  %v14645_v3 = vadd.f32 %v6550_v57, %v6486_v33  ;;  %v11487_v28 = vpop.f32.mrb[22].mxu1 }
 0x492   : > { %v6606_v6 = vcombine.high %v6582_v22, %v6582_v22  ;;  %v6613_v63 = vrot.slane %v6582_v22, %v13997_v15  ;;  %v6571_v2 = vmax.f32 %v6559_v5, 0.0  ;;  %v6562_v14 = vadd.f32 %v11487_v28, %v6497_v18  ;;  %v6553_v59 = vpop.f32.mrb[23].mxu1 }
 0x493   : > { %v6589_v0 = vcombine.high %v6581_v61, %v6581_v61  ;;  %v6596_v34 = vrot.slane %v6581_v61, %v13997_v15  ;;  %v6554_v1 = vadd.f32 %v6553_v59, %v6489_v11  ;;  %v6569_v37 = vmax.f32 %v14645_v3, 0.0 }
 0x494   : > { %v6620_v31 = vrot.slane %v6606_v6, %v13997_v15  ;;  %v6621_v52 = vcombine.high %v6613_v63, %v6613_v63  ;;  %v10765_v36 = vrot.slane %v6613_v63, 9  ;;  %v6579_v41 = vmin.f32 %v6571_v2, 10.0 }
 0x495   : > { %v6603_v17 = vrot.slane %v6589_v0, %v13997_v15  ;;  %v6604_v32 = vcombine.high %v6596_v34, %v6596_v34  ;;  %v10761_v43 = vrot.slane %v6596_v34, 9  ;;  %v6572_v3 = vmax.f32 %v6562_v14, 0.0  ;;  %v11640_v14 = vld [vmem:[%s15637_s5 + $0x70] sm:$0xff]  }
 0x496   : > { %v6622_v16 = vcombine.high %v6620_v31, %v6620_v31  ;;  %v10766_v8 = vrot.slane %v6621_v52, 9  ;;  %v10767_v54 = vrot.slane %v6620_v31, 9  ;;  %v6725_v4 = vmax.f32 %v6613_v63, %v10765_v36  ;;  %11381 = vmatprep.subr.bf16.mxu0 %v11640_v14 }
 0x497   : > { %v6605_v47 = vcombine.high %v6603_v17, %v6603_v17  ;;  %v10762_v29 = vrot.slane %v6604_v32, 9  ;;  %v10763_v12 = vrot.slane %v6603_v17, 9  ;;  %v6721_v44 = vmax.f32 %v6596_v34, %v10761_v43 }
 0x498   : > { %v10768_v13 = vrot.slane %v6622_v16, 9  ;;  %v6726_v19 = vmax.f32 %v6621_v52, %v10766_v8  ;;  %v6727_v55 = vmax.f32 %v6620_v31, %v10767_v54  ;;  %v11293_v46 = vpack.c.bf16 %v6725_v4, %v6725_v4  ;;  %v6902_v4 = vld [vmem:[#allocation4 + $0x4] sm:$0x7] }
 0x499   : > { %v10764_v51 = vrot.slane %v6605_v47, 9  ;;  %v6722_v24 = vmax.f32 %v6604_v32, %v10762_v29  ;;  %v6723_v7 = vmax.f32 %v6603_v17, %v10763_v12  ;;  %v11289_v35 = vpack.c.bf16 %v6721_v44, %v6721_v44 }
 0x49a   : > { %v6728_v26 = vmax.f32 %v6622_v16, %v10768_v13  ;;  %v11294_v45 = vpack.c.bf16 %v6726_v19, %v6726_v19  ;;  %v11295_v56 = vpack.c.bf16 %v6727_v55, %v6727_v55  ;;  %v6850_v10 = vunpack.c.l.b16 %v11293_v46 }
 0x49b   : > { %v6724_v62 = vmax.f32 %v6605_v47, %v10764_v51  ;;  %v11290_v25 = vpack.c.bf16 %v6722_v24, %v6722_v24  ;;  %v11291_v38 = vpack.c.bf16 %v6723_v7, %v6723_v7  ;;  %v6846_v40 = vunpack.c.l.b16 %v11289_v35 }
 0x49c   : > { %v11296_v39 = vpack.c.bf16 %v6728_v26, %v6728_v26  ;;  %v6851_v53 = vunpack.c.l.b16 %v11294_v45  ;;  %v6852_v48 = vunpack.c.l.b16 %v11295_v56  ;;  %v6869_v50 = vrot.slane %v6850_v10, 7 }
 0x49d   : > { %v11292_v60 = vpack.c.bf16 %v6724_v62, %v6724_v62  ;;  %v6847_v33 = vunpack.c.l.b16 %v11290_v25  ;;  %v6848_v22 = vunpack.c.l.b16 %v11291_v38  ;;  %v6862_v5 = vrot.slane %v6846_v40, 7 }
 0x49e   : > { %v6853_v57 = vunpack.c.l.b16 %v11296_v39  ;;  %v6870_v18 = vrot.slane %v6851_v53, 6  ;;  %v6872_v61 = vrot.slane %v6852_v48, 5  ;;  %v6570_v63 = vmax.f32 %v6554_v1, 0.0  ;;  %v6905_v1 = vld [vmem:[#allocation4 + $0x8] sm:$0x7] }
 0x49f   : > { %v6849_v28 = vunpack.c.l.b16 %v11292_v60  ;;  %v6863_v11 = vrot.slane %v6847_v33, 6  ;;  %v6865_v6 = vrot.slane %v6848_v22, 5  ;;  %v6577_v0 = vmin.f32 %v6569_v37, 10.0 }
 0x4a0   : > { %v6871_v2 = vsel %vm5212_vm11, %v6870_v18, %v6869_v50  ;;  %v6874_v59 = vrot.slane %v6853_v57, 4  ;;  %v6580_v34 = vmin.f32 %v6572_v3, 10.0  ;;  %v6578_v17 = vmin.f32 %v6570_v63, 10.0 }
 0x4a1   : > { %v6873_v31 = vsel %vm5215_vm3, %v6872_v61, %v6871_v2  ;;  %v6864_v52 = vsel %vm5212_vm11, %v6863_v11, %v6862_v5  ;;  %v6867_v36 = vrot.slane %v6849_v28, 4  ;;  %v7484_v37 = vshll.u32 %v14643_v58, 16 }
 0x4a2   : > { %v6875_v32 = vsel %vm15761_vm1, %v6874_v59, %v6873_v31  ;;  %v6866_v43 = vsel %vm5215_vm3, %v6865_v6, %v6864_v52  ;;  %v6584_v16 = vmax.f32 %v6579_v41, %v6580_v34  ;;  %v6583_v47 = vmax.f32 %v6577_v0, %v6578_v17 }
 0x4a3   : > { %v6891_v8 = vpack.c.b16 %v6875_v32, %v6875_v32  ;;  %v6868_v54 = vsel %vm15764_vm2, %v6867_v36, %v6866_v43  ;;  %v10801_v29 = vrot.slane %v14638_v27, 9  ;;  %v14673_v19 = vrot.slane %v7082_v21, 7  ;;  %v11643_v27 = vld [vmem:[%s15637_s5 + $0x98] sm:$0xff]  }
 0x4a4   : > { %v6890_v12 = vpack.c.b16 %v6868_v54, %v6868_v54  ;;  %v6640_v44 = vcombine.high %v6584_v16, %v6584_v16  ;;  %v6647_v13 = vrot.slane %v6584_v16, %v13997_v15  ;;  %v6623_v55 = vcombine.high %v6583_v47, %v6583_v47 }
 0x4a5   : > { %v6906_v41 = vsel %vm14661_vm0, %v6891_v8, %v6905_v1  ;;  %v6630_v46 = vrot.slane %v6583_v47, %v13997_v15  ;;  %v7437_v51 = vcombine.high %v14643_v58, %v14643_v58  ;;  %v14686_v10 = vrot.slane %v7481_v42, 6 }
 0x4a6   : > { %6907 = vst [vmem:[#allocation4 + $0x8] sm:$0x7] %v6906_v41  ;;  %v6903_v24 = vsel %vm14661_vm0, %v6890_v12, %v6902_v4  ;;  %v6654_v7 = vrot.slane %v6640_v44, %v13997_v15  ;;  %v6655_v35 = vcombine.high %v6647_v13, %v6647_v13  ;;  %v10773_v26 = vrot.slane %v6647_v13, 9 }
 0x4a7   : > { %6904 = vst [vmem:[#allocation4 + $0x4] sm:$0x7] %v6903_v24  ;;  %v6637_v21 = vrot.slane %v6623_v55, %v13997_v15  ;;  %v6638_v45 = vcombine.high %v6630_v46, %v6630_v46  ;;  %v10769_v56 = vrot.slane %v6630_v46, 9  ;;  %v7486_v52 = vrot.slane %v7484_v37, 7  ;;  %v6911_v24 = vld [vmem:[#allocation4 + $0x10] sm:$0x7] }
 0x4a8   : > { %v6656_v62 = vcombine.high %v6654_v7, %v6654_v7  ;;  %v10774_v25 = vrot.slane %v6655_v35, 9  ;;  %v10775_v38 = vrot.slane %v6654_v7, 9  ;;  %v6733_v40 = vmax.f32 %v6647_v13, %v10773_v26  ;;  %v14696_v55 = vld.sshfl [vmem:[#allocation4 + $0x14] sm:$0x12 pattern:$0x76325410] }
 0x4a9   : > { %v6639_v39 = vcombine.high %v6637_v21, %v6637_v21  ;;  %v10770_v53 = vrot.slane %v6638_v45, 9  ;;  %v10771_v48 = vrot.slane %v6637_v21, 9  ;;  %v6729_v50 = vmax.f32 %v6630_v46, %v10769_v56 }
 0x4aa   : > { %v10776_v60 = vrot.slane %v6656_v62, 9  ;;  %v6734_v33 = vmax.f32 %v6655_v35, %v10774_v25  ;;  %v6735_v22 = vmax.f32 %v6654_v7, %v10775_v38  ;;  %v11301_v5 = vpack.c.bf16 %v6733_v40, %v6733_v40 }
 0x4ab   : > { %v10772_v57 = vrot.slane %v6639_v39, 9  ;;  %v6730_v18 = vmax.f32 %v6638_v45, %v10770_v53  ;;  %v6731_v61 = vmax.f32 %v6637_v21, %v10771_v48  ;;  %v11297_v58 = vpack.c.bf16 %v6729_v50, %v6729_v50 }
 0x4ac   : > { %v6736_v42 = vmax.f32 %v6656_v62, %v10776_v60  ;;  %v11302_v3 = vpack.c.bf16 %v6734_v33, %v6734_v33  ;;  %v11303_v28 = vpack.c.bf16 %v6735_v22, %v6735_v22  ;;  %v6858_v11 = vunpack.c.l.b16 %v11301_v5  ;;  %v6908_v62 = vld [vmem:[#allocation4 + $0xc] sm:$0x7]  ;;  %v11656_v5 = vld [vmem:[%s15637_s5 + $0xf8] sm:$0xff]  }
 0x4ad   : > { %v6732_v6 = vmax.f32 %v6639_v39, %v10772_v57  ;;  %v11298_v63 = vpack.c.bf16 %v6730_v18, %v6730_v18  ;;  %v11299_v2 = vpack.c.bf16 %v6731_v61, %v6731_v61  ;;  %v6854_v59 = vunpack.c.l.b16 %v11297_v58  ;;  %v10795_v12 = vld.sshfl [vmem:[#allocation4 + $0x8] sm:$0x13 pattern:$0x76325410] }
 0x4ae   : > { %v11304_v0 = vpack.c.bf16 %v6736_v42, %v6736_v42  ;;  %v6859_v34 = vunpack.c.l.b16 %v11302_v3  ;;  %v6860_v31 = vunpack.c.l.b16 %v11303_v28  ;;  %v10794_v1 = vld.sshfl [vmem:[#allocation4 + $0x4] sm:$0x13 pattern:$0x76325410]  ;;  %v14688_v43 = vshll.u32 %v7437_v51, 16 }
 0x4af   : > { %v11300_v36 = vpack.c.bf16 %v6732_v6, %v6732_v6  ;;  %v6855_v17 = vunpack.c.l.b16 %v11298_v63  ;;  %v6856_v32 = vunpack.c.l.b16 %v11299_v2  ;;  %v6883_v54 = vrot.slane %v6858_v11, 7  ;;  %v10809_v48 = vld.sshfl [vmem:[#allocation4 + $0x4] sm:$0x12 pattern:$0x76325410] }
 0x4b0   : > { %v6861_v8 = vunpack.c.l.b16 %v11304_v0  ;;  %v6884_v4 = vrot.slane %v6859_v34, 6  ;;  %v6886_v47 = vrot.slane %v6860_v31, 5  ;;  %v6876_v13 = vrot.slane %v6854_v59, 7 }
 0x4b1   : > { %v6857_v44 = vunpack.c.l.b16 %v11300_v36  ;;  %v6877_v37 = vrot.slane %v6855_v17, 6  ;;  %v6879_v41 = vrot.slane %v6856_v32, 5  ;;  %v7004_v7 = vshrl.u32 %v10794_v1, 16  ;;  %v11641_v32 = vld [vmem:[%s15637_s5 + $0x30] sm:$0xff]  }
 0x4b2   : > { %v6885_v46 = vsel %vm5212_vm11, %v6884_v4, %v6883_v54  ;;  %v6888_v51 = vrot.slane %v6861_v8, 4  ;;  %v7487_v35 = vor.u32 %v7486_v52, %v14686_v10  ;;  %v7007_v10 = vshll.u32 %v10794_v1, 16  ;;  %v10810_v57 = vld.sshfl [vmem:[#allocation4 + $0x8] sm:$0x12 pattern:$0x76325410]  ;;  %11382 = vmatpush3.bf16.msra.mxu0 %v11641_v32 }
 0x4b3   : > { %v6887_v21 = vsel %vm5215_vm3, %v6886_v47, %v6885_v46  ;;  %v6878_v45 = vsel %vm5212_vm11, %v6877_v37, %v6876_v13  ;;  %v6881_v56 = vrot.slane %v6857_v44, 4  ;;  %v6965_v39 = vcombine.high %v10794_v1, %v10794_v1  ;;  %v11642_v4 = vld [vmem:[%s15637_s5 + $0xd8] sm:$0xff]  }
 0x4b4   : > { %v6889_v38 = vsel %vm15772_vm5, %v6888_v51, %v6887_v21  ;;  %v6880_v40 = vsel %vm5215_vm3, %v6879_v41, %v6878_v45  ;;  %v7006_v53 = vrot.slane %v7004_v7, 6  ;;  %v7009_v33 = vrot.slane %v7007_v10, 7  ;;  %vm6986_vm3 = vmor %vm14711_vm4, %vm6985_vm9  ;;  %v11646_v37 = vld [vmem:[%s15637_s5 + $0x78] sm:$0xff]   ;;  %11397 = vmatprep.subr.bf16.mxu1 %v11642_v4  ;;  %v11645_v7 = vld [vmem:[%s15637_s5 + $0xa0] sm:$0xff]  }
 0x4b5   : > { %v6893_v50 = vpack.c.b16 %v6889_v38, %v6889_v38  ;;  %v6882_v60 = vsel %vm15773_vm6, %v6881_v56, %v6880_v40  ;;  %v7018_v22 = vshrl.u32 %v10795_v12, 16  ;;  %vm15774_vm1 = vcmask 1046534   ;;  %vm14735_vm7 = vmor %vm6986_vm3, %vm6987_vm14  ;;  %v14768_v51 = vld.sshfl [vmem:[#allocation4] sm:$0xf pattern:$0x76325410]  ;;  %11398 = vmatpush3.bf16.msra.mxu1 %v11643_v27  ;;  %11383 = vmatprep.subr.bf16.mxu0 %v11646_v37 }
 0x4b6   : > { %vm14721_vm2 = vmor %vm14703_vm10, %vm15774_vm1  ;;  %v6892_v18 = vpack.c.b16 %v6882_v60, %v6882_v60  ;;  %v6973_v61 = vcombine.high %v10795_v12, %v10795_v12  ;;  %v7021_v58 = vshll.u32 %v10795_v12, 16  ;;  %v7554_v42 = vcombine.high %v14696_v55, %v14696_v55  ;;  %v11653_v4 = vld [vmem:[%s15637_s5 + $0xa8] sm:$0xff]  }
 0x4b7   : > { %v6912_v3 = vsel %vm14661_vm0, %v6893_v50, %v6911_v24  ;;  %v7010_v28 = vor.u32 %v7009_v33, %v7006_v53  ;;  %v7020_v11 = vrot.slane %v7018_v22, 6  ;;  %v7308_v6 = vcombine.high %v10809_v48, %v10809_v48 }
 0x4b8   : > { %6913 = vst [vmem:[#allocation4 + $0x10] sm:$0x7] %v6912_v3  ;;  %v6909_v63 = vsel %vm14661_vm0, %v6892_v18, %v6908_v62  ;;  %v7013_v2 = vshll.u32 %v6965_v39, 16  ;;  %v7023_v59 = vrot.slane %v7021_v58, 7  ;;  %v7316_v0 = vcombine.high %v10810_v57, %v10810_v57 }
 0x4b9   : > { %6910 = vst [vmem:[#allocation4 + $0xc] sm:$0x7] %v6909_v63  ;;  %v7488_v31 = vrot.slane %v7487_v35, 2  ;;  %v10813_v52 = vrot.slane %v10809_v48, 9  ;;  %v7335_v36 = vrot.slane %v7308_v6, 7  ;;  %v7117_v17 = vsel %vm14721_vm2, %v10801_v29, %v14673_v19  ;;  %v11644_v29 = vld [vmem:[%s15637_s5 + $0xe0] sm:$0xff]  }
 0x4ba   : > { %v7011_v1 = vrot.slane %v7010_v28, 2  ;;  %v7024_v16 = vor.u32 %v7023_v59, %v7020_v11  ;;  %v7027_v8 = vshll.u32 %v6973_v61, 16  ;;  %v7339_v54 = vrot.slane %v7316_v0, 7  ;;  %11399 = vmatprep.subr.bf16.mxu1 %v11644_v29  ;;  %v11651_v6 = vld [vmem:[%s15637_s5 + $0x38] sm:$0xff]  }
 0x4bb   : > { %v11972_v19 = vld.sshfl [vmem:[#allocation4 + $0x4] sm:$0xf pattern:$0x76325410]  ;;  %v7492_v47 = vrot.slane %v14688_v43, 7  ;;  %v14762_v12 = vsel %vm14721_vm2, %v10813_v52, %v7335_v36  ;;  %v10828_v44 = vrot.slane %v14696_v55, 9  ;;  %v14775_v43 = vsel %vm14735_vm7, %v14640_v30, %v7001_v9  ;;  %11400 = vmatpush3.bf16.msra.mxu1 %v11645_v7  ;;  %11384 = vmatpush3.bf16.msra.mxu0 %v11651_v6 }
 0x4bc   : > { %v7569_v13 = vrot.slane %v7554_v42, 7  ;;  %v7015_v41 = vrot.slane %v7013_v2, 7  ;;  %v10814_v46 = vrot.slane %v10810_v57, 9  ;;  %v7025_v55 = vrot.slane %v7024_v16, 2  ;;  %v11661_v6 = vld [vmem:[%s15637_s5 + $0x118] sm:$0xff]  }
 0x4bd   : > { %v7130_v24 = vcombine.low %v7117_v17, %v14762_v12  ;;  %v7029_v26 = vrot.slane %v7027_v8, 7  ;;  %vm6940_vm0 = vcmask 523264   ;;  %v14791_v9 = vsel %vm14735_vm7, %v7488_v31, %v7492_v47 }
 0x4be   : > { %v14783_v35 = vsel %vm14735_vm7, %v7011_v1, %v7015_v41  ;;  %v14787_v23 = vsel %vm14721_vm2, %v10814_v46, %v7339_v54  ;;  %v14795_v21 = vsel %vm14721_vm2, %v10828_v44, %v7569_v13  ;;  %v11652_v54 = vld [vmem:[%s15637_s5 + $0xe8] sm:$0xff]   ;;  %v11654_v44 = vld [vmem:[%s15637_s5 + $0xf0] sm:$0xff]   ;;  %vm12057_vm9 = vmmov 0  }
 0x4bf   : > { %v10819_v30 = vld.sshfl [vmem:[#allocation4 + $0x10] sm:$0x13 pattern:$0x76325410]  ;;  %v14799_v38 = vsel %vm14735_vm7, %v7025_v55, %v7029_v26  ;;  %v7045_v40 = vcombine.low %v14775_v43, %v14783_v35  ;;  %v7349_v39 = vcombine.low %v14762_v12, %v14787_v23  ;;  %v14806_v53 = vrot.slane %v7130_v24, %v13997_v15  ;;  %11401 = vmatprep.subr.bf16.mxu1 %v11652_v54  ;;  %v11655_v43 = vld [vmem:[%s15637_s5 + $0xb0] sm:$0xff]   ;;  %v11657_v12 = vld [vmem:[%s15637_s5 + $0x100] sm:$0xff]  }
 0x4c0   : > { %v11974_v45 = vld.sshfl [vmem:[#allocation4 + $0xc] sm:$0xf pattern:$0x76325410]  ;;  %v7429_v56 = vcombine.high %v10819_v30, %v10819_v30  ;;  %v7467_v62 = vshrl.u32 %v10819_v30, 16  ;;  %v7470_v25 = vshll.u32 %v10819_v30, 16  ;;  %v7274_v27 = vcombine.low %v14783_v35, %v14799_v38  ;;  %11402 = vmatpush3.bf16.msra.mxu1 %v11653_v4 }
 0x4c1   : > { %v10796_v10 = vld.sshfl [vmem:[#allocation4 + $0xc] sm:$0x13 pattern:$0x76325410]  ;;  %v7173_v42 = vcombine.low %v11972_v19, %v11974_v45  ;;  %11403 = vmatprep.subr.bf16.mxu1 %v11654_v44  ;;  %v7053_v45 = vrot.slane %v7045_v40, %v13997_v15  ;;  %vm15779_vm14 = vsmask.f32 256 }
 0x4c2   : > { %v6981_v48 = vcombine.high %v10796_v10, %v10796_v10  ;;  %v7032_v50 = vshrl.u32 %v10796_v10, 16  ;;  %v7035_v60 = vshll.u32 %v10796_v10, 16  ;;  %v10811_v33 = vld.sshfl [vmem:[#allocation4 + $0xc] sm:$0x12 pattern:$0x76325410]  ;;  %vm14883_vm15 = vmand %vm7107_vm8, %vm15779_vm14 }
 0x4c3   : > { %v7469_v22 = vrot.slane %v7467_v62, 6  ;;  %v7472_v57 = vrot.slane %v7470_v25, 7  ;;  %v7476_v18 = vshll.u32 %v7429_v56, 16  ;;  %v7324_v61 = vcombine.high %v10811_v33, %v10811_v33  ;;  %7174 = vrot.lane.b32.xlu0 %v7173_v42, %s15746_s23  ;;  %v11673_v54 = vld [vmem:[%s15639_s7 + $0x24] ss:$8 sps:$4 sm:$0xff]   ;;  %vm15784_vm5 = vmmov %vm15779_vm14 }
 0x4c4   : > { %v11975_v58 = vld.sshfl [vmem:[#allocation4 + $0x8] sm:$0xf pattern:$0x76325410]  ;;  %v7034_v3 = vrot.slane %v7032_v50, 6  ;;  %v7037_v28 = vrot.slane %v7035_v60, 7  ;;  %11404 = vmatpush3.bf16.msra.mxu1 %v11655_v43 }
 0x4c5   : > { %v7041_v11 = vshll.u32 %v6981_v48, 16  ;;  %v7473_v63 = vor.u32 %v7472_v57, %v7469_v22  ;;  %v7478_v2 = vrot.slane %v7476_v18, 7  ;;  %v10812_v59 = vld.sshfl [vmem:[#allocation4 + $0x10] sm:$0x12 pattern:$0x76325410]  ;;  %v6938_v16 = vcombine.low %v14768_v51, %v11975_v58  ;;  %11405 = vmatprep.subr.bf16.mxu1 %v11656_v5 }
 0x4c6   : > { %v10815_v0 = vrot.slane %v10811_v33, 9  ;;  %v7038_v31 = vor.u32 %v7037_v28, %v7034_v3  ;;  %v7332_v36 = vcombine.high %v10812_v59, %v10812_v59  ;;  %v7343_v17 = vrot.slane %v7324_v61, 7  ;;  %v11976_v14 = vld.sshfl [vmem:[#allocation4 + $0x8] sm:$0xf pattern:$0x76325410] }
 0x4c7   : > { %v7043_v52 = vrot.slane %v7041_v11, 7  ;;  %v7474_v32 = vrot.slane %v7473_v63, 2  ;;  %v10816_v1 = vrot.slane %v10812_v59, 9  ;;  %6941 = vst.msk [vmem:[#allocation7] sm:$0xff] %vm6940_vm0, %v6938_v16  ;;  %v7357_v33 = vrot.slane %v7349_v39, %v13997_v15  ;;  %v11659_v3 = vld [vmem:[%s15637_s5 + $0x108] sm:$0xff]   ;;  %v11660_v11 = vld [vmem:[%s15637_s5 + $0x110] sm:$0xff]  }
 0x4c8   : > { %v11977_v8 = vld.sshfl [vmem:[#allocation4 + $0x10] sm:$0xf pattern:$0x76325410]  ;;  %v7039_v29 = vrot.slane %v7038_v31, 2  ;;  %v7344_v19 = vsel %vm14721_vm2, %v10815_v0, %v7343_v17  ;;  %v7347_v47 = vrot.slane %v7332_v36, 7 }
 0x4c9   : > { %v7479_v13 = vsel %vm14735_vm7, %v7474_v32, %v7478_v2  ;;  %v7131_v37 = vcombine.low %v14787_v23, %v7344_v19  ;;  %v7395_v26 = vcombine.low %v11976_v14, %v11977_v8  ;;  %v8073_v59 = vld [vmem:[#allocation5 + $0x2] sm:$0x1]  ;;  %vm8083_vm10 = vsmask.f32 7942  ;;  %v11664_v17 = vld [vmem:[%s15639_s7 + $0x4] ss:$8 sps:$4 sm:$0xff]  }
 0x4ca   : > { %v7044_v41 = vsel %vm14735_vm7, %v7039_v29, %v7043_v52  ;;  %v7495_v46 = vcombine.low %v7479_v13, %v14791_v9  ;;  %v7348_v51 = vsel %vm14721_vm2, %v10816_v1, %v7347_v47  ;;  %v12056_v9 = vmov 0.0   ;;  %vm14889_vm4 = vmand %vm8082_vm12, %vm8083_vm10  ;;  %v8088_v52 = vld [vmem:[#allocation5 + $0x2] sm:$0x2]  ;;  %v11667_v32 = vld [vmem:[%s15639_s7 + $0x14] ss:$8 sps:$4 sm:$0xff]  }
 0x4cb   : > { %v7046_v55 = vcombine.low %v14799_v38, %v7044_v41  ;;  %v7350_v24 = vcombine.low %v7344_v19, %v7348_v51  ;;  %v7145_v7 = vrot.slane %v7131_v37, %v13997_v15  ;;  %v7572_v35 = vcombine.low %v7348_v51, %v14795_v21  ;;  %11488 = vmatprep.subr.bf16.mxu0 %v12056_v9  ;;  %v11658_v38 = vld [vmem:[%s15637_s5 + $0xb8] sm:$0xff]   ;;  %v11662_v14 = vld [vmem:[%s15639_s7] ss:$8 sps:$4 sm:$0xff]   ;;  %v11670_v16 = vld [vmem:[%s15639_s7 + $0x84] ss:$8 sps:$4 sm:$0xff]  }
 0x4cc   : > { %v7509_v34 = vrot.slane %v7495_v46, %v13997_v15  ;;  %v7275_v30 = vcombine.low %v7044_v41, %v7479_v13  ;;  %7397 = vst.msk [vmem:[#allocation7 + $0x18] sm:$0xff] %vm6940_vm0, %v7395_v26  ;;  %v7282_v21 = vrot.slane %v7274_v27, %v13997_v15  ;;  %11406 = vmatpush3.bf16.msra.mxu1 %v11658_v38  ;;  %v8074_v0 = vsel %vm14883_vm15, 0, %v8073_v59  ;;  %v11665_v1 = vld [vmem:[%s15639_s7 + $0x10] ss:$8 sps:$4 sm:$0xff]   ;;  %v11668_v8 = vld [vmem:[%s15639_s7 + $0x80] ss:$8 sps:$4 sm:$0xff]  }
 0x4cd   : > { %v7060_v56 = vrot.slane %v7046_v55, %v13997_v15  ;;  %v7146_v62 = vcombine.low %v14806_v53, %v7145_v7  ;;  %v7586_v25 = vrot.slane %v7572_v35, %v13997_v15  ;;  %v7364_v40 = vrot.slane %v7350_v24, %v13997_v15  ;;  %8075 = vst [vmem:[#allocation5 + $0x2] sm:$0x1] %v8074_v0  ;;  %v11671_v4 = vld [vmem:[%s15639_s7 + $0x20] ss:$8 sps:$4 sm:$0xff]   ;;  %v11676_v27 = vld [vmem:[%s15639_s7 + $0x94] ss:$8 sps:$4 sm:$0xff]  }
 0x4ce   : > { %v7289_v10 = vrot.slane %v7275_v30, %v13997_v15  ;;  %v8089_v36 = vsel %vm14889_vm4, 0, %v8088_v52  ;;  %8520 = vmatprep.subr.bf16.mxu1 %v11664_v17  ;;  %v11674_v29 = vld [vmem:[%s15639_s7 + $0x90] ss:$8 sps:$4 sm:$0xff]   ;;  %v8076_v19 = vld [vmem:[#allocation5 + $0x4] sm:$0x1]  ;;  %vm8190_vm7 = vcmask 1041408  }
 0x4cf   : > { %v7061_v48 = vcombine.low %v7053_v45, %v7060_v56  ;;  %v7510_v50 = vcombine.low %v7060_v56, %v7509_v34  ;;  %7148 = vst.msk [vmem:[#allocation7 + $0x8] sm:$0xff] %vm6940_vm0, %v7146_v62  ;;  %v7587_v53 = vcombine.low %v7145_v7, %v7586_v25  ;;  %v7365_v22 = vcombine.low %v7357_v33, %v7364_v40  ;;  %v8091_v47 = vld [vmem:[#allocation5 + $0x4] sm:$0x2]  ;;  %v11677_v37 = vld [vmem:[%s15639_s7 + $0x30] ss:$8 sps:$4 sm:$0xff]  }
 0x4d0   : > { %v7290_v60 = vcombine.low %v7282_v21, %v7289_v10  ;;  %8090 = vst [vmem:[#allocation5 + $0x2] sm:$0x2] %v8089_v36  ;;  %v8077_v44 = vsel %vm14883_vm15, 0, %v8076_v19  ;;  %v8092_v13 = vsel %vm14889_vm4, 0, %v8091_v47  ;;  %v11679_v41 = vld [vmem:[%s15639_s7 + $0x34] ss:$8 sps:$4 sm:$0xff]  }
 0x4d1   : > { %7062 = vrot.lane.b32.xlu1 %v7061_v48, %s15746_s23  ;;  %7511 = vrot.lane.b32.xlu0 %v7510_v50, %s15746_s23  ;;  %7589 = vst.msk [vmem:[#allocation7 + $0x20] sm:$0xff] %vm6940_vm0, %v7587_v53  ;;  %8078 = vst [vmem:[#allocation5 + $0x4] sm:$0x1] %v8077_v44  ;;  %v11680_v46 = vld [vmem:[%s15639_s7 + $0xa0] ss:$8 sps:$4 sm:$0xff]  }
 0x4d2   : > { %7292 = vst.msk [vmem:[#allocation7 + $0x10] sm:$0xff] %vm6940_vm0, %v7290_v60  ;;  %8093 = vst [vmem:[#allocation5 + $0x4] sm:$0x2] %v8092_v13  ;;  %v11682_v51 = vld [vmem:[%s15639_s7 + $0xa4] ss:$8 sps:$4 sm:$0xff]  }
 0x4d3   : > { %v11685_v43 = vld [vmem:[%s15639_s7 + $0x44] ss:$8 sps:$4 sm:$0xff]   ;;  %v11683_v55 = vld [vmem:[%s15639_s7 + $0x40] ss:$8 sps:$4 sm:$0xff]   ;;  %v11688_v24 = vld [vmem:[%s15639_s7 + $0xb4] ss:$8 sps:$4 sm:$0xff]  }
 0x4d4   : > { %v11686_v7 = vld [vmem:[%s15639_s7 + $0xb0] ss:$8 sps:$4 sm:$0xff]   ;;  %v11691_v35 = vld [vmem:[%s15639_s7 + $0x54] ss:$8 sps:$4 sm:$0xff]   ;;  %v11694_v34 = vld [vmem:[%s15639_s7 + $0xc4] ss:$8 sps:$4 sm:$0xff]  }
 0x4d5   : > { %7366 = vrot.lane.b32.xlu1 %v7365_v22, %s15746_s23  ;;  %v11689_v26 = vld [vmem:[%s15639_s7 + $0x50] ss:$8 sps:$4 sm:$0xff]   ;;  %v11692_v30 = vld [vmem:[%s15639_s7 + $0xc0] ss:$8 sps:$4 sm:$0xff]   ;;  %v11700_v5 = vld [vmem:[%s15639_s7 + $0xd4] ss:$8 sps:$4 sm:$0xff]  }
 0x4d6   : > { %v8070_v45 = vld [vmem:[#allocation5] sm:$0x1]  ;;  %v8085_v25 = vld [vmem:[#allocation5] sm:$0x2]  ;;  %v11698_v21 = vld [vmem:[%s15639_s7 + $0xd0] ss:$8 sps:$4 sm:$0xff]  }
 0x4d7   : > { %v11695_v56 = vld [vmem:[%s15639_s7 + $0x60] ss:$8 sps:$4 sm:$0xff]   ;;  %v8071_v62 = vsel %vm14883_vm15, 0, %v8070_v45  ;;  %v8086_v10 = vsel %vm14889_vm4, 0, %v8085_v25  ;;  %v8079_v38 = vld [vmem:[#allocation5 + $0x6] sm:$0x1] }
 0x4d8   : > { %v7594_v63 = vld [vmem:[#allocation7 + $0x20] sm:$0xff]  ;;  %8072 = vst [vmem:[#allocation5] sm:$0x1] %v8071_v62  ;;  %v11703_v48 = vld [vmem:[%s15639_s7 + $0x74] ss:$8 sps:$4 sm:$0xff]   ;;  %v8080_v50 = vsel %vm14883_vm15, 0, %v8079_v38 }
 0x4d9   : > { %8087 = vst [vmem:[#allocation5] sm:$0x2] %v8086_v10  ;;  %v8094_v40 = vld [vmem:[#allocation5 + $0x6] sm:$0x2]  ;;  %8081 = vst [vmem:[#allocation5 + $0x6] sm:$0x1] %v8080_v50 }
 0x4da   : > { %v11706_v53 = vld [vmem:[%s15639_s7 + $0xe4] ss:$8 sps:$4 sm:$0xff]   ;;  %v8095_v60 = vsel %vm14889_vm4, 0, %v8094_v40  ;;  %v11701_v33 = vld [vmem:[%s15639_s7 + $0x70] ss:$8 sps:$4 sm:$0xff]   ;;  %s431_s23 = sand.u32 1, %s12032_s26  }
 0x4db   : > { %8096 = vst [vmem:[#allocation5 + $0x6] sm:$0x2] %v8095_v60  ;;  %v11704_v22 = vld [vmem:[%s15639_s7 + $0xe0] ss:$8 sps:$4 sm:$0xff]   ;;  %vm8237_vm8 = vsmask.f32 1284 }
 0x4dc   : > { %vm8238_vm6 = vmor %vm15784_vm5, %vm8237_vm8  ;;  %vm8239_vm1 = vsmask.f32 2312  ;;  %vm8241_vm3 = vsmask.f32 3340  ;;  %vm15787_vm14 = vsmask.f32 4368 }
 0x4dd   : > { %vm8240_vm2 = vmor %vm8238_vm6, %vm8239_vm1  ;;  %vm8244_vm12 = vsmask.f32 5396  ;;  %vm8246_vm10 = vsmask.f32 6424  ;;  %vm8248_vm8 = vsmask.f32 7452 }
 0x4de   : > { %vm9816_vm6 = vcmask 1043456   ;;  %s432_s15 = scalar_lea.vmem [#allocation8], %s431_s23  ;;  %s10258_s16 = scalar_lea.sflag [#allocation9], %s431_s23 }
 0x4df   : > { %s10270_s0 = sshll.u32 %s432_s15, 4  ;;  %s15592_s0 = int_to_ptr.vmem [resolvable:$true] %s10270_s0 }
 0x4e0   : > { %s11978_s21 = scalar_lea.vmem %s15592_s0, 16  ;;  %p11985_p0 = scmp.lt.s32.totalorder %s15592_s0, %s11983_s1 }
 0x4e1   : > { %p11979_p11 = scmp.ne.s32.totalorder %s15592_s0, %s11978_s21  ;;  %p11986_p1 = scmp.lt.s32.totalorder %s11984_s2, %s11978_s21 }
 0x4e3   : > { %p11980_p12 = pnand %p11979_p11, %p12168_p5  ;;  %p11987_p2 = por %p11986_p1, %p11985_p0 }
 0x4e5   : > { %p11981_p13 = pneg %p11980_p12 }
 0x4e7   : > { %p11988_p3 = pnand %p11987_p2, %p11981_p13 }
 0x535   : > { %v7175_v57 = vpop.permute.xlu0 %7174 }
 0x536   : > { %7177 = vst.msk [vmem:[#allocation7 + $0x8] sm:$0xff] %vm7065_vm13, %v7175_v57  ;;  %v11709_v57 = vld [vmem:[%s15639_s7 + $0x184] ss:$8 sps:$4 sm:$0xff]  }
 0x53d   : > { %v7591_v18 = vld [vmem:[#allocation7 + $0x8] sm:$0xff] }
 0x53e   : > { %7925 = vmatprep.mubr.bf16.mxu0 %v7591_v18  ;;  %v11712_v18 = vld [vmem:[%s15639_s7 + $0xf4] ss:$8 sps:$4 sm:$0xff]  }
 0x543   : > { %v7063_v61 = vpop.permute.xlu1 %7062  ;;  %v7512_v58 = vpop.permute.xlu0 %7511 }
 0x544   : > { %7066 = vst.msk [vmem:[#allocation7] sm:$0xff] %vm7065_vm13, %v7063_v61  ;;  %7514 = vst.msk [vmem:[#allocation7 + $0x18] sm:$0xff] %vm7065_vm13, %v7512_v58  ;;  %v11710_v61 = vld [vmem:[%s15639_s7 + $0xf0] ss:$8 sps:$4 sm:$0xff]   ;;  %v11718_v58 = vld [vmem:[%s15639_s7 + $0x104] ss:$8 sps:$4 sm:$0xff]  }
 0x547   : > { %v7367_v42 = vpop.permute.xlu1 %7366 }
 0x548   : > { %7369 = vst.msk [vmem:[#allocation7 + $0x10] sm:$0xff] %vm7065_vm13, %v7367_v42  ;;  %vm8242_vm13 = vmor %vm8240_vm2, %vm8241_vm3 }
 0x549   : > { %vm8243_vm15 = vmor %vm8242_vm13, %vm15787_vm14 }
 0x54b   : > { %v7590_v23 = vld [vmem:[#allocation7] sm:$0xff]  ;;  %v7593_v39 = vld [vmem:[#allocation7 + $0x18] sm:$0xff] }
 0x54c   : > { %7926 = vmatmul.mubr.bf16.vlgmr.msra.gmra.mrb[32].mxu0 %v7590_v23  ;;  %7966 = vmatprep.mubr.bf16.mxu1 %v7593_v39 }
 0x54d   : > { %11489 = vmatpush3.bf16.msra.mxu0 %v11657_v12  ;;  %11496 = vmatprep.mubr.msk.bf16.mxu0 %vm12057_vm9, %v12056_v9 }
 0x54e   : > { %11490 = vmatprep.subr.bf16.mxu0 %v12056_v9 }
 0x54f   : > { %v7592_v28 = vld [vmem:[#allocation7 + $0x10] sm:$0xff] }
 0x550   : > { %7967 = vmatmul.mubr.bf16.vlgmr.msra.gmra.mrb[24].mxu1 %v7592_v28 }
 0x551   : > { %11491 = vmatpush3.bf16.msra.mxu0 %v11659_v3  ;;  %8552 = vmatprep.mubr.bf16.mxu1 %v15709_v20  ;;  %v10829_v3 = vld [vmem:[%s15638_s6] ss:$0 sm:$0xff] }
 0x552   : > { %11492 = vmatprep.subr.bf16.mxu0 %v12056_v9  ;;  %8521 = vmatpush1.bf16.msra.mxu1 %v11662_v14 }
 0x553   : > { %8522 = vmatprep.subr.bf16.mxu1 %v11667_v32 }
 0x555   : > { %11493 = vmatpush3.bf16.msra.mxu0 %v11660_v11 }
 0x556   : > { %11494 = vmatprep.subr.bf16.mxu0 %v12056_v9  ;;  %8523 = vmatpush1.bf16.msra.mxu1 %v11665_v1  ;;  %v11697_v9 = vld [vmem:[%s15639_s7 + $0x64] ss:$8 sps:$4 sm:$0xff]  }
 0x557   : > { %8524 = vmatprep.subr.bf16.mxu1 %v11673_v54 }
 0x559   : > { %11495 = vmatpush3.bf16.msra.mxu0 %v11661_v6 }
 0x55a   : > { %8381 = vmatprep.subr.bf16.mxu0 %v11670_v16  ;;  %8525 = vmatpush1.bf16.msra.mxu1 %v11671_v4 }
 0x55b   : > { %8526 = vmatprep.subr.bf16.mxu1 %v11679_v41 }
 0x55c   : > { %11497 = vmatmul.mubr.msk.bf16.vlgmr.msra.gmra.mrb[36].mxu0 %vm6940_vm0, %v7594_v63  ;;  %vm8191_vm0 = vsmask.f32 1282 }
 0x55d   : > { %8413 = vmatprep.mubr.bf16.mxu0 %v15709_v20  ;;  %8382 = vmatpush1.bf16.msra.mxu0 %v11668_v8  ;;  %vm15024_vm9 = vmand %vm8190_vm7, %vm8191_vm0 }
 0x55e   : > { %8383 = vmatprep.subr.bf16.mxu0 %v11676_v27  ;;  %8527 = vmatpush1.bf16.msra.mxu1 %v11677_v37 }
 0x55f   : > { %8528 = vmatprep.subr.bf16.mxu1 %v11685_v43 }
 0x561   : > { %8384 = vmatpush1.bf16.msra.mxu0 %v11674_v29 }
 0x562   : > { %8385 = vmatprep.subr.bf16.mxu0 %v11682_v51  ;;  %8529 = vmatpush1.bf16.msra.mxu1 %v11683_v55 }
 0x563   : > { %8530 = vmatprep.subr.bf16.mxu1 %v11691_v35 }
 0x565   : > { %8386 = vmatpush1.bf16.msra.mxu0 %v11680_v46 }
 0x566   : > { %8387 = vmatprep.subr.bf16.mxu0 %v11688_v24  ;;  %8531 = vmatpush1.bf16.msra.mxu1 %v11689_v26 }
 0x567   : > { %8532 = vmatprep.subr.bf16.mxu1 %v11697_v9 }
 0x569   : > { %8388 = vmatpush1.bf16.msra.mxu0 %v11686_v7 }
 0x56a   : > { %8389 = vmatprep.subr.bf16.mxu0 %v11694_v34  ;;  %8533 = vmatpush1.bf16.msra.mxu1 %v11695_v56 }
 0x56b   : > { %8534 = vmatprep.subr.bf16.mxu1 %v11703_v48 }
 0x56d   : > { %8390 = vmatpush1.bf16.msra.mxu0 %v11692_v30 }
 0x56e   : > { %8391 = vmatprep.subr.bf16.mxu0 %v11700_v5  ;;  %8535 = vmatpush1.bf16.msra.mxu1 %v11701_v33 }
 0x56f   : > { %8854 = vmatprep.subr.bf16.mxu1 %v11709_v57 }
 0x571   : > { %8392 = vmatpush1.bf16.msra.mxu0 %v11698_v21 }
 0x572   : > { %8393 = vmatprep.subr.bf16.mxu0 %v11706_v53 }
 0x575   : > { %8394 = vmatpush1.bf16.msra.mxu0 %v11704_v22 }
 0x576   : > { %8395 = vmatprep.subr.bf16.mxu0 %v11712_v18 }
 0x579   : > { %8396 = vmatpush1.bf16.msra.mxu0 %v11710_v61 }
 0x57a   : > { %8694 = vmatprep.subr.bf16.mxu0 %v11718_v58 }
 0x61f   : > { %v11385_v42 = vpop.f32.mrb[32].mxu0 }
 0x620   : > { %v11386_v12 = vpop.f32.mrb[33].mxu0 }
 0x621   : > { %v11387_v23 = vadd.f32 %v11386_v12, %v11385_v42  ;;  %v11388_v39 = vpop.f32.mrb[34].mxu0 }
 0x622   : > { %v11389_v28 = vpop.f32.mrb[35].mxu0 }
 0x623   : > { %v11390_v11 = vadd.f32 %v11389_v28, %v11388_v39  ;;  %v11407_v6 = vpop.f32.mrb[24].mxu1  ;;  %v7928_v2 = vadd.f32 %v11387_v23, %v10829_v3  ;;  %v8193_v28 = vld [vmem:[#allocation5 + $0x2] sm:$0x3] }
 0x624   : > { %v11408_v63 = vpop.f32.mrb[25].mxu1 }
 0x625   : > { %v11409_v59 = vadd.f32 %v11408_v63, %v11407_v6  ;;  %v11410_v0 = vpop.f32.mrb[26].mxu1  ;;  %v7931_v52 = vadd.f32 %v11390_v11, %v10829_v3  ;;  %v11742_v3 = vld [vmem:[%s15639_s7 + $0x144] ss:$8 sps:$4 sm:$0xff]  }
 0x626   : > { %v11411_v31 = vpop.f32.mrb[27].mxu1 }
 0x627   : > { %v11412_v36 = vadd.f32 %v11411_v31, %v11410_v0  ;;  %v7969_v17 = vadd.f32 %v11409_v59, %v7928_v2  ;;  %v8196_v2 = vld [vmem:[#allocation5 + $0x4] sm:$0x3]  ;;  %v12058_v59 = vmov 1966171168  }
 0x628   : > { %v8287_v0 = vunpack.c.l.s4 %v12058_v59  ;;  %v11743_v59 = vld [vmem:[%s15639_s7 + $0x1e0] ss:$8 sps:$4 sm:$0xff]  }
 0x629   : > { %v7972_v14 = vadd.f32 %v11412_v36, %v7931_v52  ;;  %v10871_v36 = vld.sshfl [vmem:[#allocation5] sm:$0x11 pattern:$0x75316420] }
 0x62f   : > { %v8009_v32 = vpop.f32.mrb[36].mxu0 }
 0x630   : > { %v8010_v1 = vadd.f32 %v8009_v32, %v7969_v17  ;;  %v11498_v16 = vpop.f32.mrb[37].mxu0  ;;  %v8228_v32 = vcombine.high %v10871_v36, %v10871_v36 }
 0x631   : > { %v8012_v8 = vpop.f32.mrb[38].mxu0 }
 0x632   : > { %v8016_v54 = vmax.f32 %v8010_v1, 0.0  ;;  %v8013_v4 = vadd.f32 %v8012_v8, %v7972_v14  ;;  %v11499_v27 = vpop.f32.mrb[39].mxu0  ;;  %v8288_v14 = vunpack.c.0.s8 %v8287_v0  ;;  %v8199_v1 = vld [vmem:[#allocation5] sm:$0x1]  ;;  %v8251_v8 = vshrl.u32 %v10871_v36, 16 }
 0x633   : > { %v11850_v27 = vld [vmem:[%s15639_s7 + $0x364] ss:$8 sps:$4 sm:$0xff]  }
 0x634   : > { %v8018_v29 = vmin.f32 %v8016_v54, 10.0  ;;  %v8017_v19 = vmax.f32 %v8013_v4, 0.0  ;;  %v15037_v16 = vsub.s32 %v8288_v14, %v13990_v49  ;;  %v8256_v54 = vshll.u32 %v8228_v32, 16 }
 0x635   : > { %v10923_v14 = vld.sshfl [vmem:[#allocation5] sm:$0x10 pattern:$0x75316420] }
 0x636   : > { %v8022_v47 = vcombine.high %v8018_v29, %v8018_v29  ;;  %v8019_v44 = vmin.f32 %v8017_v19, 10.0 }
 0x638   : > { %v8026_v13 = vmax.f32 %v8018_v29, %v8022_v47  ;;  %v8023_v37 = vcombine.high %v8019_v44, %v8019_v44  ;;  %v11130_v47 = vld.sshfl [vmem:[#allocation5 + $0x6] sm:$0x10 pattern:$0x75316420] }
 0x63a   : > { %v8036_v41 = vrot.slane %v8026_v13, %v13997_v15  ;;  %v8027_v46 = vmax.f32 %v8019_v44, %v8023_v37 }
 0x63c   : > { %v8037_v51 = vcombine.high %v8036_v41, %v8036_v41  ;;  %v10867_v43 = vrot.slane %v8036_v41, 9  ;;  %v8044_v55 = vrot.slane %v8027_v46, %v13997_v15 }
 0x63e   : > { %v10868_v24 = vrot.slane %v8037_v51, 9  ;;  %v8062_v7 = vmax.f32 %v8036_v41, %v10867_v43  ;;  %v8045_v35 = vcombine.high %v8044_v55, %v8044_v55  ;;  %v10869_v34 = vrot.slane %v8044_v55, 9 }
 0x640   : > { %v8063_v26 = vmax.f32 %v8037_v51, %v10868_v24  ;;  %v8097_v30 = vpack.c.bf16 %v8062_v7, %v8062_v7  ;;  %v10870_v9 = vrot.slane %v8045_v35, 9  ;;  %v8064_v5 = vmax.f32 %v8044_v55, %v10869_v34  ;;  %v11707_v51 = vld [vmem:[%s15639_s7 + $0x180] ss:$8 sps:$4 sm:$0xff]   ;;  %v11715_v7 = vld [vmem:[%s15639_s7 + $0x194] ss:$8 sps:$4 sm:$0xff]  }
 0x642   : > { %v8098_v45 = vpack.c.bf16 %v8063_v26, %v8063_v26  ;;  %v8111_v56 = vrot.slane %v8097_v30, %v13997_v15  ;;  %v8065_v62 = vmax.f32 %v8045_v35, %v10870_v9  ;;  %v8099_v25 = vpack.c.bf16 %v8064_v5, %v8064_v5  ;;  %v11713_v9 = vld [vmem:[%s15639_s7 + $0x190] ss:$8 sps:$4 sm:$0xff]  }
 0x644   : > { %v8118_v21 = vrot.slane %v8098_v45, %v13997_v15  ;;  %v8139_v10 = vrot.slane %v8111_v56, %v13997_v15  ;;  %v8100_v38 = vpack.c.bf16 %v8065_v62, %v8065_v62  ;;  %v8125_v48 = vrot.slane %v8099_v25, %v13997_v15  ;;  %v11716_v62 = vld [vmem:[%s15639_s7 + $0x100] ss:$8 sps:$4 sm:$0xff]   ;;  %v11721_v25 = vld [vmem:[%s15639_s7 + $0x1a4] ss:$8 sps:$4 sm:$0xff]  }
 0x646   : > { %v8146_v50 = vrot.slane %v8118_v21, %v13997_v15  ;;  %v8161_v40 = vunpack.c.l.b16 %v8139_v10  ;;  %v8132_v53 = vrot.slane %v8100_v38, %v13997_v15  ;;  %v8153_v60 = vrot.slane %v8125_v48, %v13997_v15  ;;  %v11724_v38 = vld [vmem:[%s15639_s7 + $0x114] ss:$8 sps:$4 sm:$0xff]  }
 0x648   : > { %v8162_v33 = vunpack.c.l.b16 %v8146_v50  ;;  %v8160_v22 = vrot.slane %v8132_v53, %v13997_v15  ;;  %v8163_v57 = vunpack.c.l.b16 %v8153_v60  ;;  %v8165_v18 = vrot.slane %v8161_v40, 7  ;;  %v11719_v40 = vld [vmem:[%s15639_s7 + $0x1a0] ss:$8 sps:$4 sm:$0xff]   ;;  %v11722_v53 = vld [vmem:[%s15639_s7 + $0x110] ss:$8 sps:$4 sm:$0xff]  }
 0x649   : > { %v11727_v60 = vld [vmem:[%s15639_s7 + $0x1b4] ss:$8 sps:$4 sm:$0xff]  }
 0x64a   : > { %v8166_v61 = vrot.slane %v8162_v33, 6  ;;  %v8164_v58 = vunpack.c.l.b16 %v8160_v22  ;;  %v8168_v12 = vrot.slane %v8163_v57, 7  ;;  %v11730_v22 = vld [vmem:[%s15639_s7 + $0x124] ss:$8 sps:$4 sm:$0xff]  }
 0x64c   : > { %v8167_v42 = vsel %vm5212_vm11, %v8166_v61, %v8165_v18  ;;  %v8169_v23 = vrot.slane %v8164_v58, 6  ;;  %v11725_v18 = vld [vmem:[%s15639_s7 + $0x1b0] ss:$8 sps:$4 sm:$0xff]   ;;  %v11728_v61 = vld [vmem:[%s15639_s7 + $0x120] ss:$8 sps:$4 sm:$0xff]  }
 0x64d   : > { %v8171_v39 = vpack.c.b16 %v8167_v42, %v8167_v42  ;;  %v11733_v58 = vld [vmem:[%s15639_s7 + $0x1c4] ss:$8 sps:$4 sm:$0xff]   ;;  %v11736_v42 = vld [vmem:[%s15639_s7 + $0x134] ss:$8 sps:$4 sm:$0xff]  }
 0x64e   : > { %v8170_v11 = vsel %vm5212_vm11, %v8169_v23, %v8168_v12  ;;  %vm8245_vm11 = vmor %vm8243_vm15, %vm8244_vm12  ;;  %v11731_v12 = vld [vmem:[%s15639_s7 + $0x1c0] ss:$8 sps:$4 sm:$0xff]   ;;  %v11734_v23 = vld [vmem:[%s15639_s7 + $0x130] ss:$8 sps:$4 sm:$0xff]  }
 0x64f   : > { %v8179_v6 = vrot.slane %v8171_v39, %v13997_v15  ;;  %v8172_v63 = vpack.c.b16 %v8170_v11, %v8170_v11  ;;  %vm8247_vm4 = vmor %vm8245_vm11, %vm8246_vm10  ;;  %v11739_v39 = vld [vmem:[%s15639_s7 + $0x1d4] ss:$8 sps:$4 sm:$0xff]   ;;  %v11740_v11 = vld [vmem:[%s15639_s7 + $0x140] ss:$8 sps:$4 sm:$0xff]  }
 0x650   : > { %vm15039_vm5 = vmor %vm8247_vm4, %vm8248_vm8 }
 0x651   : > { %v8194_v31 = vsel %vm15024_vm9, %v8179_v6, %v8193_v28  ;;  %v8186_v52 = vrot.slane %v8172_v63, %v13997_v15  ;;  %v8258_v13 = vsel %vm15039_vm5, %v8251_v8, %v8256_v54  ;;  %v11737_v28 = vld [vmem:[%s15639_s7 + $0x1d0] ss:$8 sps:$4 sm:$0xff]   ;;  %v11745_v6 = vld [vmem:[%s15639_s7 + $0x1e4] ss:$8 sps:$4 sm:$0xff]   ;;  %v11748_v63 = vld [vmem:[%s15639_s7 + $0x154] ss:$8 sps:$4 sm:$0xff]  }
 0x652   : > { %8195 = vst [vmem:[#allocation5 + $0x2] sm:$0x3] %v8194_v31  ;;  %v11746_v31 = vld [vmem:[%s15639_s7 + $0x150] ss:$8 sps:$4 sm:$0xff]   ;;  %v11752_v8 = vld [vmem:[%s15639_s7 + $0x160] ss:$8 sps:$4 sm:$0xff]  }
 0x653   : > { %v8197_v17 = vsel %vm15024_vm9, %v8186_v52, %v8196_v2  ;;  %v11751_v52 = vld [vmem:[%s15639_s7 + $0x1f4] ss:$8 sps:$4 sm:$0xff]  }
 0x654   : > { %8198 = vst [vmem:[#allocation5 + $0x4] sm:$0x3] %v8197_v17  ;;  %v11754_v17 = vld [vmem:[%s15639_s7 + $0x164] ss:$8 sps:$4 sm:$0xff]  }
 0x659   : > { %v8200_v4 = vld [vmem:[#allocation5 + $0x2] sm:$0x1]  ;;  %v15149_v32 = vld.sshfl [vmem:[#allocation5 + $0x2] sm:$0x10 pattern:$0x75316420] }
 0x65a   : > { %v10872_v15 = vld.sshfl [vmem:[#allocation5 + $0x2] sm:$0x11 pattern:$0x75316420]  ;;  %v8424_v29 = vcombine.low %v8199_v1, %v8200_v4  ;;  %v11749_v1 = vld [vmem:[%s15639_s7 + $0x1f0] ss:$8 sps:$4 sm:$0xff]  }
 0x65b   : > { %v8236_v19 = vcombine.high %v10872_v15, %v10872_v15  ;;  %v8260_v37 = vshrl.u32 %v10872_v15, 16  ;;  %v15046_v46 = vld.sshfl [vmem:[#allocation5 + $0x4] sm:$0x10 pattern:$0x75316420] }
 0x65c   : > { %v8431_v44 = vrot.slane %v8424_v29, %v15037_v16  ;;  %v10991_v43 = vld.sshfl [vmem:[#allocation5 + $0x4] sm:$0x11 pattern:$0x75316420]  ;;  %v11147_v55 = vcombine.high %v15046_v46, %v11130_v47  ;;  %v8737_v0 = vld [vmem:[#allocation5 + $0x2] sm:$0x1]  ;;  %v10941_v29 = vcombine.high %v10923_v14, %v15149_v32 }
 0x65d   : > { %v8265_v41 = vshll.u32 %v8236_v19, 16  ;;  %v8916_v26 = vcombine.high %v10991_v43, %v10991_v43  ;;  %v8927_v45 = vshrl.u32 %v10991_v43, 16  ;;  %v8738_v2 = vld [vmem:[#allocation5 + $0x4] sm:$0x1]  ;;  %v11760_v15 = vld [vmem:[%s15639_s7 + $0x174] ss:$8 sps:$4 sm:$0xff]  }
 0x65e   : > { %v8438_v24 = vrot.slane %v8431_v44, %v15037_v16  ;;  %v15059_v30 = vrot.slane %v11147_v55, %v15037_v16  ;;  %v8758_v36 = vcombine.low %v8737_v0, %v8738_v2  ;;  %v11757_v4 = vld [vmem:[%s15639_s7 + $0x284] ss:$8 sps:$4 sm:$0xff]   ;;  %v11755_v19 = vld [vmem:[%s15639_s7 + $0x280] ss:$8 sps:$4 sm:$0xff]   ;;  %v11758_v44 = vld [vmem:[%s15639_s7 + $0x170] ss:$8 sps:$4 sm:$0xff]  }
 0x65f   : > { %v8267_v35 = vsel %vm15039_vm5, %v8260_v37, %v8265_v41  ;;  %v8932_v56 = vshll.u32 %v8916_v26, 16  ;;  %v8605_v37 = vrot.slane %v10941_v29, %v15037_v16  ;;  %v11766_v41 = vld [vmem:[%s15639_s7 + $0x204] ss:$8 sps:$4 sm:$0xff]   ;;  %v11764_v43 = vld [vmem:[%s15639_s7 + $0x200] ss:$8 sps:$4 sm:$0xff]  }
 0x660   : > { %v8285_v34 = vcombine.low %v8258_v13, %v8267_v35  ;;  %8553 = vmatmul.mubr.bf16.vlgmr.msra.gmra.mrb[28].mxu1 %v8438_v24  ;;  %v9673_v21 = vrot.slane %v15059_v30, %v15037_v16  ;;  %v8765_v54 = vrot.slane %v8758_v36, %v15037_v16  ;;  %v11763_v13 = vld [vmem:[%s15639_s7 + $0x294] ss:$8 sps:$4 sm:$0xff]   ;;  %v11769_v55 = vld [vmem:[%s15639_s7 + $0x2a4] ss:$8 sps:$4 sm:$0xff]   ;;  %v11809_v0 = vld [vmem:[%s15639_s7 + $0x390] ss:$8 sps:$4 sm:$0xff]  }
 0x661   : > { %8855 = vmatpush1.bf16.msra.mxu1 %v11707_v51  ;;  %8886 = vmatprep.mubr.bf16.mxu1 %v15709_v20  ;;  %v15080_v48 = vsel %vm15039_vm5, %v8927_v45, %v8932_v56  ;;  %v11761_v51 = vld [vmem:[%s15639_s7 + $0x290] ss:$8 sps:$4 sm:$0xff]   ;;  %v8612_v24 = vrot.slane %v8605_v37, %v15037_v16  ;;  %v11775_v26 = vld [vmem:[%s15639_s7 + $0x2b4] ss:$8 sps:$4 sm:$0xff]   ;;  %v11776_v45 = vld [vmem:[%s15639_s7 + $0x220] ss:$8 sps:$4 sm:$0xff]  }
 0x662   : > { %v8292_v5 = vrot.slane %v8285_v34, %v15037_v16  ;;  %8856 = vmatprep.subr.bf16.mxu1 %v11715_v7  ;;  %v8952_v50 = vcombine.low %v8267_v35, %v15080_v48  ;;  %v8772_v47 = vrot.slane %v8765_v54, %v15037_v16  ;;  %v11772_v7 = vld [vmem:[%s15639_s7 + $0x214] ss:$8 sps:$4 sm:$0xff]   ;;  %v11767_v35 = vld [vmem:[%s15639_s7 + $0x2a0] ss:$8 sps:$4 sm:$0xff]   ;;  %v11770_v34 = vld [vmem:[%s15639_s7 + $0x210] ss:$8 sps:$4 sm:$0xff]  }
 0x663   : > { %v11781_v56 = vld [vmem:[%s15639_s7 + $0x2c4] ss:$8 sps:$4 sm:$0xff]   ;;  %v11811_v2 = vld [vmem:[%s15639_s7 + $0x394] ss:$8 sps:$4 sm:$0xff]   ;;  %v11818_v14 = vld [vmem:[%s15639_s7 + $0x310] ss:$8 sps:$4 sm:$0xff]  }
 0x664   : > { %v8299_v10 = vrot.slane %v8292_v5, %v15037_v16  ;;  %v15093_v33 = vrot.slane %v8952_v50, %v15037_v16  ;;  %v11773_v5 = vld [vmem:[%s15639_s7 + $0x2b0] ss:$8 sps:$4 sm:$0xff]   ;;  %v11790_v50 = vld [vmem:[%s15639_s7 + $0x244] ss:$8 sps:$4 sm:$0xff]   ;;  %v11820_v36 = vld [vmem:[%s15639_s7 + $0x314] ss:$8 sps:$4 sm:$0xff]  }
 0x665   : > { %8857 = vmatpush1.bf16.msra.mxu1 %v11713_v9  ;;  %v11778_v9 = vld [vmem:[%s15639_s7 + $0x224] ss:$8 sps:$4 sm:$0xff]   ;;  %v11827_v29 = vld [vmem:[%s15639_s7 + $0x3c0] ss:$8 sps:$4 sm:$0xff]  }
 0x666   : > { %8414 = vmatmul.mubr.bf16.vlgmr.msra.gmra.mrb[40].mxu0 %v8299_v10  ;;  %8858 = vmatprep.subr.bf16.mxu1 %v11721_v25  ;;  %v8966_v57 = vrot.slane %v15093_v33, %v15037_v16  ;;  %v11779_v25 = vld [vmem:[%s15639_s7 + $0x2c0] ss:$8 sps:$4 sm:$0xff]   ;;  %v11782_v10 = vld [vmem:[%s15639_s7 + $0x230] ss:$8 sps:$4 sm:$0xff]   ;;  %v11826_v33 = vld [vmem:[%s15639_s7 + $0x324] ss:$8 sps:$4 sm:$0xff]  }
 0x667   : > { %8695 = vmatpush1.bf16.msra.mxu0 %v11716_v62  ;;  %8726 = vmatprep.mubr.bf16.mxu0 %v15709_v20  ;;  %v11784_v62 = vld [vmem:[%s15639_s7 + $0x234] ss:$8 sps:$4 sm:$0xff]   ;;  %v11829_v54 = vld [vmem:[%s15639_s7 + $0x3c4] ss:$8 sps:$4 sm:$0xff]   ;;  %v11884_v30 = vld [vmem:[%s15641_s9 + $0x20] ss:$8 sps:$4 sm:$0xff]  }
 0x668   : > { %8696 = vmatprep.subr.bf16.mxu0 %v11724_v38  ;;  %v11787_v38 = vld [vmem:[%s15639_s7 + $0x2d4] ss:$8 sps:$4 sm:$0xff]  }
 0x669   : > { %8859 = vmatpush1.bf16.msra.mxu1 %v11719_v40  ;;  %v11785_v40 = vld [vmem:[%s15639_s7 + $0x2d0] ss:$8 sps:$4 sm:$0xff]  }
 0x66a   : > { %8860 = vmatprep.subr.bf16.mxu1 %v11727_v60  ;;  %v11793_v60 = vld [vmem:[%s15639_s7 + $0x2e4] ss:$8 sps:$4 sm:$0xff]  }
 0x66b   : > { %8697 = vmatpush1.bf16.msra.mxu0 %v11722_v53  ;;  %v11788_v53 = vld [vmem:[%s15639_s7 + $0x240] ss:$8 sps:$4 sm:$0xff]  }
 0x66c   : > { %8698 = vmatprep.subr.bf16.mxu0 %v11730_v22  ;;  %v11796_v22 = vld [vmem:[%s15639_s7 + $0x254] ss:$8 sps:$4 sm:$0xff]  }
 0x66d   : > { %8861 = vmatpush1.bf16.msra.mxu1 %v11725_v18  ;;  %v11791_v18 = vld [vmem:[%s15639_s7 + $0x2e0] ss:$8 sps:$4 sm:$0xff]  }
 0x66e   : > { %8862 = vmatprep.subr.bf16.mxu1 %v11733_v58  ;;  %v11799_v58 = vld [vmem:[%s15639_s7 + $0x2f4] ss:$8 sps:$4 sm:$0xff]  }
 0x66f   : > { %8699 = vmatpush1.bf16.msra.mxu0 %v11728_v61  ;;  %v11794_v61 = vld [vmem:[%s15639_s7 + $0x250] ss:$8 sps:$4 sm:$0xff]  }
 0x670   : > { %8700 = vmatprep.subr.bf16.mxu0 %v11736_v42  ;;  %v11044_v42 = vcombine.high %v15149_v32, %v15046_v46  ;;  %v11805_v46 = vld [vmem:[%s15639_s7 + $0x384] ss:$8 sps:$4 sm:$0xff]   ;;  %v11823_v32 = vld [vmem:[%s15639_s7 + $0x3b4] ss:$8 sps:$4 sm:$0xff]  }
 0x671   : > { %8863 = vmatpush1.bf16.msra.mxu1 %v11731_v12  ;;  %v11802_v12 = vld [vmem:[%s15639_s7 + $0x264] ss:$8 sps:$4 sm:$0xff]  }
 0x672   : > { %8864 = vmatprep.subr.bf16.mxu1 %v11739_v39  ;;  %v11800_v39 = vld [vmem:[%s15639_s7 + $0x260] ss:$8 sps:$4 sm:$0xff]  }
 0x673   : > { %8701 = vmatpush1.bf16.msra.mxu0 %v11734_v23  ;;  %v11797_v23 = vld [vmem:[%s15639_s7 + $0x2f0] ss:$8 sps:$4 sm:$0xff]  }
 0x674   : > { %8702 = vmatprep.subr.bf16.mxu0 %v11742_v3  ;;  %v9135_v3 = vrot.slane %v11044_v42, %v15037_v16  ;;  %v11865_v42 = vld [vmem:[%s15639_s7 + $0x434] ss:$8 sps:$4 sm:$0xff]  }
 0x675   : > { %8865 = vmatpush1.bf16.msra.mxu1 %v11737_v28  ;;  %v11808_v28 = vld [vmem:[%s15639_s7 + $0x274] ss:$8 sps:$4 sm:$0xff]  }
 0x676   : > { %8866 = vmatprep.subr.bf16.mxu1 %v11745_v6  ;;  %v9142_v6 = vrot.slane %v9135_v3, %v15037_v16  ;;  %v11869_v3 = vld [vmem:[%s15639_s7 + $0x450] ss:$8 sps:$4 sm:$0xff]  }
 0x677   : > { %8703 = vmatpush1.bf16.msra.mxu0 %v11740_v11  ;;  %v11803_v11 = vld [vmem:[%s15639_s7 + $0x380] ss:$8 sps:$4 sm:$0xff]  }
 0x678   : > { %8704 = vmatprep.subr.bf16.mxu0 %v11748_v63  ;;  %v11806_v63 = vld [vmem:[%s15639_s7 + $0x270] ss:$8 sps:$4 sm:$0xff]  }
 0x679   : > { %8867 = vmatpush1.bf16.msra.mxu1 %v11743_v59  ;;  %v11814_v59 = vld [vmem:[%s15639_s7 + $0x304] ss:$8 sps:$4 sm:$0xff]  }
 0x67a   : > { %8868 = vmatprep.subr.bf16.mxu1 %v11751_v52  ;;  %v11817_v52 = vld [vmem:[%s15639_s7 + $0x3a4] ss:$8 sps:$4 sm:$0xff]  }
 0x67b   : > { %8705 = vmatpush1.bf16.msra.mxu0 %v11746_v31  ;;  %v11812_v31 = vld [vmem:[%s15639_s7 + $0x300] ss:$8 sps:$4 sm:$0xff]  }
 0x67c   : > { %8706 = vmatprep.subr.bf16.mxu0 %v11754_v17  ;;  %v11815_v17 = vld [vmem:[%s15639_s7 + $0x3a0] ss:$8 sps:$4 sm:$0xff]  }
 0x67d   : > { %8869 = vmatpush1.bf16.msra.mxu1 %v11749_v1  ;;  %v11821_v1 = vld [vmem:[%s15639_s7 + $0x3b0] ss:$8 sps:$4 sm:$0xff]  }
 0x67e   : > { %9224 = vmatprep.subr.bf16.mxu1 %v11757_v4  ;;  %v11832_v4 = vld [vmem:[%s15639_s7 + $0x334] ss:$8 sps:$4 sm:$0xff]  }
 0x67f   : > { %8707 = vmatpush1.bf16.msra.mxu0 %v11752_v8  ;;  %v11824_v8 = vld [vmem:[%s15639_s7 + $0x320] ss:$8 sps:$4 sm:$0xff]  }
 0x680   : > { %8708 = vmatprep.subr.bf16.mxu0 %v11760_v15  ;;  %8887 = vmatmul.mubr.bf16.vlgmr.msra.gmra.mrb[32].mxu1 %v8772_v47  ;;  %v11835_v47 = vld [vmem:[%s15639_s7 + $0x3d4] ss:$8 sps:$4 sm:$0xff]  }
 0x681   : > { %9225 = vmatpush1.bf16.msra.mxu1 %v11755_v19  ;;  %9256 = vmatprep.mubr.bf16.mxu1 %v15709_v20  ;;  %v11830_v19 = vld [vmem:[%s15639_s7 + $0x330] ss:$8 sps:$4 sm:$0xff]  }
 0x682   : > { %9226 = vmatprep.subr.bf16.mxu1 %v11763_v13 }
 0x683   : > { %8709 = vmatpush1.bf16.msra.mxu0 %v11758_v44  ;;  %v11838_v44 = vld [vmem:[%s15639_s7 + $0x344] ss:$8 sps:$4 sm:$0xff]  }
 0x684   : > { %9048 = vmatprep.subr.bf16.mxu0 %v11766_v41  ;;  %v11833_v41 = vld [vmem:[%s15639_s7 + $0x3d0] ss:$8 sps:$4 sm:$0xff]  }
 0x685   : > { %9227 = vmatpush1.bf16.msra.mxu1 %v11761_v51  ;;  %v11836_v51 = vld [vmem:[%s15639_s7 + $0x340] ss:$8 sps:$4 sm:$0xff]  }
 0x686   : > { %8727 = vmatmul.mubr.bf16.vlgmr.msra.gmra.mrb[44].mxu0 %v8612_v24  ;;  %9228 = vmatprep.subr.bf16.mxu1 %v11769_v55  ;;  %v11844_v55 = vld [vmem:[%s15639_s7 + $0x354] ss:$8 sps:$4 sm:$0xff]  }
 0x687   : > { %9049 = vmatpush1.bf16.msra.mxu0 %v11764_v43  ;;  %9080 = vmatprep.mubr.bf16.mxu0 %v15709_v20  ;;  %v11841_v43 = vld [vmem:[%s15639_s7 + $0x3e4] ss:$8 sps:$4 sm:$0xff]  }
 0x688   : > { %9050 = vmatprep.subr.bf16.mxu0 %v11772_v7  ;;  %v11839_v7 = vld [vmem:[%s15639_s7 + $0x3e0] ss:$8 sps:$4 sm:$0xff]  }
 0x689   : > { %9229 = vmatpush1.bf16.msra.mxu1 %v11767_v35  ;;  %v11842_v35 = vld [vmem:[%s15639_s7 + $0x350] ss:$8 sps:$4 sm:$0xff]  }
 0x68a   : > { %9230 = vmatprep.subr.bf16.mxu1 %v11775_v26 }
 0x68b   : > { %9051 = vmatpush1.bf16.msra.mxu0 %v11770_v34  ;;  %v11847_v34 = vld [vmem:[%s15639_s7 + $0x3f4] ss:$8 sps:$4 sm:$0xff]  }
 0x68c   : > { %9052 = vmatprep.subr.bf16.mxu0 %v11778_v9  ;;  %v9268_v9 = vld [vmem:[#allocation5 + $0x4] sm:$0x1] }
 0x68d   : > { %9231 = vmatpush1.bf16.msra.mxu1 %v11773_v5  ;;  %v9269_v5 = vld [vmem:[#allocation5 + $0x6] sm:$0x1] }
 0x68e   : > { %9232 = vmatprep.subr.bf16.mxu1 %v11781_v56  ;;  %v11848_v56 = vld [vmem:[%s15639_s7 + $0x360] ss:$8 sps:$4 sm:$0xff]  }
 0x68f   : > { %9053 = vmatpush1.bf16.msra.mxu0 %v11776_v45  ;;  %v11845_v45 = vld [vmem:[%s15639_s7 + $0x3f0] ss:$8 sps:$4 sm:$0xff]  }
 0x690   : > { %9054 = vmatprep.subr.bf16.mxu0 %v11784_v62  ;;  %v11853_v62 = vld [vmem:[%s15639_s7 + $0x374] ss:$8 sps:$4 sm:$0xff]  }
 0x691   : > { %9233 = vmatpush1.bf16.msra.mxu1 %v11779_v25  ;;  %v9289_v25 = vcombine.low %v9268_v9, %v9269_v5  ;;  %v11919_v9 = vld [vmem:[%s15641_s9 + $0xd4] ss:$8 sps:$4 sm:$0xff]   ;;  %v11917_v5 = vld [vmem:[%s15641_s9 + $0xd0] ss:$8 sps:$4 sm:$0xff]  }
 0x692   : > { %9234 = vmatprep.subr.bf16.mxu1 %v11787_v38  ;;  %v11851_v38 = vld [vmem:[%s15639_s7 + $0x370] ss:$8 sps:$4 sm:$0xff]  }
 0x693   : > { %9055 = vmatpush1.bf16.msra.mxu0 %v11782_v10 }
 0x694   : > { %9056 = vmatprep.subr.bf16.mxu0 %v11790_v50  ;;  %v9296_v50 = vrot.slane %v9289_v25, %v15037_v16 }
 0x695   : > { %9235 = vmatpush1.bf16.msra.mxu1 %v11785_v40  ;;  %v11856_v40 = vld [vmem:[%s15639_s7 + $0x404] ss:$8 sps:$4 sm:$0xff]  }
 0x696   : > { %9236 = vmatprep.subr.bf16.mxu1 %v11793_v60  ;;  %v9303_v60 = vrot.slane %v9296_v50, %v15037_v16  ;;  %v11927_v50 = vld [vmem:[%s15643_s11] sm:$0xff]  }
 0x697   : > { %9057 = vmatpush1.bf16.msra.mxu0 %v11788_v53  ;;  %v11854_v53 = vld [vmem:[%s15639_s7 + $0x400] ss:$8 sps:$4 sm:$0xff]  }
 0x698   : > { %9058 = vmatprep.subr.bf16.mxu0 %v11796_v22  ;;  %v11859_v22 = vld [vmem:[%s15639_s7 + $0x414] ss:$8 sps:$4 sm:$0xff]  }
 0x699   : > { %9237 = vmatpush1.bf16.msra.mxu1 %v11791_v18  ;;  %v11857_v18 = vld [vmem:[%s15639_s7 + $0x410] ss:$8 sps:$4 sm:$0xff]  }
 0x69a   : > { %9238 = vmatprep.subr.bf16.mxu1 %v11799_v58  ;;  %v11860_v58 = vld [vmem:[%s15639_s7 + $0x420] ss:$8 sps:$4 sm:$0xff]  }
 0x69b   : > { %9059 = vmatpush1.bf16.msra.mxu0 %v11794_v61  ;;  %v11862_v61 = vld [vmem:[%s15639_s7 + $0x424] ss:$8 sps:$4 sm:$0xff]  }
 0x69c   : > { %9060 = vmatprep.subr.bf16.mxu0 %v11802_v12  ;;  %v11868_v12 = vld [vmem:[%s15639_s7 + $0x444] ss:$8 sps:$4 sm:$0xff]  }
 0x69d   : > { %9239 = vmatpush1.bf16.msra.mxu1 %v11797_v23  ;;  %v11866_v23 = vld [vmem:[%s15639_s7 + $0x440] ss:$8 sps:$4 sm:$0xff]  }
 0x69e   : > { %9579 = vmatprep.subr.bf16.mxu1 %v11805_v46  ;;  %v11874_v46 = vld [vmem:[%s15639_s7 + $0x464] ss:$8 sps:$4 sm:$0xff]  }
 0x69f   : > { %9061 = vmatpush1.bf16.msra.mxu0 %v11800_v39  ;;  %v11871_v39 = vld [vmem:[%s15639_s7 + $0x454] ss:$8 sps:$4 sm:$0xff]  }
 0x6a0   : > { %9062 = vmatprep.subr.bf16.mxu0 %v11808_v28  ;;  %9257 = vmatmul.mubr.bf16.vlgmr.msra.gmra.mrb[36].mxu1 %v9142_v6  ;;  %v11872_v28 = vld [vmem:[%s15639_s7 + $0x460] ss:$8 sps:$4 sm:$0xff]   ;;  %v11875_v6 = vld [vmem:[%s15639_s7 + $0x470] ss:$8 sps:$4 sm:$0xff]  }
 0x6a1   : > { %9580 = vmatpush1.bf16.msra.mxu1 %v11803_v11  ;;  %9611 = vmatprep.mubr.bf16.mxu1 %v15709_v20  ;;  %v11877_v11 = vld [vmem:[%s15639_s7 + $0x474] ss:$8 sps:$4 sm:$0xff]  }
 0x6a2   : > { %9581 = vmatprep.subr.bf16.mxu1 %v11811_v2  ;;  %v11880_v2 = vld [vmem:[%s15641_s9 + $0x4] ss:$8 sps:$4 sm:$0xff]  }
 0x6a3   : > { %9063 = vmatpush1.bf16.msra.mxu0 %v11806_v63  ;;  %v11878_v63 = vld [vmem:[%s15641_s9] ss:$8 sps:$4 sm:$0xff]  }
 0x6a4   : > { %9385 = vmatprep.subr.bf16.mxu0 %v11814_v59  ;;  %v11881_v59 = vld [vmem:[%s15641_s9 + $0x10] ss:$8 sps:$4 sm:$0xff]  }
 0x6a5   : > { %9582 = vmatpush1.bf16.msra.mxu1 %v11809_v0  ;;  %v11883_v0 = vld [vmem:[%s15641_s9 + $0x14] ss:$8 sps:$4 sm:$0xff]  }
 0x6a6   : > { %9081 = vmatmul.mubr.bf16.vlgmr.msra.gmra.mrb[48].mxu0 %v8966_v57  ;;  %9583 = vmatprep.subr.bf16.mxu1 %v11817_v52  ;;  %v11094_v57 = vld.sshfl [vmem:[#allocation5 + $0x6] sm:$0x11 pattern:$0x75316420] }
 0x6a7   : > { %9386 = vmatpush1.bf16.msra.mxu0 %v11812_v31  ;;  %9417 = vmatprep.mubr.bf16.mxu0 %v15709_v20  ;;  %v9447_v15 = vcombine.high %v11094_v57, %v11094_v57  ;;  %v9458_v13 = vshrl.u32 %v11094_v57, 16  ;;  %v11887_v31 = vld [vmem:[%s15641_s9 + $0x30] ss:$8 sps:$4 sm:$0xff]   ;;  %v11892_v52 = vld [vmem:[%s15641_s9 + $0x44] ss:$8 sps:$4 sm:$0xff]  }
 0x6a8   : > { %9387 = vmatprep.subr.bf16.mxu0 %v11820_v36  ;;  %v11890_v36 = vld [vmem:[%s15641_s9 + $0x40] ss:$8 sps:$4 sm:$0xff]   ;;  %v11901_v57 = vld [vmem:[%s15641_s9 + $0x74] ss:$8 sps:$4 sm:$0xff]  }
 0x6a9   : > { %9584 = vmatpush1.bf16.msra.mxu1 %v11815_v17  ;;  %v9463_v37 = vshll.u32 %v9447_v15, 16  ;;  %v11895_v17 = vld [vmem:[%s15641_s9 + $0x54] ss:$8 sps:$4 sm:$0xff]   ;;  %v11902_v15 = vld [vmem:[%s15641_s9 + $0x80] ss:$8 sps:$4 sm:$0xff]  }
 0x6aa   : > { %9585 = vmatprep.subr.bf16.mxu1 %v11823_v32  ;;  %v11898_v32 = vld [vmem:[%s15641_s9 + $0x64] ss:$8 sps:$4 sm:$0xff]  }
 0x6ab   : > { %9388 = vmatpush1.bf16.msra.mxu0 %v11818_v14  ;;  %v9465_v24 = vsel %vm15039_vm5, %v9458_v13, %v9463_v37  ;;  %v11893_v14 = vld [vmem:[%s15641_s9 + $0x50] ss:$8 sps:$4 sm:$0xff]  }
 0x6ac   : > { %9389 = vmatprep.subr.bf16.mxu0 %v11826_v33  ;;  %v9483_v26 = vcombine.low %v15080_v48, %v9465_v24  ;;  %v11896_v33 = vld [vmem:[%s15641_s9 + $0x60] ss:$8 sps:$4 sm:$0xff]   ;;  %v11910_v24 = vld [vmem:[%s15641_s9 + $0xa4] ss:$8 sps:$4 sm:$0xff]  }
 0x6ad   : > { %9586 = vmatpush1.bf16.msra.mxu1 %v11821_v1  ;;  %v11899_v1 = vld [vmem:[%s15641_s9 + $0x70] ss:$8 sps:$4 sm:$0xff]  }
 0x6ae   : > { %9587 = vmatprep.subr.bf16.mxu1 %v11829_v54  ;;  %v9490_v48 = vrot.slane %v9483_v26, %v15037_v16  ;;  %v11916_v26 = vld [vmem:[%s15641_s9 + $0xc4] ss:$8 sps:$4 sm:$0xff]  }
 0x6af   : > { %9390 = vmatpush1.bf16.msra.mxu0 %v11824_v8  ;;  %v11904_v8 = vld [vmem:[%s15641_s9 + $0x84] ss:$8 sps:$4 sm:$0xff]  }
 0x6b0   : > { %9391 = vmatprep.subr.bf16.mxu0 %v11832_v4  ;;  %v9497_v10 = vrot.slane %v9490_v48, %v15037_v16  ;;  %v11886_v16 = vld [vmem:[%s15641_s9 + $0x24] ss:$8 sps:$4 sm:$0xff]   ;;  %v11925_v48 = vld [vmem:[%s15641_s9 + $0xf4] ss:$8 sps:$4 sm:$0xff]  }
 0x6b1   : > { %9588 = vmatpush1.bf16.msra.mxu1 %v11827_v29 }
 0x6b2   : > { %9589 = vmatprep.subr.bf16.mxu1 %v11835_v47 }
 0x6b3   : > { %9392 = vmatpush1.bf16.msra.mxu0 %v11830_v19 }
 0x6b4   : > { %9393 = vmatprep.subr.bf16.mxu0 %v11838_v44 }
 0x6b5   : > { %9590 = vmatpush1.bf16.msra.mxu1 %v11833_v41 }
 0x6b6   : > { %9591 = vmatprep.subr.bf16.mxu1 %v11841_v43  ;;  %v11907_v43 = vld [vmem:[%s15641_s9 + $0x94] ss:$8 sps:$4 sm:$0xff]  }
 0x6b7   : > { %9394 = vmatpush1.bf16.msra.mxu0 %v11836_v51 }
 0x6b8   : > { %9395 = vmatprep.subr.bf16.mxu0 %v11844_v55  ;;  %v11905_v55 = vld [vmem:[%s15641_s9 + $0x90] ss:$8 sps:$4 sm:$0xff]  }
 0x6b9   : > { %9592 = vmatpush1.bf16.msra.mxu1 %v11839_v7  ;;  %v11908_v7 = vld [vmem:[%s15641_s9 + $0xa0] ss:$8 sps:$4 sm:$0xff]  }
 0x6ba   : > { %9593 = vmatprep.subr.bf16.mxu1 %v11847_v34  ;;  %v11911_v34 = vld [vmem:[%s15641_s9 + $0xb0] ss:$8 sps:$4 sm:$0xff]  }
 0x6bb   : > { %9396 = vmatpush1.bf16.msra.mxu0 %v11842_v35  ;;  %v11913_v35 = vld [vmem:[%s15641_s9 + $0xb4] ss:$8 sps:$4 sm:$0xff]  }
 0x6bc   : > { %9397 = vmatprep.subr.bf16.mxu0 %v11850_v27  ;;  %v11914_v27 = vld [vmem:[%s15641_s9 + $0xc0] ss:$8 sps:$4 sm:$0xff]  }
 0x6bd   : > { %9594 = vmatpush1.bf16.msra.mxu1 %v11845_v45  ;;  %v11922_v45 = vld [vmem:[%s15641_s9 + $0xe4] ss:$8 sps:$4 sm:$0xff]  }
 0x6be   : > { %10040 = vmatprep.subr.bf16.mxu1 %v11880_v2  ;;  %v11936_v2 = vld [vmem:[%s15643_s11 + $0x68] sm:$0xff]  }
 0x6bf   : > { %9398 = vmatpush1.bf16.msra.mxu0 %v11848_v56  ;;  %v11920_v56 = vld [vmem:[%s15641_s9 + $0xe0] ss:$8 sps:$4 sm:$0xff]  }
 0x6c0   : > { %9399 = vmatprep.subr.bf16.mxu0 %v11853_v62  ;;  %9612 = vmatmul.mubr.bf16.vlgmr.msra.gmra.mrb[40].mxu1 %v9497_v10  ;;  %v11923_v62 = vld [vmem:[%s15641_s9 + $0xf0] ss:$8 sps:$4 sm:$0xff]  }
 0x6c1   : > { %10041 = vmatpush1.bf16.msra.mxu1 %v11878_v63  ;;  %v11935_v63 = vld [vmem:[%s15643_s11 + $0x20] sm:$0xff]  }
 0x6c2   : > { %10042 = vmatprep.subr.bf16.mxu1 %v11883_v0 }
 0x6c3   : > { %9400 = vmatpush1.bf16.msra.mxu0 %v11851_v38  ;;  %v11926_v38 = vld [vmem:[%s15643_s11 + $0x40] sm:$0xff]  }
 0x6c4   : > { %9755 = vmatprep.subr.bf16.mxu0 %v11856_v40  ;;  %v11928_v40 = vld [vmem:[%s15643_s11 + $0x48] sm:$0xff]  }
 0x6c5   : > { %10043 = vmatpush1.bf16.msra.mxu1 %v11881_v59  ;;  %v11937_v59 = vld [vmem:[%s15643_s11 + $0x28] sm:$0xff]  }
 0x6c6   : > { %9418 = vmatmul.mubr.bf16.vlgmr.msra.gmra.mrb[52].mxu0 %v9303_v60  ;;  %10044 = vmatprep.subr.bf16.mxu1 %v11886_v16 }
 0x6c7   : > { %9756 = vmatpush1.bf16.msra.mxu0 %v11854_v53  ;;  %9787 = vmatprep.mubr.bf16.mxu0 %v15709_v20  ;;  %v11863_v20 = vld [vmem:[%s15639_s7 + $0x430] ss:$8 sps:$4 sm:$0xff]  }
 0x6c8   : > { %9757 = vmatprep.subr.bf16.mxu0 %v11859_v22  ;;  %v11929_v22 = vld [vmem:[%s15643_s11 + $0x8] sm:$0xff]  }
 0x6c9   : > { %10045 = vmatpush1.bf16.msra.mxu1 %v11884_v30 }
 0x6cb   : > { %9758 = vmatpush1.bf16.msra.mxu0 %v11857_v18 }
 0x6cc   : > { %9759 = vmatprep.subr.bf16.mxu0 %v11862_v61  ;;  %v11930_v61 = vld [vmem:[%s15643_s11 + $0x50] sm:$0xff]  }
 0x6cf   : > { %9760 = vmatpush1.bf16.msra.mxu0 %v11860_v58 }
 0x6d0   : > { %9761 = vmatprep.subr.bf16.mxu0 %v11865_v42 }
 0x6d3   : > { %9762 = vmatpush1.bf16.msra.mxu0 %v11863_v20 }
 0x6d4   : > { %9763 = vmatprep.subr.bf16.mxu0 %v11868_v12 }
 0x6d7   : > { %9764 = vmatpush1.bf16.msra.mxu0 %v11866_v23 }
 0x6d8   : > { %9765 = vmatprep.subr.bf16.mxu0 %v11871_v39 }
 0x6db   : > { %9766 = vmatpush1.bf16.msra.mxu0 %v11869_v3  ;;  %v11931_v3 = vld [vmem:[%s15643_s11 + $0x10] sm:$0xff]  }
 0x6dc   : > { %9767 = vmatprep.subr.bf16.mxu0 %v11874_v46 }
 0x6df   : > { %9768 = vmatpush1.bf16.msra.mxu0 %v11872_v28  ;;  %v11932_v28 = vld [vmem:[%s15643_s11 + $0x58] sm:$0xff]  }
 0x6e0   : > { %9769 = vmatprep.subr.bf16.mxu0 %v11877_v11  ;;  %v11933_v11 = vld [vmem:[%s15643_s11 + $0x18] sm:$0xff]  }
 0x6e3   : > { %9770 = vmatpush1.bf16.msra.mxu0 %v11875_v6  ;;  %v11934_v6 = vld [vmem:[%s15643_s11 + $0x60] sm:$0xff]  }
 0x6e4   : > { %11418 = vmatprep.subr.bf16.mxu0 %v11926_v38 }
 0x6e6   : > { %9788 = vmatmul.mubr.bf16.vlgmr.msra.gmra.mrb[56].mxu0 %v9673_v21  ;;  %v11889_v21 = vld [vmem:[%s15641_s9 + $0x34] ss:$8 sps:$4 sm:$0xff]  }
 0x6e7   : > { %10046 = vmatprep.subr.bf16.mxu1 %v11889_v21  ;;  %11419 = vmatpush3.bf16.msra.mxu0 %v11927_v50 }
 0x6e8   : > { %10047 = vmatpush1.bf16.msra.mxu1 %v11887_v31  ;;  %11420 = vmatprep.subr.bf16.mxu0 %v11928_v40 }
 0x6e9   : > { %10048 = vmatprep.subr.bf16.mxu1 %v11892_v52 }
 0x6eb   : > { %11421 = vmatpush3.bf16.msra.mxu0 %v11929_v22 }
 0x6ec   : > { %10049 = vmatpush1.bf16.msra.mxu1 %v11890_v36  ;;  %11422 = vmatprep.subr.bf16.mxu0 %v11930_v61 }
 0x6ed   : > { %10050 = vmatprep.subr.bf16.mxu1 %v11895_v17 }
 0x6ef   : > { %11423 = vmatpush3.bf16.msra.mxu0 %v11931_v3 }
 0x6f0   : > { %10051 = vmatpush1.bf16.msra.mxu1 %v11893_v14  ;;  %11424 = vmatprep.subr.bf16.mxu0 %v11932_v28 }
 0x6f1   : > { %10052 = vmatprep.subr.bf16.mxu1 %v11898_v32 }
 0x6f3   : > { %11425 = vmatpush3.bf16.msra.mxu0 %v11933_v11  ;;  %v11938_v11 = vld [vmem:[%s15643_s11 + $0x70] sm:$0xff]  }
 0x6f4   : > { %10053 = vmatpush1.bf16.msra.mxu1 %v11896_v33  ;;  %11426 = vmatprep.subr.bf16.mxu0 %v11934_v6  ;;  %v11939_v6 = vld [vmem:[%s15643_s11 + $0x30] sm:$0xff]  }
 0x6f5   : > { %10054 = vmatprep.subr.bf16.mxu1 %v11901_v57 }
 0x6f7   : > { %11427 = vmatpush3.bf16.msra.mxu0 %v11935_v63  ;;  %v11940_v63 = vld [vmem:[%s15643_s11 + $0x78] sm:$0xff]  }
 0x6f8   : > { %10055 = vmatpush1.bf16.msra.mxu1 %v11899_v1  ;;  %11428 = vmatprep.subr.bf16.mxu0 %v11936_v2  ;;  %v11941_v2 = vld [vmem:[%s15643_s11 + $0x38] sm:$0xff]  }
 0x6f9   : > { %10056 = vmatprep.subr.bf16.mxu1 %v11904_v8 }
 0x6fb   : > { %11429 = vmatpush3.bf16.msra.mxu0 %v11937_v59  ;;  %v9868_v59 = vld [vmem:[%s15642_s10] sm:$0x3] }
 0x6fc   : > { %10057 = vmatpush1.bf16.msra.mxu1 %v11902_v15  ;;  %11430 = vmatprep.subr.bf16.mxu0 %v11938_v11 }
 0x6fd   : > { %10058 = vmatprep.subr.bf16.mxu1 %v11907_v43  ;;  %v9798_v43 = vld [vmem:[%s15640_s8] sm:$0x3] }
 0x6ff   : > { %11431 = vmatpush3.bf16.msra.mxu0 %v11939_v6 }
 0x700   : > { %10059 = vmatpush1.bf16.msra.mxu1 %v11905_v55  ;;  %v9806_v55 = vsub.s32 1, %v13990_v49  ;;  %11432 = vmatprep.subr.bf16.mxu0 %v11940_v63 }
 0x701   : > { %10060 = vmatprep.subr.bf16.mxu1 %v11910_v24 }
 0x703   : > { %11433 = vmatpush3.bf16.msra.mxu0 %v11941_v2 }
 0x704   : > { %10061 = vmatpush1.bf16.msra.mxu1 %v11908_v7 }
 0x705   : > { %10062 = vmatprep.subr.bf16.mxu1 %v11913_v35  ;;  %v9807_v35 = vrot.slane %v9798_v43, %v9806_v55 }
 0x708   : > { %10063 = vmatpush1.bf16.msra.mxu1 %v11911_v34 }
 0x709   : > { %10064 = vmatprep.subr.bf16.mxu1 %v11916_v26 }
 0x70c   : > { %10065 = vmatpush1.bf16.msra.mxu1 %v11914_v27 }
 0x70d   : > { %10066 = vmatprep.subr.bf16.mxu1 %v11919_v9 }
 0x710   : > { %10067 = vmatpush1.bf16.msra.mxu1 %v11917_v5 }
 0x711   : > { %10068 = vmatprep.subr.bf16.mxu1 %v11922_v45 }
 0x714   : > { %10069 = vmatpush1.bf16.msra.mxu1 %v11920_v56 }
 0x715   : > { %10070 = vmatprep.subr.bf16.mxu1 %v11925_v48 }
 0x718   : > { %10071 = vmatpush1.bf16.msra.mxu1 %v11923_v62 }
 0x733   : > { %v8554_v54 = vpop.f32.mrb[28].mxu1 }
 0x734   : > { %v8556_v4 = vpop.f32.mrb[29].mxu1 }
 0x735   : > { %v8558_v29 = vpop.f32.mrb[30].mxu1 }
 0x736   : > { %v8559_v19 = vpop.f32.mrb[31].mxu1 }
 0x739   : > { %v8415_v47 = vpop.f32.mrb[40].mxu0 }
 0x73a   : > { %v8555_v44 = vadd.f32 %v8554_v54, %v8415_v47  ;;  %v8417_v13 = vpop.f32.mrb[41].mxu0 }
 0x73b   : > { %v8557_v37 = vadd.f32 %v8556_v4, %v8417_v13  ;;  %v8419_v41 = vpop.f32.mrb[42].mxu0 }
 0x73c   : > { %v8420_v51 = vpop.f32.mrb[43].mxu0 }
 0x73d   : > { %v9802_v51 = vsub.s32 0, %v13990_v49 }
 0x73f   : > { %v9803_v24 = vrot.slane %v9798_v43, %v9802_v51 }
 0x753   : > { %v8888_v25 = vpop.f32.mrb[32].mxu1 }
 0x754   : > { %v8890_v10 = vpop.f32.mrb[33].mxu1 }
 0x755   : > { %v8892_v53 = vpop.f32.mrb[34].mxu1 }
 0x756   : > { %v8893_v60 = vpop.f32.mrb[35].mxu1 }
 0x759   : > { %v8728_v18 = vpop.f32.mrb[44].mxu0 }
 0x75a   : > { %v8735_v58 = vadd.f32 %v8728_v18, %v8555_v44  ;;  %v8730_v42 = vpop.f32.mrb[45].mxu0 }
 0x75b   : > { %v8736_v20 = vadd.f32 %v8730_v42, %v8557_v37  ;;  %v8732_v12 = vpop.f32.mrb[46].mxu0 }
 0x75c   : > { %v8733_v23 = vpop.f32.mrb[47].mxu0  ;;  %v8895_v39 = vadd.f32 %v8888_v25, %v8735_v58 }
 0x75d   : > { %v8896_v46 = vadd.f32 %v8890_v10, %v8736_v20 }
 0x773   : > { %v9258_v0 = vpop.f32.mrb[36].mxu1 }
 0x774   : > { %v9260_v16 = vpop.f32.mrb[37].mxu1 }
 0x775   : > { %v9262_v30 = vpop.f32.mrb[38].mxu1 }
 0x776   : > { %v9263_v21 = vpop.f32.mrb[39].mxu1 }
 0x779   : > { %v9082_v31 = vpop.f32.mrb[48].mxu0 }
 0x77a   : > { %v9089_v52 = vadd.f32 %v9082_v31, %v8895_v39  ;;  %v9084_v36 = vpop.f32.mrb[49].mxu0 }
 0x77b   : > { %v9090_v17 = vadd.f32 %v9084_v36, %v8896_v46  ;;  %v9086_v14 = vpop.f32.mrb[50].mxu0 }
 0x77c   : > { %v9087_v32 = vpop.f32.mrb[51].mxu0  ;;  %v9265_v33 = vadd.f32 %v9258_v0, %v9089_v52  ;;  %v10033_v0 = vrot.slane %v9868_v59, %v9802_v51 }
 0x77d   : > { %v9266_v57 = vadd.f32 %v9260_v16, %v9090_v17  ;;  %v10037_v16 = vrot.slane %v9868_v59, %v9806_v55 }
 0x793   : > { %v9613_v1 = vpop.f32.mrb[40].mxu1 }
 0x794   : > { %v9615_v8 = vpop.f32.mrb[41].mxu1 }
 0x795   : > { %v9617_v54 = vpop.f32.mrb[42].mxu1 }
 0x796   : > { %v9618_v4 = vpop.f32.mrb[43].mxu1 }
 0x799   : > { %v9419_v15 = vpop.f32.mrb[52].mxu0 }
 0x79a   : > { %v9426_v29 = vadd.f32 %v9419_v15, %v9265_v33  ;;  %v9421_v19 = vpop.f32.mrb[53].mxu0 }
 0x79b   : > { %v9427_v47 = vadd.f32 %v9421_v19, %v9266_v57  ;;  %v9423_v44 = vpop.f32.mrb[54].mxu0 }
 0x79c   : > { %v9424_v13 = vpop.f32.mrb[55].mxu0  ;;  %v9620_v37 = vadd.f32 %v9613_v1, %v9426_v29 }
 0x79d   : > { %v9621_v41 = vadd.f32 %v9615_v8, %v9427_v47  ;;  %v10117_v8 = vld [vmem:[%s15644_s12] sm:$0x1] }
 0x7b9   : > { %v9789_v7 = vpop.f32.mrb[56].mxu0 }
 0x7ba   : > { %v9796_v34 = vadd.f32 %v9789_v7, %v9620_v37  ;;  %v9791_v26 = vpop.f32.mrb[57].mxu0 }
 0x7bb   : > { %v9797_v27 = vadd.f32 %v9791_v26, %v9621_v41  ;;  %v9793_v9 = vpop.f32.mrb[58].mxu0 }
 0x7bc   : > { %v9810_v5 = vadd.f32 %v9803_v24, %v9796_v34  ;;  %v9794_v45 = vpop.f32.mrb[59].mxu0 }
 0x7bd   : > { %v9811_v56 = vadd.f32 %v9807_v35, %v9797_v27 }
 0x7be   : > { %v9812_v48 = vmax.f32 %v9810_v5, 0.0 }
 0x7bf   : > { %v9813_v62 = vmax.f32 %v9811_v56, 0.0 }
 0x7c0   : > { %v9814_v25 = vmin.f32 %v9812_v48, 10.0 }
 0x7c1   : > { %v9815_v10 = vmin.f32 %v9813_v62, 10.0 }
 0x7c2   : > { %v9817_v38 = vsel %vm9816_vm6, %v9814_v25, 0.0 }
 0x7c3   : > { %v9818_v50 = vrot.slane %v9817_v38, 4  ;;  %v9824_v40 = vsel %vm9816_vm6, %v9815_v10, 0.0 }
 0x7c4   : > { %v9825_v53 = vrot.slane %v9824_v40, 4 }
 0x7c5   : > { %v9819_v49 = vadd.f32 %v9818_v50, %v9817_v38 }
 0x7c6   : > { %v9826_v60 = vadd.f32 %v9825_v53, %v9824_v40 }
 0x7c7   : > { %v9820_v22 = vrot.slane %v9819_v49, 2 }
 0x7c8   : > { %v9827_v18 = vrot.slane %v9826_v60, 2 }
 0x7c9   : > { %v9821_v61 = vadd.f32 %v9820_v22, %v9819_v49 }
 0x7ca   : > { %v9828_v58 = vadd.f32 %v9827_v18, %v9826_v60 }
 0x7cb   : > { %v9822_v42 = vrot.slane %v9821_v61, 1 }
 0x7cc   : > { %v9829_v20 = vrot.slane %v9828_v58, 1 }
 0x7cd   : > { %v9823_v12 = vadd.f32 %v9822_v42, %v9821_v61 }
 0x7ce   : > { %v9830_v23 = vadd.f32 %v9829_v20, %v9828_v58 }
 0x7cf   : > { %v9832_v39 = vmul.f32 0.25, %v9823_v12 }
 0x7d0   : > { %v9833_v3 = vmul.f32 0.25, %v9830_v23 }
 0x7d1   : > { %v9834_v28 = vpack.c.bf16 %v9832_v39, %v9832_v39 }
 0x7d2   : > { %v9835_v46 = vpack.c.bf16 %v9833_v3, %v9833_v3 }
 0x7d4   : > { %10072 = vmatprep.mubr.bf16.mxu1 %v9835_v46 }
 0x7d5   : > { %10073 = vmatmul.mubr.bf16.vlgmr.msra.gmra.mrb[44].mxu1 %v9834_v28 }
 0x8a8   : > { %v10074_v30 = vpop.f32.mrb[44].mxu1 }
 0x8a9   : > { %v10075_v21 = vadd.f32 %v10074_v30, %v10033_v0  ;;  %v10076_v31 = vpop.f32.mrb[45].mxu1 }
 0x8aa   : > { %v10077_v52 = vadd.f32 %v10076_v31, %v10037_v16  ;;  %v10078_v36 = vpop.f32.mrb[46].mxu1 }
 0x8ab   : > { %v10081_v17 = vmax.f32 %v10075_v21, 0.0  ;;  %v10079_v14 = vpop.f32.mrb[47].mxu1 }
 0x8ac   : > { %v10082_v32 = vmax.f32 %v10077_v52, 0.0 }
 0x8ad   : > { %v10083_v57 = vpack.c.bf16 %v10081_v17, %v10081_v17 }
 0x8ae   : > { %v10084_v33 = vpack.c.bf16 %v10082_v32, %v10082_v32 }
 0x8b0   : > { %10246 = vmatprep.mubr.bf16.mxu0 %v10084_v33 }
 0x8b1   : > { %10247 = vmatmul.mubr.bf16.vlgmr.msra.gmra.mrb[60].mxu0 %v10083_v57 }
 0x984   : > { %v11434_v1 = vpop.f32.mrb[60].mxu0 }
 0x985   : > { %v11435_v54 = vpop.f32.mrb[61].mxu0 }
 0x986   : > { %v11436_v4 = vadd.f32 %v11435_v54, %v11434_v1  ;;  %v11437_v15 = vpop.f32.mrb[62].mxu0 }
 0x987   : > { %v11438_v29 = vpop.f32.mrb[63].mxu0 }
 0x988   : > { %v10249_v19 = vadd.f32 %v11436_v4, %v10117_v8 }
 0x98a   : > { %v11212_v47 = vclamps-f32 %v10249_v19, 10.0 }
 0x98c   : > { %10256 = vst [vmem:[%s432_s15] sm:$0x1] %v11212_v47 }
 0x98d   : > { %11991 = shalt.err (!%p11988_p3)
}
 0x98e   : > { %s11992_s23 = scalar_lea.hbm %s15590_s30, 16  ;;  %s11996_s22 = scalar_lea.hbm %s15645_s13, 32 }
 0x98f   : > { %p11993_p4 = scmp.ne.s32.totalorder %s15590_s30, %s11992_s23  ;;  %p11997_p9 = scmp.lt.u32.totalorder %s15590_s30, %s15645_s13 }
 0x990   : > { %p11998_p10 = scmp.lt.u32.totalorder %s11996_s22, %s11992_s23  ;;  %p12000_p12 = scmp.lt.u32.totalorder %s11992_s23, %s15590_s30 }
 0x991   : > { %p11994_p7 = pnand %p11993_p4, %p12168_p5 }
 0x992   : > { %p11999_p11 = por %p11998_p10, %p11997_p9 }
 0x993   : > { %p11995_p8 = pneg %p11994_p7 }
 0x994   : > { %p12001_p13 = por %p12000_p12, %p11999_p11 }
 0x996   : > { %p12002_p0 = pnand %p12001_p13, %p11995_p8 }
 0x998   : > { %12005 = shalt.err (!%p12002_p0)
}
 0x999   : > { %11500 = dma.vmem_to_hbm [thread:$0]  (%p12168_p5), %s15592_s0, 16, %s15590_s30, %s10258_s16  }
 0x99a PF: > { %p11506_p1 = scmp.ge.s32.totalorder %s12040_s28, 2  ;;  %s10282_s21 = sand.u32 1, %s12028_s25  }
 0x99b   : > { %s10283_s1 = scalar_lea.sflag [#allocation9], %s10282_s21 }
 0x99c   : > { %p11503_p2 = pnand %p11506_p1, %p12172_p6 }
 0x99e   : > { %12023 = dma.done.wait (!%p11503_p2), %s10283_s1, 16  }
 0x99f   : > { %12025 = vsyncadd (!%p11503_p2), %s10283_s1, 4294967280  ;;  %p23_p3 = scmp.ge.s32.totalorder %s12155_s14, 4   ;;  %s15790_s25 = smov %s12032_s26 }
 0x9a0   : > { %s15791_s26 = smov %s12036_s27  ;;  %s15792_s27 = smov %s12166_s17 }
 0x9a1   : > { %s15793_s28 = smov %s12155_s14  ;;  %25 = sbr.rel (!%p23_p3) target bundleno = 7 (0x7), region = 127 }
 0x9a8   :  { %10287 = vsyncpa [#allocation9], 1 }
 0x9a9   :  { %10289 = vsyncpa [#allocation9 + $0x1], 1 }

</bundles_post_ra>
